<compile_context>
chip_gen: v6e
topology: v6e:2x2x1
jax: 0.10.0
libtpu: 0.0.40
codegen_flags: <defaults>
</compile_context>

<pallas_src>
import jax
import jax.numpy as jnp
import numpy as np
from jax.experimental import pallas as pl
from jax.experimental.pallas import tpu as pltpu

BB = 8  # images per grid step (fills all 8 sublanes of the FC matmuls)


# ----------------------------------------------------------------------------
# The single fused Pallas kernel (BB images per invocation)
# ----------------------------------------------------------------------------
def _net_kernel(a1_ref, w1_ref, b1_ref, w2_ref, b2_ref,
                wf1_ref, bf1_ref, wf2_ref, bf2_ref, wf3_ref, bf3_ref,
                out_ref, xrows_ref):
    # ---- conv1 + pool + conv2 + pool, one image per scf.for iteration -------
    @pl.loop(0, BB)
    def _(img):
        # conv1: one phase-stacked matmul (bf16 in, f32 acc)
        # a1 rows: phase*196 + ph*14 + pw  (phase = 2x2 pool phase), K -> 128
        a1 = a1_ref[img]                                            # (784,128)
        p = jnp.dot(a1, w1_ref[...], preferred_element_type=jnp.float32)
        # 2x2 maxpool == max over the four phase row-blocks; then bias + relu
        m = jnp.maximum(jnp.maximum(p[0:196, :], p[196:392, :]),
                        jnp.maximum(p[392:588, :], p[588:784, :]))   # (196,128)
        h1 = jnp.maximum(m + b1_ref[...], 0.0)   # 14x14 grid, row = h*14 + w

        # conv2: in-kernel im2col via 25 shifted row-slices -> ONE matmul
        # output row r = oh*14 + ow (only ow<=9, oh<=9 rows are used)
        lhs = jnp.concatenate(
            [h1[kh * 14 + kw: kh * 14 + kw + 136, :].astype(jnp.bfloat16)
             for kh in range(5) for kw in range(5)], axis=1)         # (136,3200)
        c = jnp.dot(lhs, w2_ref[...], preferred_element_type=jnp.float32)
        c = jnp.maximum(c + b2_ref[...], 0.0)                        # (136,128)

        # 2x2 maxpool on the flat row layout (two shifted maxes)
        ph = jnp.maximum(c[0:135, :], c[1:136, :])     # horizontal
        pv = jnp.maximum(ph[0:121, :], ph[14:135, :])  # vertical
        # pooled position (i, j) lives at pv row 28*i + 2*j;
        # flatten the 25 pooled positions into one lane-dense feature row
        row = jnp.concatenate(
            [pv[28 * i + 2 * j: 28 * i + 2 * j + 1, :]
             for i in range(5) for j in range(5)], axis=1)           # (1,3200)
        xrows_ref[pl.ds(img, 1), :] = row

    # ---- fc1 -> relu -> fc2 -> relu -> fc3 -> masked log_softmax, batched ---
    x = xrows_ref[...].astype(jnp.bfloat16)                          # (BB,3200)
    h = jnp.dot(x, wf1_ref[...], preferred_element_type=jnp.float32)
    h = jnp.maximum(h + bf1_ref[...], 0.0)
    h = jnp.dot(h.astype(jnp.bfloat16), wf2_ref[...],
                preferred_element_type=jnp.float32)
    h = jnp.maximum(h + bf2_ref[...], 0.0)
    logits = jnp.dot(h.astype(jnp.bfloat16), wf3_ref[...],
                     preferred_element_type=jnp.float32) + bf3_ref[...]  # (BB,128)
    # only the first 10 lanes are real classes; mask the padding out of the LSE
    valid = jax.lax.broadcasted_iota(jnp.int32, logits.shape, 1) < 10
    mx = jnp.max(jnp.where(valid, logits, -1e30), axis=-1, keepdims=True)
    se = jnp.sum(jnp.where(valid, jnp.exp(logits - mx), 0.0),
                 axis=-1, keepdims=True)
    out_ref[...] = logits - (mx + jnp.log(se))                       # (BB,128)


# ----------------------------------------------------------------------------
# Host-side one-time weight packing (pad to 128 lanes / 128-multiple K, bf16)
# ----------------------------------------------------------------------------
def pack_params(p):
    f32, bf16 = jnp.float32, jnp.bfloat16
    # conv1: K = 5*5*3 = 75 -> 128, Cout 6 -> 128
    w1 = jnp.zeros((128, 128), f32).at[:75, :6].set(p["conv1_w"].reshape(75, 6))
    b1 = jnp.zeros((1, 128), f32).at[0, :6].set(p["conv1_b"])
    # conv2: rows = tap*128 + cin (tap = kh*5+kw), Cout 16 -> 128
    w2 = (jnp.zeros((25, 128, 128), f32)
          .at[:, :6, :16].set(p["conv2_w"].reshape(25, 6, 16))
          .reshape(25 * 128, 128))
    b2 = jnp.zeros((1, 128), f32).at[0, :16].set(p["conv2_b"])
    # fc1: kernel flatten order is (pos=i*5+j, channel); torch order is c*25+pos
    wf1 = (jnp.zeros((25, 128, 128), f32)
           .at[:, :16, :120].set(jnp.transpose(p["fc1_w"].reshape(16, 25, 120),
                                               (1, 0, 2)))
           .reshape(25 * 128, 128))
    bf1 = jnp.zeros((1, 128), f32).at[0, :120].set(p["fc1_b"])
    wf2 = jnp.zeros((128, 128), f32).at[:120, :84].set(p["fc2_w"])
    bf2 = jnp.zeros((1, 128), f32).at[0, :84].set(p["fc2_b"])
    wf3 = jnp.zeros((128, 128), f32).at[:84, :10].set(p["fc3_w"])
    bf3 = jnp.zeros((1, 128), f32).at[0, :10].set(p["fc3_b"])
    return {"w1": w1.astype(bf16), "b1": b1,
            "w2": w2.astype(bf16), "b2": b2,
            "wf1": wf1.astype(bf16), "bf1": bf1,
            "wf2": wf2.astype(bf16), "bf2": bf2,
            "wf3": wf3.astype(bf16), "bf3": bf3}


# ----------------------------------------------------------------------------
# Host-side conv1 im2col: ONE stacked (B, 4*196, 128) bf16 array
# ----------------------------------------------------------------------------
def _conv1_im2col(x_nchw):
    B = x_nchw.shape[0]
    xs = jnp.transpose(x_nchw, (0, 2, 3, 1))                  # NCHW -> NHWC
    taps = [xs[:, kh:kh + 28, kw:kw + 28, :]
            for kh in range(5) for kw in range(5)]
    patches = jnp.concatenate(taps, axis=-1)                  # (B,28,28,75)
    phases = [patches[:, dh::2, dw::2, :].reshape(B, 196, 75)
              for dh in range(2) for dw in range(2)]
    a1 = jnp.concatenate(phases, axis=1)                      # (B,784,75)
    a1 = jnp.pad(a1, ((0, 0), (0, 0), (0, 53)))               # K 75 -> 128
    return a1.astype(jnp.bfloat16)


@jax.jit
def net_forward(x_nchw, packed):
    B = x_nchw.shape[0]
    B_pad = ((B + BB - 1) // BB) * BB
    x32 = x_nchw.astype(jnp.float32)
    if B_pad != B:
        x32 = jnp.pad(x32, ((0, B_pad - B), (0, 0), (0, 0), (0, 0)))
    a1 = _conv1_im2col(x32)                                    # (B_pad,784,128)
    wspec = lambda g: (0, 0)
    out = pl.pallas_call(
        _net_kernel,
        out_shape=jax.ShapeDtypeStruct((B_pad, 128), jnp.float32),
        grid=(B_pad // BB,),
        in_specs=[
            pl.BlockSpec((BB, 784, 128), lambda g: (g, 0, 0)),  # conv1 im2col
            pl.BlockSpec((128, 128), wspec),                    # w1
            pl.BlockSpec((1, 128), wspec),                      # b1
            pl.BlockSpec((3200, 128), wspec),                   # w2 (im2col layout)
            pl.BlockSpec((1, 128), wspec),                      # b2
            pl.BlockSpec((3200, 128), wspec),                   # fc1
            pl.BlockSpec((1, 128), wspec),
            pl.BlockSpec((128, 128), wspec),                    # fc2
            pl.BlockSpec((1, 128), wspec),
            pl.BlockSpec((128, 128), wspec),                    # fc3
            pl.BlockSpec((1, 128), wspec),
        ],
        out_specs=pl.BlockSpec((BB, 128), lambda g: (g, 0)),
        scratch_shapes=[
            pltpu.VMEM((BB, 3200), jnp.float32),   # flattened pooled features
        ],
        compiler_params=pltpu.CompilerParams(
            dimension_semantics=("parallel",),
            vmem_limit_bytes=32 * 1024 * 1024),
    )(a1, packed["w1"], packed["b1"], packed["w2"], packed["b2"],
      packed["wf1"], packed["bf1"], packed["wf2"], packed["bf2"],
      packed["wf3"], packed["bf3"])
    return out[:B, :10]              # drop batch padding + lane padding


# ----------------------------------------------------------------------------
# Params + pure-JAX reference (verification only)
# ----------------------------------------------------------------------------
def init_params(key):
    ks = jax.random.split(key, 10)

    def uni(k, shape, fan_in):
        bound = 1.0 / jnp.sqrt(fan_in)
        return jax.random.uniform(k, shape, jnp.float32, -bound, bound)

    return {
        "conv1_w": uni(ks[0], (5, 5, 3, 6), 3 * 25),
        "conv1_b": uni(ks[1], (6,), 3 * 25),
        "conv2_w": uni(ks[2], (5, 5, 6, 16), 6 * 25),
        "conv2_b": uni(ks[3], (16,), 6 * 25),
        "fc1_w": uni(ks[4], (400, 120), 400),   # (in, out) = torch weight.T
        "fc1_b": uni(ks[5], (120,), 400),
        "fc2_w": uni(ks[6], (120, 84), 120),
        "fc2_b": uni(ks[7], (84,), 120),
        "fc3_w": uni(ks[8], (84, 10), 84),
        "fc3_b": uni(ks[9], (10,), 84),
    }


def reference_forward(x_nchw, params):
    def conv(x, w, b):
        y = jax.lax.conv_general_dilated(
            x, w, window_strides=(1, 1), padding="VALID",
            dimension_numbers=("NCHW", "HWIO", "NCHW"))
        return y + b[None, :, None, None]

    def pool(x):
        return jax.lax.reduce_window(x, -jnp.inf, jax.lax.max,
                                     (1, 1, 2, 2), (1, 1, 2, 2), "VALID")

    x = x_nchw.astype(jnp.float32)
    x = pool(jax.nn.relu(conv(x, params["conv1_w"], params["conv1_b"])))
    x = pool(jax.nn.relu(conv(x, params["conv2_w"], params["conv2_b"])))
    x = x.reshape(x.shape[0], -1)                       # torch.flatten(x, 1)
    x = jax.nn.relu(x @ params["fc1_w"] + params["fc1_b"])
    x = jax.nn.relu(x @ params["fc2_w"] + params["fc2_b"])
    x = x @ params["fc3_w"] + params["fc3_b"]
    return jax.nn.log_softmax(x, axis=-1)


if __name__ == "__main__":
    key = jax.random.PRNGKey(0)
    k_x, k_p = jax.random.split(key)
    x = jax.random.normal(k_x, (2, 3, 32, 32), dtype=jnp.float32)  # NCHW input
    params = init_params(k_p)
    packed = pack_params(params)            # one-time host-side weight packing

    out = jax.block_until_ready(net_forward(x, packed))

    assert out.shape == (2, 10), out.shape
    # log_softmax sanity: rows exponentiate to probability distributions
    row_sums = jnp.exp(out).sum(axis=1)
    assert jnp.allclose(row_sums, jnp.ones_like(row_sums), atol=1e-3), row_sums
    # cross-check against a pure-JAX reference (bf16 MXU inputs -> loose tol)
    ref = reference_forward(x, params)
    np.testing.assert_allclose(np.asarray(out), np.asarray(ref),
                               atol=1e-1, rtol=0.0)
    print("KERNEL_OK")
</pallas_src>

<mosaic_0001>
module attributes {stable_mosaic.version = 11 : i64} {
  func.func @_net_kernel(%arg0: i32, %arg1: memref<8x784x128xbf16, #tpu.memory_space<vmem>>, %arg2: memref<128x128xbf16, #tpu.memory_space<vmem>>, %arg3: memref<1x128xf32, #tpu.memory_space<vmem>>, %arg4: memref<3200x128xbf16, #tpu.memory_space<vmem>>, %arg5: memref<1x128xf32, #tpu.memory_space<vmem>>, %arg6: memref<3200x128xbf16, #tpu.memory_space<vmem>>, %arg7: memref<1x128xf32, #tpu.memory_space<vmem>>, %arg8: memref<128x128xbf16, #tpu.memory_space<vmem>>, %arg9: memref<1x128xf32, #tpu.memory_space<vmem>>, %arg10: memref<128x128xbf16, #tpu.memory_space<vmem>>, %arg11: memref<1x128xf32, #tpu.memory_space<vmem>>, %arg12: memref<8x128xf32, #tpu.memory_space<vmem>>, %arg13: memref<8x3200xf32, #tpu.memory_space<vmem>>) attributes {dimension_semantics = [#tpu.dimension_semantics<parallel>], iteration_bounds = array<i64: 1>, scalar_prefetch = 0 : i64, scratch_operands = 1 : i64, tpu.core_type = #tpu.core_type<tc>, window_params = [{transform_indices = @transform_0, window_bounds = array<i64: 8, 784, 128>}, {pipeline_mode = #tpu.pipeline_mode<synchronous>, transform_indices = @transform_1, window_bounds = array<i64: 128, 128>}, {pipeline_mode = #tpu.pipeline_mode<synchronous>, transform_indices = @transform_2, window_bounds = array<i64: 1, 128>}, {pipeline_mode = #tpu.pipeline_mode<synchronous>, transform_indices = @transform_3, window_bounds = array<i64: 3200, 128>}, {pipeline_mode = #tpu.pipeline_mode<synchronous>, transform_indices = @transform_4, window_bounds = array<i64: 1, 128>}, {pipeline_mode = #tpu.pipeline_mode<synchronous>, transform_indices = @transform_5, window_bounds = array<i64: 3200, 128>}, {pipeline_mode = #tpu.pipeline_mode<synchronous>, transform_indices = @transform_6, window_bounds = array<i64: 1, 128>}, {pipeline_mode = #tpu.pipeline_mode<synchronous>, transform_indices = @transform_7, window_bounds = array<i64: 128, 128>}, {pipeline_mode = #tpu.pipeline_mode<synchronous>, transform_indices = @transform_8, window_bounds = array<i64: 1, 128>}, {pipeline_mode = #tpu.pipeline_mode<synchronous>, transform_indices = @transform_9, window_bounds = array<i64: 128, 128>}, {pipeline_mode = #tpu.pipeline_mode<synchronous>, transform_indices = @transform_10, window_bounds = array<i64: 1, 128>}, {transform_indices = @transform_11, window_bounds = array<i64: 8, 128>}]} {
    %c0_i32 = arith.constant 0 : i32
    %c8_i32 = arith.constant 8 : i32
    %0 = arith.addi %c0_i32, %c8_i32 : i32
    %c1_i32 = arith.constant 1 : i32
    scf.for %arg14 = %c0_i32 to %0 step %c1_i32  : i32 {
      %c1_i32_24 = arith.constant 1 : i32
      %43 = arith.muli %arg14, %c1_i32_24 : i32
      %c0_i32_25 = arith.constant 0 : i32
      %44 = arith.addi %c0_i32_25, %43 : i32
      %45 = arith.index_cast %44 : i32 to index
      %c0_26 = arith.constant 0 : index
      %c0_27 = arith.constant 0 : index
      %46 = vector.load %arg1[%45, %c0_26, %c0_27] : memref<8x784x128xbf16, #tpu.memory_space<vmem>>, vector<1x784x128xbf16>
      %47 = vector.shape_cast %46 : vector<1x784x128xbf16> to vector<784x128xbf16>
      %c0_28 = arith.constant 0 : index
      %c0_29 = arith.constant 0 : index
      %48 = vector.load %arg2[%c0_28, %c0_29] : memref<128x128xbf16, #tpu.memory_space<vmem>>, vector<128x128xbf16>
      %cst_30 = arith.constant dense<0.000000e+00> : vector<784x128xf32>
      %49 = tpu.matmul %47, %48, %cst_30 {dimension_numbers = #tpu.dot_dimension_numbers<[1], [0], [0], [1], [0, 0, 1, 1], [], []>} : vector<784x128xbf16>, vector<128x128xbf16>, vector<784x128xf32> -> vector<784x128xf32>
      %50 = vector.extract_strided_slice %49 {offsets = [0, 0], sizes = [196, 128], strides = [1, 1]} : vector<784x128xf32> to vector<196x128xf32>
      %51 = vector.extract_strided_slice %49 {offsets = [196, 0], sizes = [196, 128], strides = [1, 1]} : vector<784x128xf32> to vector<196x128xf32>
      %52 = arith.maximumf %50, %51 : vector<196x128xf32>
      %53 = vector.extract_strided_slice %49 {offsets = [392, 0], sizes = [196, 128], strides = [1, 1]} : vector<784x128xf32> to vector<196x128xf32>
      %54 = vector.extract_strided_slice %49 {offsets = [588, 0], sizes = [196, 128], strides = [1, 1]} : vector<784x128xf32> to vector<196x128xf32>
      %55 = arith.maximumf %53, %54 : vector<196x128xf32>
      %56 = arith.maximumf %52, %55 : vector<196x128xf32>
      %c0_31 = arith.constant 0 : index
      %c0_32 = arith.constant 0 : index
      %57 = vector.load %arg3[%c0_31, %c0_32] : memref<1x128xf32, #tpu.memory_space<vmem>>, vector<1x128xf32>
      %58 = vector.broadcast %57 : vector<1x128xf32> to vector<196x128xf32>
      %59 = arith.addf %56, %58 : vector<196x128xf32>
      %cst_33 = arith.constant 0.000000e+00 : f32
      %60 = vector.broadcast %cst_33 : f32 to vector<196x128xf32>
      %61 = arith.maximumf %59, %60 : vector<196x128xf32>
      %62 = vector.extract_strided_slice %61 {offsets = [0, 0], sizes = [136, 128], strides = [1, 1]} : vector<196x128xf32> to vector<136x128xf32>
      %63 = arith.truncf %62 : vector<136x128xf32> to vector<136x128xbf16>
      %64 = vector.extract_strided_slice %61 {offsets = [1, 0], sizes = [136, 128], strides = [1, 1]} : vector<196x128xf32> to vector<136x128xf32>
      %65 = arith.truncf %64 : vector<136x128xf32> to vector<136x128xbf16>
      %66 = vector.extract_strided_slice %61 {offsets = [2, 0], sizes = [136, 128], strides = [1, 1]} : vector<196x128xf32> to vector<136x128xf32>
      %67 = arith.truncf %66 : vector<136x128xf32> to vector<136x128xbf16>
      %68 = vector.extract_strided_slice %61 {offsets = [3, 0], sizes = [136, 128], strides = [1, 1]} : vector<196x128xf32> to vector<136x128xf32>
      %69 = arith.truncf %68 : vector<136x128xf32> to vector<136x128xbf16>
      %70 = vector.extract_strided_slice %61 {offsets = [4, 0], sizes = [136, 128], strides = [1, 1]} : vector<196x128xf32> to vector<136x128xf32>
      %71 = arith.truncf %70 : vector<136x128xf32> to vector<136x128xbf16>
      %72 = vector.extract_strided_slice %61 {offsets = [14, 0], sizes = [136, 128], strides = [1, 1]} : vector<196x128xf32> to vector<136x128xf32>
      %73 = arith.truncf %72 : vector<136x128xf32> to vector<136x128xbf16>
      %74 = vector.extract_strided_slice %61 {offsets = [15, 0], sizes = [136, 128], strides = [1, 1]} : vector<196x128xf32> to vector<136x128xf32>
      %75 = arith.truncf %74 : vector<136x128xf32> to vector<136x128xbf16>
      %76 = vector.extract_strided_slice %61 {offsets = [16, 0], sizes = [136, 128], strides = [1, 1]} : vector<196x128xf32> to vector<136x128xf32>
      %77 = arith.truncf %76 : vector<136x128xf32> to vector<136x128xbf16>
      %78 = vector.extract_strided_slice %61 {offsets = [17, 0], sizes = [136, 128], strides = [1, 1]} : vector<196x128xf32> to vector<136x128xf32>
      %79 = arith.truncf %78 : vector<136x128xf32> to vector<136x128xbf16>
      %80 = vector.extract_strided_slice %61 {offsets = [18, 0], sizes = [136, 128], strides = [1, 1]} : vector<196x128xf32> to vector<136x128xf32>
      %81 = arith.truncf %80 : vector<136x128xf32> to vector<136x128xbf16>
      %82 = vector.extract_strided_slice %61 {offsets = [28, 0], sizes = [136, 128], strides = [1, 1]} : vector<196x128xf32> to vector<136x128xf32>
      %83 = arith.truncf %82 : vector<136x128xf32> to vector<136x128xbf16>
      %84 = vector.extract_strided_slice %61 {offsets = [29, 0], sizes = [136, 128], strides = [1, 1]} : vector<196x128xf32> to vector<136x128xf32>
      %85 = arith.truncf %84 : vector<136x128xf32> to vector<136x128xbf16>
      %86 = vector.extract_strided_slice %61 {offsets = [30, 0], sizes = [136, 128], strides = [1, 1]} : vector<196x128xf32> to vector<136x128xf32>
      %87 = arith.truncf %86 : vector<136x128xf32> to vector<136x128xbf16>
      %88 = vector.extract_strided_slice %61 {offsets = [31, 0], sizes = [136, 128], strides = [1, 1]} : vector<196x128xf32> to vector<136x128xf32>
      %89 = arith.truncf %88 : vector<136x128xf32> to vector<136x128xbf16>
      %90 = vector.extract_strided_slice %61 {offsets = [32, 0], sizes = [136, 128], strides = [1, 1]} : vector<196x128xf32> to vector<136x128xf32>
      %91 = arith.truncf %90 : vector<136x128xf32> to vector<136x128xbf16>
      %92 = vector.extract_strided_slice %61 {offsets = [42, 0], sizes = [136, 128], strides = [1, 1]} : vector<196x128xf32> to vector<136x128xf32>
      %93 = arith.truncf %92 : vector<136x128xf32> to vector<136x128xbf16>
      %94 = vector.extract_strided_slice %61 {offsets = [43, 0], sizes = [136, 128], strides = [1, 1]} : vector<196x128xf32> to vector<136x128xf32>
      %95 = arith.truncf %94 : vector<136x128xf32> to vector<136x128xbf16>
      %96 = vector.extract_strided_slice %61 {offsets = [44, 0], sizes = [136, 128], strides = [1, 1]} : vector<196x128xf32> to vector<136x128xf32>
      %97 = arith.truncf %96 : vector<136x128xf32> to vector<136x128xbf16>
      %98 = vector.extract_strided_slice %61 {offsets = [45, 0], sizes = [136, 128], strides = [1, 1]} : vector<196x128xf32> to vector<136x128xf32>
      %99 = arith.truncf %98 : vector<136x128xf32> to vector<136x128xbf16>
      %100 = vector.extract_strided_slice %61 {offsets = [46, 0], sizes = [136, 128], strides = [1, 1]} : vector<196x128xf32> to vector<136x128xf32>
      %101 = arith.truncf %100 : vector<136x128xf32> to vector<136x128xbf16>
      %102 = vector.extract_strided_slice %61 {offsets = [56, 0], sizes = [136, 128], strides = [1, 1]} : vector<196x128xf32> to vector<136x128xf32>
      %103 = arith.truncf %102 : vector<136x128xf32> to vector<136x128xbf16>
      %104 = vector.extract_strided_slice %61 {offsets = [57, 0], sizes = [136, 128], strides = [1, 1]} : vector<196x128xf32> to vector<136x128xf32>
      %105 = arith.truncf %104 : vector<136x128xf32> to vector<136x128xbf16>
      %106 = vector.extract_strided_slice %61 {offsets = [58, 0], sizes = [136, 128], strides = [1, 1]} : vector<196x128xf32> to vector<136x128xf32>
      %107 = arith.truncf %106 : vector<136x128xf32> to vector<136x128xbf16>
      %108 = vector.extract_strided_slice %61 {offsets = [59, 0], sizes = [136, 128], strides = [1, 1]} : vector<196x128xf32> to vector<136x128xf32>
      %109 = arith.truncf %108 : vector<136x128xf32> to vector<136x128xbf16>
      %110 = vector.extract_strided_slice %61 {offsets = [60, 0], sizes = [136, 128], strides = [1, 1]} : vector<196x128xf32> to vector<136x128xf32>
      %111 = arith.truncf %110 : vector<136x128xf32> to vector<136x128xbf16>
      %112 = tpu.concatenate %63, %65, %67, %69, %71, %73, %75, %77, %79, %81, %83, %85, %87, %89, %91, %93 in 1 : vector<136x128xbf16>, vector<136x128xbf16>, vector<136x128xbf16>, vector<136x128xbf16>, vector<136x128xbf16>, vector<136x128xbf16>, vector<136x128xbf16>, vector<136x128xbf16>, vector<136x128xbf16>, vector<136x128xbf16>, vector<136x128xbf16>, vector<136x128xbf16>, vector<136x128xbf16>, vector<136x128xbf16>, vector<136x128xbf16>, vector<136x128xbf16> -> vector<136x2048xbf16>
      %113 = tpu.concatenate %95, %97, %99, %101, %103, %105, %107, %109, %111 in 1 : vector<136x128xbf16>, vector<136x128xbf16>, vector<136x128xbf16>, vector<136x128xbf16>, vector<136x128xbf16>, vector<136x128xbf16>, vector<136x128xbf16>, vector<136x128xbf16>, vector<136x128xbf16> -> vector<136x1152xbf16>
      %114 = tpu.concatenate %112, %113 in 1 : vector<136x2048xbf16>, vector<136x1152xbf16> -> vector<136x3200xbf16>
      %c0_34 = arith.constant 0 : index
      %c0_35 = arith.constant 0 : index
      %115 = vector.load %arg4[%c0_34, %c0_35] : memref<3200x128xbf16, #tpu.memory_space<vmem>>, vector<3200x128xbf16>
      %cst_36 = arith.constant dense<0.000000e+00> : vector<136x128xf32>
      %116 = tpu.matmul %114, %115, %cst_36 {dimension_numbers = #tpu.dot_dimension_numbers<[1], [0], [0], [1], [0, 0, 1, 1], [], []>} : vector<136x3200xbf16>, vector<3200x128xbf16>, vector<136x128xf32> -> vector<136x128xf32>
      %c0_37 = arith.constant 0 : index
      %c0_38 = arith.constant 0 : index
      %117 = vector.load %arg5[%c0_37, %c0_38] : memref<1x128xf32, #tpu.memory_space<vmem>>, vector<1x128xf32>
      %118 = vector.broadcast %117 : vector<1x128xf32> to vector<136x128xf32>
      %119 = arith.addf %116, %118 : vector<136x128xf32>
      %cst_39 = arith.constant 0.000000e+00 : f32
      %120 = vector.broadcast %cst_39 : f32 to vector<136x128xf32>
      %121 = arith.maximumf %119, %120 : vector<136x128xf32>
      %122 = vector.extract_strided_slice %121 {offsets = [0, 0], sizes = [135, 128], strides = [1, 1]} : vector<136x128xf32> to vector<135x128xf32>
      %123 = vector.extract_strided_slice %121 {offsets = [1, 0], sizes = [135, 128], strides = [1, 1]} : vector<136x128xf32> to vector<135x128xf32>
      %124 = arith.maximumf %122, %123 : vector<135x128xf32>
      %125 = vector.extract_strided_slice %124 {offsets = [0, 0], sizes = [121, 128], strides = [1, 1]} : vector<135x128xf32> to vector<121x128xf32>
      %126 = vector.extract_strided_slice %124 {offsets = [14, 0], sizes = [121, 128], strides = [1, 1]} : vector<135x128xf32> to vector<121x128xf32>
      %127 = arith.maximumf %125, %126 : vector<121x128xf32>
      %128 = vector.extract_strided_slice %127 {offsets = [0, 0], sizes = [1, 128], strides = [1, 1]} : vector<121x128xf32> to vector<1x128xf32>
      %129 = vector.extract_strided_slice %127 {offsets = [2, 0], sizes = [1, 128], strides = [1, 1]} : vector<121x128xf32> to vector<1x128xf32>
      %130 = vector.extract_strided_slice %127 {offsets = [4, 0], sizes = [1, 128], strides = [1, 1]} : vector<121x128xf32> to vector<1x128xf32>
      %131 = vector.extract_strided_slice %127 {offsets = [6, 0], sizes = [1, 128], strides = [1, 1]} : vector<121x128xf32> to vector<1x128xf32>
      %132 = vector.extract_strided_slice %127 {offsets = [8, 0], sizes = [1, 128], strides = [1, 1]} : vector<121x128xf32> to vector<1x128xf32>
      %133 = vector.extract_strided_slice %127 {offsets = [28, 0], sizes = [1, 128], strides = [1, 1]} : vector<121x128xf32> to vector<1x128xf32>
      %134 = vector.extract_strided_slice %127 {offsets = [30, 0], sizes = [1, 128], strides = [1, 1]} : vector<121x128xf32> to vector<1x128xf32>
      %135 = vector.extract_strided_slice %127 {offsets = [32, 0], sizes = [1, 128], strides = [1, 1]} : vector<121x128xf32> to vector<1x128xf32>
      %136 = vector.extract_strided_slice %127 {offsets = [34, 0], sizes = [1, 128], strides = [1, 1]} : vector<121x128xf32> to vector<1x128xf32>
      %137 = vector.extract_strided_slice %127 {offsets = [36, 0], sizes = [1, 128], strides = [1, 1]} : vector<121x128xf32> to vector<1x128xf32>
      %138 = vector.extract_strided_slice %127 {offsets = [56, 0], sizes = [1, 128], strides = [1, 1]} : vector<121x128xf32> to vector<1x128xf32>
      %139 = vector.extract_strided_slice %127 {offsets = [58, 0], sizes = [1, 128], strides = [1, 1]} : vector<121x128xf32> to vector<1x128xf32>
      %140 = vector.extract_strided_slice %127 {offsets = [60, 0], sizes = [1, 128], strides = [1, 1]} : vector<121x128xf32> to vector<1x128xf32>
      %141 = vector.extract_strided_slice %127 {offsets = [62, 0], sizes = [1, 128], strides = [1, 1]} : vector<121x128xf32> to vector<1x128xf32>
      %142 = vector.extract_strided_slice %127 {offsets = [64, 0], sizes = [1, 128], strides = [1, 1]} : vector<121x128xf32> to vector<1x128xf32>
      %143 = vector.extract_strided_slice %127 {offsets = [84, 0], sizes = [1, 128], strides = [1, 1]} : vector<121x128xf32> to vector<1x128xf32>
      %144 = vector.extract_strided_slice %127 {offsets = [86, 0], sizes = [1, 128], strides = [1, 1]} : vector<121x128xf32> to vector<1x128xf32>
      %145 = vector.extract_strided_slice %127 {offsets = [88, 0], sizes = [1, 128], strides = [1, 1]} : vector<121x128xf32> to vector<1x128xf32>
      %146 = vector.extract_strided_slice %127 {offsets = [90, 0], sizes = [1, 128], strides = [1, 1]} : vector<121x128xf32> to vector<1x128xf32>
      %147 = vector.extract_strided_slice %127 {offsets = [92, 0], sizes = [1, 128], strides = [1, 1]} : vector<121x128xf32> to vector<1x128xf32>
      %148 = vector.extract_strided_slice %127 {offsets = [112, 0], sizes = [1, 128], strides = [1, 1]} : vector<121x128xf32> to vector<1x128xf32>
      %149 = vector.extract_strided_slice %127 {offsets = [114, 0], sizes = [1, 128], strides = [1, 1]} : vector<121x128xf32> to vector<1x128xf32>
      %150 = vector.extract_strided_slice %127 {offsets = [116, 0], sizes = [1, 128], strides = [1, 1]} : vector<121x128xf32> to vector<1x128xf32>
      %151 = vector.extract_strided_slice %127 {offsets = [118, 0], sizes = [1, 128], strides = [1, 1]} : vector<121x128xf32> to vector<1x128xf32>
      %152 = vector.extract_strided_slice %127 {offsets = [120, 0], sizes = [1, 128], strides = [1, 1]} : vector<121x128xf32> to vector<1x128xf32>
      %153 = tpu.concatenate %128, %129, %130, %131, %132, %133, %134, %135, %136, %137, %138, %139, %140, %141, %142, %143 in 1 : vector<1x128xf32>, vector<1x128xf32>, vector<1x128xf32>, vector<1x128xf32>, vector<1x128xf32>, vector<1x128xf32>, vector<1x128xf32>, vector<1x128xf32>, vector<1x128xf32>, vector<1x128xf32>, vector<1x128xf32>, vector<1x128xf32>, vector<1x128xf32>, vector<1x128xf32>, vector<1x128xf32>, vector<1x128xf32> -> vector<1x2048xf32>
      %154 = tpu.concatenate %144, %145, %146, %147, %148, %149, %150, %151, %152 in 1 : vector<1x128xf32>, vector<1x128xf32>, vector<1x128xf32>, vector<1x128xf32>, vector<1x128xf32>, vector<1x128xf32>, vector<1x128xf32>, vector<1x128xf32>, vector<1x128xf32> -> vector<1x1152xf32>
      %155 = tpu.concatenate %153, %154 in 1 : vector<1x2048xf32>, vector<1x1152xf32> -> vector<1x3200xf32>
      %156 = arith.index_cast %44 : i32 to index
      %c0_40 = arith.constant 0 : index
      %157 = vector.load %arg13[%156, %c0_40] : memref<8x3200xf32, #tpu.memory_space<vmem>>, vector<1x3200xf32>
      tpu.vector_store %arg13[%156, %c0_40], %155 {strides = array<i32>} : memref<8x3200xf32, #tpu.memory_space<vmem>>, vector<1x3200xf32>,
    }
    %c8_i32_0 = arith.constant 8 : i32
    %c0 = arith.constant 0 : index
    %c0_1 = arith.constant 0 : index
    %1 = vector.load %arg13[%c0, %c0_1] : memref<8x3200xf32, #tpu.memory_space<vmem>>, vector<8x3200xf32>
    %2 = arith.truncf %1 : vector<8x3200xf32> to vector<8x3200xbf16>
    %c0_2 = arith.constant 0 : index
    %c0_3 = arith.constant 0 : index
    %3 = vector.load %arg6[%c0_2, %c0_3] : memref<3200x128xbf16, #tpu.memory_space<vmem>>, vector<3200x128xbf16>
    %cst = arith.constant dense<0.000000e+00> : vector<8x128xf32>
    %4 = tpu.matmul %2, %3, %cst {dimension_numbers = #tpu.dot_dimension_numbers<[1], [0], [0], [1], [0, 0, 1, 1], [], []>} : vector<8x3200xbf16>, vector<3200x128xbf16>, vector<8x128xf32> -> vector<8x128xf32>
    %c0_4 = arith.constant 0 : index
    %c0_5 = arith.constant 0 : index
    %5 = vector.load %arg7[%c0_4, %c0_5] : memref<1x128xf32, #tpu.memory_space<vmem>>, vector<1x128xf32>
    %6 = vector.broadcast %5 : vector<1x128xf32> to vector<8x128xf32>
    %7 = arith.addf %4, %6 : vector<8x128xf32>
    %cst_6 = arith.constant 0.000000e+00 : f32
    %8 = vector.broadcast %cst_6 : f32 to vector<8x128xf32>
    %9 = arith.maximumf %7, %8 : vector<8x128xf32>
    %10 = arith.truncf %9 : vector<8x128xf32> to vector<8x128xbf16>
    %c0_7 = arith.constant 0 : index
    %c0_8 = arith.constant 0 : index
    %11 = vector.load %arg8[%c0_7, %c0_8] : memref<128x128xbf16, #tpu.memory_space<vmem>>, vector<128x128xbf16>
    %cst_9 = arith.constant dense<0.000000e+00> : vector<8x128xf32>
    %12 = tpu.matmul %10, %11, %cst_9 {dimension_numbers = #tpu.dot_dimension_numbers<[1], [0], [0], [1], [0, 0, 1, 1], [], []>} : vector<8x128xbf16>, vector<128x128xbf16>, vector<8x128xf32> -> vector<8x128xf32>
    %c0_10 = arith.constant 0 : index
    %c0_11 = arith.constant 0 : index
    %13 = vector.load %arg9[%c0_10, %c0_11] : memref<1x128xf32, #tpu.memory_space<vmem>>, vector<1x128xf32>
    %14 = vector.broadcast %13 : vector<1x128xf32> to vector<8x128xf32>
    %15 = arith.addf %12, %14 : vector<8x128xf32>
    %cst_12 = arith.constant 0.000000e+00 : f32
    %16 = vector.broadcast %cst_12 : f32 to vector<8x128xf32>
    %17 = arith.maximumf %15, %16 : vector<8x128xf32>
    %18 = arith.truncf %17 : vector<8x128xf32> to vector<8x128xbf16>
    %c0_13 = arith.constant 0 : index
    %c0_14 = arith.constant 0 : index
    %19 = vector.load %arg10[%c0_13, %c0_14] : memref<128x128xbf16, #tpu.memory_space<vmem>>, vector<128x128xbf16>
    %cst_15 = arith.constant dense<0.000000e+00> : vector<8x128xf32>
    %20 = tpu.matmul %18, %19, %cst_15 {dimension_numbers = #tpu.dot_dimension_numbers<[1], [0], [0], [1], [0, 0, 1, 1], [], []>} : vector<8x128xbf16>, vector<128x128xbf16>, vector<8x128xf32> -> vector<8x128xf32>
    %c0_16 = arith.constant 0 : index
    %c0_17 = arith.constant 0 : index
    %21 = vector.load %arg11[%c0_16, %c0_17] : memref<1x128xf32, #tpu.memory_space<vmem>>, vector<1x128xf32>
    %22 = vector.broadcast %21 : vector<1x128xf32> to vector<8x128xf32>
    %23 = arith.addf %20, %22 : vector<8x128xf32>
    %24 = tpu.iota {dimensions = array<i32: 1>} : vector<8x128xi32>
    %c10_i32 = arith.constant 10 : i32
    %25 = vector.broadcast %c10_i32 : i32 to vector<8x128xi32>
    %26 = arith.cmpi slt, %24, %25 : vector<8x128xi32>
    %cst_18 = arith.constant -1.000000e+30 : f32
    %27 = vector.broadcast %cst_18 : f32 to vector<8x128xf32>
    %28 = arith.select %26, %23, %27 : vector<8x128xi1>, vector<8x128xf32>
    %cst_19 = arith.constant dense<0xFF800000> : vector<8xf32>
    %29 = vector.multi_reduction <maximumf>, %28, %cst_19 [1] : vector<8x128xf32> to vector<8xf32>
    %30 = vector.shape_cast %29 : vector<8xf32> to vector<8x1xf32>
    %31 = vector.broadcast %30 : vector<8x1xf32> to vector<8x128xf32>
    %32 = arith.subf %23, %31 : vector<8x128xf32>
    %33 = math.exp %32 : vector<8x128xf32>
    %cst_20 = arith.constant 0.000000e+00 : f32
    %34 = vector.broadcast %cst_20 : f32 to vector<8x128xf32>
    %35 = arith.select %26, %33, %34 : vector<8x128xi1>, vector<8x128xf32>
    %cst_21 = arith.constant dense<0.000000e+00> : vector<8xf32>
    %36 = vector.multi_reduction <add>, %35, %cst_21 [1] : vector<8x128xf32> to vector<8xf32>
    %37 = vector.shape_cast %36 : vector<8xf32> to vector<8x1xf32>
    %38 = math.log %37 : vector<8x1xf32>
    %39 = arith.addf %30, %38 : vector<8x1xf32>
    %40 = vector.broadcast %39 : vector<8x1xf32> to vector<8x128xf32>
    %41 = arith.subf %23, %40 : vector<8x128xf32>
    %c0_22 = arith.constant 0 : index
    %c0_23 = arith.constant 0 : index
    %42 = vector.load %arg12[%c0_22, %c0_23] : memref<8x128xf32, #tpu.memory_space<vmem>>, vector<8x128xf32>
    tpu.vector_store %arg12[%c0_22, %c0_23], %41 {strides = array<i32>} : memref<8x128xf32, #tpu.memory_space<vmem>>, vector<8x128xf32>,
    return
  }
  func.func @transform_0(%arg0: i32) -> (i32, i32, i32) {
    %c0_i32 = arith.constant 0 : i32
    %c0_i32_0 = arith.constant 0 : i32
    %c0_i32_1 = arith.constant 0 : i32
    return %arg0, %c0_i32, %c0_i32_0 : i32, i32, i32
  }
  func.func @transform_1(%arg0: i32) -> (i32, i32) {
    %c0_i32 = arith.constant 0 : i32
    %c0_i32_0 = arith.constant 0 : i32
    %c0_i32_1 = arith.constant 0 : i32
    return %c0_i32, %c0_i32_0 : i32, i32
  }
  func.func @transform_2(%arg0: i32) -> (i32, i32) {
    %c0_i32 = arith.constant 0 : i32
    %c0_i32_0 = arith.constant 0 : i32
    %c0_i32_1 = arith.constant 0 : i32
    return %c0_i32, %c0_i32_0 : i32, i32
  }
  func.func @transform_3(%arg0: i32) -> (i32, i32) {
    %c0_i32 = arith.constant 0 : i32
    %c0_i32_0 = arith.constant 0 : i32
    %c0_i32_1 = arith.constant 0 : i32
    return %c0_i32, %c0_i32_0 : i32, i32
  }
  func.func @transform_4(%arg0: i32) -> (i32, i32) {
    %c0_i32 = arith.constant 0 : i32
    %c0_i32_0 = arith.constant 0 : i32
    %c0_i32_1 = arith.constant 0 : i32
    return %c0_i32, %c0_i32_0 : i32, i32
  }
  func.func @transform_5(%arg0: i32) -> (i32, i32) {
    %c0_i32 = arith.constant 0 : i32
    %c0_i32_0 = arith.constant 0 : i32
    %c0_i32_1 = arith.constant 0 : i32
    return %c0_i32, %c0_i32_0 : i32, i32
  }
  func.func @transform_6(%arg0: i32) -> (i32, i32) {
    %c0_i32 = arith.constant 0 : i32
    %c0_i32_0 = arith.constant 0 : i32
    %c0_i32_1 = arith.constant 0 : i32
    return %c0_i32, %c0_i32_0 : i32, i32
  }
  func.func @transform_7(%arg0: i32) -> (i32, i32) {
    %c0_i32 = arith.constant 0 : i32
    %c0_i32_0 = arith.constant 0 : i32
    %c0_i32_1 = arith.constant 0 : i32
    return %c0_i32, %c0_i32_0 : i32, i32
  }
  func.func @transform_8(%arg0: i32) -> (i32, i32) {
    %c0_i32 = arith.constant 0 : i32
    %c0_i32_0 = arith.constant 0 : i32
    %c0_i32_1 = arith.constant 0 : i32
    return %c0_i32, %c0_i32_0 : i32, i32
  }
  func.func @transform_9(%arg0: i32) -> (i32, i32) {
    %c0_i32 = arith.constant 0 : i32
    %c0_i32_0 = arith.constant 0 : i32
    %c0_i32_1 = arith.constant 0 : i32
    return %c0_i32, %c0_i32_0 : i32, i32
  }
  func.func @transform_10(%arg0: i32) -> (i32, i32) {
    %c0_i32 = arith.constant 0 : i32
    %c0_i32_0 = arith.constant 0 : i32
    %c0_i32_1 = arith.constant 0 : i32
    return %c0_i32, %c0_i32_0 : i32, i32
  }
  func.func @transform_11(%arg0: i32) -> (i32, i32) {
    %c0_i32 = arith.constant 0 : i32
    %c0_i32_0 = arith.constant 0 : i32
    return %arg0, %c0_i32 : i32, i32
  }
}

</mosaic_0001>

<bundles_post_ra>
// kernel: net_forward.1
= control target key start
LH: loop header
LB: loop body
LE: loop exit
PB: predicated region body
PF: predicated region fallthrough
CT: control target
= control target key end

     0   :  { %s10873_s17 = smov 0   ;;  %s14469_s0 = inlined_call_operand.vmem [shape: bf16[8,784,128], index: 0, kind: input, shape index: {}]   ;;  %s14470_s1 = inlined_call_operand.vmem [shape: bf16[128,128], index: 1, kind: input, shape index: {}]   ;;  %s14471_s2 = inlined_call_operand.vmem [shape: f32[1,128], index: 2, kind: input, shape index: {}]   ;;  %s14472_s3 = inlined_call_operand.vmem [shape: bf16[3200,128], index: 3, kind: input, shape index: {}]   ;;  %s14473_s4 = inlined_call_operand.vmem [shape: f32[1,128], index: 4, kind: input, shape index: {}]   ;;  %s14474_s5 = inlined_call_operand.vmem [shape: bf16[3200,128], index: 5, kind: input, shape index: {}]   ;;  %s14475_s6 = inlined_call_operand.vmem [shape: f32[1,128], index: 6, kind: input, shape index: {}]   ;;  %s14476_s7 = inlined_call_operand.vmem [shape: bf16[128,128], index: 7, kind: input, shape index: {}]   ;;  %s14477_s8 = inlined_call_operand.vmem [shape: f32[1,128], index: 8, kind: input, shape index: {}]   ;;  %s14478_s9 = inlined_call_operand.vmem [shape: bf16[128,128], index: 9, kind: input, shape index: {}]   ;;  %s14479_s10 = inlined_call_operand.vmem [shape: f32[1,128], index: 10, kind: input, shape index: {}]   ;;  %s14480_s11 = inlined_call_operand.vmem [shape: f32[8,128], index: 11, kind: output, shape index: {}]  }
   0x1 LB: > { %v10315_v0 = vld [vmem:[%s14470_s1 + $0x38] sm:$0xff]   ;;  %v14481_v1 = vmov 0.0   ;;  %v10316_v2 = vld [vmem:[%s14470_s1 + $0x30] sm:$0xff]   ;;  %vm10809_vm0 = vmmov 0   ;;  %s8756_s22 = smul.u32 392, %s10806_s17  ;;  %v10317_v3 = vld [vmem:[%s14470_s1 + $0x28] sm:$0xff]   ;;  %s10806_s17 = sphi %s10873_s17, %s44_s17  }
   0x2   : > { %9962 = vmatprep.subr.bf16.mxu0 %v14481_v1  ;;  %9978 = vmatprep.mubr.msk.bf16.mxu0 %vm10809_vm0, %v14481_v1  ;;  %v10318_v4 = vld [vmem:[%s14470_s1 + $0x20] sm:$0xff]   ;;  %v10319_v5 = vld [vmem:[%s14470_s1 + $0x18] sm:$0xff]   ;;  %v10320_v6 = vld [vmem:[%s14470_s1 + $0x10] sm:$0xff]   ;;  %vm954_vm1 = vcmask 1043456   ;;  %vm1286_vm2 = vsmask.f32 7424 }
   0x3   : > { %9963 = vmatpush3.bf16.msra.mxu0 %v10315_v0  ;;  %s10896_s27 = scalar_lea.vmem %s14469_s0, %s8756_s22  ;;  %v10321_v7 = vld [vmem:[%s14470_s1 + $0x8] sm:$0xff]   ;;  %v10322_v8 = vld [vmem:[%s14470_s1] sm:$0xff]   ;;  %vm1484_vm3 = vcmask 1044480   ;;  %vm1403_vm4 = vsmask.f32 6400  ;;  %vm1376_vm6 = vcmask 1046528  }
   0x4   : > { %9964 = vmatprep.subr.bf16.mxu0 %v14481_v1  ;;  %v10323_v9 = vld [vmem:[%s10896_s27] sm:$0xff]   ;;  %v10324_v10 = vld [vmem:[%s10896_s27 + $0x8] sm:$0xff]   ;;  %v10325_v11 = vld [vmem:[%s10896_s27 + $0x10] sm:$0xff]   ;;  %vm1511_vm5 = vsmask.f32 4352  ;;  %vm1838_vm7 = vcmask 1040384  }
   0x5   : > { %v10326_v12 = vld [vmem:[%s10896_s27 + $0x18] sm:$0xff]   ;;  %v10327_v13 = vld [vmem:[%s10896_s27 + $0x20] sm:$0xff]   ;;  %v10328_v14 = vld [vmem:[%s10896_s27 + $0x28] sm:$0xff]   ;;  %vm1448_vm8 = vcmask 1045504   ;;  %vm1796_vm9 = vsmask.f32 1280 }
   0x6   : > { %v10329_v15 = vld [vmem:[%s10896_s27 + $0x30] sm:$0xff]   ;;  %v10330_v16 = vld [vmem:[%s10896_s27 + $0x38] sm:$0xff]   ;;  %v10331_v17 = vld [vmem:[%s10896_s27 + $0x40] sm:$0xff]   ;;  %vm1643_vm10 = vsmask.f32 5376  ;;  %vm5536_vm12 = vcmask 1041408  }
   0x7   : > { %9965 = vmatpush3.bf16.msra.mxu0 %v10316_v2  ;;  %v10332_v18 = vld [vmem:[%s10896_s27 + $0x48] sm:$0xff]   ;;  %v10333_v19 = vld [vmem:[%s10896_s27 + $0x50] sm:$0xff]   ;;  %v10334_v20 = vld [vmem:[%s10896_s27 + $0x58] sm:$0xff]   ;;  %vm1856_vm11 = vsmask.f32 256  ;;  %s5781_s28 = sshra.s32 %s10806_s17, 3 }
   0x8   : > { %9966 = vmatprep.subr.bf16.mxu0 %v14481_v1  ;;  %v10335_v21 = vld [vmem:[%s10896_s27 + $0x60] sm:$0xff]   ;;  %v10336_v22 = vld [vmem:[%s10896_s27 + $0x68] sm:$0xff]   ;;  %v10337_v23 = vld [vmem:[%s10896_s27 + $0x70] sm:$0xff]   ;;  %s8528_s29 = smul.u32 200, %s5781_s28  ;;  %s5784_s30 = sand.u32 7, %s10806_s17 }
   0x9   : > { %v10338_v24 = vld [vmem:[%s10896_s27 + $0x78] sm:$0xff]   ;;  %v10339_v25 = vld [vmem:[%s10896_s27 + $0x80] sm:$0xff]   ;;  %v10340_v26 = vld [vmem:[%s10896_s27 + $0x88] sm:$0xff]   ;;  %s44_s17 = sadd.s32 1, %s10806_s17  }
   0xa   : > { %v10341_v27 = vld [vmem:[%s10896_s27 + $0x90] sm:$0xff]   ;;  %v10342_v28 = vld [vmem:[%s10896_s27 + $0x98] sm:$0xff]   ;;  %v10343_v29 = vld [vmem:[%s10896_s27 + $0xa0] sm:$0xff]   ;;  %s5787_s12 = sadd.s32 %s8528_s29, %s5784_s30  ;;  %p41_p0 = scmp.ge.s32.totalorder %s44_s17, 8  }
   0xb   : > { %9967 = vmatpush3.bf16.msra.mxu0 %v10317_v3  ;;  %v10344_v30 = vld [vmem:[%s10896_s27 + $0xa8] sm:$0xff]   ;;  %v10345_v31 = vld [vmem:[%s10896_s27 + $0xb0] sm:$0xff]   ;;  %v10346_v32 = vld [vmem:[%s10896_s27 + $0xb8] sm:$0xff]   ;;  %s13738_s13 = scalar_lea.vmem [#allocation2], %s5787_s12  ;;  %vm10812_vm14 = vmmov (%p41_p0), 0  }
   0xc   : > { %9968 = vmatprep.subr.bf16.mxu0 %v14481_v1  ;;  %v10347_v33 = vld [vmem:[%s10896_s27 + $0xc0] sm:$0xff]   ;;  %v10348_v37 = vld [vmem:[%s10896_s27 + $0xc8] sm:$0xff]   ;;  %v10349_v42 = vld [vmem:[%s10896_s27 + $0xd0] sm:$0xff]  }
   0xd   : > { %v10350_v47 = vld [vmem:[%s10896_s27 + $0xd8] sm:$0xff]   ;;  %v10351_v52 = vld [vmem:[%s10896_s27 + $0xe0] sm:$0xff]   ;;  %v10352_v57 = vld [vmem:[%s10896_s27 + $0xe8] sm:$0xff]  }
   0xe   : > { %v10353_v62 = vld [vmem:[%s10896_s27 + $0xf0] sm:$0xff]  }
   0xf   : > { %9969 = vmatpush3.bf16.msra.mxu0 %v10318_v4  ;;  %v10354_v4 = vld [vmem:[%s10896_s27 + $0xf8] sm:$0xff]  }
  0x10   : > { %9970 = vmatprep.subr.bf16.mxu0 %v14481_v1 }
  0x13   : > { %9971 = vmatpush3.bf16.msra.mxu0 %v10319_v5 }
  0x14   : > { %9972 = vmatprep.subr.bf16.mxu0 %v14481_v1 }
  0x17   : > { %9973 = vmatpush3.bf16.msra.mxu0 %v10320_v6 }
  0x18   : > { %9974 = vmatprep.subr.bf16.mxu0 %v14481_v1 }
  0x1b   : > { %9975 = vmatpush3.bf16.msra.mxu0 %v10321_v7 }
  0x1c   : > { %9976 = vmatprep.subr.bf16.mxu0 %v14481_v1 }
  0x1f   : > { %9977 = vmatpush3.bf16.msra.mxu0 %v10322_v8 }
  0x22   : > { %9979 = vmatmul.mubr.bf16.vlgmr.msra.gmra.mxu0 %v10323_v9  ;;  %v10355_v9 = vld [vmem:[%s10896_s27 + $0x100] sm:$0xff]  }
  0x23   : > { %9982 = vmatprep.mubr.msk.bf16.mxu0 %vm10809_vm0, %v14481_v1 }
  0x2a   : > { %9983 = vmatmul.mubr.bf16.gmra.mxu0 %v10324_v10 }
  0x2b   : > { %9986 = vmatprep.mubr.msk.bf16.mxu0 %vm10809_vm0, %v14481_v1 }
  0x32   : > { %9987 = vmatmul.mubr.bf16.gmra.mxu0 %v10325_v11 }
  0x33   : > { %9990 = vmatprep.mubr.msk.bf16.mxu0 %vm10809_vm0, %v14481_v1 }
  0x3a   : > { %9991 = vmatmul.mubr.bf16.gmra.mxu0 %v10326_v12 }
  0x3b   : > { %9994 = vmatprep.mubr.msk.bf16.mxu0 %vm10809_vm0, %v14481_v1 }
  0x42   : > { %9995 = vmatmul.mubr.bf16.gmra.mxu0 %v10327_v13 }
  0x43   : > { %9998 = vmatprep.mubr.msk.bf16.mxu0 %vm10809_vm0, %v14481_v1 }
  0x4a   : > { %9999 = vmatmul.mubr.bf16.gmra.mxu0 %v10328_v14  ;;  %v10356_v14 = vld [vmem:[%s10896_s27 + $0x108] sm:$0xff]  }
  0x4b   : > { %10002 = vmatprep.mubr.msk.bf16.mxu0 %vm10809_vm0, %v14481_v1 }
  0x52   : > { %10003 = vmatmul.mubr.bf16.gmra.mxu0 %v10329_v15 }
  0x53   : > { %10006 = vmatprep.mubr.msk.bf16.mxu0 %vm10809_vm0, %v14481_v1 }
  0x5a   : > { %10007 = vmatmul.mubr.bf16.gmra.mxu0 %v10330_v16 }
  0x5b   : > { %10010 = vmatprep.mubr.msk.bf16.mxu0 %vm10809_vm0, %v14481_v1 }
  0x62   : > { %10011 = vmatmul.mubr.bf16.gmra.mxu0 %v10331_v17 }
  0x63   : > { %10014 = vmatprep.mubr.msk.bf16.mxu0 %vm10809_vm0, %v14481_v1 }
  0x6a   : > { %10015 = vmatmul.mubr.bf16.gmra.mxu0 %v10332_v18 }
  0x6b   : > { %10018 = vmatprep.mubr.msk.bf16.mxu0 %vm10809_vm0, %v14481_v1 }
  0x72   : > { %10019 = vmatmul.mubr.bf16.gmra.mxu0 %v10333_v19  ;;  %v10357_v19 = vld [vmem:[%s10896_s27 + $0x110] sm:$0xff]  }
  0x73   : > { %10022 = vmatprep.mubr.msk.bf16.mxu0 %vm10809_vm0, %v14481_v1 }
  0x7a   : > { %10023 = vmatmul.mubr.bf16.gmra.mxu0 %v10334_v20 }
  0x7b   : > { %10026 = vmatprep.mubr.msk.bf16.mxu0 %vm10809_vm0, %v14481_v1 }
  0x82   : > { %10027 = vmatmul.mubr.bf16.gmra.mxu0 %v10335_v21 }
  0x83   : > { %10030 = vmatprep.mubr.msk.bf16.mxu0 %vm10809_vm0, %v14481_v1 }
  0x8a   : > { %10031 = vmatmul.mubr.bf16.gmra.mxu0 %v10336_v22 }
  0x8b   : > { %10034 = vmatprep.mubr.msk.bf16.mxu0 %vm10809_vm0, %v14481_v1 }
  0x92   : > { %10035 = vmatmul.mubr.bf16.gmra.mxu0 %v10337_v23 }
  0x93   : > { %10038 = vmatprep.mubr.msk.bf16.mxu0 %vm10809_vm0, %v14481_v1 }
  0x9a   : > { %10039 = vmatmul.mubr.bf16.gmra.mxu0 %v10338_v24  ;;  %v10358_v24 = vld [vmem:[%s10896_s27 + $0x118] sm:$0xff]  }
  0x9b   : > { %10042 = vmatprep.mubr.msk.bf16.mxu0 %vm10809_vm0, %v14481_v1 }
  0xa2   : > { %10043 = vmatmul.mubr.bf16.gmra.mxu0 %v10339_v25 }
  0xa3   : > { %10046 = vmatprep.mubr.msk.bf16.mxu0 %vm10809_vm0, %v14481_v1 }
  0xaa   : > { %10047 = vmatmul.mubr.bf16.gmra.mxu0 %v10340_v26 }
  0xab   : > { %10050 = vmatprep.mubr.msk.bf16.mxu0 %vm10809_vm0, %v14481_v1 }
  0xb2   : > { %10051 = vmatmul.mubr.bf16.gmra.mxu0 %v10341_v27 }
  0xb3   : > { %10054 = vmatprep.mubr.msk.bf16.mxu0 %vm10809_vm0, %v14481_v1 }
  0xba   : > { %10055 = vmatmul.mubr.bf16.gmra.mxu0 %v10342_v28 }
  0xbb   : > { %10058 = vmatprep.mubr.msk.bf16.mxu0 %vm10809_vm0, %v14481_v1 }
  0xc2   : > { %10059 = vmatmul.mubr.bf16.gmra.mxu0 %v10343_v29  ;;  %v10359_v29 = vld [vmem:[%s10896_s27 + $0x120] sm:$0xff]  }
  0xc3   : > { %10062 = vmatprep.mubr.msk.bf16.mxu0 %vm10809_vm0, %v14481_v1 }
  0xca   : > { %10063 = vmatmul.mubr.bf16.gmra.mxu0 %v10344_v30 }
  0xcb   : > { %10066 = vmatprep.mubr.msk.bf16.mxu0 %vm10809_vm0, %v14481_v1 }
  0xd2   : > { %10067 = vmatmul.mubr.bf16.gmra.mxu0 %v10345_v31 }
  0xd3   : > { %10070 = vmatprep.mubr.msk.bf16.mxu0 %vm10809_vm0, %v14481_v1 }
  0xda   : > { %10071 = vmatmul.mubr.bf16.gmra.mxu0 %v10346_v32 }
  0xdb   : > { %10074 = vmatprep.mubr.msk.bf16.mxu0 %vm10809_vm0, %v14481_v1 }
  0xe2   : > { %v10991_v34 = vpop.f32.mrf.mxu0  ;;  %10075 = vmatmul.mubr.bf16.gmra.mxu0 %v10347_v33 }
  0xe3   : > { %10078 = vmatprep.mubr.msk.bf16.mxu0 %vm10809_vm0, %v14481_v1 }
  0xe4   : > { %v9980_v35 = vpop.f32.mrf.mxu0 }
  0xe5   : > { %v10360_v35 = vld [vmem:[%s10896_s27 + $0x128] sm:$0xff]  }
  0xe6   : > { %v10995_v36 = vpop.f32.mrf.mxu0 }
  0xe8   : > { %v9981_v38 = vpop.f32.mrf.mxu0 }
  0xea   : > { %v10998_v39 = vpop.f32.mrf.mxu0  ;;  %10079 = vmatmul.mubr.bf16.gmra.mxu0 %v10348_v37 }
  0xeb   : > { %10082 = vmatprep.mubr.msk.bf16.mxu0 %vm10809_vm0, %v14481_v1 }
  0xec   : > { %v9984_v40 = vpop.f32.mrf.mxu0 }
  0xee   : > { %v11002_v41 = vpop.f32.mrf.mxu0 }
  0xf0   : > { %v9985_v43 = vpop.f32.mrf.mxu0 }
  0xf2   : > { %v11005_v44 = vpop.f32.mrf.mxu0  ;;  %10083 = vmatmul.mubr.bf16.gmra.mxu0 %v10349_v42 }
  0xf3   : > { %10086 = vmatprep.mubr.msk.bf16.mxu0 %vm10809_vm0, %v14481_v1 }
  0xf4   : > { %v9988_v45 = vpop.f32.mrf.mxu0 }
  0xf6   : > { %v11009_v46 = vpop.f32.mrf.mxu0 }
  0xf8   : > { %v9989_v48 = vpop.f32.mrf.mxu0 }
  0xf9   : > { %v10361_v48 = vld [vmem:[%s10896_s27 + $0x130] sm:$0xff]  }
  0xfa   : > { %v11012_v49 = vpop.f32.mrf.mxu0  ;;  %10087 = vmatmul.mubr.bf16.gmra.mxu0 %v10350_v47 }
  0xfb   : > { %10090 = vmatprep.mubr.msk.bf16.mxu0 %vm10809_vm0, %v14481_v1 }
  0xfc   : > { %v9992_v50 = vpop.f32.mrf.mxu0 }
  0xfe   : > { %v11016_v51 = vpop.f32.mrf.mxu0 }
 0x100   : > { %v9993_v53 = vpop.f32.mrf.mxu0 }
 0x102   : > { %v11019_v54 = vpop.f32.mrf.mxu0  ;;  %10091 = vmatmul.mubr.bf16.gmra.mxu0 %v10351_v52 }
 0x103   : > { %10094 = vmatprep.mubr.msk.bf16.mxu0 %vm10809_vm0, %v14481_v1 }
 0x104   : > { %v9996_v55 = vpop.f32.mrf.mxu0 }
 0x106   : > { %v11023_v56 = vpop.f32.mrf.mxu0 }
 0x108   : > { %v9997_v58 = vpop.f32.mrf.mxu0 }
 0x10a   : > { %v11026_v59 = vpop.f32.mrf.mxu0  ;;  %10095 = vmatmul.mubr.bf16.gmra.mxu0 %v10352_v57 }
 0x10b   : > { %10098 = vmatprep.mubr.msk.bf16.mxu0 %vm10809_vm0, %v14481_v1 }
 0x10c   : > { %v10000_v60 = vpop.f32.mrf.mxu0 }
 0x10e   : > { %v11030_v61 = vpop.f32.mrf.mxu0 }
 0x110   : > { %v10001_v63 = vpop.f32.mrf.mxu0 }
 0x111   : > { %v10362_v63 = vld [vmem:[%s10896_s27 + $0x138] sm:$0xff]  }
 0x112   : > { %v11033_v0 = vpop.f32.mrf.mxu0  ;;  %10099 = vmatmul.mubr.bf16.gmra.mxu0 %v10353_v62 }
 0x113   : > { %10102 = vmatprep.mubr.msk.bf16.mxu0 %vm10809_vm0, %v14481_v1 }
 0x114   : > { %v10004_v2 = vpop.f32.mrf.mxu0 }
 0x116   : > { %v11037_v3 = vpop.f32.mrf.mxu0 }
 0x118   : > { %v10005_v5 = vpop.f32.mrf.mxu0 }
 0x11a   : > { %v11040_v6 = vpop.f32.mrf.mxu0  ;;  %10103 = vmatmul.mubr.bf16.gmra.mxu0 %v10354_v4 }
 0x11b   : > { %10106 = vmatprep.mubr.msk.bf16.mxu0 %vm10809_vm0, %v14481_v1 }
 0x11c   : > { %v10008_v7 = vpop.f32.mrf.mxu0 }
 0x11e   : > { %v11044_v8 = vpop.f32.mrf.mxu0 }
 0x120   : > { %v10009_v10 = vpop.f32.mrf.mxu0 }
 0x122   : > { %v11047_v11 = vpop.f32.mrf.mxu0  ;;  %10107 = vmatmul.mubr.bf16.gmra.mxu0 %v10355_v9 }
 0x123   : > { %14616 = vst [vmem:[#allocation3_spill] sm:$0xff] %v11047_v11  ;;  %10110 = vmatprep.mubr.msk.bf16.mxu0 %vm10809_vm0, %v14481_v1 }
 0x124   : > { %v10012_v12 = vpop.f32.mrf.mxu0 }
 0x126   : > { %v11051_v13 = vpop.f32.mrf.mxu0 }
 0x127   : > { %14617 = vst [vmem:[#allocation4_spill] sm:$0xff] %v11051_v13 }
 0x128   : > { %v10013_v15 = vpop.f32.mrf.mxu0 }
 0x129   : > { %v10363_v15 = vld [vmem:[%s10896_s27 + $0x140] sm:$0xff]  }
 0x12a   : > { %v11054_v16 = vpop.f32.mrf.mxu0  ;;  %10111 = vmatmul.mubr.bf16.gmra.mxu0 %v10356_v14 }
 0x12b   : > { %14618 = vst [vmem:[#allocation5_spill] sm:$0xff] %v11054_v16  ;;  %10114 = vmatprep.mubr.msk.bf16.mxu0 %vm10809_vm0, %v14481_v1 }
 0x12c   : > { %v10016_v17 = vpop.f32.mrf.mxu0 }
 0x12e   : > { %v11058_v18 = vpop.f32.mrf.mxu0 }
 0x12f   : > { %14619 = vst [vmem:[#allocation6_spill] sm:$0xff] %v11058_v18 }
 0x130   : > { %v10017_v20 = vpop.f32.mrf.mxu0 }
 0x132   : > { %v11061_v21 = vpop.f32.mrf.mxu0  ;;  %10115 = vmatmul.mubr.bf16.gmra.mxu0 %v10357_v19 }
 0x133   : > { %14620 = vst [vmem:[#allocation7_spill] sm:$0xff] %v11061_v21  ;;  %10118 = vmatprep.mubr.msk.bf16.mxu0 %vm10809_vm0, %v14481_v1 }
 0x134   : > { %v10020_v22 = vpop.f32.mrf.mxu0 }
 0x136   : > { %v11065_v23 = vpop.f32.mrf.mxu0 }
 0x137   : > { %14621 = vst [vmem:[#allocation8_spill] sm:$0xff] %v11065_v23 }
 0x138   : > { %v10021_v25 = vpop.f32.mrf.mxu0 }
 0x13a   : > { %v11068_v26 = vpop.f32.mrf.mxu0  ;;  %10119 = vmatmul.mubr.bf16.gmra.mxu0 %v10358_v24 }
 0x13b   : > { %14622 = vst [vmem:[#allocation9_spill] sm:$0xff] %v11068_v26  ;;  %10122 = vmatprep.mubr.msk.bf16.mxu0 %vm10809_vm0, %v14481_v1 }
 0x13c   : > { %v10024_v27 = vpop.f32.mrf.mxu0 }
 0x13e   : > { %v11072_v28 = vpop.f32.mrf.mxu0 }
 0x13f   : > { %14623 = vst [vmem:[#allocation10_spill] sm:$0xff] %v11072_v28 }
 0x140   : > { %v10025_v30 = vpop.f32.mrf.mxu0 }
 0x141   : > { %v10364_v30 = vld [vmem:[%s10896_s27 + $0x148] sm:$0xff]  }
 0x142   : > { %v11075_v31 = vpop.f32.mrf.mxu0  ;;  %10123 = vmatmul.mubr.bf16.gmra.mxu0 %v10359_v29 }
 0x143   : > { %10126 = vmatprep.mubr.msk.bf16.mxu0 %vm10809_vm0, %v14481_v1 }
 0x144   : > { %v10028_v32 = vpop.f32.mrf.mxu0 }
 0x146   : > { %v11079_v33 = vpop.f32.mrf.mxu0 }
 0x147   : > { %v14484_v40 = vrot.slane %v11079_v33, 4 }
 0x148   : > { %v10029_v37 = vpop.f32.mrf.mxu0 }
 0x14a   : > { %v642_v38 = vpop.f32.mrf.mxu0  ;;  %10127 = vmatmul.mubr.bf16.gmra.mxu0 %v10360_v35 }
 0x14b   : > { %v958_v42 = vrot.slane %v642_v38, 4  ;;  %10130 = vmatprep.mubr.msk.bf16.mxu0 %vm10809_vm0, %v14481_v1 }
 0x14c   : > { %v10032_v43 = vpop.f32.mrf.mxu0 }
 0x14d   : > { %v11088_v45 = vsel %vm954_vm1, %v14484_v40, %v958_v42 }
 0x14e   : > { %v645_v47 = vpop.f32.mrf.mxu0 }
 0x14f   : > { %v960_v50 = vrot.slane %v645_v47, 4 }
 0x150   : > { %v10033_v52 = vpop.f32.mrf.mxu0 }
 0x151   : > { %v11092_v53 = vsel %vm954_vm1, %v958_v42, %v960_v50 }
 0x152   : > { %v650_v55 = vpop.f32.mrf.mxu0  ;;  %10131 = vmatmul.mubr.bf16.gmra.mxu0 %v10361_v48 }
 0x153   : > { %v962_v57 = vrot.slane %v650_v55, 4  ;;  %10134 = vmatprep.mubr.msk.bf16.mxu0 %vm10809_vm0, %v14481_v1 }
 0x154   : > { %v10036_v58 = vpop.f32.mrf.mxu0 }
 0x155   : > { %v11097_v60 = vsel %vm954_vm1, %v960_v50, %v962_v57  ;;  %v10365_v50 = vld [vmem:[%s10896_s27 + $0x150] sm:$0xff]  }
 0x156   : > { %v653_v62 = vpop.f32.mrf.mxu0 }
 0x157   : > { %v964_v2 = vrot.slane %v653_v62, 4 }
 0x158   : > { %v10037_v4 = vpop.f32.mrf.mxu0 }
 0x159   : > { %v11101_v5 = vsel %vm954_vm1, %v962_v57, %v964_v2 }
 0x15a   : > { %v658_v7 = vpop.f32.mrf.mxu0  ;;  %10135 = vmatmul.mubr.bf16.gmra.mxu0 %v10362_v63 }
 0x15b   : > { %v966_v9 = vrot.slane %v658_v7, 4  ;;  %10138 = vmatprep.mubr.msk.bf16.mxu0 %vm10809_vm0, %v14481_v1  ;;  %v10366_v7 = vld [vmem:[%s10896_s27 + $0x158] sm:$0xff]  }
 0x15c   : > { %v10040_v10 = vpop.f32.mrf.mxu0 }
 0x15d   : > { %v11106_v12 = vsel %vm954_vm1, %v964_v2, %v966_v9 }
 0x15e   : > { %v661_v14 = vpop.f32.mrf.mxu0 }
 0x15f   : > { %v968_v17 = vrot.slane %v661_v14, 4 }
 0x160   : > { %v10041_v19 = vpop.f32.mrf.mxu0 }
 0x161   : > { %v11110_v20 = vsel %vm954_vm1, %v966_v9, %v968_v17 }
 0x162   : > { %v666_v22 = vpop.f32.mrf.mxu0  ;;  %10139 = vmatmul.mubr.bf16.gmra.mxu0 %v10363_v15 }
 0x163   : > { %v970_v24 = vrot.slane %v666_v22, 4  ;;  %10142 = vmatprep.mubr.msk.bf16.mxu0 %vm10809_vm0, %v14481_v1 }
 0x164   : > { %v10044_v25 = vpop.f32.mrf.mxu0 }
 0x165   : > { %v11115_v27 = vsel %vm954_vm1, %v968_v17, %v970_v24  ;;  %v10367_v25 = vld [vmem:[%s10896_s27 + $0x160] sm:$0xff]  }
 0x166   : > { %v669_v29 = vpop.f32.mrf.mxu0 }
 0x167   : > { %v972_v32 = vrot.slane %v669_v29, 4 }
 0x168   : > { %v10045_v35 = vpop.f32.mrf.mxu0 }
 0x169   : > { %v11119_v37 = vsel %vm954_vm1, %v970_v24, %v972_v32 }
 0x16a   : > { %v674_v38 = vpop.f32.mrf.mxu0  ;;  %10143 = vmatmul.mubr.bf16.gmra.mxu0 %v10364_v30 }
 0x16b   : > { %v974_v42 = vrot.slane %v674_v38, 4  ;;  %10146 = vmatprep.mubr.msk.bf16.mxu0 %vm10809_vm0, %v14481_v1 }
 0x16c   : > { %v10048_v43 = vpop.f32.mrf.mxu0 }
 0x16d   : > { %v11124_v47 = vsel %vm954_vm1, %v972_v32, %v974_v42 }
 0x16e   : > { %v677_v48 = vpop.f32.mrf.mxu0 }
 0x16f   : > { %v976_v52 = vrot.slane %v677_v48, 4 }
 0x170   : > { %v10049_v55 = vpop.f32.mrf.mxu0 }
 0x171   : > { %v11128_v57 = vsel %vm954_vm1, %v974_v42, %v976_v52 }
 0x172   : > { %v682_v58 = vpop.f32.mrf.mxu0  ;;  %10147 = vmatmul.mubr.bf16.gmra.mxu0 %v10365_v50  ;;  %v10368_v50 = vld [vmem:[%s10896_s27 + $0x168] sm:$0xff]  }
 0x173   : > { %v978_v62 = vrot.slane %v682_v58, 4  ;;  %10150 = vmatprep.mubr.msk.bf16.mxu0 %vm10809_vm0, %v14481_v1  ;;  %v10372_v58 = vld [vmem:[%s14472_s3 + $0x78] sm:$0xff]  }
 0x174   : > { %v10052_v63 = vpop.f32.mrf.mxu0  ;;  %8814 = vmatprep.subr.bf16.mxu1 %v10372_v58  ;;  %v10379_v58 = vld [vmem:[%s14472_s3 + $0x20] sm:$0xff]  }
 0x175   : > { %v11133_v2 = vsel %vm954_vm1, %v976_v52, %v978_v62  ;;  %v10373_v63 = vld [vmem:[%s14472_s3 + $0x38] sm:$0xff]  }
 0x176   : > { %v685_v4 = vpop.f32.mrf.mxu0  ;;  %8815 = vmatpush3.bf16.msra.mxu1 %v10373_v63 }
 0x177   : > { %v980_v9 = vrot.slane %v685_v4, 4 }
 0x178   : > { %v10053_v10 = vpop.f32.mrf.mxu0 }
 0x179   : > { %v11137_v14 = vsel %vm954_vm1, %v978_v62, %v980_v9  ;;  %v10374_v10 = vld [vmem:[%s14472_s3 + $0x70] sm:$0xff]  }
 0x17a   : > { %v690_v15 = vpop.f32.mrf.mxu0  ;;  %10151 = vmatmul.mubr.bf16.gmra.mxu0 %v10366_v7  ;;  %8816 = vmatprep.subr.bf16.mxu1 %v10374_v10  ;;  %v10382_v10 = vld [vmem:[%s14472_s3 + $0x338] sm:$0xff]  }
 0x17b   : > { %v982_v17 = vrot.slane %v690_v15, 4  ;;  %10154 = vmatprep.mubr.msk.bf16.mxu0 %vm10809_vm0, %v14481_v1 }
 0x17c   : > { %v10056_v19 = vpop.f32.mrf.mxu0 }
 0x17d   : > { %v11142_v22 = vsel %vm954_vm1, %v980_v9, %v982_v17 }
 0x17e   : > { %v693_v24 = vpop.f32.mrf.mxu0 }
 0x17f   : > { %v984_v29 = vrot.slane %v693_v24, 4  ;;  %v10369_v24 = vld [vmem:[%s10896_s27 + $0x170] sm:$0xff]  }
 0x180   : > { %v10057_v30 = vpop.f32.mrf.mxu0 }
 0x181   : > { %v11146_v32 = vsel %vm954_vm1, %v982_v17, %v984_v29  ;;  %v10375_v17 = vld [vmem:[%s14472_s3 + $0x30] sm:$0xff]   ;;  %v10376_v30 = vld [vmem:[%s14472_s3 + $0x68] sm:$0xff]  }
 0x182   : > { %v698_v35 = vpop.f32.mrf.mxu0  ;;  %10155 = vmatmul.mubr.bf16.gmra.mxu0 %v10367_v25  ;;  %8817 = vmatpush3.bf16.msra.mxu1 %v10375_v17 }
 0x183   : > { %v986_v38 = vrot.slane %v698_v35, 4  ;;  %10158 = vmatprep.mubr.msk.bf16.mxu0 %vm10809_vm0, %v14481_v1  ;;  %8818 = vmatprep.subr.bf16.mxu1 %v10376_v30  ;;  %v10384_v30 = vld [vmem:[%s14472_s3 + $0x370] sm:$0xff]  }
 0x184   : > { %v10060_v42 = vpop.f32.mrf.mxu0 }
 0x185   : > { %v11151_v43 = vsel %vm954_vm1, %v984_v29, %v986_v38 }
 0x186   : > { %v701_v48 = vpop.f32.mrf.mxu0 }
 0x187   : > { %v988_v52 = vrot.slane %v701_v48, 4 }
 0x188   : > { %v10061_v55 = vpop.f32.mrf.mxu0 }
 0x189   : > { %v11158_v62 = vsel %vm954_vm1, %v986_v38, %v988_v52  ;;  %v10377_v38 = vld [vmem:[%s14472_s3 + $0x28] sm:$0xff]  }
 0x18a   : > { %14624 = vst [vmem:[#allocation11_spill] sm:$0xff] %v11158_v62  ;;  %v706_v4 = vpop.f32.mrf.mxu0  ;;  %10159 = vmatmul.mubr.bf16.gmra.mxu0 %v10368_v50  ;;  %8819 = vmatpush3.bf16.msra.mxu1 %v10377_v38 }
 0x18b   : > { %v990_v7 = vrot.slane %v706_v4, 4  ;;  %10162 = vmatprep.mubr.msk.bf16.mxu0 %vm10809_vm0, %v14481_v1  ;;  %v10370_v4 = vld [vmem:[%s10896_s27 + $0x178] sm:$0xff]  }
 0x18c   : > { %v10064_v9 = vpop.f32.mrf.mxu0 }
 0x18d   : > { %v11169_v15 = vsel %vm954_vm1, %v988_v52, %v990_v7  ;;  %v10378_v52 = vld [vmem:[%s14472_s3 + $0x60] sm:$0xff]  }
 0x18e   : > { %14625 = vst [vmem:[#allocation12_spill] sm:$0xff] %v11169_v15  ;;  %v709_v19 = vpop.f32.mrf.mxu0  ;;  %8820 = vmatprep.subr.bf16.mxu1 %v10378_v52 }
 0x18f   : > { %v992_v25 = vrot.slane %v709_v19, 4  ;;  %8821 = vmatpush3.bf16.msra.mxu1 %v10379_v58  ;;  %v10381_v19 = vld [vmem:[%s14472_s3 + $0x58] sm:$0xff]   ;;  %v10387_v58 = vld [vmem:[%s14472_s3 + $0x10] sm:$0xff]  }
 0x190   : > { %v10065_v29 = vpop.f32.mrf.mxu0  ;;  %8822 = vmatprep.subr.bf16.mxu1 %v10381_v19  ;;  %v10389_v19 = vld [vmem:[%s14472_s3 + $0x48] sm:$0xff]  }
 0x191   : > { %v11179_v35 = vsel %vm954_vm1, %v990_v7, %v992_v25  ;;  %v10380_v7 = vld [vmem:[%s14472_s3 + $0x378] sm:$0xff]  }
 0x192   : > { %14626 = vst [vmem:[#allocation13_spill] sm:$0xff] %v11179_v35  ;;  %v714_v42 = vpop.f32.mrf.mxu0  ;;  %10163 = vmatmul.mubr.bf16.gmra.mxu0 %v10369_v24  ;;  %9234 = vmatprep.subr.bf16.mxu0 %v10380_v7  ;;  %v10388_v7 = vld [vmem:[%s14472_s3 + $0x368] sm:$0xff]  }
 0x193   : > { %v994_v48 = vrot.slane %v714_v42, 4  ;;  %10166 = vmatprep.mubr.msk.bf16.mxu0 %vm10809_vm0, %v14481_v1  ;;  %9235 = vmatpush3.bf16.msra.mxu0 %v10382_v10  ;;  %v10386_v42 = vld [vmem:[%s14472_s3 + $0x330] sm:$0xff]  }
 0x194   : > { %v10068_v50 = vpop.f32.mrf.mxu0  ;;  %9236 = vmatprep.subr.bf16.mxu0 %v10384_v30 }
 0x195   : > { %v11190_v55 = vsel %vm954_vm1, %v992_v25, %v994_v48  ;;  %v10383_v25 = vld [vmem:[%s14472_s3 + $0x18] sm:$0xff]   ;;  %v10385_v50 = vld [vmem:[%s14472_s3 + $0x50] sm:$0xff]  }
 0x196   : > { %14627 = vst [vmem:[#allocation14_spill] sm:$0xff] %v11190_v55  ;;  %v717_v63 = vpop.f32.mrf.mxu0  ;;  %8823 = vmatpush3.bf16.msra.mxu1 %v10383_v25 }
 0x197   : > { %v996_v9 = vrot.slane %v717_v63, 4  ;;  %9237 = vmatpush3.bf16.msra.mxu0 %v10386_v42  ;;  %8824 = vmatprep.subr.bf16.mxu1 %v10385_v50  ;;  %v10392_v42 = vld [vmem:[%s14472_s3 + $0x360] sm:$0xff]  }
 0x198   : > { %v10069_v17 = vpop.f32.mrf.mxu0  ;;  %9238 = vmatprep.subr.bf16.mxu0 %v10388_v7 }
 0x199   : > { %v11206_v24 = vsel %vm954_vm1, %v994_v48, %v996_v9  ;;  %v10390_v17 = vld [vmem:[%s14472_s3 + $0x328] sm:$0xff]  }
 0x19a   : > { %14628 = vst [vmem:[#allocation15_spill] sm:$0xff] %v11206_v24  ;;  %v722_v29 = vpop.f32.mrf.mxu0  ;;  %10167 = vmatmul.mubr.bf16.gmra.mxu0 %v10370_v4  ;;  %v10371_v4 = vld [vmem:[%s10896_s27 + $0x180] sm:$0xff]   ;;  %8825 = vmatpush3.bf16.msra.mxu1 %v10387_v58 }
 0x19b   : > { %v998_v38 = vrot.slane %v722_v29, 4  ;;  %10170 = vmatprep.mubr.msk.bf16.mxu0 %vm10809_vm0, %v14481_v1  ;;  %9239 = vmatpush3.bf16.msra.mxu0 %v10390_v17  ;;  %v10391_v29 = vld [vmem:[%s14472_s3 + $0x8] sm:$0xff]   ;;  %v10393_v58 = vld [vmem:[%s14472_s3 + $0x40] sm:$0xff]   ;;  %v10396_v17 = vld [vmem:[%s14472_s3 + $0x358] sm:$0xff]  }
 0x19c   : > { %v10072_v48 = vpop.f32.mrf.mxu0  ;;  %8826 = vmatprep.subr.bf16.mxu1 %v10389_v19  ;;  %9240 = vmatprep.subr.bf16.mxu0 %v10392_v42  ;;  %v10401_v42 = vld [vmem:[%s14472_s3 + $0x310] sm:$0xff]  }
 0x19d   : > { %v11223_v52 = vsel %vm954_vm1, %v996_v9, %v998_v38 }
 0x19e   : > { %14629 = vst [vmem:[#allocation16_spill] sm:$0xff] %v11223_v52  ;;  %v725_v63 = vpop.f32.mrf.mxu0  ;;  %8827 = vmatpush3.bf16.msra.mxu1 %v10391_v29  ;;  %v10400_v29 = vld [vmem:[%s14472_s3 + $0x350] sm:$0xff]  }
 0x19f   : > { %v1000_v10 = vrot.slane %v725_v63, 4  ;;  %8828 = vmatprep.subr.bf16.mxu1 %v10393_v58  ;;  %v10402_v58 = vld [vmem:[%s14472_s3 + $0x348] sm:$0xff]  }
 0x1a0   : > { %v10073_v9 = vpop.f32.mrf.mxu0 }
 0x1a1   : > { %v11239_v25 = vsel %vm954_vm1, %v998_v38, %v1000_v10  ;;  %v10394_v38 = vld [vmem:[%s14472_s3 + $0x320] sm:$0xff]   ;;  %v10398_v9 = vld [vmem:[%s14472_s3 + $0x318] sm:$0xff]  }
 0x1a2   : > { %14630 = vst [vmem:[#allocation17_spill] sm:$0xff] %v11239_v25  ;;  %v11244_v30 = vpop.f32.mrf.mxu0  ;;  %10171 = vmatmul.mubr.bf16.gmra.mxu0 %v10371_v4  ;;  %v10395_v4 = vld [vmem:[%s14472_s3] sm:$0xff]  }
 0x1a3   : > { %14631 = vst [vmem:[#allocation18_spill] sm:$0xff] %v11244_v30  ;;  %v14483_v48 = vrot.slane %v11244_v30, 4  ;;  %9241 = vmatpush3.bf16.msra.mxu0 %v10394_v38  ;;  %8829 = vmatpush3.bf16.msra.mxu1 %v10395_v4  ;;  %v10403_v4 = vld [vmem:[%s14472_s3 + $0x308] sm:$0xff]  }
 0x1a4   : > { %v10076_v50 = vpop.f32.mrf.mxu0  ;;  %9242 = vmatprep.subr.bf16.mxu0 %v10396_v17 }
 0x1a5   : > { %v11259_v63 = vsel %vm954_vm1, %v1000_v10, %v14483_v48 }
 0x1a6   : > { %14632 = vst [vmem:[#allocation19_spill] sm:$0xff] %v11259_v63  ;;  %v11264_v7 = vpop.f32.mrf.mxu0 }
 0x1a7   : > { %9243 = vmatpush3.bf16.msra.mxu0 %v10398_v9 }
 0x1a8   : > { %v10077_v19 = vpop.f32.mrf.mxu0  ;;  %9244 = vmatprep.subr.bf16.mxu0 %v10400_v29  ;;  %v10406_v29 = vld [vmem:[%s14472_s3 + $0x340] sm:$0xff]  }
 0x1a9   : > { %v10397_v19 = vld [vmem:[%s14472_s3 + $0xf8] sm:$0xff]  }
 0x1aa   : > { %v11272_v10 = vpop.f32.mrf.mxu0  ;;  %8884 = vmatprep.subr.bf16.mxu1 %v10397_v19 }
 0x1ab   : > { %9245 = vmatpush3.bf16.msra.mxu0 %v10401_v42  ;;  %v10407_v42 = vld [vmem:[%s14472_s3 + $0x300] sm:$0xff]  }
 0x1ac   : > { %v10080_v38 = vpop.f32.mrf.mxu0  ;;  %9246 = vmatprep.subr.bf16.mxu0 %v10402_v58 }
 0x1ae   : > { %v11280_v50 = vpop.f32.mrf.mxu0 }
 0x1af   : > { %9247 = vmatpush3.bf16.msra.mxu0 %v10403_v4 }
 0x1b0   : > { %v10081_v17 = vpop.f32.mrf.mxu0  ;;  %9248 = vmatprep.subr.bf16.mxu0 %v10406_v29 }
 0x1b2   : > { %v11288_v9 = vpop.f32.mrf.mxu0 }
 0x1b3   : > { %9249 = vmatpush3.bf16.msra.mxu0 %v10407_v42 }
 0x1b4   : > { %v10084_v38 = vpop.f32.mrf.mxu0 }
 0x1b6   : > { %v11299_v58 = vpop.f32.mrf.mxu0 }
 0x1b8   : > { %v10085_v4 = vpop.f32.mrf.mxu0 }
 0x1ba   : > { %v11301_v17 = vpop.f32.mrf.mxu0 }
 0x1bc   : > { %v10088_v1 = vpop.f32.mrf.mxu0 }
 0x1be   : > { %v11303_v48 = vpop.f32.mrf.mxu0 }
 0x1c0   : > { %v10089_v40 = vpop.f32.mrf.mxu0 }
 0x1c2   : > { %v11305_v28 = vpop.f32.mrf.mxu0 }
 0x1c4   : > { %v10092_v63 = vpop.f32.mrf.mxu0 }
 0x1c6   : > { %v11307_v30 = vpop.f32.mrf.mxu0 }
 0x1c8   : > { %v10093_v26 = vpop.f32.mrf.mxu0 }
 0x1c9   : > { %v10418_v26 = vld [vmem:[%s14472_s3 + $0x478] sm:$0xff]  }
 0x1ca   : > { %v11309_v25 = vpop.f32.mrf.mxu0  ;;  %9374 = vmatprep.subr.bf16.mxu0 %v10418_v26 }
 0x1cc   : > { %v10096_v19 = vpop.f32.mrf.mxu0 }
 0x1ce   : > { %v11311_v29 = vpop.f32.mrf.mxu0 }
 0x1d0   : > { %v10097_v42 = vpop.f32.mrf.mxu0 }
 0x1d2   : > { %v11313_v38 = vpop.f32.mrf.mxu0 }
 0x1d4   : > { %v10100_v4 = vpop.f32.mrf.mxu0 }
 0x1d6   : > { %v11315_v23 = vpop.f32.mrf.mxu0 }
 0x1d8   : > { %v10101_v1 = vpop.f32.mrf.mxu0 }
 0x1da   : > { %v11317_v52 = vpop.f32.mrf.mxu0 }
 0x1dc   : > { %v10104_v40 = vpop.f32.mrf.mxu0 }
 0x1de   : > { %v11319_v21 = vpop.f32.mrf.mxu0 }
 0x1e0   : > { %v10105_v63 = vpop.f32.mrf.mxu0 }
 0x1e2   : > { %v11324_v19 = vpop.f32.mrf.mxu0 }
 0x1e4   : > { %v10108_v42 = vpop.f32.mrf.mxu0 }
 0x1e6   : > { %v11326_v24 = vpop.f32.mrf.mxu0 }
 0x1e7   : > { %14633 = vst [vmem:[#allocation20_spill] sm:$0xff] %v11326_v24 }
 0x1e8   : > { %v10109_v4 = vpop.f32.mrf.mxu0 }
 0x1ea   : > { %v11328_v18 = vpop.f32.mrf.mxu0 }
 0x1eb   : > { %14634 = vst [vmem:[#allocation21_spill] sm:$0xff] %v11328_v18 }
 0x1ec   : > { %v10112_v1 = vpop.f32.mrf.mxu0 }
 0x1ee   : > { %v11330_v55 = vpop.f32.mrf.mxu0 }
 0x1ef   : > { %14635 = vst [vmem:[#allocation22_spill] sm:$0xff] %v11330_v55 }
 0x1f0   : > { %v10113_v40 = vpop.f32.mrf.mxu0 }
 0x1f1   : > { %v955_v40 = vrot.slane %v11075_v31, 4 }
 0x1f2   : > { %v11332_v16 = vpop.f32.mrf.mxu0 }
 0x1f3   : > { %14636 = vst [vmem:[#allocation23_spill] sm:$0xff] %v11332_v16 }
 0x1f4   : > { %v10116_v35 = vpop.f32.mrf.mxu0 }
 0x1f5   : > { %v14641_v35 = vrot.slane %v11079_v33, 4  ;;  %v11355_v33 = vld [vmem:[%s14471_s2] ss:$0 sm:$0xff] }
 0x1f6   : > { %v11334_v13 = vpop.f32.mrf.mxu0 }
 0x1f7   : > { %14637 = vst [vmem:[#allocation24_spill] sm:$0xff] %v11334_v13  ;;  %v957_v13 = vsel %vm954_vm1, %v955_v40, %v14641_v35 }
 0x1f8   : > { %v10117_v15 = vpop.f32.mrf.mxu0 }
 0x1fa   : > { %v11336_v63 = vpop.f32.mrf.mxu0 }
 0x1fb   : > { %14638 = vst [vmem:[#allocation25_spill] sm:$0xff] %v11336_v63 }
 0x1fc   : > { %v10120_v26 = vpop.f32.mrf.mxu0 }
 0x1fe   : > { %v11338_v11 = vpop.f32.mrf.mxu0 }
 0x1ff   : > { %14639 = vst [vmem:[#allocation26_spill] sm:$0xff] %v11338_v11 }
 0x200   : > { %v10121_v42 = vpop.f32.mrf.mxu0 }
 0x201   : > { %v1029_v42 = vmax.f32 %v10991_v34, %v957_v13 }
 0x202   : > { %v11340_v24 = vpop.f32.mrf.mxu0 }
 0x203   : > { %14640 = vst [vmem:[#allocation27_spill] sm:$0xff] %v11340_v24 }
 0x204   : > { %v10124_v4 = vpop.f32.mrf.mxu0 }
 0x206   : > { %v11342_v18 = vpop.f32.mrf.mxu0 }
 0x207   : > { %v1079_v15 = vrot.slane %v11342_v18, 4 }
 0x208   : > { %v10125_v1 = vpop.f32.mrf.mxu0 }
 0x20a   : > { %v834_v55 = vpop.f32.mrf.mxu0 }
 0x20b   : > { %v1080_v63 = vrot.slane %v834_v55, 4  ;;  %v1030_v55 = vmax.f32 %v10995_v36, %v11088_v45 }
 0x20c   : > { %v10128_v26 = vpop.f32.mrf.mxu0 }
 0x20d   : > { %v1081_v11 = vsel %vm954_vm1, %v1079_v15, %v1080_v63 }
 0x20e   : > { %v1153_v4 = vmax.f32 %v11264_v7, %v1081_v11  ;;  %v837_v24 = vpop.f32.mrf.mxu0  ;;  %v1031_v7 = vmax.f32 %v10998_v39, %v11092_v53 }
 0x20f   : > { %v1082_v16 = vrot.slane %v837_v24, 4 }
 0x210   : > { %v1178_v1 = vmax.f32 %v1029_v42, %v1153_v4  ;;  %v10129_v62 = vpop.f32.mrf.mxu0 }
 0x211   : > { %v1083_v40 = vsel %vm954_vm1, %v1080_v63, %v1082_v16 }
 0x212   : > { %v1154_v35 = vmax.f32 %v11272_v10, %v1083_v40  ;;  %v842_v15 = vpop.f32.mrf.mxu0  ;;  %v1210_v11 = vadd.f32 %v11355_v33, %v1178_v1  ;;  %v1032_v1 = vmax.f32 %v11002_v41, %v11097_v60  ;;  %v1033_v41 = vmax.f32 %v11005_v44, %v11101_v5 }
 0x213   : > { %v1084_v34 = vrot.slane %v842_v15, 4  ;;  %v1034_v5 = vmax.f32 %v11009_v46, %v11106_v12  ;;  %v1037_v12 = vmax.f32 %v11019_v54, %v11119_v37 }
 0x214   : > { %v1179_v13 = vmax.f32 %v1030_v55, %v1154_v35  ;;  %v10132_v24 = vpop.f32.mrf.mxu0  ;;  %v1235_v36 = vmax.f32 %v1210_v11, 0.0 }
 0x215   : > { %v1085_v62 = vsel %vm954_vm1, %v1082_v16, %v1084_v34 }
 0x216   : > { %v1211_v26 = vadd.f32 %v11355_v33, %v1179_v13  ;;  %v1155_v63 = vmax.f32 %v11280_v50, %v1085_v62  ;;  %v845_v42 = vpop.f32.mrf.mxu0 }
 0x217   : > { %v1086_v4 = vrot.slane %v845_v42, 4 }
 0x218   : > { %v1236_v45 = vmax.f32 %v1211_v26, 0.0  ;;  %v1180_v10 = vmax.f32 %v1031_v7, %v1155_v63  ;;  %v10133_v40 = vpop.f32.mrf.mxu0 }
 0x219   : > { %v1087_v15 = vsel %vm954_vm1, %v1084_v34, %v1086_v4 }
 0x21a   : > { %v11370_v55 = vpack.c.bf16 %v1236_v45, %v1235_v36  ;;  %v1212_v16 = vadd.f32 %v11355_v33, %v1180_v10  ;;  %v1156_v39 = vmax.f32 %v11288_v9, %v1087_v15  ;;  %v850_v53 = vpop.f32.mrf.mxu0 }
 0x21b   : > { %v1088_v35 = vrot.slane %v850_v53, 4  ;;  %v1035_v53 = vmax.f32 %v11012_v49, %v11110_v20 }
 0x21c   : > { %v1237_v50 = vmax.f32 %v1212_v16, 0.0  ;;  %v1181_v13 = vmax.f32 %v1032_v1, %v1156_v39  ;;  %v10136_v24 = vpop.f32.mrf.mxu0  ;;  %v1288_v11 = vshrl.u32 %v11370_v55, 16  ;;  %v1290_v62 = vshll.u32 %v11370_v55, 16 }
 0x21d   : > { %v1089_v34 = vsel %vm954_vm1, %v1086_v4, %v1088_v35 }
 0x21e   : > { %v1213_v60 = vadd.f32 %v11355_v33, %v1181_v13  ;;  %v1157_v7 = vmax.f32 %v11299_v58, %v1089_v34  ;;  %v853_v26 = vpop.f32.mrf.mxu0  ;;  %v11381_v9 = vrot.slane %v1288_v11, 1  ;;  %v11383_v42 = vrot.slane %v1290_v62, 2 }
 0x21f   : > { %v1090_v63 = vrot.slane %v853_v26, 4  ;;  %v11385_v36 = vpack.c.bf16 %v1237_v50, %v1236_v45  ;;  %v1292_v1 = vrot.slane %v1290_v62, 1  ;;  %v10399_v26 = vld [vmem:[%s14472_s3 + $0xb8] sm:$0xff]  }
 0x220   : > { %v1238_v10 = vmax.f32 %v1213_v60, 0.0  ;;  %v1182_v40 = vmax.f32 %v1033_v41, %v1157_v7  ;;  %v10137_v15 = vpop.f32.mrf.mxu0  ;;  %v1406_v44 = vor.u32 %v11383_v42, %v11381_v9 }
 0x221   : > { %14642 = vst [vmem:[#allocation28_spill] sm:$0xff] %v11385_v36  ;;  %v1091_v4 = vsel %vm954_vm1, %v1088_v35, %v1090_v63  ;;  %v1036_v35 = vmax.f32 %v11016_v51, %v11115_v27 }
 0x222   : > { %v11392_v58 = vpack.c.bf16 %v1238_v10, %v1237_v50  ;;  %v1214_v16 = vadd.f32 %v11355_v33, %v1182_v40  ;;  %v1158_v39 = vmax.f32 %v11301_v17, %v1091_v4  ;;  %v858_v45 = vpop.f32.mrf.mxu0  ;;  %v1293_v50 = vor.u32 %v1292_v1, %v1288_v11 }
 0x223   : > { %v1092_v13 = vrot.slane %v858_v45, 4  ;;  %v1485_v4 = vrot.slane %v11385_v36, 3 }
 0x224   : > { %v1239_v24 = vmax.f32 %v1214_v16, 0.0  ;;  %v1183_v62 = vmax.f32 %v1034_v5, %v1158_v39  ;;  %v10140_v34 = vpop.f32.mrf.mxu0  ;;  %v1295_v41 = vshll.u32 %v11392_v58, 16  ;;  %v1299_v46 = vshrl.u32 %v11392_v58, 16 }
 0x225   : > { %v1093_v17 = vsel %vm954_vm1, %v1090_v63, %v1092_v13 }
 0x226   : > { %v11405_v60 = vpack.c.bf16 %v1239_v24, %v1238_v10  ;;  %v1215_v49 = vadd.f32 %v11355_v33, %v1183_v62  ;;  %v1159_v51 = vmax.f32 %v11303_v48, %v1093_v17  ;;  %v861_v20 = vpop.f32.mrf.mxu0  ;;  %v1297_v27 = vrot.slane %v1295_v41, 1  ;;  %v10404_v10 = vld [vmem:[%s14472_s3 + $0xf0] sm:$0xff]  }
 0x227   : > { %v1094_v7 = vrot.slane %v861_v20, 4  ;;  %v1407_v9 = vrot.slane %v1299_v46, 1  ;;  %v1408_v54 = vrot.slane %v1295_v41, 2  ;;  %v10405_v62 = vld [vmem:[%s14472_s3 + $0xb0] sm:$0xff]  }
 0x228   : > { %14643 = vst [vmem:[#allocation29_spill] sm:$0xff] %v11405_v60  ;;  %v1240_v37 = vmax.f32 %v1215_v49, 0.0  ;;  %v1184_v63 = vmax.f32 %v1035_v53, %v1159_v51  ;;  %v10141_v42 = vpop.f32.mrf.mxu0  ;;  %v1298_v11 = vsel %vm1286_vm2, %v1293_v50, %v1297_v27  ;;  %v14487_v40 = vshrl.u32 %v11405_v60, 16 }
 0x229   : > { %v1095_v48 = vsel %vm954_vm1, %v1092_v13, %v1094_v7  ;;  %4100 = vmatprep.mubr.bf16.mxu1 %v1298_v11  ;;  %v1486_v15 = vrot.slane %v11405_v60, 3  ;;  %v11425_v45 = vor.u32 %v1408_v54, %v1407_v9  ;;  %v1038_v53 = vmax.f32 %v11023_v56, %v11124_v47  ;;  %v10408_v47 = vld [vmem:[%s14472_s3 + $0xe8] sm:$0xff]  }
 0x22a   : > { %v11420_v1 = vpack.c.bf16 %v1240_v37, %v1239_v24  ;;  %v1216_v5 = vadd.f32 %v11355_v33, %v1184_v63  ;;  %v1160_v16 = vmax.f32 %v11305_v28, %v1095_v48  ;;  %v866_v39 = vpop.f32.mrf.mxu0  ;;  %4101 = vmatmul.mubr.bf16.vlgmr.msra.gmra.mxu1 %v11370_v55  ;;  %v14486_v24 = vshll.u32 %v11405_v60, 16 }
 0x22b   : > { %v1096_v13 = vrot.slane %v866_v39, 4  ;;  %8885 = vmatpush3.bf16.msra.mxu1 %v10399_v26  ;;  %v11436_v28 = vsel %vm1484_vm3, %v1485_v4, %v1486_v15  ;;  %v1301_v51 = vor.u32 %v1299_v46, %v1297_v27  ;;  %v1523_v20 = vrot.slane %v14487_v40, 3  ;;  %v10409_v27 = vld [vmem:[%s14472_s3 + $0xa8] sm:$0xff]  }
 0x22c   : > { %v1241_v34 = vmax.f32 %v1216_v5, 0.0  ;;  %v1185_v41 = vmax.f32 %v1036_v35, %v1160_v16  ;;  %v10144_v17 = vpop.f32.mrf.mxu0  ;;  %v1303_v50 = vshll.u32 %v11420_v1, 16  ;;  %8886 = vmatprep.subr.bf16.mxu1 %v10404_v10  ;;  %v1307_v56 = vshrl.u32 %v11420_v1, 16  ;;  %v10410_v5 = vld [vmem:[%s14472_s3 + $0xe0] sm:$0xff]  }
 0x22d   : > { %v1097_v49 = vsel %vm954_vm1, %v1094_v7, %v1096_v13  ;;  %v11448_v26 = vsel %vm1403_vm4, %v1406_v44, %v11425_v45  ;;  %v1526_v46 = vrot.slane %v14486_v24, 4  ;;  %v1039_v16 = vmax.f32 %v11026_v59, %v11128_v57 }
 0x22e   : > { %v11450_v35 = vpack.c.bf16 %v1241_v34, %v1240_v37  ;;  %v1217_v9 = vadd.f32 %v11355_v33, %v1185_v41  ;;  %v1161_v54 = vmax.f32 %v11307_v30, %v1097_v49  ;;  %v869_v63 = vpop.f32.mrf.mxu0  ;;  %v1305_v42 = vrot.slane %v1303_v50, 1 }
 0x22f   : > { %v1098_v11 = vrot.slane %v869_v63, 4  ;;  %8887 = vmatpush3.bf16.msra.mxu1 %v10405_v62  ;;  %v1411_v7 = vrot.slane %v1307_v56, 1  ;;  %v1412_v44 = vrot.slane %v1303_v50, 2 }
 0x230   : > { %14644 = vst [vmem:[#allocation30_spill] sm:$0xff] %v11450_v35  ;;  %v1242_v10 = vmax.f32 %v1217_v9, 0.0  ;;  %v1186_v37 = vmax.f32 %v1037_v12, %v1161_v54  ;;  %v10145_v48 = vpop.f32.mrf.mxu0  ;;  %v11460_v4 = vsel %vm1286_vm2, %v1301_v51, %v1305_v42  ;;  %v11463_v30 = vshrl.u32 %v11450_v35, 16  ;;  %8888 = vmatprep.subr.bf16.mxu1 %v10408_v47 }
 0x231   : > { %14645 = vst [vmem:[#allocation31_spill] sm:$0xff] %v11460_v4  ;;  %v1099_v39 = vsel %vm954_vm1, %v1096_v13, %v1098_v11  ;;  %4108 = vmatprep.mubr.bf16.mxu1 %v11460_v4  ;;  %v11473_v12 = vshll.u32 %v11450_v35, 16  ;;  %v1488_v13 = vrot.slane %v11450_v35, 3  ;;  %v11486_v49 = vor.u32 %v1412_v44, %v1411_v7  ;;  %v14666_v35 = vld [vmem:[#allocation20_spill] sm:$0xff] }
 0x232   : > { %14646 = vst [vmem:[#allocation32_spill] sm:$0xff] %v11463_v30  ;;  %v11475_v62 = vpack.c.bf16 %v1242_v10, %v1241_v34  ;;  %v1218_v41 = vadd.f32 %v11355_v33, %v1186_v37  ;;  %v1162_v17 = vmax.f32 %v11309_v25, %v1099_v39  ;;  %v874_v50 = vpop.f32.mrf.mxu0  ;;  %4109 = vmatmul.mubr.bf16.gmra.mxu1 %v11392_v58  ;;  %v1532_v47 = vrot.slane %v11463_v30, 3  ;;  %v10411_v34 = vld [vmem:[%s14472_s3 + $0xa0] sm:$0xff]   ;;  %v10412_v37 = vld [vmem:[%s14472_s3 + $0xd8] sm:$0xff]  }
 0x233   : > { %14647 = vst [vmem:[#allocation33_spill] sm:$0xff] %v11473_v12  ;;  %v1100_v59 = vrot.slane %v874_v50, 4  ;;  %v1535_v57 = vrot.slane %v11473_v12, 4  ;;  %8889 = vmatpush3.bf16.msra.mxu1 %v10409_v27  ;;  %v11488_v54 = vor.u32 %v1526_v46, %v1523_v20  ;;  %v1309_v39 = vor.u32 %v1307_v56, %v1305_v42  ;;  %v10413_v42 = vld [vmem:[%s14472_s3 + $0x98] sm:$0xff]  }
 0x234   : > { %v1243_v51 = vmax.f32 %v1218_v41, 0.0  ;;  %v1187_v9 = vmax.f32 %v1038_v53, %v1162_v17  ;;  %v10148_v25 = vpop.f32.mrf.mxu0  ;;  %v14489_v63 = vshll.u32 %v11475_v62, 16  ;;  %8890 = vmatprep.subr.bf16.mxu1 %v10410_v5  ;;  %v11500_v7 = vsel %vm1403_vm4, %v11425_v45, %v11486_v49 }
 0x235   : > { %14648 = vst [vmem:[#allocation34_spill] sm:$0xff] %v11488_v54  ;;  %v1101_v27 = vsel %vm954_vm1, %v1098_v11, %v1100_v59  ;;  %v11495_v48 = vor.u32 %v1535_v57, %v1532_v47  ;;  %v10419_v11 = vld [vmem:[%s14472_s3 + $0x438] sm:$0xff]   ;;  %v10414_v57 = vld [vmem:[%s14472_s3 + $0xd0] sm:$0xff]  }
 0x236   : > { %v11502_v53 = vpack.c.bf16 %v1243_v51, %v1242_v10  ;;  %v1219_v20 = vadd.f32 %v11355_v33, %v1187_v9  ;;  %v1163_v46 = vmax.f32 %v11311_v29, %v1101_v27  ;;  %v877_v44 = vpop.f32.mrf.mxu0  ;;  %v1313_v5 = vrot.slane %v14489_v63, 1  ;;  %v10420_v10 = vld [vmem:[%s14472_s3 + $0x470] sm:$0xff]  }
 0x237   : > { %v1102_v56 = vrot.slane %v877_v44, 4  ;;  %v11514_v45 = vsel %vm1511_vm5, %v11488_v54, %v11495_v48  ;;  %v11521_v29 = vsel %vm1484_vm3, %v1486_v15, %v1488_v13  ;;  %8891 = vmatpush3.bf16.msra.mxu1 %v10411_v34  ;;  %v1040_v34 = vmax.f32 %v11030_v61, %v11133_v2  ;;  %v10421_v2 = vld [vmem:[%s14472_s3 + $0x430] sm:$0xff]   ;;  %v10423_v44 = vld [vmem:[%s14472_s3 + $0x468] sm:$0xff]  }
 0x238   : > { %14649 = vst [vmem:[#allocation35_spill] sm:$0xff] %v11514_v45  ;;  %v1244_v41 = vmax.f32 %v1219_v20, 0.0  ;;  %v1188_v17 = vmax.f32 %v1039_v16, %v1163_v46  ;;  %4724 = vmatprep.mubr.bf16.mxu0 %v11514_v45  ;;  %v10149_v50 = vpop.f32.mrf.mxu0  ;;  %v11531_v47 = vsel %vm1286_vm2, %v1309_v39, %v1313_v5  ;;  %v11534_v15 = vshrl.u32 %v11502_v53, 16  ;;  %8892 = vmatprep.subr.bf16.mxu1 %v10412_v37  ;;  %v14697_v45 = vld [vmem:[#allocation8_spill] sm:$0xff] }
 0x239   : > { %14650 = vst [vmem:[#allocation36_spill] sm:$0xff] %v11531_v47  ;;  %v1103_v9 = vsel %vm954_vm1, %v1100_v59, %v1102_v56  ;;  %4725 = vmatmul.mubr.bf16.vlgmr.msra.gmra.mxu0 %v11521_v29  ;;  %4116 = vmatprep.mubr.bf16.mxu1 %v11531_v47  ;;  %v11545_v16 = vshll.u32 %v11502_v53, 16  ;;  %v14490_v46 = vshrl.u32 %v11475_v62, 16 }
 0x23a   : > { %14651 = vst [vmem:[#allocation37_spill] sm:$0xff] %v11534_v15  ;;  %v11547_v25 = vpack.c.bf16 %v1244_v41, %v1243_v51  ;;  %v1220_v37 = vadd.f32 %v11355_v33, %v1188_v17  ;;  %v1164_v27 = vmax.f32 %v11313_v38, %v1103_v9  ;;  %v882_v39 = vpop.f32.mrf.mxu0  ;;  %4117 = vmatmul.mubr.bf16.gmra.mxu1 %v11420_v1  ;;  %v1541_v61 = vrot.slane %v11534_v15, 3  ;;  %v10415_v38 = vld [vmem:[%s14472_s3 + $0x90] sm:$0xff]  }
 0x23b   : > { %14652 = vst [vmem:[#allocation38_spill] sm:$0xff] %v11545_v16  ;;  %9375 = vmatpush3.bf16.msra.mxu0 %v10419_v11  ;;  %v1104_v59 = vrot.slane %v882_v39, 4  ;;  %v1544_v20 = vrot.slane %v11545_v16, 4  ;;  %v14491_v51 = vrot.slane %v11502_v53, 3  ;;  %8893 = vmatpush3.bf16.msra.mxu1 %v10413_v42  ;;  %v10416_v39 = vld [vmem:[%s14472_s3 + $0xc8] sm:$0xff]   ;;  %v1041_v42 = vmax.f32 %v11033_v0, %v11137_v14 }
 0x23c   : > { %9376 = vmatprep.subr.bf16.mxu0 %v10420_v10  ;;  %v1245_v11 = vmax.f32 %v1220_v37, 0.0  ;;  %v1189_v17 = vmax.f32 %v1040_v34, %v1164_v27  ;;  %v10152_v50 = vpop.f32.mrf.mxu0  ;;  %v14488_v9 = vshll.u32 %v11547_v25, 16  ;;  %8894 = vmatprep.subr.bf16.mxu1 %v10414_v57  ;;  %v1317_v40 = vor.u32 %v14490_v46, %v1313_v5  ;;  %v10425_v0 = vld [vmem:[%s14472_s3 + $0x428] sm:$0xff]  }
 0x23d   : > { %v1105_v24 = vsel %vm954_vm1, %v1102_v56, %v1104_v59  ;;  %v11572_v10 = vor.u32 %v1544_v20, %v1541_v61  ;;  %v10426_v56 = vld [vmem:[%s14472_s3 + $0x460] sm:$0xff]  }
 0x23e   : > { %v11576_v37 = vpack.c.bf16 %v1245_v11, %v1244_v41  ;;  %v1221_v34 = vadd.f32 %v11355_v33, %v1189_v17  ;;  %v1165_v57 = vmax.f32 %v11315_v23, %v1105_v24  ;;  %v885_v27 = vpop.f32.mrf.mxu0  ;;  %v1321_v50 = vrot.slane %v14488_v9, 1  ;;  %v10417_v24 = vld [vmem:[%s14472_s3 + $0x88] sm:$0xff]   ;;  %v10422_v20 = vld [vmem:[%s14472_s3 + $0xc0] sm:$0xff]   ;;  %v10429_v9 = vld [vmem:[%s14472_s3 + $0x178] sm:$0xff]  }
 0x23f   : > { %9377 = vmatpush3.bf16.msra.mxu0 %v10421_v2  ;;  %v1106_v14 = vrot.slane %v885_v27, 4  ;;  %v11588_v5 = vsel %vm1511_vm5, %v11495_v48, %v11572_v10  ;;  %v11595_v23 = vsel %vm1484_vm3, %v1488_v13, %v14491_v51  ;;  %8895 = vmatpush3.bf16.msra.mxu1 %v10415_v38  ;;  %v1042_v38 = vmax.f32 %v11037_v3, %v11142_v22  ;;  %v10427_v22 = vld [vmem:[%s14472_s3 + $0x420] sm:$0xff]  }
 0x240   : > { %14653 = vst [vmem:[#allocation39_spill] sm:$0xff] %v11588_v5  ;;  %14654 = vst [vmem:[#allocation40_spill] sm:$0xff] %v11595_v23  ;;  %9378 = vmatprep.subr.bf16.mxu0 %v10423_v44  ;;  %v1246_v41 = vmax.f32 %v1221_v34, 0.0  ;;  %v1190_v48 = vmax.f32 %v1041_v42, %v1165_v57  ;;  %4732 = vmatprep.mubr.bf16.mxu0 %v11588_v5  ;;  %v10153_v61 = vpop.f32.mrf.mxu0  ;;  %v11605_v2 = vsel %vm1286_vm2, %v1317_v40, %v1321_v50 }
 0x241   : > { %14655 = vst [vmem:[#allocation41_spill] sm:$0xff] %v11605_v2  ;;  %v11608_v13 = vshrl.u32 %v11576_v37, 16  ;;  %8896 = vmatprep.subr.bf16.mxu1 %v10416_v39  ;;  %v1107_v44 = vsel %vm954_vm1, %v1104_v59, %v1106_v14  ;;  %4733 = vmatmul.mubr.bf16.gmra.mxu0 %v11595_v23  ;;  %v11619_v40 = vshll.u32 %v11576_v37, 16  ;;  %v14493_v27 = vshrl.u32 %v11547_v25, 16 }
 0x242   : > { %4124 = vmatprep.mubr.bf16.mxu1 %v11605_v2  ;;  %v11621_v17 = vpack.c.bf16 %v1246_v41, %v1245_v11  ;;  %v1222_v39 = vadd.f32 %v11355_v33, %v1190_v48  ;;  %v1166_v42 = vmax.f32 %v11317_v52, %v1107_v44  ;;  %v890_v34 = vpop.f32.mrf.mxu0  ;;  %v14494_v11 = vrot.slane %v11576_v37, 3  ;;  %v10424_v52 = vld [vmem:[%s14472_s3 + $0x80] sm:$0xff]  }
 0x243   : > { %14656 = vst [vmem:[#allocation42_spill] sm:$0xff] %v11608_v13  ;;  %14657 = vst [vmem:[#allocation43_spill] sm:$0xff] %v11619_v40  ;;  %4125 = vmatmul.mubr.bf16.gmra.mxu1 %v11475_v62  ;;  %v1550_v3 = vrot.slane %v11608_v13, 3  ;;  %9379 = vmatpush3.bf16.msra.mxu0 %v10425_v0  ;;  %v1108_v59 = vrot.slane %v890_v34, 4  ;;  %v1553_v57 = vrot.slane %v11619_v40, 4  ;;  %v10428_v0 = vld [vmem:[%s14472_s3 + $0x458] sm:$0xff]   ;;  %v1325_v46 = vor.u32 %v14493_v27, %v1321_v50 }
 0x244   : > { %8897 = vmatpush3.bf16.msra.mxu1 %v10417_v24  ;;  %9380 = vmatprep.subr.bf16.mxu0 %v10426_v56  ;;  %v1247_v48 = vmax.f32 %v1222_v39, 0.0  ;;  %v1191_v61 = vmax.f32 %v1042_v38, %v1166_v42  ;;  %v10156_v44 = vpop.f32.mrf.mxu0  ;;  %v14492_v34 = vshll.u32 %v11621_v17, 16  ;;  %v1043_v24 = vmax.f32 %v11040_v6, %v11146_v32  ;;  %v10430_v6 = vld [vmem:[%s14472_s3 + $0x418] sm:$0xff]  }
 0x245   : > { %8898 = vmatprep.subr.bf16.mxu1 %v10422_v20  ;;  %v1109_v63 = vsel %vm954_vm1, %v1106_v14, %v1108_v59  ;;  %v1554_v56 = vor.u32 %v1553_v57, %v1550_v3  ;;  %v14659_v50 = vrot.slane %v11502_v53, 3 }
 0x246   : > { %v11648_v51 = vpack.c.bf16 %v1247_v48, %v1246_v41  ;;  %v1223_v38 = vadd.f32 %v11355_v33, %v1191_v61  ;;  %v1167_v39 = vmax.f32 %v11319_v21, %v1109_v63  ;;  %v893_v20 = vpop.f32.mrf.mxu0  ;;  %v1329_v42 = vrot.slane %v14492_v34, 1  ;;  %v10432_v63 = vld [vmem:[%s14472_s3 + $0x450] sm:$0xff]  }
 0x247   : > { %9381 = vmatpush3.bf16.msra.mxu0 %v10427_v22  ;;  %v1110_v32 = vrot.slane %v893_v20, 4  ;;  %v11659_v14 = vsel %vm1511_vm5, %v11572_v10, %v1554_v56  ;;  %v11666_v21 = vsel %vm1484_vm3, %v14659_v50, %v14494_v11 }
 0x248   : > { %14658 = vst [vmem:[#allocation44_spill] sm:$0xff] %v11659_v14  ;;  %14660 = vst [vmem:[#allocation45_spill] sm:$0xff] %v11666_v21  ;;  %8899 = vmatpush3.bf16.msra.mxu1 %v10424_v52  ;;  %9382 = vmatprep.subr.bf16.mxu0 %v10428_v0  ;;  %v1248_v41 = vmax.f32 %v1223_v38, 0.0  ;;  %v1192_v3 = vmax.f32 %v1043_v24, %v1167_v39  ;;  %v10157_v22 = vpop.f32.mrf.mxu0  ;;  %v11673_v10 = vsel %vm1286_vm2, %v1325_v46, %v1329_v42 }
 0x249   : > { %4740 = vmatprep.mubr.bf16.mxu0 %v11659_v14  ;;  %14661 = vst [vmem:[#allocation46_spill] sm:$0xff] %v11673_v10  ;;  %v11676_v57 = vshrl.u32 %v11648_v51, 16  ;;  %8954 = vmatprep.subr.bf16.mxu1 %v10429_v9  ;;  %v1044_v52 = vmax.f32 %v11044_v8, %v11151_v43  ;;  %v1111_v0 = vsel %vm954_vm1, %v1108_v59, %v1110_v32  ;;  %v11684_v61 = vshll.u32 %v11648_v51, 16  ;;  %v10433_v43 = vld [vmem:[%s14472_s3 + $0x410] sm:$0xff]   ;;  %v14664_v22 = vld [vmem:[#allocation11_spill] sm:$0xff] }
 0x24a   : > { %4741 = vmatmul.mubr.bf16.gmra.mxu0 %v11666_v21  ;;  %4132 = vmatprep.mubr.bf16.mxu1 %v11673_v10  ;;  %v11686_v44 = vpack.c.bf16 %v1248_v41, %v1247_v48  ;;  %v1224_v46 = vadd.f32 %v11355_v33, %v1192_v3  ;;  %v1168_v24 = vmax.f32 %v11324_v19, %v1111_v0  ;;  %v898_v38 = vpop.f32.mrf.mxu0  ;;  %v14500_v39 = vshrl.u32 %v11621_v17, 16  ;;  %v10434_v19 = vld [vmem:[%s14472_s3 + $0x448] sm:$0xff]  }
 0x24b   : > { %14662 = vst [vmem:[#allocation47_spill] sm:$0xff] %v11676_v57  ;;  %14663 = vst [vmem:[#allocation48_spill] sm:$0xff] %v11684_v61  ;;  %4133 = vmatmul.mubr.bf16.gmra.mxu1 %v11547_v25  ;;  %v1559_v8 = vrot.slane %v11676_v57, 3  ;;  %9383 = vmatpush3.bf16.msra.mxu0 %v10430_v6  ;;  %v1112_v9 = vrot.slane %v898_v38, 4  ;;  %v1562_v59 = vrot.slane %v11684_v61, 4  ;;  %v14665_v0 = vld [vmem:[#allocation3_spill] sm:$0xff] }
 0x24c   : > { %9384 = vmatprep.subr.bf16.mxu0 %v10432_v63  ;;  %v1249_v20 = vmax.f32 %v1224_v46, 0.0  ;;  %v1193_v50 = vmax.f32 %v1044_v52, %v1168_v24  ;;  %v10160_v3 = vpop.f32.mrf.mxu0  ;;  %v14499_v6 = vshll.u32 %v11686_v44, 16  ;;  %v1045_v34 = vmax.f32 %v14665_v0, %v14664_v22  ;;  %v10435_v24 = vld [vmem:[%s14472_s3 + $0x408] sm:$0xff]  }
 0x24d   : > { %v1113_v38 = vsel %vm954_vm1, %v1110_v32, %v1112_v9  ;;  %v1563_v27 = vor.u32 %v1562_v59, %v1559_v8  ;;  %v1333_v11 = vor.u32 %v14500_v39, %v1329_v42  ;;  %v14667_v32 = vld [vmem:[#allocation12_spill] sm:$0xff]  ;;  %v10439_v39 = vld [vmem:[%s14472_s3 + $0x400] sm:$0xff]  }
 0x24e   : > { %v11707_v48 = vpack.c.bf16 %v1249_v20, %v1248_v41  ;;  %v1225_v63 = vadd.f32 %v11355_v33, %v1193_v50  ;;  %v1169_v60 = vmax.f32 %v14666_v35, %v1113_v38  ;;  %v901_v46 = vpop.f32.mrf.mxu0  ;;  %v1337_v52 = vrot.slane %v14499_v6, 1  ;;  %v14668_v8 = vld [vmem:[#allocation4_spill] sm:$0xff] }
 0x24f   : > { %9385 = vmatpush3.bf16.msra.mxu0 %v10433_v43  ;;  %v1046_v59 = vmax.f32 %v14668_v8, %v14667_v32  ;;  %v1114_v3 = vrot.slane %v901_v46, 4  ;;  %v11719_v42 = vsel %vm1511_vm5, %v1554_v56, %v1563_v27  ;;  %v14670_v41 = vrot.slane %v11648_v51, 3  ;;  %v10438_v43 = vld [vmem:[%s14472_s3 + $0x440] sm:$0xff]  }
 0x250   : > { %14669 = vst [vmem:[#allocation11_spill] sm:$0xff] %v11719_v42  ;;  %v14671_v35 = vrot.slane %v11576_v37, 3  ;;  %9386 = vmatprep.subr.bf16.mxu0 %v10434_v19  ;;  %v1250_v22 = vmax.f32 %v1225_v63, 0.0  ;;  %v1194_v0 = vmax.f32 %v1045_v34, %v1169_v60  ;;  %4748 = vmatprep.mubr.bf16.mxu0 %v11719_v42  ;;  %v10161_v38 = vpop.f32.mrf.mxu0  ;;  %v11733_v56 = vsel %vm1286_vm2, %v1333_v11, %v1337_v52 }
 0x251   : > { %14673 = vst [vmem:[#allocation20_spill] sm:$0xff] %v11733_v56  ;;  %v11736_v46 = vshrl.u32 %v11707_v48, 16  ;;  %v1115_v32 = vsel %vm954_vm1, %v1112_v9, %v1114_v3  ;;  %4140 = vmatprep.mubr.bf16.mxu1 %v11733_v56  ;;  %v11742_v19 = vshll.u32 %v11707_v48, 16  ;;  %v14676_v60 = vshrl.u32 %v11475_v62, 16 }
 0x252   : > { %v11726_v50 = vsel %vm1484_vm3, %v14671_v35, %v14670_v41  ;;  %v14677_v63 = vshll.u32 %v11475_v62, 16  ;;  %v11748_v11 = vpack.c.bf16 %v1250_v22, %v1249_v20  ;;  %v1226_v41 = vadd.f32 %v11355_v33, %v1194_v0  ;;  %v14678_v35 = vld [vmem:[#allocation21_spill] sm:$0xff]  ;;  %v906_v9 = vpop.f32.mrf.mxu0 }
 0x253   : > { %14672 = vst [vmem:[#allocation3_spill] sm:$0xff] %v11726_v50  ;;  %14674 = vst [vmem:[#allocation12_spill] sm:$0xff] %v11736_v46  ;;  %4749 = vmatmul.mubr.bf16.gmra.mxu0 %v11726_v50  ;;  %v1415_v34 = vrot.slane %v14676_v60, 1  ;;  %v1170_v38 = vmax.f32 %v14678_v35, %v1115_v32  ;;  %4141 = vmatmul.mubr.bf16.gmra.mxu1 %v11621_v17  ;;  %v1568_v6 = vrot.slane %v11736_v46, 3  ;;  %v1116_v60 = vrot.slane %v906_v9, 4  ;;  %v10450_v0 = vld [vmem:[%s14472_s3 + $0x578] sm:$0xff]  }
 0x254   : > { %14675 = vst [vmem:[#allocation4_spill] sm:$0xff] %v11742_v19  ;;  %v1416_v8 = vrot.slane %v14677_v63, 2  ;;  %9387 = vmatpush3.bf16.msra.mxu0 %v10435_v24  ;;  %v1571_v56 = vrot.slane %v11742_v19, 4  ;;  %v14510_v63 = vshrl.u32 %v11686_v44, 16  ;;  %v14679_v32 = vld [vmem:[#allocation13_spill] sm:$0xff]  ;;  %v11765_v24 = vmax.f32 %v1226_v41, 0.0  ;;  %v10164_v47 = vpop.f32.mrf.mxu0 }
 0x255   : > { %9388 = vmatprep.subr.bf16.mxu0 %v10438_v43  ;;  %v14680_v35 = vld [vmem:[#allocation5_spill] sm:$0xff]  ;;  %v1195_v2 = vmax.f32 %v1046_v59, %v1170_v38  ;;  %v14509_v9 = vshll.u32 %v11748_v11, 16  ;;  %v1117_v4 = vsel %vm954_vm1, %v1114_v3, %v1116_v60  ;;  %v14685_v3 = vrot.slane %v11648_v51, 3  ;;  %v14690_v38 = vld [vmem:[#allocation6_spill] sm:$0xff]  ;;  %v14699_v50 = vld [vmem:[#allocation24_spill] sm:$0xff] }
 0x256   : > { %v1047_v10 = vmax.f32 %v14680_v35, %v14679_v32  ;;  %v1572_v42 = vor.u32 %v1571_v56, %v1568_v6  ;;  %v1341_v20 = vor.u32 %v14510_v63, %v1337_v52  ;;  %v11771_v43 = vor.u32 %v1416_v8, %v1415_v34  ;;  %v14682_v32 = vld [vmem:[#allocation22_spill] sm:$0xff]  ;;  %v909_v35 = vpop.f32.mrf.mxu0 }
 0x257   : > { %v11774_v14 = vpack.c.bf16 %v11765_v24, %v1250_v22  ;;  %v1227_v5 = vadd.f32 %v11355_v33, %v1195_v2  ;;  %v1171_v41 = vmax.f32 %v14682_v32, %v1117_v4  ;;  %v1345_v47 = vrot.slane %v14509_v9, 1  ;;  %v14689_v8 = vld [vmem:[#allocation14_spill] sm:$0xff]  ;;  %v14694_v9 = vld [vmem:[#allocation7_spill] sm:$0xff] }
 0x258   : > { %9389 = vmatpush3.bf16.msra.mxu0 %v10439_v39  ;;  %v1118_v59 = vrot.slane %v909_v35, 4  ;;  %v11781_v6 = vsel %vm1511_vm5, %v1563_v27, %v1572_v42  ;;  %v14684_v52 = vrot.slane %v11707_v48, 3  ;;  %v11793_v4 = vsel %vm1403_vm4, %v11486_v49, %v11771_v43  ;;  %v10165_v39 = vpop.f32.mrf.mxu0 }
 0x259   : > { %14681 = vst [vmem:[#allocation21_spill] sm:$0xff] %v11774_v14  ;;  %14683 = vst [vmem:[#allocation13_spill] sm:$0xff] %v11781_v6  ;;  %9514 = vmatprep.subr.bf16.mxu0 %v10450_v0  ;;  %v1252_v2 = vmax.f32 %v1227_v5, 0.0  ;;  %v1196_v56 = vmax.f32 %v1047_v10, %v1171_v41  ;;  %4756 = vmatprep.mubr.bf16.mxu0 %v11781_v6  ;;  %v11797_v27 = vsel %vm1286_vm2, %v1341_v20, %v1345_v47  ;;  %v14692_v20 = vld [vmem:[#allocation23_spill] sm:$0xff] }
 0x25a   : > { %v11788_v22 = vsel %vm1484_vm3, %v14685_v3, %v14684_v52  ;;  %14687 = vst [vmem:[#allocation22_spill] sm:$0xff] %v11797_v27  ;;  %v11800_v34 = vshrl.u32 %v11774_v14, 16  ;;  %v1048_v32 = vmax.f32 %v14690_v38, %v14689_v8  ;;  %v1119_v35 = vsel %vm954_vm1, %v1116_v60, %v1118_v59  ;;  %4148 = vmatprep.mubr.bf16.mxu1 %v11797_v27  ;;  %v914_v41 = vpop.f32.mrf.mxu0  ;;  %v14693_v38 = vld [vmem:[#allocation15_spill] sm:$0xff] }
 0x25b   : > { %14686 = vst [vmem:[#allocation5_spill] sm:$0xff] %v11788_v22  ;;  %4757 = vmatmul.mubr.bf16.gmra.mxu0 %v11788_v22  ;;  %v11808_v49 = vshll.u32 %v11774_v14, 16  ;;  %v11811_v5 = vpack.c.bf16 %v1252_v2, %v11765_v24  ;;  %v1228_v10 = vadd.f32 %v11355_v33, %v1196_v56  ;;  %v1172_v0 = vmax.f32 %v14692_v20, %v1119_v35  ;;  %v14696_v20 = vld [vmem:[#allocation16_spill] sm:$0xff] }
 0x25c   : > { %14688 = vst [vmem:[#allocation49_spill] sm:$0xff] %v11800_v34  ;;  %4149 = vmatmul.mubr.bf16.gmra.mxu1 %v11686_v44  ;;  %v1577_v52 = vrot.slane %v11800_v34, 3  ;;  %v1120_v60 = vrot.slane %v914_v41, 4  ;;  %v14521_v8 = vshrl.u32 %v11748_v11, 16  ;;  %v1049_v63 = vmax.f32 %v14694_v9, %v14693_v38  ;;  %v10168_v6 = vpop.f32.mrf.mxu0  ;;  %v14701_v38 = vld [vmem:[#allocation9_spill] sm:$0xff] }
 0x25d   : > { %14691 = vst [vmem:[#allocation14_spill] sm:$0xff] %v11808_v49  ;;  %v1580_v3 = vrot.slane %v11808_v49, 4  ;;  %v11822_v27 = vmax.f32 %v1228_v10, 0.0  ;;  %v1197_v56 = vmax.f32 %v1048_v32, %v1172_v0  ;;  %v14519_v35 = vshll.u32 %v11811_v5, 16  ;;  %v14700_v0 = vld [vmem:[#allocation17_spill] sm:$0xff] }
 0x25e   : > { %v1050_v54 = vmax.f32 %v14697_v45, %v14696_v20  ;;  %v1121_v41 = vsel %vm954_vm1, %v1118_v59, %v1120_v60  ;;  %v1349_v39 = vor.u32 %v14521_v8, %v1345_v47  ;;  %v917_v10 = vpop.f32.mrf.mxu0  ;;  %v14520_v32 = vshrl.u32 %v11811_v5, 16 }
 0x25f   : > { %14695 = vst [vmem:[#allocation6_spill] sm:$0xff] %v11822_v27  ;;  %v1581_v36 = vor.u32 %v1580_v3, %v1577_v52  ;;  %v11831_v22 = vpack.c.bf16 %v11822_v27, %v1252_v2  ;;  %v1173_v9 = vmax.f32 %v14699_v50, %v1121_v41  ;;  %v1353_v6 = vrot.slane %v14519_v35, 1 }
 0x260   : > { %v1051_v45 = vmax.f32 %v14701_v38, %v14700_v0  ;;  %v1122_v20 = vrot.slane %v917_v10, 4  ;;  %v14703_v47 = vrot.slane %v11774_v14, 3  ;;  %v14704_v2 = vrot.slane %v11707_v48, 3  ;;  %v10169_v41 = vpop.f32.mrf.mxu0  ;;  %v14709_v10 = vld [vmem:[#allocation18_spill] sm:$0xff] }
 0x261   : > { %14698 = vst [vmem:[#allocation23_spill] sm:$0xff] %v11831_v22  ;;  %v11840_v59 = vsel %vm1511_vm5, %v1572_v42, %v1581_v36  ;;  %v11850_v50 = vadd.f32 %v11355_v33, %v1197_v56  ;;  %v1198_v3 = vmax.f32 %v1049_v63, %v1173_v9  ;;  %v11854_v0 = vsel %vm1286_vm2, %v1349_v39, %v1353_v6  ;;  %v14711_v56 = vld [vmem:[#allocation19_spill] sm:$0xff]  ;;  %v14712_v9 = vld [vmem:[#allocation10_spill] sm:$0xff]  ;;  %v14713_v41 = vld [vmem:[#allocation25_spill] sm:$0xff] }
 0x262   : > { %14702 = vst [vmem:[#allocation15_spill] sm:$0xff] %v11840_v59  ;;  %v11847_v52 = vsel %vm1484_vm3, %v14704_v2, %v14703_v47  ;;  %4764 = vmatprep.mubr.bf16.mxu0 %v11840_v59  ;;  %14707 = vst [vmem:[#allocation8_spill] sm:$0xff] %v11854_v0  ;;  %v11858_v42 = vor.u32 %v14520_v32, %v1353_v6  ;;  %v14710_v38 = vrot.slane %v14709_v10, 4  ;;  %4156 = vmatprep.mubr.bf16.mxu1 %v11854_v0 }
 0x263   : > { %14705 = vst [vmem:[#allocation7_spill] sm:$0xff] %v11847_v52  ;;  %14706 = vst [vmem:[#allocation16_spill] sm:$0xff] %v11850_v50  ;;  %v1123_v47 = vsel %vm954_vm1, %v1120_v60, %v1122_v20  ;;  %4765 = vmatmul.mubr.bf16.gmra.mxu0 %v11847_v52  ;;  %v11867_v63 = vshrl.u32 %v11831_v22, 16  ;;  %v11870_v39 = vshll.u32 %v11831_v22, 16  ;;  %v1052_v6 = vmax.f32 %v14712_v9, %v14711_v56 }
 0x264   : > { %14708 = vst [vmem:[#allocation24_spill] sm:$0xff] %v11858_v42  ;;  %v1053_v35 = vmax.f32 %v11075_v31, %v14710_v38  ;;  %v1230_v2 = vadd.f32 %v11355_v33, %v1198_v3  ;;  %v1174_v10 = vmax.f32 %v14713_v41, %v1123_v47  ;;  %v922_v31 = vpop.f32.mrf.mxu0  ;;  %4157 = vmatmul.mubr.bf16.gmra.mxu1 %v11748_v11  ;;  %v1732_v60 = vrot.slane %v11545_v16, 1 }
 0x265   : > { %v1124_v38 = vrot.slane %v922_v31, 4  ;;  %4164 = vmatprep.mubr.bf16.mxu1 %v11858_v42  ;;  %v1586_v32 = vrot.slane %v11867_v63, 3  ;;  %v1589_v8 = vrot.slane %v11870_v39, 4  ;;  %v14529_v56 = vmax.f32 %v11850_v50, 0.0 }
 0x266   : > { %v11883_v9 = vmax.f32 %v1230_v2, 0.0  ;;  %v1199_v3 = vmax.f32 %v1050_v54, %v1174_v10  ;;  %v10172_v47 = vpop.f32.mrf.mxu0  ;;  %v11886_v41 = vrot.slane %v11831_v22, 3  ;;  %v1730_v42 = vrot.slane %v11473_v12, 1  ;;  %v14716_v2 = vld [vmem:[#allocation26_spill] sm:$0xff] }
 0x267   : > { %v1125_v27 = vsel %vm954_vm1, %v1122_v20, %v1124_v38  ;;  %v11889_v31 = vor.u32 %v1589_v8, %v1586_v32  ;;  %v1735_v59 = vrot.slane %v11619_v40, 1  ;;  %v1734_v47 = vor.u32 %v1732_v60, %v11534_v15 }
 0x268   : > { %14714 = vst [vmem:[#allocation17_spill] sm:$0xff] %v11883_v9  ;;  %v11896_v0 = vpack.c.bf16 %v11883_v9, %v14529_v56  ;;  %v1175_v52 = vmax.f32 %v14716_v2, %v1125_v27  ;;  %v925_v54 = vpop.f32.mrf.mxu0  ;;  %v1231_v8 = vadd.f32 %v11355_v33, %v1199_v3  ;;  %v1268_v50 = vpack.c.bf16 %v11765_v24, %v11765_v24  ;;  %v14722_v9 = vld [vmem:[#allocation27_spill] sm:$0xff] }
 0x269   : > { %14715 = vst [vmem:[#allocation9_spill] sm:$0xff] %v11889_v31  ;;  %v1126_v32 = vrot.slane %v925_v54, 4  ;;  %v11904_v20 = vsel %vm1511_vm5, %v1581_v36, %v11889_v31  ;;  %v14718_v27 = vrot.slane %v11774_v14, 3  ;;  %v14724_v14 = vshll.u32 %v11547_v25, 16 }
 0x26a   : > { %14717 = vst [vmem:[#allocation18_spill] sm:$0xff] %v11904_v20  ;;  %v1200_v56 = vmax.f32 %v1051_v45, %v1175_v52  ;;  %4772 = vmatprep.mubr.bf16.mxu0 %v11904_v20  ;;  %v11916_v10 = vshrl.u32 %v11896_v0, 16  ;;  %v11919_v3 = vshll.u32 %v11896_v0, 16  ;;  %v10173_v36 = vpop.f32.mrf.mxu0  ;;  %v1731_v45 = vor.u32 %v1730_v42, %v11463_v30 }
 0x26b   : > { %v11913_v2 = vsel %vm1484_vm3, %v14718_v27, %v11886_v41  ;;  %v1127_v54 = vsel %vm954_vm1, %v1124_v38, %v1126_v32  ;;  %v1177_v24 = vmax.f32 %v11342_v18, %v1126_v32  ;;  %v1736_v52 = vsel %vm1286_vm2, %v1734_v47, %v1735_v59 }
 0x26c   : > { %14719 = vst [vmem:[#allocation19_spill] sm:$0xff] %v11913_v2  ;;  %14720 = vst [vmem:[#allocation10_spill] sm:$0xff] %v11916_v10  ;;  %4773 = vmatmul.mubr.bf16.gmra.mxu0 %v11913_v2  ;;  %v1232_v27 = vadd.f32 %v11355_v33, %v1200_v56  ;;  %v1176_v20 = vmax.f32 %v14722_v9, %v1127_v54  ;;  %4165 = vmatmul.mubr.bf16.gmra.mxu1 %v1268_v50  ;;  %v1697_v21 = vrot.slane %v11916_v10, 3 }
 0x26d   : > { %14721 = vst [vmem:[#allocation25_spill] sm:$0xff] %v11919_v3  ;;  %v1698_v23 = vrot.slane %v11919_v3, 4  ;;  %v1256_v36 = vmax.f32 %v1231_v8, 0.0  ;;  %v1202_v22 = vmax.f32 %v1053_v35, %v1177_v24  ;;  %4204 = vmatprep.mubr.bf16.mxu1 %v11448_v26  ;;  %v1693_v18 = vrot.slane %v11896_v0, 3 }
 0x26e   : > { %v1733_v38 = vsel %vm1286_vm2, %v1731_v45, %v1732_v60  ;;  %v1257_v42 = vmax.f32 %v1232_v27, 0.0  ;;  %v1201_v32 = vmax.f32 %v1052_v6, %v1176_v20  ;;  %v14723_v56 = vshrl.u32 %v11547_v25, 16 }
 0x26f   : > { %v1699_v47 = vor.u32 %v1698_v23, %v1697_v21  ;;  %v1234_v50 = vadd.f32 %v11355_v33, %v1202_v22  ;;  %v1900_v9 = vshrl.u32 %v1736_v52, 16  ;;  %v1903_v54 = vshll.u32 %v1736_v52, 16  ;;  %v10431_v21 = vld [vmem:[%s14472_s3 + $0x138] sm:$0xff]  }
 0x270   : > { %v1419_v2 = vrot.slane %v14723_v56, 1  ;;  %v1420_v8 = vrot.slane %v14724_v14, 2  ;;  %v11938_v35 = vpack.c.bf16 %v1257_v42, %v1256_v36  ;;  %v1233_v26 = vadd.f32 %v11355_v33, %v1201_v32  ;;  %v10436_v33 = vld [vmem:[%s14472_s3 + $0x170] sm:$0xff]  }
 0x271   : > { %v1700_v60 = vsel %vm1511_vm5, %v11889_v31, %v1699_v47  ;;  %v1738_v6 = vrot.slane %v11684_v61, 1  ;;  %v1259_v23 = vmax.f32 %v1234_v50, 0.0  ;;  %v1892_v22 = vshrl.u32 %v1733_v38, 16 }
 0x272   : > { %4780 = vmatprep.mubr.bf16.mxu0 %v1700_v60  ;;  %v1895_v20 = vshll.u32 %v1733_v38, 16  ;;  %v1421_v24 = vor.u32 %v1420_v8, %v1419_v2  ;;  %v11947_v45 = vmax.f32 %v1233_v26, 0.0  ;;  %v1694_v14 = vsel %vm1484_vm3, %v11886_v41, %v1693_v18 }
 0x273   : > { %v1737_v52 = vor.u32 %v1735_v59, %v11608_v13  ;;  %v14725_v27 = vrot.slane %v11392_v58, 1  ;;  %v14726_v36 = vrot.slane %v11370_v55, 1  ;;  %v1902_v38 = vrot.slane %v1900_v9, 1  ;;  %v10437_v9 = vld [vmem:[%s14472_s3 + $0x130] sm:$0xff]  }
 0x274   : > { %4781 = vmatmul.mubr.bf16.gmra.mxu0 %v1694_v14  ;;  %v1905_v2 = vrot.slane %v1903_v54, 2  ;;  %v11962_v32 = vsel %vm1403_vm4, %v11771_v43, %v1421_v24  ;;  %v11965_v56 = vpack.c.bf16 %v1259_v23, %v11947_v45  ;;  %v1894_v50 = vrot.slane %v1892_v22, 1  ;;  %v10440_v43 = vld [vmem:[%s14472_s3 + $0x168] sm:$0xff]  }
 0x275   : > { %v1379_v42 = vsel %vm1376_vm6, %v14726_v36, %v14725_v27  ;;  %4788 = vmatprep.mubr.bf16.mxu0 %v1699_v47  ;;  %v1739_v59 = vsel %vm1286_vm2, %v1737_v52, %v1738_v6  ;;  %v1897_v8 = vrot.slane %v1895_v20, 2  ;;  %v1380_v26 = vrot.slane %v11420_v1, 1  ;;  %v10441_v36 = vld [vmem:[%s14472_s3 + $0x128] sm:$0xff]  }
 0x276   : > { %4205 = vmatmul.mubr.bf16.vlgmr.msra.gmra.mxu1 %v1379_v42  ;;  %v14727_v47 = vshrl.u32 %v11621_v17, 16  ;;  %v1906_v60 = vor.u32 %v1905_v2, %v1902_v38  ;;  %v1994_v23 = vshrl.u32 %v1739_v59, 16  ;;  %v14728_v22 = vshll.u32 %v11621_v17, 16 }
 0x277   : > { %8955 = vmatpush3.bf16.msra.mxu1 %v10431_v21  ;;  %4212 = vmatprep.mubr.bf16.mxu1 %v11500_v7  ;;  %v1997_v21 = vshll.u32 %v1739_v59, 16  ;;  %v1741_v7 = vrot.slane %v11742_v19, 1  ;;  %v1898_v14 = vor.u32 %v1897_v8, %v1894_v50  ;;  %v14729_v52 = vmov %v14725_v27  ;;  %v10442_v59 = vld [vmem:[%s14472_s3 + $0x160] sm:$0xff]  }
 0x278   : > { %8956 = vmatprep.subr.bf16.mxu1 %v10436_v33  ;;  %v1423_v54 = vrot.slane %v14727_v47, 1  ;;  %v1424_v20 = vrot.slane %v14728_v22, 2  ;;  %v11984_v33 = vsel %vm1376_vm6, %v14729_v52, %v1380_v26  ;;  %v1764_v27 = vrot.slane %v11534_v15, 1 }
 0x279   : > { %14730 = vst [vmem:[#allocation26_spill] sm:$0xff] %v11984_v33  ;;  %v1765_v42 = vrot.slane %v11545_v16, 2  ;;  %v1740_v38 = vor.u32 %v1738_v6, %v11676_v57  ;;  %v14731_v50 = vshrl.u32 %v11686_v44, 16  ;;  %v1996_v47 = vrot.slane %v1994_v23, 1 }
 0x27a   : > { %v1425_v2 = vor.u32 %v1424_v20, %v1423_v54  ;;  %v1999_v22 = vrot.slane %v1997_v21, 2  ;;  %v14732_v52 = vshll.u32 %v11686_v44, 16  ;;  %v1761_v6 = vrot.slane %v11463_v30, 1 }
 0x27b   : > { %8957 = vmatpush3.bf16.msra.mxu1 %v10437_v9  ;;  %v1427_v8 = vrot.slane %v14731_v50, 1  ;;  %v1907_v9 = vsel %vm1403_vm4, %v1898_v14, %v1906_v60  ;;  %v1742_v54 = vsel %vm1286_vm2, %v1740_v38, %v1741_v7  ;;  %v1766_v23 = vor.u32 %v1765_v42, %v1764_v27  ;;  %v10444_v50 = vld [vmem:[%s14472_s3 + $0x158] sm:$0xff]  }
 0x27c   : > { %8958 = vmatprep.subr.bf16.mxu1 %v10440_v43  ;;  %4789 = vmatmul.mubr.bf16.gmra.mxu0 %v1693_v18  ;;  %v1428_v31 = vrot.slane %v14732_v52, 2  ;;  %v1762_v43 = vrot.slane %v11473_v12, 2  ;;  %v12005_v20 = vsel %vm1403_vm4, %v1421_v24, %v1425_v2  ;;  %v10443_v18 = vld [vmem:[%s14472_s3 + $0x120] sm:$0xff]   ;;  %v1382_v21 = vrot.slane %v11475_v62, 1 }
 0x27d   : > { %4932 = vmatprep.mubr.bf16.mxu0 %v1907_v9  ;;  %v2000_v38 = vor.u32 %v1999_v22, %v1996_v47  ;;  %v2048_v9 = vshrl.u32 %v1742_v54, 16  ;;  %v2051_v24 = vshll.u32 %v1742_v54, 16  ;;  %v1768_v12 = vrot.slane %v11608_v13, 1  ;;  %v10446_v22 = vld [vmem:[%s14472_s3 + $0x150] sm:$0xff]  }
 0x27e   : > { %4213 = vmatmul.mubr.bf16.gmra.mxu1 %v11984_v33  ;;  %v1429_v14 = vor.u32 %v1428_v31, %v1427_v8  ;;  %v1763_v52 = vor.u32 %v1762_v43, %v1761_v6  ;;  %v1769_v27 = vrot.slane %v11619_v40, 2  ;;  %v10445_v31 = vld [vmem:[%s14472_s3 + $0x118] sm:$0xff]   ;;  %v1743_v8 = vor.u32 %v1741_v7, %v11736_v46 }
 0x27f   : > { %4220 = vmatprep.mubr.bf16.mxu1 %v11793_v4  ;;  %8959 = vmatpush3.bf16.msra.mxu1 %v10441_v36  ;;  %v1744_v4 = vrot.slane %v11808_v49, 1  ;;  %v10451_v6 = vld [vmem:[%s14472_s3 + $0x538] sm:$0xff]   ;;  %v12041_v43 = vsel %vm1403_vm4, %v1906_v60, %v2000_v38  ;;  %v2053_v54 = vrot.slane %v2051_v24, 2  ;;  %v14736_v7 = vshll.u32 %v11748_v11, 16  ;;  %v10447_v24 = vld [vmem:[%s14472_s3 + $0x110] sm:$0xff]  }
 0x280   : > { %8960 = vmatprep.subr.bf16.mxu1 %v10442_v59  ;;  %v12017_v36 = vsel %vm1403_vm4, %v1425_v2, %v1429_v14  ;;  %v12025_v42 = vsel %vm1403_vm4, %v1763_v52, %v1766_v23  ;;  %v12028_v59 = vsel %vm1376_vm6, %v1380_v26, %v1382_v21  ;;  %v14735_v2 = vshrl.u32 %v11748_v11, 16 }
 0x281   : > { %14733 = vst [vmem:[#allocation27_spill] sm:$0xff] %v12025_v42  ;;  %14734 = vst [vmem:[#allocation50_spill] sm:$0xff] %v12028_v59  ;;  %v2050_v26 = vrot.slane %v2048_v9, 1  ;;  %v1745_v52 = vsel %vm1286_vm2, %v1743_v8, %v1744_v4  ;;  %v1770_v60 = vor.u32 %v1769_v27, %v1768_v12  ;;  %v14738_v30 = vshll.u32 %v11811_v5, 16  ;;  %v10448_v8 = vld [vmem:[%s14472_s3 + $0x148] sm:$0xff]   ;;  %v10453_v12 = vld [vmem:[%s14472_s3 + $0x530] sm:$0xff]  }
 0x282   : > { %v1431_v47 = vrot.slane %v14735_v2, 1  ;;  %v14737_v2 = vshrl.u32 %v11811_v5, 16  ;;  %v2102_v27 = vshrl.u32 %v1745_v52, 16  ;;  %v1450_v33 = vrot.slane %v11392_v58, 2 }
 0x283   : > { %8961 = vmatpush3.bf16.msra.mxu1 %v10443_v18  ;;  %v1432_v18 = vrot.slane %v14736_v7, 2  ;;  %v1384_v7 = vrot.slane %v11547_v25, 1 }
 0x284   : > { %8962 = vmatprep.subr.bf16.mxu1 %v10444_v50  ;;  %4933 = vmatmul.mubr.bf16.vlgmr.msra.gmra.mxu0 %v12025_v42  ;;  %v10452_v50 = vld [vmem:[%s14472_s3 + $0x570] sm:$0xff]   ;;  %v1435_v42 = vrot.slane %v14737_v2, 1 }
 0x285   : > { %4940 = vmatprep.mubr.bf16.mxu0 %v12041_v43  ;;  %v1433_v9 = vor.u32 %v1432_v18, %v1431_v47  ;;  %9515 = vmatpush3.bf16.msra.mxu0 %v10451_v6  ;;  %v12074_v18 = vsel %vm1403_vm4, %v1766_v23, %v1770_v60  ;;  %v10454_v23 = vld [vmem:[%s14472_s3 + $0x140] sm:$0xff]  }
 0x286   : > { %4221 = vmatmul.mubr.bf16.gmra.mxu1 %v12028_v59  ;;  %v1436_v59 = vrot.slane %v14738_v30, 2  ;;  %9516 = vmatprep.subr.bf16.mxu0 %v10452_v50  ;;  %v10455_v30 = vld [vmem:[%s14472_s3 + $0x568] sm:$0xff]   ;;  %14739 = vst [vmem:[#allocation51_spill] sm:$0xff] %v12074_v18  ;;  %v1773_v50 = vrot.slane %v11684_v61, 2 }
 0x287   : > { %4228 = vmatprep.mubr.bf16.mxu1 %v11962_v32  ;;  %8963 = vmatpush3.bf16.msra.mxu1 %v10445_v31  ;;  %v2054_v32 = vor.u32 %v2053_v54, %v2050_v26  ;;  %v2105_v31 = vshll.u32 %v1745_v52, 16  ;;  %v12067_v47 = vsel %vm1403_vm4, %v1429_v14, %v1433_v9  ;;  %v10449_v26 = vld [vmem:[%s14472_s3 + $0x108] sm:$0xff]   ;;  %v12082_v14 = vsel %vm1376_vm6, %v1382_v21, %v1384_v7 }
 0x288   : > { %8964 = vmatprep.subr.bf16.mxu1 %v10446_v22  ;;  %v1747_v22 = vrot.slane %v11870_v39, 1  ;;  %v12076_v6 = vor.u32 %v1436_v59, %v1435_v42  ;;  %14740 = vst [vmem:[#allocation52_spill] sm:$0xff] %v12082_v14  ;;  %v1772_v54 = vrot.slane %v11676_v57, 1  ;;  %v1746_v52 = vor.u32 %v1744_v4, %v11800_v34  ;;  %v10457_v42 = vld [vmem:[%s14472_s3 + $0x528] sm:$0xff]  }
 0x289   : > { %9517 = vmatpush3.bf16.msra.mxu0 %v10453_v12  ;;  %v12095_v21 = vsel %vm1403_vm4, %v2000_v38, %v2054_v32  ;;  %v2104_v59 = vrot.slane %v2102_v27, 1  ;;  %v2107_v2 = vrot.slane %v2105_v31, 2  ;;  %v10456_v38 = vld [vmem:[%s14472_s3 + $0x100] sm:$0xff]   ;;  %v10461_v27 = vld [vmem:[%s14472_s3 + $0x1f8] sm:$0xff]  }
 0x28a   : > { %v12099_v4 = vsel %vm1403_vm4, %v1433_v9, %v12076_v6  ;;  %9518 = vmatprep.subr.bf16.mxu0 %v10455_v30  ;;  %v1774_v9 = vor.u32 %v1773_v50, %v1772_v54  ;;  %v10459_v12 = vld [vmem:[%s14472_s3 + $0x520] sm:$0xff]   ;;  %v1386_v30 = vrot.slane %v11621_v17, 1  ;;  %v10460_v54 = vld [vmem:[%s14472_s3 + $0x558] sm:$0xff]   ;;  %v1750_v50 = vrot.slane %v11919_v3, 1 }
 0x28b   : > { %8965 = vmatpush3.bf16.msra.mxu1 %v10447_v24  ;;  %v10458_v24 = vld [vmem:[%s14472_s3 + $0x560] sm:$0xff]   ;;  %v2108_v31 = vor.u32 %v2107_v2, %v2104_v59  ;;  %v1749_v59 = vor.u32 %v1747_v22, %v11867_v63  ;;  %v10462_v2 = vld [vmem:[%s14472_s3 + $0x518] sm:$0xff]  }
 0x28c   : > { %8966 = vmatprep.subr.bf16.mxu1 %v10448_v8  ;;  %4941 = vmatmul.mubr.bf16.gmra.mxu0 %v12074_v18  ;;  %v1748_v8 = vsel %vm1286_vm2, %v1746_v52, %v1747_v22  ;;  %v12123_v52 = vsel %vm1403_vm4, %v1770_v60, %v1774_v9  ;;  %v12136_v60 = vsel %vm1376_vm6, %v1384_v7, %v1386_v30  ;;  %v10464_v22 = vld [vmem:[%s14472_s3 + $0x550] sm:$0xff]   ;;  %v10466_v18 = vld [vmem:[%s14472_s3 + $0x548] sm:$0xff]  }
 0x28d   : > { %4948 = vmatprep.mubr.bf16.mxu0 %v12095_v21  ;;  %9519 = vmatpush3.bf16.msra.mxu0 %v10457_v42  ;;  %14741 = vst [vmem:[#allocation53_spill] sm:$0xff] %v12123_v52  ;;  %v1777_v42 = vrot.slane %v11742_v19, 2  ;;  %14743 = vst [vmem:[#allocation55_spill] sm:$0xff] %v12136_v60 }
 0x28e   : > { %4229 = vmatmul.mubr.bf16.gmra.mxu1 %v12082_v14  ;;  %9520 = vmatprep.subr.bf16.mxu0 %v10458_v24  ;;  %v12133_v24 = vsel %vm1403_vm4, %v2054_v32, %v2108_v31  ;;  %v1751_v32 = vsel %vm1286_vm2, %v1749_v59, %v1750_v50 }
 0x28f   : > { %4236 = vmatprep.mubr.bf16.mxu1 %v12005_v20  ;;  %8967 = vmatpush3.bf16.msra.mxu1 %v10449_v26  ;;  %v2156_v20 = vshrl.u32 %v1748_v8, 16  ;;  %v2159_v26 = vshll.u32 %v1748_v8, 16  ;;  %14742 = vst [vmem:[#allocation54_spill] sm:$0xff] %v12133_v24 }
 0x290   : > { %8968 = vmatprep.subr.bf16.mxu1 %v10454_v23  ;;  %v1776_v23 = vrot.slane %v11736_v46, 1 }
 0x291   : > { %9521 = vmatpush3.bf16.msra.mxu0 %v10459_v12  ;;  %v2158_v8 = vrot.slane %v2156_v20, 1  ;;  %v12142_v12 = vshll.u32 %v11938_v35, 16 }
 0x292   : > { %9522 = vmatprep.subr.bf16.mxu0 %v10460_v54  ;;  %v1778_v7 = vor.u32 %v1777_v42, %v1776_v23  ;;  %v2210_v54 = vshrl.u32 %v1751_v32, 16  ;;  %v1780_v23 = vrot.slane %v11800_v34, 1  ;;  %v1781_v42 = vrot.slane %v11808_v49, 2 }
 0x293   : > { %8969 = vmatpush3.bf16.msra.mxu1 %v10456_v38  ;;  %v2161_v38 = vrot.slane %v2159_v26, 2  ;;  %14744 = vst [vmem:[#allocation56_spill] sm:$0xff] %v12142_v12  ;;  %v1388_v26 = vrot.slane %v11686_v44, 1  ;;  %v1756_v59 = vrot.slane %v12142_v12, 1 }
 0x294   : > { %9024 = vmatprep.subr.bf16.mxu1 %v10461_v27  ;;  %4949 = vmatmul.mubr.bf16.gmra.mxu0 %v12123_v52  ;;  %v10465_v27 = vld [vmem:[%s14472_s3 + $0x510] sm:$0xff]   ;;  %v2213_v52 = vshll.u32 %v1751_v32, 16 }
 0x295   : > { %4956 = vmatprep.mubr.bf16.mxu0 %v12133_v24  ;;  %9523 = vmatpush3.bf16.msra.mxu0 %v10462_v2  ;;  %v2162_v20 = vor.u32 %v2161_v38, %v2158_v8  ;;  %v1752_v2 = vor.u32 %v1750_v50, %v11916_v10  ;;  %v10467_v8 = vld [vmem:[%s14472_s3 + $0x508] sm:$0xff]   ;;  %v10470_v50 = vld [vmem:[%s14472_s3 + $0x540] sm:$0xff]  }
 0x296   : > { %4237 = vmatmul.mubr.bf16.gmra.mxu1 %v12136_v60  ;;  %9524 = vmatprep.subr.bf16.mxu0 %v10464_v22  ;;  %v12170_v22 = vsel %vm1376_vm6, %v1386_v30, %v1388_v26  ;;  %v2215_v32 = vrot.slane %v2213_v52, 2  ;;  %v12184_v60 = vshrl.u32 %v11938_v35, 16 }
 0x297   : > { %4244 = vmatprep.mubr.bf16.mxu1 %v12017_v36  ;;  %v12157_v36 = vsel %vm1403_vm4, %v1774_v9, %v1778_v7  ;;  %v12167_v38 = vsel %vm1403_vm4, %v2108_v31, %v2162_v20  ;;  %14747 = vst [vmem:[#allocation59_spill] sm:$0xff] %v12170_v22  ;;  %v2212_v9 = vrot.slane %v2210_v54, 1  ;;  %v1782_v31 = vor.u32 %v1781_v42, %v1780_v23 }
 0x298   : > { %14745 = vst [vmem:[#allocation57_spill] sm:$0xff] %v12157_v36  ;;  %14746 = vst [vmem:[#allocation58_spill] sm:$0xff] %v12167_v38  ;;  %v1784_v23 = vrot.slane %v11867_v63, 1  ;;  %v1785_v42 = vrot.slane %v11870_v39, 2 }
 0x299   : > { %9525 = vmatpush3.bf16.msra.mxu0 %v10465_v27  ;;  %v1757_v27 = vsel %vm1286_vm2, %v1752_v2, %v1756_v59  ;;  %v2216_v30 = vor.u32 %v2215_v32, %v2212_v9  ;;  %14748 = vst [vmem:[#allocation60_spill] sm:$0xff] %v12184_v60  ;;  %v12199_v32 = vor.u32 %v12184_v60, %v1756_v59 }
 0x29a   : > { %9526 = vmatprep.subr.bf16.mxu0 %v10466_v18  ;;  %v10471_v18 = vld [vmem:[%s14472_s3 + $0x500] sm:$0xff]   ;;  %v2264_v52 = vshrl.u32 %v1757_v27, 16  ;;  %v2267_v54 = vshll.u32 %v1757_v27, 16  ;;  %v12208_v27 = vrot.slane %v11811_v5, 1 }
 0x29b   : > { %v12196_v2 = vsel %vm1403_vm4, %v2162_v20, %v2216_v30  ;;  %v2327_v20 = vshrl.u32 %v12199_v32, 16 }
 0x29c   : > { %4957 = vmatmul.mubr.bf16.gmra.mxu0 %v12157_v36  ;;  %v1390_v36 = vrot.slane %v11748_v11, 1  ;;  %14751 = vst [vmem:[#allocation63_spill] sm:$0xff] %v12196_v2  ;;  %v2269_v9 = vrot.slane %v2267_v54, 2  ;;  %14753 = vst [vmem:[#allocation64_spill] sm:$0xff] %v12208_v27  ;;  %v1789_v54 = vrot.slane %v11919_v3, 2 }
 0x29d   : > { %4964 = vmatprep.mubr.bf16.mxu0 %v12167_v38  ;;  %9527 = vmatpush3.bf16.msra.mxu0 %v10467_v8  ;;  %v2266_v8 = vrot.slane %v2264_v52, 1  ;;  %v1788_v52 = vrot.slane %v11916_v10, 1  ;;  %v1809_v38 = vrot.slane %v11742_v19, 7 }
 0x29e   : > { %4245 = vmatmul.mubr.bf16.gmra.mxu1 %v12170_v22  ;;  %9528 = vmatprep.subr.bf16.mxu0 %v10470_v50  ;;  %v12187_v22 = vsel %vm1403_vm4, %v1778_v7, %v1782_v31  ;;  %v14752_v7 = vmov 0.0  }
 0x29f   : > { %4252 = vmatprep.mubr.bf16.mxu1 %v12067_v47  ;;  %14749 = vst [vmem:[#allocation61_spill] sm:$0xff] %v12187_v22  ;;  %v12190_v47 = vsel %vm1376_vm6, %v1388_v26, %v1390_v36  ;;  %v1786_v26 = vor.u32 %v1785_v42, %v1784_v23  ;;  %v12205_v50 = vor.u32 %v2269_v9, %v2266_v8  ;;  %v2329_v42 = vrot.slane %v2327_v20, 1 }
 0x2a0   : > { %14750 = vst [vmem:[#allocation62_spill] sm:$0xff] %v12190_v47  ;;  %v12224_v23 = vsel %vm1376_vm6, %v1390_v36, %v12208_v27  ;;  %v1840_v9 = vrot.slane %v11576_v37, 7  ;;  %v1839_v36 = vrot.slane %v11502_v53, 7  ;;  %v1800_v20 = vrot.slane %v11608_v13, 6 }
 0x2a1   : > { %9529 = vmatpush3.bf16.msra.mxu0 %v10471_v18  ;;  %v2330_v18 = vshll.u32 %v12199_v32, 16  ;;  %v12213_v59 = vsel %vm1403_vm4, %v1782_v31, %v1786_v26  ;;  %14756 = vst [vmem:[#allocation67_spill] sm:$0xff] %v12224_v23  ;;  %v1790_v31 = vor.u32 %v1789_v54, %v1788_v52  ;;  %v1797_v52 = vrot.slane %v11534_v15, 6 }
 0x2a2   : > { %10174 = vmatprep.subr.bf16.mxu0 %v14752_v7  ;;  %14754 = vst [vmem:[#allocation65_spill] sm:$0xff] %v12213_v59  ;;  %v1798_v54 = vrot.slane %v11545_v16, 7  ;;  %v1963_v13 = vshll.u32 %v1839_v36, 16  ;;  %v1449_v16 = vrot.slane %v11370_v55, 2 }
 0x2a3   : > { %v2332_v8 = vrot.slane %v2330_v18, 2  ;;  %v1801_v18 = vrot.slane %v11619_v40, 7 }
 0x2a4   : > { %4965 = vmatmul.mubr.bf16.gmra.mxu0 %v12187_v22  ;;  %v1793_v22 = vrot.slane %v12142_v12, 2  ;;  %v1965_v55 = vrot.slane %v1963_v13, 2  ;;  %v1451_v13 = vsel %vm1448_vm8, %v1449_v16, %v1450_v33  ;;  %v10469_v16 = vld [vmem:[%s14472_s3 + $0x1b0] sm:$0xff]  }
 0x2a5   : > { %4972 = vmatprep.mubr.bf16.mxu0 %v12196_v2  ;;  %v1802_v14 = vor.u32 %v1801_v18, %v1800_v20  ;;  %v10463_v20 = vld [vmem:[%s14472_s3 + $0x1b8] sm:$0xff]  }
 0x2a6   : > { %4253 = vmatmul.mubr.bf16.gmra.mxu1 %v12190_v47  ;;  %v12236_v47 = vsel %vm1403_vm4, %v1786_v26, %v1790_v31  ;;  %v1960_v26 = vshrl.u32 %v1839_v36, 16 }
 0x2a7   : > { %4260 = vmatprep.mubr.bf16.mxu1 %v12099_v4  ;;  %v12220_v4 = vsel %vm1403_vm4, %v2216_v30, %v12205_v50  ;;  %v1792_v30 = vrot.slane %v12184_v60, 1  ;;  %14757 = vst [vmem:[#allocation68_spill] sm:$0xff] %v12236_v47 }
 0x2a8   : > { %14755 = vst [vmem:[#allocation66_spill] sm:$0xff] %v12220_v4 }
 0x2a9   : > { %v12246_v40 = vor.u32 %v1793_v22, %v1792_v30  ;;  %v1804_v30 = vrot.slane %v11676_v57, 6 }
 0x2ab   : > { %14758 = vst [vmem:[#allocation69_spill] sm:$0xff] %v12246_v40  ;;  %v12255_v22 = vsel %vm1403_vm4, %v1790_v31, %v12246_v40 }
 0x2ac   : > { %4973 = vmatmul.mubr.bf16.gmra.mxu0 %v12213_v59  ;;  %v2333_v59 = vor.u32 %v2332_v8, %v2329_v42  ;;  %v1842_v8 = vrot.slane %v11648_v51, 7  ;;  %14759 = vst [vmem:[#allocation70_spill] sm:$0xff] %v12255_v22 }
 0x2ad   : > { %4980 = vmatprep.mubr.bf16.mxu0 %v12220_v4 }
 0x2ae   : > { %4261 = vmatmul.mubr.bf16.gmra.mxu1 %v12224_v23  ;;  %v2334_v42 = vsel %vm1403_vm4, %v12205_v50, %v2333_v59 }
 0x2af   : > { %4268 = vmatprep.mubr.bf16.mxu1 %v12076_v6  ;;  %v1841_v6 = vsel %vm1838_vm7, %v1839_v36, %v1840_v9  ;;  %v1805_v36 = vrot.slane %v11684_v61, 7  ;;  %v12268_v61 = vshll.u32 %v11965_v56, 16 }
 0x2b0   : > { %v1968_v23 = vshrl.u32 %v1841_v6, 16  ;;  %v1971_v15 = vshll.u32 %v1841_v6, 16 }
 0x2b1   : > { %14760 = vst [vmem:[#allocation71_spill] sm:$0xff] %v12268_v61  ;;  %v1806_v2 = vor.u32 %v1805_v36, %v1804_v30 }
 0x2b2   : > { %v1970_v18 = vrot.slane %v1968_v23, 1  ;;  %v1973_v6 = vrot.slane %v1971_v15, 2  ;;  %v14761_v15 = vrot.slane %v11420_v1, 2 }
 0x2b4   : > { %4981 = vmatmul.mubr.bf16.gmra.mxu0 %v12236_v47  ;;  %v1799_v47 = vor.u32 %v1798_v54, %v1797_v52  ;;  %v1453_v23 = vsel %vm1448_vm8, %v1450_v33, %v14761_v15 }
 0x2b5   : > { %4988 = vmatprep.mubr.bf16.mxu0 %v2334_v42  ;;  %v1844_v42 = vrot.slane %v11707_v48, 7 }
 0x2b6   : > { %4269 = vmatmul.mubr.bf16.gmra.mxu1 %v12208_v27  ;;  %v1843_v27 = vsel %vm1838_vm7, %v1840_v9, %v1842_v8  ;;  %v1803_v52 = vsel %vm1796_vm9, %v1799_v47, %v1802_v14  ;;  %v10468_v9 = vld [vmem:[%s14472_s3 + $0x1f0] sm:$0xff]   ;;  %v1943_v31 = vshrl.u32 %v1799_v47, 16  ;;  %v1946_v54 = vshll.u32 %v1799_v47, 16 }
 0x2b7   : > { %4308 = vmatprep.mubr.bf16.mxu1 %v11436_v28  ;;  %v1962_v28 = vrot.slane %v1960_v26, 1  ;;  %v2030_v26 = vshrl.u32 %v1843_v27, 16  ;;  %v2033_v57 = vshll.u32 %v1843_v27, 16  ;;  %v1951_v4 = vshrl.u32 %v1803_v52, 16  ;;  %v14763_v27 = vld [vmem:[#allocation23_spill] sm:$0xff] }
 0x2b8   : > { %v1808_v47 = vrot.slane %v11736_v46, 6  ;;  %v1954_v33 = vshll.u32 %v1803_v52, 16  ;;  %v1948_v30 = vrot.slane %v1946_v54, 2  ;;  %v14588_v52 = vrot.slane %v12268_v61, 1 }
 0x2b9   : > { %v1966_v24 = vor.u32 %v1965_v55, %v1962_v28  ;;  %v2032_v36 = vrot.slane %v2030_v26, 1  ;;  %v14762_v28 = vld [vmem:[#allocation21_spill] sm:$0xff]  ;;  %v2035_v15 = vrot.slane %v2033_v57, 2  ;;  %v10473_v26 = vld [vmem:[%s14472_s3 + $0x1a8] sm:$0xff]  }
 0x2ba   : > { %v1846_v55 = vrot.slane %v14762_v28, 7  ;;  %v1956_v54 = vrot.slane %v1954_v33, 2 }
 0x2bc   : > { %4989 = vmatmul.mubr.bf16.gmra.mxu0 %v12255_v22  ;;  %v12278_v22 = vor.u32 %v1973_v6, %v1970_v18  ;;  %v1812_v18 = vrot.slane %v11800_v34, 6  ;;  %v1813_v6 = vrot.slane %v11808_v49, 7  ;;  %v1889_v49 = vsel %vm1286_vm2, %v12199_v32, %v14588_v52  ;;  %v14764_v52 = vld [vmem:[#allocation40_spill] sm:$0xff] }
 0x2bd   : > { %4996 = vmatprep.mubr.bf16.mxu0 %v2333_v59  ;;  %v1945_v59 = vrot.slane %v1943_v31, 1  ;;  %v1810_v31 = vor.u32 %v1809_v38, %v1808_v47  ;;  %v10474_v38 = vld [vmem:[%s14472_s3 + $0x1e0] sm:$0xff]   ;;  %v2321_v47 = vshll.u32 %v1889_v49, 16  ;;  %v1847_v19 = vsel %vm1838_vm7, %v1844_v42, %v1846_v55 }
 0x2be   : > { %4309 = vmatmul.mubr.bf16.vlgmr.msra.gmra.mxu1 %v1451_v13  ;;  %v1953_v13 = vrot.slane %v1951_v4, 1  ;;  %v1975_v57 = vsel %vm1403_vm4, %v1966_v24, %v12278_v22  ;;  %v2318_v4 = vshrl.u32 %v1889_v49, 16  ;;  %v12308_v34 = vor.u32 %v1813_v6, %v1812_v18  ;;  %v10476_v6 = vld [vmem:[%s14472_s3 + $0x1d8] sm:$0xff]  }
 0x2bf   : > { %9025 = vmatpush3.bf16.msra.mxu1 %v10463_v20  ;;  %4316 = vmatprep.mubr.bf16.mxu1 %v11521_v29  ;;  %v10472_v20 = vld [vmem:[%s14472_s3 + $0x1e8] sm:$0xff]   ;;  %v1845_v29 = vsel %vm1838_vm7, %v1842_v8, %v1844_v42  ;;  %v1811_v24 = vsel %vm1796_vm9, %v1806_v2, %v1810_v31  ;;  %v2036_v49 = vor.u32 %v2035_v15, %v2032_v36  ;;  %v10475_v42 = vld [vmem:[%s14472_s3 + $0x1a0] sm:$0xff]   ;;  %v2141_v18 = vshll.u32 %v1847_v19, 16 }
 0x2c0   : > { %9026 = vmatprep.subr.bf16.mxu1 %v10468_v9  ;;  %v1807_v9 = vsel %vm1796_vm9, %v1802_v14, %v1806_v2  ;;  %v2084_v8 = vshrl.u32 %v1845_v29, 16  ;;  %v2087_v14 = vshll.u32 %v1845_v29, 16  ;;  %v2323_v29 = vrot.slane %v2321_v47, 2 }
 0x2c1   : > { %v2021_v33 = vshrl.u32 %v1807_v9, 16  ;;  %v2024_v32 = vshll.u32 %v1807_v9, 16  ;;  %v12312_v46 = vor.u32 %v1956_v54, %v1953_v13  ;;  %v2138_v2 = vshrl.u32 %v1847_v19, 16 }
 0x2c2   : > { %v2075_v13 = vshrl.u32 %v1811_v24, 16  ;;  %v2078_v15 = vshll.u32 %v1811_v24, 16  ;;  %v1815_v9 = vsel %vm1796_vm9, %v1810_v31, %v12308_v34  ;;  %v10477_v31 = vld [vmem:[%s14472_s3 + $0x198] sm:$0xff]  }
 0x2c3   : > { %9027 = vmatpush3.bf16.msra.mxu1 %v10469_v16  ;;  %v1949_v16 = vor.u32 %v1948_v30, %v1945_v59  ;;  %v14765_v59 = vrot.slane %v14763_v27, 7  ;;  %v2089_v30 = vrot.slane %v2087_v14, 2  ;;  %v2023_v36 = vrot.slane %v2021_v33, 1  ;;  %v10482_v24 = vld [vmem:[%s14472_s3 + $0x638] sm:$0xff]  }
 0x2c4   : > { %9028 = vmatprep.subr.bf16.mxu1 %v10472_v20  ;;  %4997 = vmatmul.mubr.bf16.gmra.mxu0 %v12246_v40  ;;  %v2320_v20 = vrot.slane %v2318_v4, 1  ;;  %v2086_v40 = vrot.slane %v2084_v8, 1  ;;  %v2026_v54 = vrot.slane %v2024_v32, 2  ;;  %v14767_v14 = vrot.slane %v11420_v1, 2 }
 0x2c5   : > { %5140 = vmatprep.mubr.bf16.mxu0 %v1975_v57  ;;  %v1958_v19 = vsel %vm1403_vm4, %v1949_v16, %v12312_v46  ;;  %v14766_v57 = vrot.slane %v11475_v62, 2  ;;  %v1456_v4 = vrot.slane %v11547_v25, 2  ;;  %v2140_v47 = vrot.slane %v2138_v2, 1  ;;  %v10478_v16 = vld [vmem:[%s14472_s3 + $0x1d0] sm:$0xff]  }
 0x2c6   : > { %4317 = vmatmul.mubr.bf16.gmra.mxu1 %v1453_v23  ;;  %v1849_v23 = vsel %vm1838_vm7, %v1846_v55, %v14765_v59  ;;  %v2143_v33 = vrot.slane %v2141_v18, 2  ;;  %v2132_v32 = vshll.u32 %v1815_v9, 16  ;;  %v2080_v59 = vrot.slane %v2078_v15, 2 }
 0x2c7   : > { %4324 = vmatprep.mubr.bf16.mxu1 %v14764_v52  ;;  %9029 = vmatpush3.bf16.msra.mxu1 %v10473_v26  ;;  %v12323_v52 = vor.u32 %v2323_v29, %v2320_v20  ;;  %v2192_v26 = vshrl.u32 %v1849_v23, 16  ;;  %v2195_v8 = vshll.u32 %v1849_v23, 16  ;;  %v2037_v20 = vsel %vm1403_vm4, %v12278_v22, %v2036_v49 }
 0x2c8   : > { %9030 = vmatprep.subr.bf16.mxu1 %v10474_v38  ;;  %v1455_v38 = vsel %vm1448_vm8, %v14767_v14, %v14766_v57  ;;  %v2090_v29 = vor.u32 %v2089_v30, %v2086_v40  ;;  %v2027_v23 = vor.u32 %v2026_v54, %v2023_v36  ;;  %v1458_v2 = vrot.slane %v11621_v17, 2  ;;  %v10480_v54 = vld [vmem:[%s14472_s3 + $0x1c8] sm:$0xff]  }
 0x2c9   : > { %v12330_v55 = vsel %vm1403_vm4, %v12205_v50, %v12323_v52  ;;  %v2129_v50 = vshrl.u32 %v1815_v9, 16  ;;  %v2194_v18 = vrot.slane %v2192_v26, 1  ;;  %v14768_v9 = vld [vmem:[#allocation45_spill] sm:$0xff]  ;;  %v14594_v57 = vrot.slane %v11686_v44, 2  ;;  %v10483_v26 = vld [vmem:[%s14472_s3 + $0x630] sm:$0xff]  }
 0x2ca   : > { %v1816_v40 = vrot.slane %v11867_v63, 6  ;;  %v1817_v22 = vrot.slane %v11870_v39, 7  ;;  %v14595_v30 = vrot.slane %v11896_v0, 7  ;;  %v2144_v36 = vor.u32 %v2143_v33, %v2140_v47 }
 0x2cb   : > { %9031 = vmatpush3.bf16.msra.mxu1 %v10475_v42  ;;  %v2077_v42 = vrot.slane %v2075_v13, 1  ;;  %v2131_v13 = vrot.slane %v2129_v50, 1  ;;  %v2134_v15 = vrot.slane %v2132_v32, 2  ;;  %v12376_v33 = vsel %vm1448_vm8, %v1456_v4, %v1458_v2 }
 0x2cc   : > { %9032 = vmatprep.subr.bf16.mxu1 %v10476_v6  ;;  %5141 = vmatmul.mubr.bf16.vlgmr.msra.gmra.mxu0 %v1958_v19  ;;  %v2197_v6 = vrot.slane %v2195_v8, 2  ;;  %v10479_v19 = vld [vmem:[%s14472_s3 + $0x190] sm:$0xff]   ;;  %v12368_v8 = vpack.c.bf16 %v11947_v45, %v11947_v45  ;;  %v2028_v32 = vsel %vm1403_vm4, %v12312_v46, %v2027_v23  ;;  %v12385_v45 = vsel %vm1448_vm8, %v1458_v2, %v14594_v57 }
 0x2cd   : > { %5148 = vmatprep.mubr.bf16.mxu0 %v2037_v20  ;;  %10175 = vmatpush3.bf16.msra.mxu0 %v10482_v24  ;;  %v2081_v14 = vor.u32 %v2080_v59, %v2077_v42  ;;  %v10481_v24 = vld [vmem:[%s14472_s3 + $0x188] sm:$0xff]   ;;  %v2145_v46 = vsel %vm1403_vm4, %v2090_v29, %v2144_v36  ;;  %v12398_v20 = vor.u32 %v2134_v15, %v2131_v13  ;;  %v10484_v42 = vld [vmem:[%s14472_s3 + $0x1c0] sm:$0xff]   ;;  %v14593_v2 = vrot.slane %v11502_v53, 1 }
 0x2ce   : > { %4325 = vmatmul.mubr.bf16.gmra.mxu1 %v1455_v38  ;;  %10176 = vmatprep.subr.bf16.mxu0 %v14752_v7  ;;  %v2091_v38 = vsel %vm1403_vm4, %v2036_v49, %v2090_v29  ;;  %v12378_v50 = vor.u32 %v2197_v6, %v2194_v18  ;;  %v14770_v49 = vrot.slane %v14763_v27, 7  ;;  %v10486_v59 = vld [vmem:[%s14472_s3 + $0x628] sm:$0xff]   ;;  %v1707_v18 = vrot.slane %v11576_v37, 1 }
 0x2cf   : > { %4332 = vmatprep.mubr.bf16.mxu1 %v14768_v9  ;;  %9033 = vmatpush3.bf16.msra.mxu1 %v10477_v31  ;;  %v14769_v31 = vrot.slane %v11475_v62, 2  ;;  %v2082_v6 = vsel %vm1403_vm4, %v2027_v23, %v2081_v14  ;;  %v1709_v9 = vrot.slane %v11648_v51, 1  ;;  %v1713_v23 = vrot.slane %v14762_v28, 1  ;;  %v14772_v15 = vld [vmem:[#allocation3_spill] sm:$0xff] }
 0x2d0   : > { %9034 = vmatprep.subr.bf16.mxu1 %v10478_v16  ;;  %v12387_v16 = vor.u32 %v1817_v22, %v1816_v40  ;;  %v12415_v40 = vsel %vm1403_vm4, %v2144_v36, %v12378_v50  ;;  %v12420_v13 = vsel %vm1376_vm6, %v14593_v2, %v1707_v18  ;;  %v10485_v36 = vld [vmem:[%s14472_s3 + $0x180] sm:$0xff]  }
 0x2d1   : > { %v1457_v47 = vsel %vm1448_vm8, %v14769_v31, %v1456_v4  ;;  %v1851_v4 = vsel %vm1838_vm7, %v14770_v49, %v14595_v30  ;;  %10177 = vmatpush3.bf16.msra.mxu0 %v10483_v26  ;;  %14771 = vst [vmem:[#allocation40_spill] sm:$0xff] %v12420_v13  ;;  %v1821_v26 = vrot.slane %v11919_v3, 7  ;;  %v10488_v49 = vld [vmem:[%s14472_s3 + $0x278] sm:$0xff]  }
 0x2d2   : > { %10178 = vmatprep.subr.bf16.mxu0 %v14752_v7  ;;  %v2246_v22 = vshrl.u32 %v1851_v4, 16 }
 0x2d3   : > { %9035 = vmatpush3.bf16.msra.mxu1 %v10479_v19  ;;  %v1711_v19 = vrot.slane %v11707_v48, 1 }
 0x2d4   : > { %9036 = vmatprep.subr.bf16.mxu1 %v10480_v54  ;;  %5149 = vmatmul.mubr.bf16.gmra.mxu0 %v2028_v32  ;;  %v12427_v54 = vsel %vm1796_vm9, %v12308_v34, %v12387_v16  ;;  %v2249_v32 = vshll.u32 %v1851_v4, 16  ;;  %v10487_v34 = vld [vmem:[%s14472_s3 + $0x620] sm:$0xff]   ;;  %v1920_v4 = vshll.u32 %v12420_v13, 16  ;;  %v12458_v2 = vrot.slane %v2246_v22, 1 }
 0x2d5   : > { %5156 = vmatprep.mubr.bf16.mxu0 %v2091_v38  ;;  %v12434_v38 = vsel %vm1376_vm6, %v1707_v18, %v1709_v9  ;;  %v12437_v31 = vsel %vm1376_vm6, %v1709_v9, %v1711_v19  ;;  %10179 = vmatpush3.bf16.msra.mxu0 %v10486_v59  ;;  %v2183_v9 = vshrl.u32 %v12427_v54, 16  ;;  %v12461_v57 = vsel %vm1376_vm6, %v1711_v19, %v1713_v23 }
 0x2d6   : > { %4333 = vmatmul.mubr.bf16.gmra.mxu1 %v1457_v47  ;;  %14773 = vst [vmem:[#allocation45_spill] sm:$0xff] %v12434_v38  ;;  %14774 = vst [vmem:[#allocation3_spill] sm:$0xff] %v12437_v31  ;;  %v12441_v47 = vsel %vm1403_vm4, %v2081_v14, %v12398_v20  ;;  %v2006_v18 = vshll.u32 %v12434_v38, 16  ;;  %10180 = vmatprep.subr.bf16.mxu0 %v14752_v7  ;;  %v1917_v14 = vshrl.u32 %v12420_v13, 16  ;;  %v2060_v59 = vshll.u32 %v12437_v31, 16 }
 0x2d7   : > { %4340 = vmatprep.mubr.bf16.mxu1 %v14772_v15  ;;  %9037 = vmatpush3.bf16.msra.mxu1 %v10481_v24  ;;  %v2003_v24 = vshrl.u32 %v12434_v38, 16  ;;  %v2186_v15 = vshll.u32 %v12427_v54, 16  ;;  %14775 = vst [vmem:[#allocation72_spill] sm:$0xff] %v12461_v57  ;;  %v2111_v3 = vshrl.u32 %v12461_v57, 16  ;;  %v2114_v54 = vshll.u32 %v12461_v57, 16 }
 0x2d8   : > { %9038 = vmatprep.subr.bf16.mxu1 %v10484_v42  ;;  %v2057_v42 = vshrl.u32 %v12437_v31, 16  ;;  %v2008_v29 = vrot.slane %v2006_v18, 2  ;;  %v10489_v31 = vld [vmem:[%s14472_s3 + $0x618] sm:$0xff]   ;;  %v2062_v13 = vrot.slane %v2060_v59, 2  ;;  %v1715_v22 = vrot.slane %v14763_v27, 1 }
 0x2d9   : > { %v2005_v30 = vrot.slane %v2003_v24, 1  ;;  %10181 = vmatpush3.bf16.msra.mxu0 %v10487_v34  ;;  %v1717_v19 = vrot.slane %v11896_v0, 1  ;;  %v1919_v24 = vrot.slane %v1917_v14, 1  ;;  %v1922_v18 = vrot.slane %v1920_v4, 2 }
 0x2da   : > { %v2059_v38 = vrot.slane %v2057_v42, 1  ;;  %10182 = vmatprep.subr.bf16.mxu0 %v14752_v7  ;;  %v12472_v34 = vrot.slane %v11938_v35, 1  ;;  %v2116_v42 = vrot.slane %v2114_v54, 2  ;;  %v12476_v59 = vsel %vm1376_vm6, %v1713_v23, %v1715_v22  ;;  %v10491_v23 = vld [vmem:[%s14472_s3 + $0x610] sm:$0xff]  }
 0x2db   : > { %9039 = vmatpush3.bf16.msra.mxu1 %v10485_v36  ;;  %v2251_v36 = vrot.slane %v2249_v32, 2  ;;  %14776 = vst [vmem:[#allocation73_spill] sm:$0xff] %v12476_v59  ;;  %v12479_v57 = vsel %vm1376_vm6, %v1715_v22, %v1717_v19  ;;  %v2165_v32 = vshrl.u32 %v12476_v59, 16  ;;  %v2168_v14 = vshll.u32 %v12476_v59, 16 }
 0x2dc   : > { %9094 = vmatprep.subr.bf16.mxu1 %v10488_v49  ;;  %5157 = vmatmul.mubr.bf16.gmra.mxu0 %v2082_v6  ;;  %v2113_v49 = vrot.slane %v2111_v3, 1  ;;  %14777 = vst [vmem:[#allocation74_spill] sm:$0xff] %v12479_v57  ;;  %v14778_v6 = vld [vmem:[#allocation5_spill] sm:$0xff]  ;;  %v2219_v4 = vshrl.u32 %v12479_v57, 16  ;;  %v2009_v54 = vor.u32 %v2008_v29, %v2005_v30  ;;  %v2063_v22 = vor.u32 %v2062_v13, %v2059_v38 }
 0x2dd   : > { %5164 = vmatprep.mubr.bf16.mxu0 %v2145_v46  ;;  %v2222_v46 = vshll.u32 %v12479_v57, 16  ;;  %10183 = vmatpush3.bf16.msra.mxu0 %v10489_v31  ;;  %v2167_v59 = vrot.slane %v2165_v32, 1  ;;  %v2170_v27 = vrot.slane %v2168_v14, 2  ;;  %v2185_v30 = vrot.slane %v2183_v9, 1 }
 0x2de   : > { %4341 = vmatmul.mubr.bf16.gmra.mxu1 %v12376_v33  ;;  %v14779_v33 = vrot.slane %v11916_v10, 6  ;;  %10184 = vmatprep.subr.bf16.mxu0 %v14752_v7  ;;  %v2221_v57 = vrot.slane %v2219_v4, 1  ;;  %v2188_v29 = vrot.slane %v2186_v15, 2  ;;  %v2117_v13 = vor.u32 %v2116_v42, %v2113_v49 }
 0x2df   : > { %4348 = vmatprep.mubr.bf16.mxu1 %v14778_v6  ;;  %v12495_v6 = vsel %vm1376_vm6, %v1717_v19, %v12472_v34  ;;  %v2224_v28 = vrot.slane %v2222_v46, 2  ;;  %v2171_v38 = vor.u32 %v2170_v27, %v2167_v59  ;;  %v10492_v19 = vld [vmem:[%s14472_s3 + $0x608] sm:$0xff]   ;;  %v1824_v27 = vrot.slane %v12184_v60, 6 }
 0x2e0   : > { %v12488_v3 = vor.u32 %v1821_v26, %v14779_v33  ;;  %v1852_v26 = vrot.slane %v11938_v35, 7  ;;  %v12499_v33 = vor.u32 %v1922_v18, %v1919_v24  ;;  %v2273_v31 = vshrl.u32 %v12495_v6, 16  ;;  %v14782_v18 = vld [vmem:[#allocation7_spill] sm:$0xff] }
 0x2e1   : > { %v2276_v10 = vshll.u32 %v12495_v6, 16  ;;  %10185 = vmatpush3.bf16.msra.mxu0 %v10491_v23  ;;  %v2225_v32 = vor.u32 %v2224_v28, %v2221_v57  ;;  %v1825_v15 = vrot.slane %v12142_v12, 7  ;;  %v12518_v28 = vsel %vm1403_vm4, %v2009_v54, %v2063_v22  ;;  %v10495_v23 = vld [vmem:[%s14472_s3 + $0x600] sm:$0xff]  }
 0x2e2   : > { %v2275_v14 = vrot.slane %v2273_v31, 1  ;;  %v12508_v35 = vsel %vm1403_vm4, %v12499_v33, %v2009_v54  ;;  %v1823_v9 = vsel %vm1796_vm9, %v12387_v16, %v12488_v3  ;;  %10186 = vmatprep.subr.bf16.mxu0 %v14752_v7  ;;  %v1832_v57 = vshll.u32 %v12368_v8, 16 }
 0x2e3   : > { %v2278_v4 = vrot.slane %v2276_v10, 2  ;;  %v1829_v10 = vshrl.u32 %v12368_v8, 16  ;;  %v2252_v49 = vor.u32 %v2251_v36, %v12458_v2  ;;  %v1462_v42 = vrot.slane %v11748_v11, 2 }
 0x2e4   : > { %5165 = vmatmul.mubr.bf16.gmra.mxu0 %v12441_v47  ;;  %v14780_v47 = vrot.slane %v11896_v0, 7  ;;  %v12533_v59 = vsel %vm1403_vm4, %v2063_v22, %v2117_v13  ;;  %v12536_v8 = vsel %vm1403_vm4, %v2117_v13, %v2171_v38  ;;  %v2240_v46 = vshll.u32 %v1823_v9, 16 }
 0x2e5   : > { %5172 = vmatprep.mubr.bf16.mxu0 %v12415_v40  ;;  %v12527_v24 = vor.u32 %v2278_v4, %v2275_v14  ;;  %v2189_v40 = vor.u32 %v2188_v29, %v2185_v30  ;;  %10187 = vmatpush3.bf16.msra.mxu0 %v10492_v19  ;;  %v12542_v54 = vsel %vm1403_vm4, %v2171_v38, %v2225_v32  ;;  %v1854_v30 = vrot.slane %v11965_v56, 7 }
 0x2e6   : > { %4349 = vmatmul.mubr.bf16.gmra.mxu1 %v12385_v45  ;;  %v1853_v16 = vsel %vm1838_vm7, %v14780_v47, %v1852_v26  ;;  %v2237_v45 = vshrl.u32 %v1823_v9, 16  ;;  %v1826_v31 = vor.u32 %v1825_v15, %v1824_v27  ;;  %10188 = vmatprep.subr.bf16.mxu0 %v14752_v7  ;;  %v1831_v29 = vrot.slane %v1829_v10, 6  ;;  %v14785_v47 = vld [vmem:[#allocation19_spill] sm:$0xff] }
 0x2e7   : > { %14781 = vst [vmem:[#allocation5_spill] sm:$0xff] %v12527_v24  ;;  %4356 = vmatprep.mubr.bf16.mxu1 %v14782_v18  ;;  %v2300_v2 = vshrl.u32 %v1853_v16, 16  ;;  %v2303_v36 = vshll.u32 %v1853_v16, 16  ;;  %v12547_v22 = vsel %vm1403_vm4, %v2225_v32, %v12527_v24  ;;  %v1834_v13 = vrot.slane %v1832_v57, 7 }
 0x2e8   : > { %14783 = vst [vmem:[#allocation7_spill] sm:$0xff] %v12547_v22  ;;  %v2190_v19 = vsel %vm1403_vm4, %v12398_v20, %v2189_v40  ;;  %v14784_v14 = vrot.slane %v11686_v44, 2  ;;  %v2239_v4 = vrot.slane %v2237_v45, 1  ;;  %v2242_v9 = vrot.slane %v2240_v46, 2 }
 0x2e9   : > { %10189 = vmatpush3.bf16.msra.mxu0 %v10495_v23  ;;  %v2253_v27 = vsel %vm1403_vm4, %v12378_v50, %v2252_v49  ;;  %v2302_v32 = vrot.slane %v2300_v2, 1  ;;  %v2305_v15 = vrot.slane %v2303_v36, 2  ;;  %v1827_v10 = vsel %vm1796_vm9, %v12488_v3, %v1826_v31 }
 0x2ea   : > { %v1463_v38 = vsel %vm1448_vm8, %v14784_v14, %v1462_v42  ;;  %v8830_v57 = vpop.f32.mrf.mxu1  ;;  %v1855_v20 = vsel %vm1838_vm7, %v1852_v26, %v1854_v30  ;;  %v1464_v16 = vrot.slane %v11811_v5, 2  ;;  %v2243_v45 = vor.u32 %v2242_v9, %v2239_v4 }
 0x2eb   : > { %v2291_v46 = vshrl.u32 %v1827_v10, 16  ;;  %v2294_v23 = vshll.u32 %v1827_v10, 16  ;;  %v2306_v2 = vor.u32 %v2305_v15, %v2302_v32  ;;  %v2363_v36 = vshrl.u32 %v1855_v20, 16 }
 0x2ec   : > { %5173 = vmatmul.mubr.bf16.gmra.mxu0 %v2190_v19  ;;  %v8831_v18 = vpop.f32.mrf.mxu1  ;;  %v1835_v19 = vor.u32 %v1834_v13, %v1831_v29  ;;  %v2366_v14 = vshll.u32 %v1855_v20, 16  ;;  %v2244_v26 = vsel %vm1403_vm4, %v2189_v40, %v2243_v45  ;;  %v14786_v20 = vld [vmem:[#allocation28_spill] sm:$0xff] }
 0x2ed   : > { %5180 = vmatprep.mubr.bf16.mxu0 %v2253_v27  ;;  %v12562_v50 = vadd.f32 %v8831_v18, %v8830_v57  ;;  %v1465_v27 = vsel %vm1448_vm8, %v1462_v42, %v1464_v16  ;;  %v2293_v30 = vrot.slane %v2291_v46, 1  ;;  %v2307_v29 = vsel %vm1403_vm4, %v2252_v49, %v2306_v2 }
 0x2ee   : > { %4357 = vmatmul.mubr.bf16.gmra.mxu1 %v1463_v38  ;;  %v8833_v3 = vpop.f32.mrf.mxu1  ;;  %v1836_v12 = vsel %vm1796_vm9, %v1826_v31, %v1835_v19  ;;  %v2365_v13 = vrot.slane %v2363_v36, 1  ;;  %v2368_v4 = vrot.slane %v2366_v14, 2  ;;  %v1513_v18 = vshrl.u32 %v14786_v20, 16 }
 0x2ef   : > { %4364 = vmatprep.mubr.bf16.mxu1 %v14785_v47  ;;  %v2296_v47 = vrot.slane %v2294_v23, 2  ;;  %v2354_v15 = vshrl.u32 %v1836_v12, 16  ;;  %v2357_v40 = vshll.u32 %v1836_v12, 16  ;;  %v1516_v46 = vshll.u32 %v14786_v20, 16 }
 0x2f0   : > { %v8834_v38 = vpop.f32.mrf.mxu1  ;;  %v2369_v57 = vor.u32 %v2368_v4, %v2365_v13  ;;  %v12576_v49 = vshrl.u32 %v11965_v56, 16 }
 0x2f1   : > { %v12567_v60 = vadd.f32 %v8834_v38, %v8833_v3  ;;  %v2297_v32 = vor.u32 %v2296_v47, %v2293_v30  ;;  %v2356_v36 = vrot.slane %v2354_v15, 1  ;;  %v1515_v30 = vrot.slane %v1513_v18, 3 }
 0x2f2   : > { %v8836_v9 = vpop.f32.mrf.mxu1  ;;  %14787 = vst [vmem:[#allocation19_spill] sm:$0xff] %v12576_v49  ;;  %v2370_v12 = vsel %vm1403_vm4, %v2306_v2, %v2369_v57 }
 0x2f3   : > { %v2298_v19 = vsel %vm1403_vm4, %v2243_v45, %v2297_v32  ;;  %v1518_v45 = vrot.slane %v1516_v46, 4 }
 0x2f4   : > { %5181 = vmatmul.mubr.bf16.gmra.mxu0 %v2244_v26  ;;  %v8837_v42 = vpop.f32.mrf.mxu1 }
 0x2f5   : > { %5188 = vmatprep.mubr.bf16.mxu0 %v2307_v29  ;;  %v12571_v10 = vadd.f32 %v8837_v42, %v8836_v9 }
 0x2f6   : > { %4365 = vmatmul.mubr.bf16.gmra.mxu1 %v1465_v27  ;;  %v8839_v31 = vpop.f32.mrf.mxu1  ;;  %v14788_v27 = vrot.slane %v12268_v61, 1 }
 0x2f7   : > { %4372 = vmatprep.mubr.bf16.mxu1 %v11886_v41  ;;  %v2359_v41 = vrot.slane %v2357_v40, 2 }
 0x2f8   : > { %v8840_v23 = vpop.f32.mrf.mxu1  ;;  %v1890_v38 = vor.u32 %v14788_v27, %v12576_v49  ;;  %v14809_v49 = vld [vmem:[#allocation58_spill] sm:$0xff] }
 0x2f9   : > { %v12579_v14 = vadd.f32 %v8840_v23, %v8839_v31  ;;  %v9250_v3 = vpop.f32.mrf.mxu0  ;;  %v2360_v13 = vor.u32 %v2359_v41, %v2356_v36  ;;  %v1519_v31 = vor.u32 %v1518_v45, %v1515_v30  ;;  %v10493_v23 = vld [vmem:[%s14472_s3 + $0x270] sm:$0xff]   ;;  %v14791_v41 = vld [vmem:[#allocation34_spill] sm:$0xff] }
 0x2fa   : > { %v8842_v26 = vpop.f32.mrf.mxu1  ;;  %v2385_v2 = vshrl.u32 %v1890_v38, 16  ;;  %v2388_v15 = vshll.u32 %v1890_v38, 16 }
 0x2fb   : > { %v9251_v56 = vpop.f32.mrf.mxu0  ;;  %v2361_v46 = vsel %vm1403_vm4, %v2297_v32, %v2360_v13  ;;  %v10494_v32 = vld [vmem:[%s14472_s3 + $0x230] sm:$0xff]  }
 0x2fc   : > { %5189 = vmatmul.mubr.bf16.gmra.mxu0 %v2298_v19  ;;  %v12586_v47 = vadd.f32 %v9251_v56, %v9250_v3  ;;  %v8843_v29 = vpop.f32.mrf.mxu1  ;;  %v2387_v20 = vrot.slane %v2385_v2, 1  ;;  %v1528_v3 = vsel %vm1511_vm5, %v1519_v31, %v14791_v41 }
 0x2fd   : > { %5196 = vmatprep.mubr.bf16.mxu0 %v2370_v12  ;;  %v12588_v4 = vadd.f32 %v8843_v29, %v8842_v26  ;;  %v9253_v9 = vpop.f32.mrf.mxu0  ;;  %v2390_v12 = vrot.slane %v2388_v15, 2  ;;  %v10497_v15 = vld [vmem:[%s14472_s3 + $0x228] sm:$0xff]  }
 0x2fe   : > { %4373 = vmatmul.mubr.bf16.gmra.mxu1 %v1464_v16  ;;  %14789 = vst [vmem:[#allocation28_spill] sm:$0xff] %v12586_v47  ;;  %v8845_v42 = vpop.f32.mrf.mxu1  ;;  %v10490_v16 = vld [vmem:[%s14472_s3 + $0x238] sm:$0xff]  }
 0x2ff   : > { %4412 = vmatprep.mubr.bf16.mxu1 %v11392_v58  ;;  %v9254_v40 = vpop.f32.mrf.mxu0  ;;  %v12607_v26 = vor.u32 %v2390_v12, %v2387_v20 }
 0x300   : > { %v12593_v58 = vadd.f32 %v9254_v40, %v9253_v9  ;;  %v8846_v18 = vpop.f32.mrf.mxu1 }
 0x301   : > { %v12599_v19 = vadd.f32 %v8846_v18, %v8845_v42  ;;  %v9256_v36 = vpop.f32.mrf.mxu0  ;;  %14792 = vst [vmem:[#allocation34_spill] sm:$0xff] %v12607_v26  ;;  %v12619_v9 = vsel %vm1403_vm4, %v12323_v52, %v12607_v26 }
 0x302   : > { %14790 = vst [vmem:[#allocation75_spill] sm:$0xff] %v12593_v58  ;;  %14794 = vst [vmem:[#allocation77_spill] sm:$0xff] %v12619_v9  ;;  %v14806_v9 = vld [vmem:[#allocation11_spill] sm:$0xff]  ;;  %v14855_v58 = vld [vmem:[#allocation24_spill] sm:$0xff] }
 0x303   : > { %v8848_v27 = vpop.f32.mrf.mxu1  ;;  %v9257_v38 = vpop.f32.mrf.mxu0 }
 0x304   : > { %5197 = vmatmul.mubr.bf16.gmra.mxu0 %v2361_v46  ;;  %v12609_v56 = vadd.f32 %v9257_v38, %v9256_v36  ;;  %v14796_v46 = vld [vmem:[#allocation35_spill] sm:$0xff]  ;;  %v10499_v36 = vld [vmem:[%s14472_s3 + $0x220] sm:$0xff]  }
 0x305   : > { %5204 = vmatprep.mubr.bf16.mxu0 %v2369_v57  ;;  %v8849_v30 = vpop.f32.mrf.mxu1  ;;  %v10496_v57 = vld [vmem:[%s14472_s3 + $0x268] sm:$0xff]   ;;  %v9259_v29 = vpop.f32.mrf.mxu0 }
 0x306   : > { %4413 = vmatmul.mubr.bf16.vlgmr.msra.gmra.mxu1 %v1528_v3  ;;  %14793 = vst [vmem:[#allocation76_spill] sm:$0xff] %v12609_v56  ;;  %v12614_v45 = vadd.f32 %v8849_v30, %v8848_v27  ;;  %v10501_v30 = vld [vmem:[%s14472_s3 + $0x218] sm:$0xff]  }
 0x307   : > { %9095 = vmatpush3.bf16.msra.mxu1 %v10490_v16  ;;  %4420 = vmatprep.mubr.bf16.mxu1 %v11420_v1  ;;  %v8851_v2 = vpop.f32.mrf.mxu1  ;;  %v9260_v42 = vpop.f32.mrf.mxu0  ;;  %v10498_v16 = vld [vmem:[%s14472_s3 + $0x260] sm:$0xff]  }
 0x308   : > { %9096 = vmatprep.subr.bf16.mxu1 %v10493_v23  ;;  %v12624_v40 = vadd.f32 %v9260_v42, %v9259_v29 }
 0x309   : > { %v8852_v31 = vpop.f32.mrf.mxu1 }
 0x30a   : > { %14795 = vst [vmem:[#allocation78_spill] sm:$0xff] %v12624_v40  ;;  %v12629_v20 = vadd.f32 %v8852_v31, %v8851_v2  ;;  %v9262_v18 = vpop.f32.mrf.mxu0  ;;  %v10502_v2 = vld [vmem:[%s14472_s3 + $0x250] sm:$0xff]  }
 0x30b   : > { %9097 = vmatpush3.bf16.msra.mxu1 %v10494_v32  ;;  %v8854_v52 = vpop.f32.mrf.mxu1 }
 0x30c   : > { %9098 = vmatprep.subr.bf16.mxu1 %v10496_v57  ;;  %5205 = vmatmul.mubr.bf16.gmra.mxu0 %v2360_v13  ;;  %v9263_v23 = vpop.f32.mrf.mxu0  ;;  %v10500_v13 = vld [vmem:[%s14472_s3 + $0x258] sm:$0xff]  }
 0x30d   : > { %10190 = vmatprep.mubr.msk.bf16.mxu0 %vm10809_vm0, %v14752_v7  ;;  %v12638_v41 = vadd.f32 %v9263_v23, %v9262_v18  ;;  %v8855_v3 = vpop.f32.mrf.mxu1 }
 0x30e   : > { %4421 = vmatmul.mubr.bf16.gmra.mxu1 %v14796_v46  ;;  %v12643_v12 = vadd.f32 %v8855_v3, %v8854_v52  ;;  %v9265_v27 = vpop.f32.mrf.mxu0  ;;  %v10503_v52 = vld [vmem:[%s14472_s3 + $0x210] sm:$0xff]  }
 0x30f   : > { %4428 = vmatprep.mubr.bf16.mxu1 %v11475_v62  ;;  %9099 = vmatpush3.bf16.msra.mxu1 %v10497_v15  ;;  %14797 = vst [vmem:[#allocation35_spill] sm:$0xff] %v12638_v41  ;;  %v8857_v38 = vpop.f32.mrf.mxu1 }
 0x310   : > { %9100 = vmatprep.subr.bf16.mxu1 %v10498_v16  ;;  %v9266_v32 = vpop.f32.mrf.mxu0  ;;  %v14799_v16 = vld [vmem:[#allocation39_spill] sm:$0xff] }
 0x311   : > { %v12648_v57 = vadd.f32 %v9266_v32, %v9265_v27  ;;  %v8858_v29 = vpop.f32.mrf.mxu1 }
 0x312   : > { %v12653_v42 = vadd.f32 %v8858_v29, %v8857_v38  ;;  %v10505_v38 = vld [vmem:[%s14472_s3 + $0x208] sm:$0xff]   ;;  %v10506_v29 = vld [vmem:[%s14472_s3 + $0x240] sm:$0xff]  }
 0x313   : > { %9101 = vmatpush3.bf16.msra.mxu1 %v10499_v36  ;;  %14798 = vst [vmem:[#allocation79_spill] sm:$0xff] %v12648_v57  ;;  %v9268_v15 = vpop.f32.mrf.mxu0  ;;  %v8860_v31 = vpop.f32.mrf.mxu1 }
 0x314   : > { %9102 = vmatprep.subr.bf16.mxu1 %v10500_v13  ;;  %10191 = vmatmul.mubr.bf16.vlgmr.msra.gmra.mxu0 %v12041_v43  ;;  %v10504_v43 = vld [vmem:[%s14472_s3 + $0x248] sm:$0xff]  }
 0x315   : > { %10194 = vmatprep.mubr.msk.bf16.mxu0 %vm10809_vm0, %v14752_v7  ;;  %v9269_v18 = vpop.f32.mrf.mxu0  ;;  %v8861_v23 = vpop.f32.mrf.mxu1 }
 0x316   : > { %4429 = vmatmul.mubr.bf16.gmra.mxu1 %v14799_v16  ;;  %v12663_v46 = vadd.f32 %v9269_v18, %v9268_v15  ;;  %v12668_v36 = vadd.f32 %v8861_v23, %v8860_v31  ;;  %v14802_v16 = vld [vmem:[#allocation44_spill] sm:$0xff] }
 0x317   : > { %4436 = vmatprep.mubr.bf16.mxu1 %v11547_v25  ;;  %9103 = vmatpush3.bf16.msra.mxu1 %v10501_v30  ;;  %v9271_v3 = vpop.f32.mrf.mxu0  ;;  %v8863_v13 = vpop.f32.mrf.mxu1 }
 0x318   : > { %14800 = vst [vmem:[#allocation39_spill] sm:$0xff] %v12663_v46  ;;  %9104 = vmatprep.subr.bf16.mxu1 %v10502_v2 }
 0x319   : > { %v9272_v27 = vpop.f32.mrf.mxu0  ;;  %v8864_v30 = vpop.f32.mrf.mxu1 }
 0x31a   : > { %v12673_v32 = vadd.f32 %v9272_v27, %v9271_v3  ;;  %v12678_v2 = vadd.f32 %v8864_v30, %v8863_v13 }
 0x31b   : > { %9105 = vmatpush3.bf16.msra.mxu1 %v10503_v52  ;;  %v9274_v15 = vpop.f32.mrf.mxu0  ;;  %v10507_v52 = vld [vmem:[%s14472_s3 + $0x200] sm:$0xff]  }
 0x31c   : > { %14801 = vst [vmem:[#allocation80_spill] sm:$0xff] %v12673_v32  ;;  %9106 = vmatprep.subr.bf16.mxu1 %v10504_v43  ;;  %10195 = vmatmul.mubr.bf16.gmra.mxu0 %v12095_v21  ;;  %v8866_v31 = vpop.f32.mrf.mxu1  ;;  %v10508_v21 = vld [vmem:[%s14472_s3 + $0x2f8] sm:$0xff]  }
 0x31d   : > { %10198 = vmatprep.mubr.msk.bf16.mxu0 %vm10809_vm0, %v14752_v7  ;;  %v9275_v18 = vpop.f32.mrf.mxu0 }
 0x31e   : > { %4437 = vmatmul.mubr.bf16.gmra.mxu1 %v14802_v16  ;;  %v12688_v23 = vadd.f32 %v9275_v18, %v9274_v15  ;;  %v8867_v43 = vpop.f32.mrf.mxu1  ;;  %v14805_v18 = vld [vmem:[#allocation54_spill] sm:$0xff] }
 0x31f   : > { %4444 = vmatprep.mubr.bf16.mxu1 %v11621_v17  ;;  %9107 = vmatpush3.bf16.msra.mxu1 %v10505_v38  ;;  %v12693_v3 = vadd.f32 %v8867_v43, %v8866_v31  ;;  %v9277_v13 = vpop.f32.mrf.mxu0 }
 0x320   : > { %14803 = vst [vmem:[#allocation44_spill] sm:$0xff] %v12688_v23  ;;  %9108 = vmatprep.subr.bf16.mxu1 %v10506_v29  ;;  %v8869_v27 = vpop.f32.mrf.mxu1  ;;  %v14810_v23 = vld [vmem:[#allocation13_spill] sm:$0xff] }
 0x321   : > { %v9278_v30 = vpop.f32.mrf.mxu0 }
 0x322   : > { %v12695_v16 = vadd.f32 %v9278_v30, %v9277_v13  ;;  %v8870_v38 = vpop.f32.mrf.mxu1 }
 0x323   : > { %9109 = vmatpush3.bf16.msra.mxu1 %v10507_v52  ;;  %v12697_v26 = vadd.f32 %v8870_v38, %v8869_v27  ;;  %v9280_v15 = vpop.f32.mrf.mxu0 }
 0x324   : > { %14804 = vst [vmem:[#allocation81_spill] sm:$0xff] %v12695_v16  ;;  %9164 = vmatprep.subr.bf16.mxu1 %v10508_v21  ;;  %10199 = vmatmul.mubr.bf16.gmra.mxu0 %v14805_v18  ;;  %v8872_v29 = vpop.f32.mrf.mxu1 }
 0x325   : > { %10202 = vmatprep.mubr.msk.bf16.mxu0 %vm10809_vm0, %v14752_v7  ;;  %v9281_v31 = vpop.f32.mrf.mxu0 }
 0x326   : > { %4445 = vmatmul.mubr.bf16.gmra.mxu1 %v14806_v9  ;;  %v12704_v43 = vadd.f32 %v9281_v31, %v9280_v15  ;;  %v8873_v52 = vpop.f32.mrf.mxu1 }
 0x327   : > { %4452 = vmatprep.mubr.bf16.mxu1 %v11686_v44  ;;  %v12706_v13 = vadd.f32 %v8873_v52, %v8872_v29  ;;  %v9283_v21 = vpop.f32.mrf.mxu0 }
 0x328   : > { %14807 = vst [vmem:[#allocation54_spill] sm:$0xff] %v12704_v43  ;;  %v8875_v27 = vpop.f32.mrf.mxu1  ;;  %v14813_v43 = vld [vmem:[#allocation63_spill] sm:$0xff] }
 0x329   : > { %v9284_v30 = vpop.f32.mrf.mxu0 }
 0x32a   : > { %v12708_v38 = vadd.f32 %v9284_v30, %v9283_v21  ;;  %v8876_v18 = vpop.f32.mrf.mxu1 }
 0x32b   : > { %v12710_v61 = vadd.f32 %v8876_v18, %v8875_v27 }
 0x32c   : > { %14808 = vst [vmem:[#allocation11_spill] sm:$0xff] %v12708_v38  ;;  %v9286_v9 = vpop.f32.mrf.mxu0  ;;  %10203 = vmatmul.mubr.bf16.gmra.mxu0 %v14809_v49  ;;  %v8878_v16 = vpop.f32.mrf.mxu1 }
 0x32d   : > { %10206 = vmatprep.mubr.msk.bf16.mxu0 %vm10809_vm0, %v14752_v7 }
 0x32e   : > { %4453 = vmatmul.mubr.bf16.gmra.mxu1 %v14810_v23  ;;  %v9287_v15 = vpop.f32.mrf.mxu0  ;;  %v8879_v31 = vpop.f32.mrf.mxu1  ;;  %v12727_v23 = vld [vmem:[%s14473_s4] ss:$0 sm:$0xff] }
 0x32f   : > { %4460 = vmatprep.mubr.bf16.mxu1 %v11748_v11  ;;  %v12717_v29 = vadd.f32 %v9287_v15, %v9286_v9  ;;  %v12719_v52 = vadd.f32 %v8879_v31, %v8878_v16  ;;  %v14814_v9 = vld [vmem:[#allocation15_spill] sm:$0xff]  ;;  %v4106_v46 = vadd.f32 %v12567_v60, %v12727_v23  ;;  %v4114_v40 = vadd.f32 %v12579_v14, %v12727_v23 }
 0x330   : > { %v9289_v21 = vpop.f32.mrf.mxu0  ;;  %v8881_v27 = vpop.f32.mrf.mxu1 }
 0x331   : > { %14811 = vst [vmem:[#allocation58_spill] sm:$0xff] %v12717_v29 }
 0x332   : > { %v9290_v30 = vpop.f32.mrf.mxu0  ;;  %v8882_v49 = vpop.f32.mrf.mxu1 }
 0x333   : > { %v12721_v18 = vadd.f32 %v9290_v30, %v9289_v21 }
 0x334   : > { %v9292_v38 = vpop.f32.mrf.mxu0  ;;  %10207 = vmatmul.mubr.bf16.gmra.mxu0 %v14813_v43  ;;  %v4103_v43 = vadd.f32 %v12562_v50, %v12727_v23 }
 0x335   : > { %14812 = vst [vmem:[#allocation13_spill] sm:$0xff] %v12721_v18  ;;  %10210 = vmatprep.mubr.msk.bf16.mxu0 %vm10809_vm0, %v14752_v7 }
 0x336   : > { %v8900_v32 = vpop.f32.mrf.mxu1  ;;  %4461 = vmatmul.mubr.bf16.gmra.mxu1 %v14814_v9  ;;  %v9293_v16 = vpop.f32.mrf.mxu0 }
 0x337   : > { %4468 = vmatprep.mubr.bf16.mxu1 %v11811_v5  ;;  %v12733_v15 = vadd.f32 %v9293_v16, %v9292_v38  ;;  %v14817_v38 = vld [vmem:[#allocation66_spill] sm:$0xff] }
 0x338   : > { %v8901_v31 = vpop.f32.mrf.mxu1  ;;  %v9295_v27 = vpop.f32.mrf.mxu0  ;;  %v14818_v16 = vld [vmem:[#allocation6_spill] sm:$0xff] }
 0x339   : > { %14815 = vst [vmem:[#allocation63_spill] sm:$0xff] %v12733_v15  ;;  %v8902_v21 = vadd.f32 %v8901_v31, %v8900_v32  ;;  %v1279_v15 = vpack.c.bf16 %v14818_v16, %v14818_v16  ;;  %v14819_v32 = vld [vmem:[#allocation18_spill] sm:$0xff] }
 0x33a   : > { %v8903_v30 = vpop.f32.mrf.mxu1  ;;  %v9296_v18 = vpop.f32.mrf.mxu0 }
 0x33b   : > { %v12737_v49 = vadd.f32 %v8902_v21, %v4103_v43  ;;  %v12739_v29 = vadd.f32 %v9296_v18, %v9295_v27  ;;  %v4111_v21 = vadd.f32 %v12571_v10, %v12727_v23 }
 0x33c   : > { %v8904_v9 = vpop.f32.mrf.mxu1  ;;  %v9298_v41 = vpop.f32.mrf.mxu0  ;;  %10211 = vmatmul.mubr.bf16.gmra.mxu0 %v14817_v38 }
 0x33d   : > { %14816 = vst [vmem:[#allocation15_spill] sm:$0xff] %v12739_v29  ;;  %v8905_v57 = vadd.f32 %v8904_v9, %v8903_v30  ;;  %10214 = vmatprep.mubr.msk.bf16.mxu0 %vm10809_vm0, %v14752_v7 }
 0x33e   : > { %v8906_v50 = vpop.f32.mrf.mxu1  ;;  %4469 = vmatmul.mubr.bf16.gmra.mxu1 %v14819_v32  ;;  %v9299_v18 = vpop.f32.mrf.mxu0 }
 0x33f   : > { %v12749_v31 = vadd.f32 %v8905_v57, %v4106_v46  ;;  %4476 = vmatprep.mubr.bf16.mxu1 %v1279_v15  ;;  %v12751_v43 = vadd.f32 %v9299_v18, %v9298_v41  ;;  %v14821_v15 = vld [vmem:[#allocation9_spill] sm:$0xff] }
 0x340   : > { %v8907_v60 = vpop.f32.mrf.mxu1  ;;  %v9301_v30 = vpop.f32.mrf.mxu0 }
 0x341   : > { %14820 = vst [vmem:[#allocation66_spill] sm:$0xff] %v12751_v43  ;;  %v8908_v27 = vadd.f32 %v8907_v60, %v8906_v50  ;;  %v14822_v50 = vld [vmem:[#allocation26_spill] sm:$0xff]  ;;  %v14841_v43 = vld [vmem:[#allocation20_spill] sm:$0xff] }
 0x342   : > { %v8909_v9 = vpop.f32.mrf.mxu1  ;;  %v9302_v29 = vpop.f32.mrf.mxu0 }
 0x343   : > { %v12755_v38 = vadd.f32 %v8908_v27, %v4111_v21  ;;  %v4119_v29 = vadd.f32 %v12588_v4, %v12727_v23  ;;  %v4122_v4 = vadd.f32 %v12599_v19, %v12727_v23  ;;  %v10512_v19 = vld [vmem:[%s14472_s3 + $0x2e8] sm:$0xff]  }
 0x344   : > { %v8910_v32 = vpop.f32.mrf.mxu1  ;;  %v9390_v46 = vpop.f32.mrf.mxu0  ;;  %10215 = vmatmul.mubr.bf16.gmra.mxu0 %v12330_v55 }
 0x345   : > { %v8911_v57 = vadd.f32 %v8910_v32, %v8909_v9 }
 0x346   : > { %v8912_v41 = vpop.f32.mrf.mxu1  ;;  %4477 = vmatmul.mubr.bf16.gmra.mxu1 %v14821_v15  ;;  %v9391_v10 = vpop.f32.mrf.mxu0 }
 0x347   : > { %v12761_v18 = vadd.f32 %v8911_v57, %v4114_v40  ;;  %4516 = vmatprep.mubr.bf16.mxu1 %v14822_v50  ;;  %v12764_v60 = vadd.f32 %v9391_v10, %v9390_v46  ;;  %v10509_v40 = vld [vmem:[%s14472_s3 + $0x2b8] sm:$0xff]   ;;  %v10510_v46 = vld [vmem:[%s14472_s3 + $0x2f0] sm:$0xff]   ;;  %v14825_v50 = vld [vmem:[#allocation31_spill] sm:$0xff] }
 0x348   : > { %v8913_v21 = vpop.f32.mrf.mxu1  ;;  %v9393_v14 = vpop.f32.mrf.mxu0 }
 0x349   : > { %14823 = vst [vmem:[#allocation6_spill] sm:$0xff] %v12764_v60  ;;  %v8914_v27 = vadd.f32 %v8913_v21, %v8912_v41  ;;  %v14830_v60 = vld [vmem:[#allocation52_spill] sm:$0xff] }
 0x34a   : > { %v8915_v30 = vpop.f32.mrf.mxu1  ;;  %v9394_v55 = vpop.f32.mrf.mxu0 }
 0x34b   : > { %v12768_v9 = vadd.f32 %v8914_v27, %v4119_v29  ;;  %v12773_v32 = vadd.f32 %v9394_v55, %v9393_v14  ;;  %v14826_v27 = vld [vmem:[#allocation50_spill] sm:$0xff]  ;;  %v10511_v14 = vld [vmem:[%s14472_s3 + $0x2b0] sm:$0xff]  }
 0x34c   : > { %v8916_v57 = vpop.f32.mrf.mxu1  ;;  %v9396_v15 = vpop.f32.mrf.mxu0 }
 0x34d   : > { %14824 = vst [vmem:[#allocation18_spill] sm:$0xff] %v12773_v32  ;;  %v8917_v41 = vadd.f32 %v8916_v57, %v8915_v30  ;;  %v4127_v30 = vadd.f32 %v12614_v45, %v12727_v23  ;;  %v4130_v45 = vadd.f32 %v12629_v20, %v12727_v23  ;;  %v10516_v20 = vld [vmem:[%s14472_s3 + $0x2d8] sm:$0xff]  }
 0x34e   : > { %v8918_v10 = vpop.f32.mrf.mxu1  ;;  %4517 = vmatmul.mubr.bf16.vlgmr.msra.gmra.mxu1 %v14825_v50  ;;  %v9397_v29 = vpop.f32.mrf.mxu0 }
 0x34f   : > { %v12781_v21 = vadd.f32 %v8917_v41, %v4122_v4  ;;  %9165 = vmatpush3.bf16.msra.mxu1 %v10509_v40  ;;  %4524 = vmatprep.mubr.bf16.mxu1 %v14826_v27  ;;  %v12787_v55 = vadd.f32 %v9397_v29, %v9396_v15  ;;  %v10513_v15 = vld [vmem:[%s14472_s3 + $0x2a8] sm:$0xff]   ;;  %v10514_v27 = vld [vmem:[%s14472_s3 + $0x2e0] sm:$0xff]  }
 0x350   : > { %v8919_v32 = vpop.f32.mrf.mxu1  ;;  %9166 = vmatprep.subr.bf16.mxu1 %v10510_v46  ;;  %v9399_v40 = vpop.f32.mrf.mxu0 }
 0x351   : > { %14827 = vst [vmem:[#allocation9_spill] sm:$0xff] %v12787_v55  ;;  %v8920_v57 = vadd.f32 %v8919_v32, %v8918_v10 }
 0x352   : > { %v8921_v4 = vpop.f32.mrf.mxu1  ;;  %v9400_v50 = vpop.f32.mrf.mxu0 }
 0x353   : > { %v12794_v41 = vadd.f32 %v8920_v57, %v4127_v30  ;;  %9167 = vmatpush3.bf16.msra.mxu1 %v10511_v14  ;;  %v12799_v29 = vadd.f32 %v9400_v50, %v9399_v40  ;;  %v14829_v57 = vld [vmem:[#allocation36_spill] sm:$0xff] }
 0x354   : > { %v8922_v46 = vpop.f32.mrf.mxu1  ;;  %9168 = vmatprep.subr.bf16.mxu1 %v10512_v19  ;;  %v9402_v10 = vpop.f32.mrf.mxu0  ;;  %v10515_v19 = vld [vmem:[%s14472_s3 + $0x2a0] sm:$0xff]  }
 0x355   : > { %14828 = vst [vmem:[#allocation26_spill] sm:$0xff] %v12799_v29  ;;  %v8923_v32 = vadd.f32 %v8922_v46, %v8921_v4  ;;  %v4135_v4 = vadd.f32 %v12643_v12, %v12727_v23  ;;  %v4138_v12 = vadd.f32 %v12653_v42, %v12727_v23  ;;  %v14834_v29 = vld [vmem:[#allocation55_spill] sm:$0xff] }
 0x356   : > { %v8924_v30 = vpop.f32.mrf.mxu1  ;;  %4525 = vmatmul.mubr.bf16.gmra.mxu1 %v14829_v57  ;;  %v9403_v55 = vpop.f32.mrf.mxu0  ;;  %v10518_v57 = vld [vmem:[%s14472_s3 + $0x2d0] sm:$0xff]   ;;  %v10520_v42 = vld [vmem:[%s14472_s3 + $0x2c8] sm:$0xff]  }
 0x357   : > { %v12807_v14 = vadd.f32 %v8923_v32, %v4130_v45  ;;  %4532 = vmatprep.mubr.bf16.mxu1 %v14830_v60  ;;  %9169 = vmatpush3.bf16.msra.mxu1 %v10513_v15  ;;  %v12813_v40 = vadd.f32 %v9403_v55, %v9402_v10  ;;  %v10517_v55 = vld [vmem:[%s14472_s3 + $0x298] sm:$0xff]  }
 0x358   : > { %v8925_v50 = vpop.f32.mrf.mxu1  ;;  %9170 = vmatprep.subr.bf16.mxu1 %v10514_v27  ;;  %v9405_v45 = vpop.f32.mrf.mxu0 }
 0x359   : > { %14831 = vst [vmem:[#allocation31_spill] sm:$0xff] %v12813_v40  ;;  %v8926_v46 = vadd.f32 %v8925_v50, %v8924_v30 }
 0x35a   : > { %v8927_v32 = vpop.f32.mrf.mxu1  ;;  %v9406_v15 = vpop.f32.mrf.mxu0 }
 0x35b   : > { %v12820_v60 = vadd.f32 %v8926_v46, %v4135_v4  ;;  %9171 = vmatpush3.bf16.msra.mxu1 %v10515_v19  ;;  %v12825_v10 = vadd.f32 %v9406_v15, %v9405_v45  ;;  %v14833_v46 = vld [vmem:[#allocation41_spill] sm:$0xff] }
 0x35c   : > { %v8928_v27 = vpop.f32.mrf.mxu1  ;;  %9172 = vmatprep.subr.bf16.mxu1 %v10516_v20  ;;  %v9408_v50 = vpop.f32.mrf.mxu0  ;;  %v10519_v20 = vld [vmem:[%s14472_s3 + $0x290] sm:$0xff]  }
 0x35d   : > { %14832 = vst [vmem:[#allocation50_spill] sm:$0xff] %v12825_v10  ;;  %v8929_v30 = vadd.f32 %v8928_v27, %v8927_v32  ;;  %v4143_v32 = vadd.f32 %v12668_v36, %v12727_v23  ;;  %v4146_v36 = vadd.f32 %v12678_v2, %v12727_v23  ;;  %v14838_v10 = vld [vmem:[#allocation59_spill] sm:$0xff]  ;;  %v10524_v2 = vld [vmem:[%s14472_s3 + $0x3f8] sm:$0xff]  }
 0x35e   : > { %v8930_v4 = vpop.f32.mrf.mxu1  ;;  %4533 = vmatmul.mubr.bf16.gmra.mxu1 %v14833_v46  ;;  %v9409_v40 = vpop.f32.mrf.mxu0  ;;  %v10522_v46 = vld [vmem:[%s14472_s3 + $0x2c0] sm:$0xff]  }
 0x35f   : > { %v12833_v19 = vadd.f32 %v8929_v30, %v4138_v12  ;;  %4540 = vmatprep.mubr.bf16.mxu1 %v14834_v29  ;;  %9173 = vmatpush3.bf16.msra.mxu1 %v10517_v55  ;;  %v12839_v45 = vadd.f32 %v9409_v40, %v9408_v50  ;;  %v10521_v40 = vld [vmem:[%s14472_s3 + $0x288] sm:$0xff]  }
 0x360   : > { %v8931_v15 = vpop.f32.mrf.mxu1  ;;  %9174 = vmatprep.subr.bf16.mxu1 %v10518_v57  ;;  %v9411_v12 = vpop.f32.mrf.mxu0 }
 0x361   : > { %14835 = vst [vmem:[#allocation36_spill] sm:$0xff] %v12839_v45  ;;  %v8932_v27 = vadd.f32 %v8931_v15, %v8930_v4 }
 0x362   : > { %v8933_v30 = vpop.f32.mrf.mxu1  ;;  %v9412_v55 = vpop.f32.mrf.mxu0 }
 0x363   : > { %v12846_v29 = vadd.f32 %v8932_v27, %v4143_v32  ;;  %9175 = vmatpush3.bf16.msra.mxu1 %v10519_v20  ;;  %v12851_v50 = vadd.f32 %v9412_v55, %v9411_v12  ;;  %v14837_v27 = vld [vmem:[#allocation46_spill] sm:$0xff] }
 0x364   : > { %v8934_v57 = vpop.f32.mrf.mxu1  ;;  %9176 = vmatprep.subr.bf16.mxu1 %v10520_v42  ;;  %v9414_v15 = vpop.f32.mrf.mxu0  ;;  %v10523_v42 = vld [vmem:[%s14472_s3 + $0x280] sm:$0xff]  }
 0x365   : > { %14836 = vst [vmem:[#allocation52_spill] sm:$0xff] %v12851_v50  ;;  %v8935_v4 = vadd.f32 %v8934_v57, %v8933_v30  ;;  %v4151_v30 = vadd.f32 %v12693_v3, %v12727_v23 }
 0x366   : > { %v8936_v32 = vpop.f32.mrf.mxu1  ;;  %4541 = vmatmul.mubr.bf16.gmra.mxu1 %v14837_v27  ;;  %v9415_v45 = vpop.f32.mrf.mxu0 }
 0x367   : > { %v12859_v20 = vadd.f32 %v8935_v4, %v4146_v36  ;;  %4548 = vmatprep.mubr.bf16.mxu1 %v14838_v10  ;;  %9177 = vmatpush3.bf16.msra.mxu1 %v10521_v40  ;;  %v12865_v12 = vadd.f32 %v9415_v45, %v9414_v15 }
 0x368   : > { %v8937_v55 = vpop.f32.mrf.mxu1  ;;  %9178 = vmatprep.subr.bf16.mxu1 %v10522_v46  ;;  %v9417_v36 = vpop.f32.mrf.mxu0  ;;  %v4154_v46 = vadd.f32 %v12697_v26, %v12727_v23 }
 0x369   : > { %14839 = vst [vmem:[#allocation41_spill] sm:$0xff] %v12865_v12  ;;  %v8938_v57 = vadd.f32 %v8937_v55, %v8936_v32  ;;  %v14842_v55 = vld [vmem:[#allocation62_spill] sm:$0xff] }
 0x36a   : > { %v8939_v4 = vpop.f32.mrf.mxu1  ;;  %v9418_v40 = vpop.f32.mrf.mxu0 }
 0x36b   : > { %v12872_v10 = vadd.f32 %v8938_v57, %v4151_v30  ;;  %9179 = vmatpush3.bf16.msra.mxu1 %v10523_v42  ;;  %v12874_v27 = vadd.f32 %v9418_v40, %v9417_v36  ;;  %v4159_v57 = vadd.f32 %v12706_v13, %v12727_v23 }
 0x36c   : > { %v8940_v45 = vpop.f32.mrf.mxu1  ;;  %9304 = vmatprep.subr.bf16.mxu1 %v10524_v2  ;;  %v9420_v12 = vpop.f32.mrf.mxu0 }
 0x36d   : > { %14840 = vst [vmem:[#allocation55_spill] sm:$0xff] %v12874_v27  ;;  %v8941_v15 = vadd.f32 %v8940_v45, %v8939_v4 }
 0x36e   : > { %v8942_v50 = vpop.f32.mrf.mxu1  ;;  %4549 = vmatmul.mubr.bf16.gmra.mxu1 %v14841_v43  ;;  %v9421_v32 = vpop.f32.mrf.mxu0 }
 0x36f   : > { %v12879_v3 = vadd.f32 %v8941_v15, %v4154_v46  ;;  %4556 = vmatprep.mubr.bf16.mxu1 %v14842_v55  ;;  %v12882_v30 = vadd.f32 %v9421_v32, %v9420_v12  ;;  %v4162_v46 = vadd.f32 %v12710_v61, %v12727_v23  ;;  %v14845_v12 = vld [vmem:[#allocation16_spill] sm:$0xff]  ;;  %v4167_v61 = vadd.f32 %v12719_v52, %v12727_v23 }
 0x370   : > { %v8943_v42 = vpop.f32.mrf.mxu1  ;;  %v9423_v36 = vpop.f32.mrf.mxu0  ;;  %v14846_v32 = vmax.f32 %v14845_v12, 0.0 }
 0x371   : > { %14843 = vst [vmem:[#allocation46_spill] sm:$0xff] %v12882_v30  ;;  %v8944_v2 = vadd.f32 %v8943_v42, %v8942_v50  ;;  %v14847_v50 = vld [vmem:[#allocation22_spill] sm:$0xff] }
 0x372   : > { %v8945_v40 = vpop.f32.mrf.mxu1  ;;  %v9424_v4 = vpop.f32.mrf.mxu0  ;;  %v12895_v30 = vpack.c.bf16 %v14846_v32, %v14818_v16 }
 0x373   : > { %v12886_v26 = vadd.f32 %v8944_v2, %v4159_v57  ;;  %v12888_v45 = vadd.f32 %v9424_v4, %v9423_v36  ;;  %v14848_v2 = vld [vmem:[#allocation67_spill] sm:$0xff] }
 0x374   : > { %v8946_v43 = vpop.f32.mrf.mxu1  ;;  %v9426_v55 = vpop.f32.mrf.mxu0  ;;  %v1612_v16 = vrot.slane %v12895_v30, 1 }
 0x375   : > { %14844 = vst [vmem:[#allocation59_spill] sm:$0xff] %v12888_v45  ;;  %v8947_v15 = vadd.f32 %v8946_v43, %v8945_v40 }
 0x376   : > { %v8948_v13 = vpop.f32.mrf.mxu1  ;;  %4557 = vmatmul.mubr.bf16.gmra.mxu1 %v14847_v50  ;;  %v9427_v57 = vpop.f32.mrf.mxu0 }
 0x377   : > { %v12898_v42 = vadd.f32 %v8947_v15, %v4162_v46  ;;  %4564 = vmatprep.mubr.bf16.mxu1 %v14848_v2  ;;  %v12901_v36 = vadd.f32 %v9427_v57, %v9426_v55  ;;  %v1602_v2 = vshll.u32 %v12895_v30, 16  ;;  %v14851_v57 = vld [vmem:[#allocation8_spill] sm:$0xff] }
 0x378   : > { %v8949_v4 = vpop.f32.mrf.mxu1  ;;  %v9429_v43 = vpop.f32.mrf.mxu0 }
 0x379   : > { %14849 = vst [vmem:[#allocation20_spill] sm:$0xff] %v12901_v36  ;;  %v8950_v40 = vadd.f32 %v8949_v4, %v8948_v13  ;;  %v14852_v36 = vld [vmem:[#allocation64_spill] sm:$0xff] }
 0x37a   : > { %v8951_v45 = vpop.f32.mrf.mxu1  ;;  %v9430_v32 = vpop.f32.mrf.mxu0  ;;  %v1613_v52 = vsel %vm1376_vm6, %v14852_v36, %v1612_v16 }
 0x37b   : > { %v12906_v12 = vadd.f32 %v8950_v40, %v4167_v61  ;;  %v12908_v50 = vadd.f32 %v9430_v32, %v9429_v43  ;;  %v1604_v40 = vrot.slane %v1602_v2, 1 }
 0x37c   : > { %v8952_v46 = vpop.f32.mrf.mxu1  ;;  %v9432_v15 = vpop.f32.mrf.mxu0 }
 0x37d   : > { %14850 = vst [vmem:[#allocation62_spill] sm:$0xff] %v12908_v50  ;;  %v1605_v36 = vsel %vm1286_vm2, %v14855_v58, %v1604_v40 }
 0x37e   : > { %v8970_v55 = vpop.f32.mrf.mxu1  ;;  %4565 = vmatmul.mubr.bf16.gmra.mxu1 %v14851_v57  ;;  %v9433_v23 = vpop.f32.mrf.mxu0 }
 0x37f   : > { %4572 = vmatprep.mubr.bf16.mxu1 %v1613_v52  ;;  %v12914_v45 = vadd.f32 %v9433_v23, %v9432_v15  ;;  %v14856_v15 = vld [vmem:[#allocation32_spill] sm:$0xff] }
 0x380   : > { %v8971_v13 = vpop.f32.mrf.mxu1  ;;  %v9435_v61 = vpop.f32.mrf.mxu0  ;;  %v1647_v23 = vrot.slane %v14856_v15, 2  ;;  %v1606_v15 = vshrl.u32 %v12895_v30, 16 }
 0x381   : > { %14853 = vst [vmem:[#allocation16_spill] sm:$0xff] %v12914_v45  ;;  %v8972_v4 = vadd.f32 %v8971_v13, %v8970_v55  ;;  %v14857_v55 = vld [vmem:[#allocation33_spill] sm:$0xff] }
 0x382   : > { %v8973_v43 = vpop.f32.mrf.mxu1  ;;  %v9436_v46 = vpop.f32.mrf.mxu0  ;;  %v1648_v13 = vrot.slane %v14857_v55, 3 }
 0x383   : > { %v12917_v32 = vadd.f32 %v8972_v4, %v12737_v49  ;;  %v12919_v50 = vadd.f32 %v9436_v46, %v9435_v61  ;;  %v14859_v46 = vld [vmem:[#allocation29_spill] sm:$0xff] }
 0x384   : > { %v8974_v27 = vpop.f32.mrf.mxu1  ;;  %v9438_v56 = vpop.f32.mrf.mxu0  ;;  %v1649_v55 = vor.u32 %v1648_v13, %v1647_v23 }
 0x385   : > { %14854 = vst [vmem:[#allocation22_spill] sm:$0xff] %v12919_v50  ;;  %v8975_v57 = vadd.f32 %v8974_v27, %v8973_v43  ;;  %v14860_v27 = vshrl.u32 %v14859_v46, 16  ;;  %v14861_v50 = vshll.u32 %v14859_v46, 16 }
 0x386   : > { %v8976_v52 = vpop.f32.mrf.mxu1  ;;  %4573 = vmatmul.mubr.bf16.gmra.mxu1 %v1605_v36  ;;  %v9439_v49 = vpop.f32.mrf.mxu0 }
 0x387   : > { %v12926_v2 = vadd.f32 %v8975_v57, %v12749_v31  ;;  %4580 = vmatprep.mubr.bf16.mxu1 %v1612_v16  ;;  %v12928_v4 = vadd.f32 %v9439_v49, %v9438_v56  ;;  %v1644_v43 = vrot.slane %v14860_v27, 2  ;;  %v1645_v58 = vrot.slane %v14861_v50, 3 }
 0x388   : > { %v8977_v61 = vpop.f32.mrf.mxu1  ;;  %v9441_v36 = vpop.f32.mrf.mxu0  ;;  %v1608_v16 = vor.u32 %v1606_v15, %v1604_v40 }
 0x389   : > { %14858 = vst [vmem:[#allocation67_spill] sm:$0xff] %v12928_v4  ;;  %v8978_v45 = vadd.f32 %v8977_v61, %v8976_v52  ;;  %v1646_v49 = vor.u32 %v1645_v58, %v1644_v43  ;;  %v14862_v52 = vld [vmem:[#allocation37_spill] sm:$0xff]  ;;  %v14863_v36 = vld [vmem:[#allocation38_spill] sm:$0xff] }
 0x38a   : > { %v8979_v47 = vpop.f32.mrf.mxu1  ;;  %v9442_v57 = vpop.f32.mrf.mxu0  ;;  %v1651_v61 = vrot.slane %v14862_v52, 2  ;;  %v1652_v22 = vrot.slane %v14863_v36, 3  ;;  %v14872_v52 = vld [vmem:[#allocation48_spill] sm:$0xff] }
 0x38b   : > { %v12936_v31 = vadd.f32 %v8978_v45, %v12755_v38  ;;  %v1650_v50 = vsel %vm1643_vm10, %v1646_v49, %v1649_v55  ;;  %v1617_v49 = vrot.slane %v14859_v46, 2  ;;  %v14867_v46 = vld [vmem:[#allocation42_spill] sm:$0xff] }
 0x38c   : > { %v8980_v56 = vpop.f32.mrf.mxu1  ;;  %v9530_v24 = vpop.f32.mrf.mxu0  ;;  %v1653_v57 = vor.u32 %v1652_v22, %v1651_v61 }
 0x38d   : > { %v8981_v4 = vadd.f32 %v8980_v56, %v8979_v47  ;;  %v14865_v47 = vld [vmem:[#allocation30_spill] sm:$0xff] }
 0x38e   : > { %v8982_v27 = vpop.f32.mrf.mxu1  ;;  %4581 = vmatmul.mubr.bf16.gmra.mxu1 %v1608_v16  ;;  %v9531_v38 = vpop.f32.mrf.mxu0  ;;  %v1618_v58 = vrot.slane %v14865_v47, 2  ;;  %v1654_v61 = vsel %vm1643_vm10, %v1649_v55, %v1653_v57  ;;  %v10528_v55 = vld [vmem:[%s14472_s3 + $0x3e8] sm:$0xff]  }
 0x38f   : > { %v12942_v23 = vadd.f32 %v8981_v4, %v12761_v18  ;;  %4620 = vmatprep.mubr.bf16.mxu1 %v1650_v50  ;;  %v12944_v45 = vadd.f32 %v9531_v38, %v9530_v24  ;;  %v10525_v18 = vld [vmem:[%s14472_s3 + $0x3b8] sm:$0xff]  }
 0x390   : > { %v8983_v13 = vpop.f32.mrf.mxu1  ;;  %v9533_v43 = vpop.f32.mrf.mxu0  ;;  %v1619_v22 = vsel %vm1448_vm8, %v1617_v49, %v1618_v58 }
 0x391   : > { %14864 = vst [vmem:[#allocation8_spill] sm:$0xff] %v12944_v45  ;;  %v8984_v40 = vadd.f32 %v8983_v13, %v8982_v27  ;;  %v10526_v27 = vld [vmem:[%s14472_s3 + $0x3f0] sm:$0xff]   ;;  %v1655_v13 = vrot.slane %v14867_v46, 2 }
 0x392   : > { %v8985_v15 = vpop.f32.mrf.mxu1  ;;  %v9534_v16 = vpop.f32.mrf.mxu0 }
 0x393   : > { %v12948_v56 = vadd.f32 %v8984_v40, %v12768_v9  ;;  %v12954_v4 = vadd.f32 %v9534_v16, %v9533_v43  ;;  %v14868_v40 = vld [vmem:[#allocation43_spill] sm:$0xff] }
 0x394   : > { %v8986_v24 = vpop.f32.mrf.mxu1  ;;  %v9536_v38 = vpop.f32.mrf.mxu0  ;;  %v1656_v45 = vrot.slane %v14868_v40, 3  ;;  %v1660_v40 = vrot.slane %v14872_v52, 3 }
 0x395   : > { %14866 = vst [vmem:[#allocation64_spill] sm:$0xff] %v12954_v4  ;;  %v8987_v50 = vadd.f32 %v8986_v24, %v8985_v15  ;;  %v10527_v15 = vld [vmem:[%s14472_s3 + $0x3b0] sm:$0xff]  }
 0x396   : > { %v8988_v9 = vpop.f32.mrf.mxu1  ;;  %4621 = vmatmul.mubr.bf16.vlgmr.msra.gmra.mxu1 %v1619_v22  ;;  %v9537_v16 = vpop.f32.mrf.mxu0 }
 0x397   : > { %v12964_v43 = vadd.f32 %v8987_v50, %v12781_v21  ;;  %9305 = vmatpush3.bf16.msra.mxu1 %v10525_v18  ;;  %4628 = vmatprep.mubr.bf16.mxu1 %v1654_v61  ;;  %v12969_v24 = vadd.f32 %v9537_v16, %v9536_v38  ;;  %v1620_v21 = vrot.slane %v11502_v53, 2  ;;  %v1657_v18 = vor.u32 %v1656_v45, %v1655_v13  ;;  %v10529_v38 = vld [vmem:[%s14472_s3 + $0x3a8] sm:$0xff]  }
 0x398   : > { %v8989_v49 = vpop.f32.mrf.mxu1  ;;  %9306 = vmatprep.subr.bf16.mxu1 %v10526_v27  ;;  %v9539_v4 = vpop.f32.mrf.mxu0 }
 0x399   : > { %14869 = vst [vmem:[#allocation24_spill] sm:$0xff] %v12969_v24  ;;  %v8990_v22 = vadd.f32 %v8989_v49, %v8988_v9  ;;  %v10530_v9 = vld [vmem:[%s14472_s3 + $0x3e0] sm:$0xff]   ;;  %v1621_v45 = vsel %vm1448_vm8, %v1618_v58, %v1620_v21  ;;  %v1658_v13 = vsel %vm1643_vm10, %v1653_v57, %v1657_v18  ;;  %v10532_v57 = vld [vmem:[%s14472_s3 + $0x3d8] sm:$0xff]  }
 0x39a   : > { %v8991_v50 = vpop.f32.mrf.mxu1  ;;  %v9540_v36 = vpop.f32.mrf.mxu0 }
 0x39b   : > { %v12976_v61 = vadd.f32 %v8990_v22, %v12794_v41  ;;  %9307 = vmatpush3.bf16.msra.mxu1 %v10527_v15  ;;  %v12981_v27 = vadd.f32 %v9540_v36, %v9539_v4  ;;  %v14871_v15 = vld [vmem:[#allocation47_spill] sm:$0xff] }
 0x39c   : > { %v8992_v16 = vpop.f32.mrf.mxu1  ;;  %9308 = vmatprep.subr.bf16.mxu1 %v10528_v55  ;;  %v9542_v24 = vpop.f32.mrf.mxu0  ;;  %v1659_v22 = vrot.slane %v14871_v15, 2  ;;  %v10531_v55 = vld [vmem:[%s14472_s3 + $0x3a0] sm:$0xff]  }
 0x39d   : > { %14870 = vst [vmem:[#allocation32_spill] sm:$0xff] %v12981_v27  ;;  %v8993_v49 = vadd.f32 %v8992_v16, %v8991_v50 }
 0x39e   : > { %v8994_v41 = vpop.f32.mrf.mxu1  ;;  %4629 = vmatmul.mubr.bf16.gmra.mxu1 %v1621_v45  ;;  %v9543_v4 = vpop.f32.mrf.mxu0  ;;  %v1661_v27 = vor.u32 %v1660_v40, %v1659_v22 }
 0x39f   : > { %v12991_v36 = vadd.f32 %v8993_v49, %v12807_v14  ;;  %4636 = vmatprep.mubr.bf16.mxu1 %v1658_v13  ;;  %9309 = vmatpush3.bf16.msra.mxu1 %v10529_v38  ;;  %v12996_v50 = vadd.f32 %v9543_v4, %v9542_v24  ;;  %v1622_v14 = vrot.slane %v11576_v37, 2  ;;  %v10533_v24 = vld [vmem:[%s14472_s3 + $0x398] sm:$0xff]  }
 0x3a0   : > { %v8995_v58 = vpop.f32.mrf.mxu1  ;;  %9310 = vmatprep.subr.bf16.mxu1 %v10530_v9  ;;  %v9545_v45 = vpop.f32.mrf.mxu0  ;;  %v1662_v22 = vsel %vm1643_vm10, %v1657_v18, %v1661_v27  ;;  %v10536_v18 = vld [vmem:[%s14472_s3 + $0x3c8] sm:$0xff]  }
 0x3a1   : > { %14873 = vst [vmem:[#allocation33_spill] sm:$0xff] %v12996_v50  ;;  %v8996_v16 = vadd.f32 %v8995_v58, %v8994_v41  ;;  %v10534_v41 = vld [vmem:[%s14472_s3 + $0x3d0] sm:$0xff]   ;;  %v1623_v40 = vsel %vm1448_vm8, %v1620_v21, %v1622_v14 }
 0x3a2   : > { %v8997_v49 = vpop.f32.mrf.mxu1  ;;  %v9546_v13 = vpop.f32.mrf.mxu0  ;;  %v14876_v50 = vld [vmem:[#allocation4_spill] sm:$0xff] }
 0x3a3   : > { %v13003_v38 = vadd.f32 %v8996_v16, %v12820_v60  ;;  %9311 = vmatpush3.bf16.msra.mxu1 %v10531_v55  ;;  %v13008_v9 = vadd.f32 %v9546_v13, %v9545_v45  ;;  %v14875_v55 = vld [vmem:[#allocation12_spill] sm:$0xff]  ;;  %v1664_v52 = vrot.slane %v14876_v50, 3 }
 0x3a4   : > { %v8998_v4 = vpop.f32.mrf.mxu1  ;;  %9312 = vmatprep.subr.bf16.mxu1 %v10532_v57  ;;  %v9548_v58 = vpop.f32.mrf.mxu0  ;;  %v1663_v16 = vrot.slane %v14875_v55, 2 }
 0x3a5   : > { %14874 = vst [vmem:[#allocation29_spill] sm:$0xff] %v13008_v9  ;;  %v8999_v37 = vadd.f32 %v8998_v4, %v8997_v49  ;;  %v10535_v49 = vld [vmem:[%s14472_s3 + $0x390] sm:$0xff]  }
 0x3a6   : > { %v9000_v60 = vpop.f32.mrf.mxu1  ;;  %4637 = vmatmul.mubr.bf16.gmra.mxu1 %v1623_v40  ;;  %v9549_v57 = vpop.f32.mrf.mxu0  ;;  %v1665_v9 = vor.u32 %v1664_v52, %v1663_v16 }
 0x3a7   : > { %v13018_v45 = vadd.f32 %v8999_v37, %v12833_v19  ;;  %4644 = vmatprep.mubr.bf16.mxu1 %v1662_v22  ;;  %9313 = vmatpush3.bf16.msra.mxu1 %v10533_v24  ;;  %v13023_v13 = vadd.f32 %v9549_v57, %v9548_v58  ;;  %v1624_v19 = vrot.slane %v11648_v51, 2  ;;  %v10537_v58 = vld [vmem:[%s14472_s3 + $0x388] sm:$0xff]  }
 0x3a8   : > { %v9001_v21 = vpop.f32.mrf.mxu1  ;;  %9314 = vmatprep.subr.bf16.mxu1 %v10534_v41  ;;  %v9551_v40 = vpop.f32.mrf.mxu0  ;;  %v1666_v16 = vsel %vm1643_vm10, %v1661_v27, %v1665_v9  ;;  %v10540_v27 = vld [vmem:[%s14472_s3 + $0x4f8] sm:$0xff]  }
 0x3a9   : > { %14877 = vst [vmem:[#allocation30_spill] sm:$0xff] %v13023_v13  ;;  %v9002_v4 = vadd.f32 %v9001_v21, %v9000_v60  ;;  %v10538_v60 = vld [vmem:[%s14472_s3 + $0x3c0] sm:$0xff]   ;;  %v1625_v52 = vsel %vm1448_vm8, %v1622_v14, %v1624_v19 }
 0x3aa   : > { %v9003_v37 = vpop.f32.mrf.mxu1  ;;  %v9552_v22 = vpop.f32.mrf.mxu0  ;;  %v14880_v13 = vld [vmem:[#allocation14_spill] sm:$0xff] }
 0x3ab   : > { %v13030_v24 = vadd.f32 %v9002_v4, %v12846_v29  ;;  %9315 = vmatpush3.bf16.msra.mxu1 %v10535_v49  ;;  %v13035_v41 = vadd.f32 %v9552_v22, %v9551_v40  ;;  %v14879_v49 = vld [vmem:[#allocation49_spill] sm:$0xff]  ;;  %v1668_v50 = vrot.slane %v14880_v13, 3 }
 0x3ac   : > { %v9004_v57 = vpop.f32.mrf.mxu1  ;;  %9316 = vmatprep.subr.bf16.mxu1 %v10536_v18  ;;  %v9554_v21 = vpop.f32.mrf.mxu0  ;;  %v1667_v4 = vrot.slane %v14879_v49, 2 }
 0x3ad   : > { %14878 = vst [vmem:[#allocation42_spill] sm:$0xff] %v13035_v41  ;;  %v9005_v51 = vadd.f32 %v9004_v57, %v9003_v37  ;;  %v10539_v37 = vld [vmem:[%s14472_s3 + $0x380] sm:$0xff]  }
 0x3ae   : > { %v9006_v29 = vpop.f32.mrf.mxu1  ;;  %4645 = vmatmul.mubr.bf16.gmra.mxu1 %v1625_v52  ;;  %v9555_v18 = vpop.f32.mrf.mxu0  ;;  %v1669_v41 = vor.u32 %v1668_v50, %v1667_v4  ;;  %v1672_v50 = vrot.slane %v11870_v39, 3 }
 0x3af   : > { %v13045_v40 = vadd.f32 %v9005_v51, %v12859_v20  ;;  %4652 = vmatprep.mubr.bf16.mxu1 %v1666_v16  ;;  %9317 = vmatpush3.bf16.msra.mxu1 %v10537_v58  ;;  %v13050_v22 = vadd.f32 %v9555_v18, %v9554_v21  ;;  %v1626_v20 = vrot.slane %v11707_v48, 2  ;;  %v1671_v48 = vrot.slane %v11867_v63, 2 }
 0x3b0   : > { %v9007_v14 = vpop.f32.mrf.mxu1  ;;  %9318 = vmatprep.subr.bf16.mxu1 %v10538_v60  ;;  %v9557_v52 = vpop.f32.mrf.mxu0 }
 0x3b1   : > { %14881 = vst [vmem:[#allocation47_spill] sm:$0xff] %v13050_v22  ;;  %v9008_v57 = vadd.f32 %v9007_v14, %v9006_v29  ;;  %v1627_v22 = vsel %vm1448_vm8, %v1624_v19, %v1626_v20  ;;  %v1670_v29 = vsel %vm1643_vm10, %v1665_v9, %v1669_v41 }
 0x3b2   : > { %v9009_v51 = vpop.f32.mrf.mxu1  ;;  %v9558_v16 = vpop.f32.mrf.mxu0 }
 0x3b3   : > { %v13057_v58 = vadd.f32 %v9008_v57, %v12872_v10  ;;  %9319 = vmatpush3.bf16.msra.mxu1 %v10539_v37  ;;  %v13059_v13 = vadd.f32 %v9558_v16, %v9557_v52  ;;  %v14884_v52 = vld [vmem:[#allocation21_spill] sm:$0xff] }
 0x3b4   : > { %v9010_v21 = vpop.f32.mrf.mxu1  ;;  %9444 = vmatprep.subr.bf16.mxu1 %v10540_v27  ;;  %v9560_v18 = vpop.f32.mrf.mxu0  ;;  %v1628_v19 = vrot.slane %v14884_v52, 2  ;;  %v14887_v52 = vld [vmem:[#allocation25_spill] sm:$0xff] }
 0x3b5   : > { %14882 = vst [vmem:[#allocation12_spill] sm:$0xff] %v13059_v13  ;;  %v9011_v60 = vadd.f32 %v9010_v21, %v9009_v51 }
 0x3b6   : > { %v9012_v49 = vpop.f32.mrf.mxu1  ;;  %4653 = vmatmul.mubr.bf16.gmra.mxu1 %v1627_v22  ;;  %v9561_v4 = vpop.f32.mrf.mxu0  ;;  %v1673_v22 = vor.u32 %v1672_v50, %v1671_v48 }
 0x3b7   : > { %v13066_v10 = vadd.f32 %v9011_v60, %v12879_v3  ;;  %4660 = vmatprep.mubr.bf16.mxu1 %v1670_v29  ;;  %v13068_v37 = vadd.f32 %v9561_v4, %v9560_v18  ;;  %v1629_v29 = vsel %vm1448_vm8, %v1626_v20, %v1628_v19  ;;  %v14886_v4 = vld [vmem:[#allocation10_spill] sm:$0xff] }
 0x3b8   : > { %v9013_v14 = vpop.f32.mrf.mxu1  ;;  %v9563_v57 = vpop.f32.mrf.mxu0 }
 0x3b9   : > { %14883 = vst [vmem:[#allocation82_spill] sm:$0xff] %v13068_v37  ;;  %v9014_v27 = vadd.f32 %v9013_v14, %v9012_v49  ;;  %v1674_v49 = vsel %vm1643_vm10, %v1669_v41, %v1673_v22  ;;  %v1678_v14 = vrot.slane %v14886_v4, 2  ;;  %v1681_v37 = vrot.slane %v14887_v52, 3 }
 0x3ba   : > { %v9015_v51 = vpop.f32.mrf.mxu1  ;;  %v9564_v16 = vpop.f32.mrf.mxu0 }
 0x3bb   : > { %v13072_v9 = vadd.f32 %v9014_v27, %v12886_v26  ;;  %v13074_v21 = vadd.f32 %v9564_v16, %v9563_v57 }
 0x3bc   : > { %v9016_v13 = vpop.f32.mrf.mxu1  ;;  %v9566_v60 = vpop.f32.mrf.mxu0 }
 0x3bd   : > { %14885 = vst [vmem:[#allocation21_spill] sm:$0xff] %v13074_v21  ;;  %v9017_v3 = vadd.f32 %v9016_v13, %v9015_v51  ;;  %v14888_v51 = vld [vmem:[#allocation23_spill] sm:$0xff] }
 0x3be   : > { %v9018_v18 = vpop.f32.mrf.mxu1  ;;  %4661 = vmatmul.mubr.bf16.gmra.mxu1 %v1629_v29  ;;  %v9567_v26 = vpop.f32.mrf.mxu0  ;;  %v1630_v20 = vrot.slane %v14888_v51, 2  ;;  %v1682_v29 = vor.u32 %v1681_v37, %v1678_v14 }
 0x3bf   : > { %v13081_v48 = vadd.f32 %v9017_v3, %v12898_v42  ;;  %4668 = vmatprep.mubr.bf16.mxu1 %v1674_v49  ;;  %v13083_v50 = vadd.f32 %v9567_v26, %v9566_v60 }
 0x3c0   : > { %v9019_v27 = vpop.f32.mrf.mxu1  ;;  %v9569_v57 = vpop.f32.mrf.mxu0  ;;  %v1631_v3 = vsel %vm1448_vm8, %v1628_v19, %v1630_v20  ;;  %v1683_v60 = vsel %vm1643_vm10, %v1673_v22, %v1682_v29 }
 0x3c1   : > { %v9020_v13 = vadd.f32 %v9019_v27, %v9018_v18 }
 0x3c2   : > { %v9021_v16 = vpop.f32.mrf.mxu1  ;;  %v9570_v21 = vpop.f32.mrf.mxu0 }
 0x3c3   : > { %v13087_v41 = vadd.f32 %v9020_v13, %v12906_v12  ;;  %v13089_v4 = vadd.f32 %v9570_v21, %v9569_v57  ;;  %v1632_v12 = vrot.slane %v11896_v0, 2 }
 0x3c4   : > { %v9022_v52 = vpop.f32.mrf.mxu1  ;;  %v9572_v42 = vpop.f32.mrf.mxu0 }
 0x3c5   : > { %v1633_v22 = vsel %vm1448_vm8, %v1630_v20, %v1632_v12  ;;  %v1704_v20 = vrot.slane %v14865_v47, 1 }
 0x3c6   : > { %v9040_v49 = vpop.f32.mrf.mxu1  ;;  %4669 = vmatmul.mubr.bf16.gmra.mxu1 %v1631_v3  ;;  %v9573_v18 = vpop.f32.mrf.mxu0 }
 0x3c7   : > { %4676 = vmatprep.mubr.bf16.mxu1 %v1683_v60  ;;  %v13093_v26 = vadd.f32 %v9573_v18, %v9572_v42 }
 0x3c8   : > { %v9041_v27 = vpop.f32.mrf.mxu1  ;;  %v9575_v14 = vpop.f32.mrf.mxu0 }
 0x3c9   : > { %v9042_v37 = vadd.f32 %v9041_v27, %v9040_v49 }
 0x3ca   : > { %v9043_v13 = vpop.f32.mrf.mxu1  ;;  %v9576_v52 = vpop.f32.mrf.mxu0 }
 0x3cb   : > { %v13097_v21 = vadd.f32 %v9042_v37, %v12917_v32  ;;  %v13099_v57 = vadd.f32 %v9576_v52, %v9575_v14 }
 0x3cc   : > { %v9044_v19 = vpop.f32.mrf.mxu1  ;;  %v9578_v16 = vpop.f32.mrf.mxu0 }
 0x3cd   : > { %v9045_v51 = vadd.f32 %v9044_v19, %v9043_v13 }
 0x3ce   : > { %v9046_v3 = vpop.f32.mrf.mxu1  ;;  %4677 = vmatmul.mubr.bf16.gmra.mxu1 %v1633_v22  ;;  %v9579_v49 = vpop.f32.mrf.mxu0 }
 0x3cf   : > { %v13103_v42 = vadd.f32 %v9045_v51, %v12926_v2  ;;  %4684 = vmatprep.mubr.bf16.mxu1 %v1682_v29  ;;  %v13105_v0 = vadd.f32 %v9579_v49, %v9578_v16  ;;  %v14889_v29 = vrot.slane %v11502_v53, 1  ;;  %v10541_v53 = vld [vmem:[%s14472_s3 + $0x4b8] sm:$0xff]  }
 0x3d0   : > { %v9047_v60 = vpop.f32.mrf.mxu1  ;;  %v9581_v18 = vpop.f32.mrf.mxu0 }
 0x3d1   : > { %v9048_v32 = vadd.f32 %v9047_v60, %v9046_v3  ;;  %v13116_v51 = vsel %vm1376_vm6, %v1704_v20, %v14889_v29  ;;  %v14890_v20 = vld [vmem:[#allocation40_spill] sm:$0xff]  ;;  %v10544_v29 = vld [vmem:[%s14472_s3 + $0x4e8] sm:$0xff]  }
 0x3d2   : > { %v9049_v27 = vpop.f32.mrf.mxu1  ;;  %v9582_v14 = vpop.f32.mrf.mxu0 }
 0x3d3   : > { %v13108_v37 = vadd.f32 %v9048_v32, %v12936_v31 }
 0x3d4   : > { %v9050_v13 = vpop.f32.mrf.mxu1  ;;  %v13111_v19 = vpop.f32.mrf.mxu0 }
 0x3d5   : > { %v9051_v52 = vadd.f32 %v9050_v13, %v9049_v27 }
 0x3d6   : > { %v9052_v2 = vpop.f32.mrf.mxu1  ;;  %4685 = vmatmul.mubr.bf16.gmra.mxu1 %v1632_v12  ;;  %v10192_v22 = vpop.f32.mrf.mxu0 }
 0x3d7   : > { %v13119_v16 = vadd.f32 %v9051_v52, %v12942_v23  ;;  %4828 = vmatprep.mubr.bf16.mxu1 %v13116_v51  ;;  %v10542_v23 = vld [vmem:[%s14472_s3 + $0x4f0] sm:$0xff]  }
 0x3d8   : > { %v9053_v31 = vpop.f32.mrf.mxu1  ;;  %v13122_v49 = vpop.f32.mrf.mxu0  ;;  %v10543_v52 = vld [vmem:[%s14472_s3 + $0x4b0] sm:$0xff]  }
 0x3d9   : > { %v9054_v3 = vadd.f32 %v9053_v31, %v9052_v2 }
 0x3da   : > { %v9055_v47 = vpop.f32.mrf.mxu1  ;;  %v10193_v12 = vpop.f32.mrf.mxu0 }
 0x3db   : > { %v13125_v60 = vadd.f32 %v9054_v3, %v12948_v56 }
 0x3dc   : > { %v9056_v32 = vpop.f32.mrf.mxu1  ;;  %v13133_v27 = vpop.f32.mrf.mxu0 }
 0x3dd   : > { %v9057_v18 = vadd.f32 %v9056_v32, %v9055_v47  ;;  %v10545_v47 = vld [vmem:[%s14472_s3 + $0x4a8] sm:$0xff]  }
 0x3de   : > { %v9058_v14 = vpop.f32.mrf.mxu1  ;;  %4829 = vmatmul.mubr.bf16.vlgmr.msra.gmra.mxu1 %v11420_v1  ;;  %v10196_v56 = vpop.f32.mrf.mxu0 }
 0x3df   : > { %v13137_v13 = vadd.f32 %v9057_v18, %v12964_v43  ;;  %9445 = vmatpush3.bf16.msra.mxu1 %v10541_v53  ;;  %4836 = vmatprep.mubr.bf16.mxu1 %v14890_v20  ;;  %v10546_v53 = vld [vmem:[%s14472_s3 + $0x4e0] sm:$0xff]   ;;  %v14893_v56 = vld [vmem:[#allocation45_spill] sm:$0xff] }
 0x3e0   : > { %v9059_v2 = vpop.f32.mrf.mxu1  ;;  %9446 = vmatprep.subr.bf16.mxu1 %v10542_v23  ;;  %v13146_v31 = vpop.f32.mrf.mxu0  ;;  %v10547_v20 = vld [vmem:[%s14472_s3 + $0x4a0] sm:$0xff]  }
 0x3e1   : > { %v9060_v22 = vadd.f32 %v9059_v2, %v9058_v14  ;;  %14891 = vst [vmem:[#allocation23_spill] sm:$0xff] %v13146_v31  ;;  %v10548_v2 = vld [vmem:[%s14472_s3 + $0x4d8] sm:$0xff]  }
 0x3e2   : > { %v9061_v1 = vpop.f32.mrf.mxu1  ;;  %v10197_v3 = vpop.f32.mrf.mxu0 }
 0x3e3   : > { %v13149_v43 = vadd.f32 %v9060_v22, %v12976_v61  ;;  %9447 = vmatpush3.bf16.msra.mxu1 %v10543_v52  ;;  %v10549_v3 = vld [vmem:[%s14472_s3 + $0x498] sm:$0xff]  }
 0x3e4   : > { %v9062_v12 = vpop.f32.mrf.mxu1  ;;  %9448 = vmatprep.subr.bf16.mxu1 %v10544_v29  ;;  %v13157_v23 = vpop.f32.mrf.mxu0 }
 0x3e5   : > { %v9063_v32 = vadd.f32 %v9062_v12, %v9061_v1  ;;  %14892 = vst [vmem:[#allocation40_spill] sm:$0xff] %v13157_v23  ;;  %v10550_v12 = vld [vmem:[%s14472_s3 + $0x4d0] sm:$0xff]  }
 0x3e6   : > { %v9064_v18 = vpop.f32.mrf.mxu1  ;;  %4837 = vmatmul.mubr.bf16.gmra.mxu1 %v11475_v62  ;;  %v10200_v14 = vpop.f32.mrf.mxu0 }
 0x3e7   : > { %v13161_v61 = vadd.f32 %v9063_v32, %v12991_v36  ;;  %4844 = vmatprep.mubr.bf16.mxu1 %v14893_v56  ;;  %9449 = vmatpush3.bf16.msra.mxu1 %v10545_v47  ;;  %v14896_v56 = vld [vmem:[#allocation3_spill] sm:$0xff] }
 0x3e8   : > { %v9065_v52 = vpop.f32.mrf.mxu1  ;;  %9450 = vmatprep.subr.bf16.mxu1 %v10546_v53  ;;  %v13170_v22 = vpop.f32.mrf.mxu0 }
 0x3e9   : > { %v9066_v29 = vadd.f32 %v9065_v52, %v9064_v18  ;;  %14894 = vst [vmem:[#allocation45_spill] sm:$0xff] %v13170_v22 }
 0x3ea   : > { %v9067_v62 = vpop.f32.mrf.mxu1  ;;  %v10201_v1 = vpop.f32.mrf.mxu0 }
 0x3eb   : > { %v13173_v36 = vadd.f32 %v9066_v29, %v13003_v38  ;;  %9451 = vmatpush3.bf16.msra.mxu1 %v10547_v20  ;;  %v10551_v20 = vld [vmem:[%s14472_s3 + $0x490] sm:$0xff]  }
 0x3ec   : > { %v9068_v47 = vpop.f32.mrf.mxu1  ;;  %9452 = vmatprep.subr.bf16.mxu1 %v10548_v2  ;;  %v13181_v32 = vpop.f32.mrf.mxu0  ;;  %v10552_v2 = vld [vmem:[%s14472_s3 + $0x4c8] sm:$0xff]  }
 0x3ed   : > { %v9069_v53 = vadd.f32 %v9068_v47, %v9067_v62  ;;  %14895 = vst [vmem:[#allocation83_spill] sm:$0xff] %v13181_v32 }
 0x3ee   : > { %v9070_v18 = vpop.f32.mrf.mxu1  ;;  %4845 = vmatmul.mubr.bf16.gmra.mxu1 %v11547_v25  ;;  %v10204_v14 = vpop.f32.mrf.mxu0 }
 0x3ef   : > { %v13185_v38 = vadd.f32 %v9069_v53, %v13018_v45  ;;  %4852 = vmatprep.mubr.bf16.mxu1 %v14896_v56  ;;  %9453 = vmatpush3.bf16.msra.mxu1 %v10549_v3  ;;  %v10553_v3 = vld [vmem:[%s14472_s3 + $0x488] sm:$0xff]  }
 0x3f0   : > { %v9071_v52 = vpop.f32.mrf.mxu1  ;;  %9454 = vmatprep.subr.bf16.mxu1 %v10550_v12  ;;  %v13194_v62 = vpop.f32.mrf.mxu0  ;;  %v10554_v12 = vld [vmem:[%s14472_s3 + $0x4c0] sm:$0xff]  }
 0x3f1   : > { %v9072_v29 = vadd.f32 %v9071_v52, %v9070_v18  ;;  %14897 = vst [vmem:[#allocation3_spill] sm:$0xff] %v13194_v62  ;;  %v10555_v52 = vld [vmem:[%s14472_s3 + $0x480] sm:$0xff]  }
 0x3f2   : > { %v9073_v25 = vpop.f32.mrf.mxu1  ;;  %v10205_v1 = vpop.f32.mrf.mxu0 }
 0x3f3   : > { %v13197_v45 = vadd.f32 %v9072_v29, %v13030_v24  ;;  %9455 = vmatpush3.bf16.msra.mxu1 %v10551_v20  ;;  %v14899_v20 = vld [vmem:[#allocation72_spill] sm:$0xff]  ;;  %v10556_v29 = vld [vmem:[%s14472_s3 + $0x5f8] sm:$0xff]  }
 0x3f4   : > { %v9074_v47 = vpop.f32.mrf.mxu1  ;;  %9456 = vmatprep.subr.bf16.mxu1 %v10552_v2  ;;  %v13205_v18 = vpop.f32.mrf.mxu0 }
 0x3f5   : > { %v9075_v53 = vadd.f32 %v9074_v47, %v9073_v25  ;;  %14898 = vst [vmem:[#allocation84_spill] sm:$0xff] %v13205_v18 }
 0x3f6   : > { %v9076_v14 = vpop.f32.mrf.mxu1  ;;  %4853 = vmatmul.mubr.bf16.gmra.mxu1 %v11621_v17  ;;  %v10208_v56 = vpop.f32.mrf.mxu0 }
 0x3f7   : > { %v13209_v24 = vadd.f32 %v9075_v53, %v13045_v40  ;;  %4860 = vmatprep.mubr.bf16.mxu1 %v14899_v20  ;;  %9457 = vmatpush3.bf16.msra.mxu1 %v10553_v3 }
 0x3f8   : > { %v9077_v2 = vpop.f32.mrf.mxu1  ;;  %9458 = vmatprep.subr.bf16.mxu1 %v10554_v12  ;;  %v13218_v1 = vpop.f32.mrf.mxu0 }
 0x3f9   : > { %v9078_v25 = vadd.f32 %v9077_v2, %v9076_v14  ;;  %14900 = vst [vmem:[#allocation72_spill] sm:$0xff] %v13218_v1  ;;  %v14902_v2 = vld [vmem:[#allocation73_spill] sm:$0xff] }
 0x3fa   : > { %v9079_v17 = vpop.f32.mrf.mxu1  ;;  %v10209_v47 = vpop.f32.mrf.mxu0 }
 0x3fb   : > { %v13221_v40 = vadd.f32 %v9078_v25, %v13057_v58  ;;  %9459 = vmatpush3.bf16.msra.mxu1 %v10555_v52 }
 0x3fc   : > { %v9080_v3 = vpop.f32.mrf.mxu1  ;;  %9584 = vmatprep.subr.bf16.mxu1 %v10556_v29  ;;  %v13223_v56 = vpop.f32.mrf.mxu0 }
 0x3fd   : > { %v9081_v53 = vadd.f32 %v9080_v3, %v9079_v17  ;;  %14901 = vst [vmem:[#allocation85_spill] sm:$0xff] %v13223_v56 }
 0x3fe   : > { %v9082_v20 = vpop.f32.mrf.mxu1  ;;  %4861 = vmatmul.mubr.bf16.gmra.mxu1 %v11686_v44  ;;  %v10212_v14 = vpop.f32.mrf.mxu0 }
 0x3ff   : > { %v13227_v12 = vadd.f32 %v9081_v53, %v13066_v10  ;;  %4868 = vmatprep.mubr.bf16.mxu1 %v14902_v2  ;;  %v14905_v14 = vld [vmem:[#allocation74_spill] sm:$0xff] }
 0x400   : > { %v9083_v1 = vpop.f32.mrf.mxu1  ;;  %v13230_v58 = vpop.f32.mrf.mxu0 }
 0x401   : > { %v9084_v18 = vadd.f32 %v9083_v1, %v9082_v20  ;;  %14903 = vst [vmem:[#allocation73_spill] sm:$0xff] %v13230_v58  ;;  %v14909_v58 = vld [vmem:[#allocation53_spill] sm:$0xff] }
 0x402   : > { %v9085_v25 = vpop.f32.mrf.mxu1  ;;  %v10213_v29 = vpop.f32.mrf.mxu0  ;;  %v2012_v56 = vshrl.u32 %v14909_v58, 16  ;;  %v2015_v62 = vshll.u32 %v14909_v58, 16 }
 0x403   : > { %v13233_v52 = vadd.f32 %v9084_v18, %v13072_v9 }
 0x404   : > { %v9086_v17 = vpop.f32.mrf.mxu1  ;;  %v13235_v3 = vpop.f32.mrf.mxu0 }
 0x405   : > { %v9087_v47 = vadd.f32 %v9086_v17, %v9085_v25  ;;  %14904 = vst [vmem:[#allocation86_spill] sm:$0xff] %v13235_v3 }
 0x406   : > { %v9088_v44 = vpop.f32.mrf.mxu1  ;;  %4869 = vmatmul.mubr.bf16.gmra.mxu1 %v11748_v11  ;;  %v10216_v53 = vpop.f32.mrf.mxu0 }
 0x407   : > { %v13239_v10 = vadd.f32 %v9087_v47, %v13081_v48  ;;  %4876 = vmatprep.mubr.bf16.mxu1 %v14905_v14  ;;  %v14907_v47 = vld [vmem:[#allocation51_spill] sm:$0xff] }
 0x408   : > { %v9089_v1 = vpop.f32.mrf.mxu1  ;;  %v13242_v2 = vpop.f32.mrf.mxu0  ;;  %v1934_v53 = vshrl.u32 %v14907_v47, 16  ;;  %v1937_v14 = vshll.u32 %v14907_v47, 16 }
 0x409   : > { %v9090_v20 = vadd.f32 %v9089_v1, %v9088_v44  ;;  %14906 = vst [vmem:[#allocation74_spill] sm:$0xff] %v13242_v2 }
 0x40a   : > { %v9091_v9 = vpop.f32.mrf.mxu1  ;;  %v10217_v25 = vpop.f32.mrf.mxu0  ;;  %v1936_v2 = vrot.slane %v1934_v53, 1  ;;  %v1909_v53 = vshrl.u32 %v13116_v51, 16 }
 0x40b   : > { %v13245_v18 = vadd.f32 %v9090_v20, %v13087_v41  ;;  %v14908_v41 = vld [vmem:[#allocation27_spill] sm:$0xff] }
 0x40c   : > { %v9092_v29 = vpop.f32.mrf.mxu1  ;;  %v1926_v20 = vshrl.u32 %v14908_v41, 16  ;;  %v1929_v25 = vshll.u32 %v14908_v41, 16 }
 0x40e   : > { %v9110_v17 = vpop.f32.mrf.mxu1  ;;  %4877 = vmatmul.mubr.bf16.gmra.mxu1 %v11811_v5  ;;  %v1939_v5 = vrot.slane %v1937_v14, 2  ;;  %v1912_v14 = vshll.u32 %v13116_v51, 16 }
 0x40f   : > { %4884 = vmatprep.mubr.bf16.mxu1 %v12495_v6 }
 0x410   : > { %v9111_v11 = vpop.f32.mrf.mxu1 }
 0x411   : > { %v9112_v48 = vadd.f32 %v9111_v11, %v9110_v17  ;;  %v1928_v11 = vrot.slane %v1926_v20, 1 }
 0x412   : > { %v9113_v44 = vpop.f32.mrf.mxu1 }
 0x413   : > { %v13252_v1 = vadd.f32 %v9112_v48, %v13097_v21  ;;  %v1931_v21 = vrot.slane %v1929_v25, 2 }
 0x414   : > { %v9114_v9 = vpop.f32.mrf.mxu1 }
 0x415   : > { %v9115_v29 = vadd.f32 %v9114_v9, %v9113_v44  ;;  %v1940_v44 = vor.u32 %v1939_v5, %v1936_v2  ;;  %v14910_v9 = vld [vmem:[#allocation17_spill] sm:$0xff]  ;;  %v1932_v20 = vor.u32 %v1931_v21, %v1928_v11  ;;  %v1911_v2 = vrot.slane %v1909_v53, 1 }
 0x416   : > { %v9116_v3 = vpop.f32.mrf.mxu1  ;;  %4885 = vmatmul.mubr.bf16.gmra.mxu1 %v12895_v30  ;;  %v1914_v5 = vrot.slane %v1912_v14, 2 }
 0x417   : > { %v13258_v6 = vadd.f32 %v9115_v29, %v13103_v42  ;;  %4892 = vmatprep.mubr.bf16.mxu1 %v12472_v34  ;;  %v1282_v29 = vpack.c.bf16 %v14910_v9, %v14910_v9  ;;  %v1941_v22 = vsel %vm1403_vm4, %v1932_v20, %v1940_v44 }
 0x418   : > { %v9117_v17 = vpop.f32.mrf.mxu1 }
 0x419   : > { %v9118_v48 = vadd.f32 %v9117_v17, %v9116_v3  ;;  %v2014_v3 = vrot.slane %v2012_v56, 1  ;;  %v2017_v17 = vrot.slane %v2015_v62, 2  ;;  %v1915_v56 = vor.u32 %v1914_v5, %v1911_v2 }
 0x41a   : > { %v9119_v41 = vpop.f32.mrf.mxu1 }
 0x41b   : > { %v13266_v30 = vadd.f32 %v9118_v48, %v13108_v37  ;;  %v14911_v48 = vld [vmem:[#allocation57_spill] sm:$0xff]  ;;  %v2018_v21 = vor.u32 %v2017_v17, %v2014_v3 }
 0x41c   : > { %v9120_v42 = vpop.f32.mrf.mxu1  ;;  %v2066_v31 = vshrl.u32 %v14911_v48, 16  ;;  %v2069_v9 = vshll.u32 %v14911_v48, 16  ;;  %v14912_v17 = vld [vmem:[#allocation61_spill] sm:$0xff] }
 0x41d   : > { %v9121_v25 = vadd.f32 %v9120_v42, %v9119_v41  ;;  %v10557_v41 = vld [vmem:[%s14472_s3 + $0x5b8] sm:$0xff]   ;;  %v2120_v2 = vshrl.u32 %v14912_v17, 16 }
 0x41e   : > { %v9122_v32 = vpop.f32.mrf.mxu1  ;;  %4893 = vmatmul.mubr.bf16.gmra.mxu1 %v1282_v29  ;;  %v2068_v14 = vrot.slane %v2066_v31, 1  ;;  %v2071_v42 = vrot.slane %v2069_v9, 2 }
 0x41f   : > { %v13272_v23 = vadd.f32 %v9121_v25, %v13119_v16  ;;  %5036 = vmatprep.mubr.bf16.mxu1 %v1941_v22  ;;  %v10558_v16 = vld [vmem:[%s14472_s3 + $0x5f0] sm:$0xff]  }
 0x420   : > { %v9123_v37 = vpop.f32.mrf.mxu1  ;;  %v10559_v25 = vld [vmem:[%s14472_s3 + $0x5b0] sm:$0xff]  }
 0x421   : > { %v9124_v51 = vadd.f32 %v9123_v37, %v9122_v32  ;;  %v1924_v32 = vsel %vm1403_vm4, %v1915_v56, %v12499_v33  ;;  %v10560_v33 = vld [vmem:[%s14472_s3 + $0x5e8] sm:$0xff]  }
 0x422   : > { %v9125_v11 = vpop.f32.mrf.mxu1 }
 0x423   : > { %v13277_v62 = vadd.f32 %v9124_v51, %v13125_v60  ;;  %v2019_v60 = vsel %vm1403_vm4, %v1940_v44, %v2018_v21  ;;  %v2123_v44 = vshll.u32 %v14912_v17, 16  ;;  %v10561_v51 = vld [vmem:[%s14472_s3 + $0x5a8] sm:$0xff]  }
 0x424   : > { %v9126_v53 = vpop.f32.mrf.mxu1 }
 0x425   : > { %v9127_v22 = vadd.f32 %v9126_v53, %v9125_v11  ;;  %v10562_v11 = vld [vmem:[%s14472_s3 + $0x5e0] sm:$0xff]   ;;  %v2125_v53 = vrot.slane %v2123_v44, 2 }
 0x426   : > { %v9128_v29 = vpop.f32.mrf.mxu1  ;;  %5037 = vmatmul.mubr.bf16.vlgmr.msra.gmra.mxu1 %v1924_v32  ;;  %v10563_v32 = vld [vmem:[%s14472_s3 + $0x5a0] sm:$0xff]  }
 0x427   : > { %v13289_v20 = vadd.f32 %v9127_v22, %v13137_v13  ;;  %9585 = vmatpush3.bf16.msra.mxu1 %v10557_v41  ;;  %5044 = vmatprep.mubr.bf16.mxu1 %v2019_v60  ;;  %v2072_v13 = vor.u32 %v2071_v42, %v2068_v14  ;;  %v2122_v41 = vrot.slane %v2120_v2, 1  ;;  %v10564_v42 = vld [vmem:[%s14472_s3 + $0x5d8] sm:$0xff]   ;;  %v10566_v2 = vld [vmem:[%s14472_s3 + $0x5d0] sm:$0xff]  }
 0x428   : > { %v9129_v3 = vpop.f32.mrf.mxu1  ;;  %9586 = vmatprep.subr.bf16.mxu1 %v10558_v16  ;;  %v14913_v60 = vld [vmem:[#allocation65_spill] sm:$0xff] }
 0x429   : > { %v9130_v31 = vadd.f32 %v9129_v3, %v9128_v29 }
 0x42a   : > { %v9131_v5 = vpop.f32.mrf.mxu1 }
 0x42b   : > { %v13300_v37 = vadd.f32 %v9130_v31, %v13149_v43  ;;  %9587 = vmatpush3.bf16.msra.mxu1 %v10559_v25  ;;  %v2073_v43 = vsel %vm1403_vm4, %v2018_v21, %v2072_v13  ;;  %v2177_v21 = vshll.u32 %v14913_v60, 16 }
 0x42c   : > { %v9132_v9 = vpop.f32.mrf.mxu1  ;;  %9588 = vmatprep.subr.bf16.mxu1 %v10560_v33  ;;  %v10565_v33 = vld [vmem:[%s14472_s3 + $0x598] sm:$0xff]  }
 0x42d   : > { %v9133_v56 = vadd.f32 %v9132_v9, %v9131_v5 }
 0x42e   : > { %v9134_v16 = vpop.f32.mrf.mxu1  ;;  %5045 = vmatmul.mubr.bf16.gmra.mxu1 %v12508_v35  ;;  %v2174_v35 = vshrl.u32 %v14913_v60, 16 }
 0x42f   : > { %v13311_v22 = vadd.f32 %v9133_v56, %v13161_v61  ;;  %5052 = vmatprep.mubr.bf16.mxu1 %v2073_v43  ;;  %9589 = vmatpush3.bf16.msra.mxu1 %v10561_v51  ;;  %v2126_v61 = vor.u32 %v2125_v53, %v2122_v41  ;;  %v2179_v51 = vrot.slane %v2177_v21, 2  ;;  %v10567_v56 = vld [vmem:[%s14472_s3 + $0x590] sm:$0xff]   ;;  %v10568_v53 = vld [vmem:[%s14472_s3 + $0x5c8] sm:$0xff]  }
 0x430   : > { %v9135_v14 = vpop.f32.mrf.mxu1  ;;  %9590 = vmatprep.subr.bf16.mxu1 %v10562_v11  ;;  %v2176_v5 = vrot.slane %v2174_v35, 1  ;;  %v14914_v43 = vld [vmem:[#allocation68_spill] sm:$0xff]  ;;  %v10570_v35 = vld [vmem:[%s14472_s3 + $0x5c0] sm:$0xff]  }
 0x431   : > { %v9136_v29 = vadd.f32 %v9135_v14, %v9134_v16 }
 0x432   : > { %v9137_v25 = vpop.f32.mrf.mxu1 }
 0x433   : > { %v13322_v3 = vadd.f32 %v9136_v29, %v13173_v36  ;;  %9591 = vmatpush3.bf16.msra.mxu1 %v10563_v32  ;;  %v2127_v36 = vsel %vm1403_vm4, %v2072_v13, %v2126_v61  ;;  %v2231_v13 = vshll.u32 %v14914_v43, 16 }
 0x434   : > { %v9138_v31 = vpop.f32.mrf.mxu1  ;;  %9592 = vmatprep.subr.bf16.mxu1 %v10564_v42  ;;  %v10569_v42 = vld [vmem:[%s14472_s3 + $0x588] sm:$0xff]  }
 0x435   : > { %v9139_v44 = vadd.f32 %v9138_v31, %v9137_v25 }
 0x436   : > { %v9140_v9 = vpop.f32.mrf.mxu1  ;;  %5053 = vmatmul.mubr.bf16.gmra.mxu1 %v12518_v28  ;;  %v2228_v28 = vshrl.u32 %v14914_v43, 16 }
 0x437   : > { %v13333_v11 = vadd.f32 %v9139_v44, %v13185_v38  ;;  %5060 = vmatprep.mubr.bf16.mxu1 %v2127_v36  ;;  %9593 = vmatpush3.bf16.msra.mxu1 %v10565_v33  ;;  %v2180_v38 = vor.u32 %v2179_v51, %v2176_v5  ;;  %v2233_v33 = vrot.slane %v2231_v13, 2  ;;  %v10571_v44 = vld [vmem:[%s14472_s3 + $0x580] sm:$0xff]  }
 0x438   : > { %v9141_v41 = vpop.f32.mrf.mxu1  ;;  %9594 = vmatprep.subr.bf16.mxu1 %v10566_v2  ;;  %v2230_v25 = vrot.slane %v2228_v28, 1 }
 0x439   : > { %v9142_v16 = vadd.f32 %v9141_v41, %v9140_v9  ;;  %v14915_v9 = vld [vmem:[#allocation70_spill] sm:$0xff] }
 0x43a   : > { %v9143_v32 = vpop.f32.mrf.mxu1  ;;  %v2282_v36 = vshrl.u32 %v14915_v9, 16 }
 0x43b   : > { %v13344_v14 = vadd.f32 %v9142_v16, %v13197_v45  ;;  %9595 = vmatpush3.bf16.msra.mxu1 %v10567_v56  ;;  %v2181_v45 = vsel %vm1403_vm4, %v2126_v61, %v2180_v38  ;;  %v2285_v56 = vshll.u32 %v14915_v9, 16 }
 0x43c   : > { %v9144_v29 = vpop.f32.mrf.mxu1  ;;  %9596 = vmatprep.subr.bf16.mxu1 %v10568_v53  ;;  %v2284_v16 = vrot.slane %v2282_v36, 1 }
 0x43d   : > { %v9145_v21 = vadd.f32 %v9144_v29, %v9143_v32  ;;  %v2287_v28 = vrot.slane %v2285_v56, 2 }
 0x43e   : > { %v9146_v31 = vpop.f32.mrf.mxu1  ;;  %5061 = vmatmul.mubr.bf16.gmra.mxu1 %v12533_v59  ;;  %v2234_v59 = vor.u32 %v2233_v33, %v2230_v25  ;;  %v14916_v25 = vld [vmem:[#allocation69_spill] sm:$0xff] }
 0x43f   : > { %v13355_v2 = vadd.f32 %v9145_v21, %v13209_v24  ;;  %5068 = vmatprep.mubr.bf16.mxu1 %v2181_v45  ;;  %9597 = vmatpush3.bf16.msra.mxu1 %v10569_v42  ;;  %v2288_v21 = vor.u32 %v2287_v28, %v2284_v16  ;;  %v2345_v33 = vshrl.u32 %v14916_v25, 16 }
 0x440   : > { %v9147_v5 = vpop.f32.mrf.mxu1  ;;  %9598 = vmatprep.subr.bf16.mxu1 %v10570_v35  ;;  %v2235_v32 = vsel %vm1403_vm4, %v2180_v38, %v2234_v59 }
 0x441   : > { %v9148_v51 = vadd.f32 %v9147_v5, %v9146_v31  ;;  %v2348_v31 = vshll.u32 %v14916_v25, 16  ;;  %v2347_v38 = vrot.slane %v2345_v33, 1 }
 0x442   : > { %v9149_v41 = vpop.f32.mrf.mxu1 }
 0x443   : > { %v13363_v61 = vadd.f32 %v9148_v51, %v13221_v40  ;;  %9599 = vmatpush3.bf16.msra.mxu1 %v10571_v44  ;;  %v2350_v51 = vrot.slane %v2348_v31, 2 }
 0x444   : > { %v9150_v24 = vpop.f32.mrf.mxu1  ;;  %10286 = vmatprep.subr.bf16.mxu1 %v14752_v7 }
 0x445   : > { %v9151_v53 = vadd.f32 %v9150_v24, %v9149_v41  ;;  %v2336_v24 = vshrl.u32 %v12472_v34, 16  ;;  %v2351_v16 = vor.u32 %v2350_v51, %v2347_v38  ;;  %v1862_v51 = vrot.slane %v14871_v15, 7 }
 0x446   : > { %v9152_v13 = vpop.f32.mrf.mxu1  ;;  %5069 = vmatmul.mubr.bf16.gmra.mxu1 %v12536_v8 }
 0x447   : > { %v13369_v42 = vadd.f32 %v9151_v53, %v13227_v12  ;;  %5076 = vmatprep.mubr.bf16.mxu1 %v2235_v32  ;;  %v2289_v12 = vsel %vm1403_vm4, %v2234_v59, %v2288_v21 }
 0x448   : > { %v9153_v29 = vpop.f32.mrf.mxu1 }
 0x449   : > { %v9154_v35 = vadd.f32 %v9153_v29, %v9152_v13  ;;  %v2338_v13 = vrot.slane %v2336_v24, 1  ;;  %v14917_v29 = vld [vmem:[#allocation7_spill] sm:$0xff] }
 0x44a   : > { %v9155_v40 = vpop.f32.mrf.mxu1 }
 0x44b   : > { %v13374_v45 = vadd.f32 %v9154_v35, %v13233_v52  ;;  %v2339_v52 = vshll.u32 %v12472_v34, 16  ;;  %v1859_v35 = vrot.slane %v14867_v46, 7  ;;  %v14921_v46 = vld [vmem:[#allocation28_spill] sm:$0xff] }
 0x44c   : > { %v9156_v44 = vpop.f32.mrf.mxu1 }
 0x44d   : > { %v9157_v5 = vadd.f32 %v9156_v44, %v9155_v40  ;;  %v2341_v59 = vrot.slane %v2339_v52, 2  ;;  %v14918_v44 = vld [vmem:[#allocation43_spill] sm:$0xff] }
 0x44e   : > { %v9158_v8 = vpop.f32.mrf.mxu1  ;;  %5077 = vmatmul.mubr.bf16.gmra.mxu1 %v12542_v54 }
 0x44f   : > { %v13379_v36 = vadd.f32 %v9157_v5, %v13239_v10  ;;  %5084 = vmatprep.mubr.bf16.mxu1 %v2289_v12  ;;  %v2352_v10 = vsel %vm1403_vm4, %v2288_v21, %v2351_v16  ;;  %v2342_v31 = vor.u32 %v2341_v59, %v2338_v13  ;;  %v1860_v5 = vor.u32 %v1859_v35, %v14918_v44 }
 0x450   : > { %v9159_v56 = vpop.f32.mrf.mxu1 }
 0x451   : > { %v9160_v41 = vadd.f32 %v9159_v56, %v9158_v8  ;;  %v14919_v8 = vld [vmem:[#allocation37_spill] sm:$0xff] }
 0x452   : > { %v9161_v53 = vpop.f32.mrf.mxu1  ;;  %v1857_v12 = vrot.slane %v14919_v8, 7 }
 0x453   : > { %v13384_v28 = vadd.f32 %v9160_v41, %v13245_v18  ;;  %v14920_v41 = vld [vmem:[#allocation5_spill] sm:$0xff] }
 0x454   : > { %v9162_v54 = vpop.f32.mrf.mxu1  ;;  %v2343_v21 = vsel %vm1403_vm4, %v14920_v41, %v2342_v31  ;;  %v1861_v53 = vsel %vm1856_vm11, %v1857_v12, %v1860_v5 }
 0x456   : > { %v9180_v32 = vpop.f32.mrf.mxu1  ;;  %5085 = vmatmul.mubr.bf16.gmra.mxu1 %v14917_v29 }
 0x457   : > { %5092 = vmatprep.mubr.bf16.mxu1 %v2352_v10  ;;  %v1985_v10 = vshrl.u32 %v1861_v53, 16 }
 0x458   : > { %v9181_v40 = vpop.f32.mrf.mxu1 }
 0x459   : > { %v9182_v33 = vadd.f32 %v9181_v40, %v9180_v32  ;;  %v14923_v32 = vld [vmem:[#allocation48_spill] sm:$0xff]  ;;  %v1988_v40 = vshll.u32 %v1861_v53, 16 }
 0x45a   : > { %v9183_v34 = vpop.f32.mrf.mxu1  ;;  %v1863_v29 = vor.u32 %v1862_v51, %v14923_v32 }
 0x45b   : > { %v4623_v18 = vadd.f32 %v9182_v33, %v13252_v1  ;;  %v14922_v1 = vld [vmem:[#allocation38_spill] sm:$0xff]  ;;  %v14924_v33 = vld [vmem:[#allocation75_spill] sm:$0xff]  ;;  %v1990_v41 = vrot.slane %v1988_v40, 2 }
 0x45c   : > { %v9184_v38 = vpop.f32.mrf.mxu1  ;;  %v1858_v13 = vor.u32 %v1857_v12, %v14922_v1 }
 0x45d   : > { %v9185_v56 = vadd.f32 %v9184_v38, %v9183_v34  ;;  %v13396_v24 = vadd.f32 %v14921_v46, %v4623_v18 }
 0x45e   : > { %v9186_v52 = vpop.f32.mrf.mxu1  ;;  %5093 = vmatmul.mubr.bf16.gmra.mxu1 %v2343_v21  ;;  %v1977_v8 = vshrl.u32 %v1858_v13, 16  ;;  %v1980_v38 = vshll.u32 %v1858_v13, 16  ;;  %v14925_v21 = vld [vmem:[#allocation76_spill] sm:$0xff] }
 0x45f   : > { %v4626_v54 = vadd.f32 %v9185_v56, %v13258_v6  ;;  %5100 = vmatprep.mubr.bf16.mxu1 %v2351_v16  ;;  %v1864_v6 = vsel %vm1856_vm11, %v1859_v35, %v1863_v29  ;;  %v1865_v16 = vrot.slane %v14875_v55, 7  ;;  %v1987_v56 = vrot.slane %v1985_v10, 1 }
 0x460   : > { %v9187_v59 = vpop.f32.mrf.mxu1  ;;  %v2039_v13 = vshrl.u32 %v1864_v6, 16  ;;  %v2042_v29 = vshll.u32 %v1864_v6, 16 }
 0x461   : > { %v9188_v15 = vadd.f32 %v9187_v59, %v9186_v52  ;;  %v13403_v34 = vadd.f32 %v14924_v33, %v4626_v54  ;;  %v1982_v54 = vrot.slane %v1980_v38, 2  ;;  %v14926_v59 = vld [vmem:[#allocation4_spill] sm:$0xff]  ;;  %v1991_v55 = vor.u32 %v1990_v41, %v1987_v56 }
 0x462   : > { %v9189_v44 = vpop.f32.mrf.mxu1  ;;  %v1866_v35 = vor.u32 %v1865_v16, %v14926_v59  ;;  %v14931_v59 = vld [vmem:[#allocation79_spill] sm:$0xff] }
 0x463   : > { %v4631_v18 = vadd.f32 %v9188_v15, %v13266_v30  ;;  %v1979_v30 = vrot.slane %v1977_v8, 1  ;;  %v14927_v15 = vld [vmem:[#allocation78_spill] sm:$0xff] }
 0x464   : > { %v9190_v5 = vpop.f32.mrf.mxu1 }
 0x465   : > { %v9191_v12 = vadd.f32 %v9190_v5, %v9189_v44  ;;  %v13409_v46 = vadd.f32 %v14925_v21, %v4631_v18  ;;  %v14928_v18 = vld [vmem:[#allocation49_spill] sm:$0xff]  ;;  %v14929_v21 = vld [vmem:[#allocation35_spill] sm:$0xff] }
 0x466   : > { %v9192_v52 = vpop.f32.mrf.mxu1  ;;  %5101 = vmatmul.mubr.bf16.gmra.mxu1 %v2342_v31  ;;  %v1983_v31 = vor.u32 %v1982_v54, %v1979_v30  ;;  %v1868_v8 = vrot.slane %v14928_v18, 7 }
 0x467   : > { %v4634_v53 = vadd.f32 %v9191_v12, %v13272_v23  ;;  %5244 = vmatprep.mubr.bf16.mxu1 %v14907_v47  ;;  %v2041_v23 = vrot.slane %v2039_v13, 1  ;;  %v1867_v47 = vsel %vm1856_vm11, %v1862_v51, %v1866_v35  ;;  %v2044_v12 = vrot.slane %v2042_v29, 2  ;;  %v10573_v29 = vld [vmem:[%s14472_s3 + $0x630] sm:$0xff]  }
 0x468   : > { %v9193_v1 = vpop.f32.mrf.mxu1  ;;  %v1992_v5 = vsel %vm1403_vm4, %v1983_v31, %v1991_v55  ;;  %v2096_v13 = vshll.u32 %v1867_v47, 16 }
 0x469   : > { %v9194_v32 = vadd.f32 %v9193_v1, %v9192_v52  ;;  %v13415_v10 = vadd.f32 %v14927_v15, %v4634_v53  ;;  %v2093_v52 = vshrl.u32 %v1867_v47, 16  ;;  %v14930_v53 = vld [vmem:[#allocation14_spill] sm:$0xff]  ;;  %v2045_v1 = vor.u32 %v2044_v12, %v2041_v23  ;;  %v14932_v47 = vld [vmem:[#allocation39_spill] sm:$0xff] }
 0x46a   : > { %v9195_v40 = vpop.f32.mrf.mxu1  ;;  %v1869_v30 = vor.u32 %v1868_v8, %v14930_v53  ;;  %v2098_v23 = vrot.slane %v2096_v13, 2 }
 0x46b   : > { %v4639_v33 = vadd.f32 %v9194_v32, %v13277_v62  ;;  %v10572_v62 = vld [vmem:[%s14472_s3 + $0x638] sm:$0xff]   ;;  %v2095_v15 = vrot.slane %v2093_v52, 1 }
 0x46c   : > { %v9196_v44 = vpop.f32.mrf.mxu1 }
 0x46d   : > { %v9197_v38 = vadd.f32 %v9196_v44, %v9195_v40  ;;  %v13422_v56 = vadd.f32 %v14929_v21, %v4639_v33  ;;  %v1870_v40 = vsel %vm1856_vm11, %v1865_v16, %v1869_v30  ;;  %v1871_v33 = vrot.slane %v11867_v63, 7 }
 0x46e   : > { %v9198_v6 = vpop.f32.mrf.mxu1  ;;  %5245 = vmatmul.mubr.bf16.vlgmr.msra.gmra.mxu1 %v1992_v5  ;;  %v2046_v44 = vsel %vm1403_vm4, %v1991_v55, %v2045_v1  ;;  %v10574_v5 = vld [vmem:[%s14472_s3 + $0x628] sm:$0xff]   ;;  %v2147_v63 = vshrl.u32 %v1870_v40, 16  ;;  %v2150_v12 = vshll.u32 %v1870_v40, 16  ;;  %v2099_v21 = vor.u32 %v2098_v23, %v2095_v15  ;;  %v10576_v15 = vld [vmem:[%s14472_s3 + $0x618] sm:$0xff]  }
 0x46f   : > { %v4642_v41 = vadd.f32 %v9197_v38, %v13289_v20  ;;  %10294 = vmatpush3.bf16.msra.mxu1 %v10572_v62  ;;  %5252 = vmatprep.mubr.bf16.mxu1 %v14909_v58  ;;  %v14936_v23 = vld [vmem:[#allocation81_spill] sm:$0xff] }
 0x470   : > { %v9199_v51 = vpop.f32.mrf.mxu1  ;;  %10287 = vmatprep.subr.bf16.mxu1 %v14752_v7  ;;  %v2149_v53 = vrot.slane %v2147_v63, 1  ;;  %v2152_v30 = vrot.slane %v2150_v12, 2  ;;  %v2100_v13 = vsel %vm1403_vm4, %v2045_v1, %v2099_v21 }
 0x471   : > { %v9200_v54 = vadd.f32 %v9199_v51, %v9198_v6  ;;  %v13432_v35 = vadd.f32 %v14931_v59, %v4642_v41  ;;  %v1872_v6 = vor.u32 %v1871_v33, %v11870_v39  ;;  %v14933_v41 = vld [vmem:[#allocation80_spill] sm:$0xff]  ;;  %v10575_v51 = vld [vmem:[%s14472_s3 + $0x620] sm:$0xff]  }
 0x472   : > { %v9201_v20 = vpop.f32.mrf.mxu1  ;;  %v14934_v59 = vld [vmem:[#allocation44_spill] sm:$0xff] }
 0x473   : > { %v4647_v32 = vadd.f32 %v9200_v54, %v13300_v37  ;;  %10295 = vmatpush3.bf16.msra.mxu1 %v10573_v29  ;;  %v1873_v39 = vsel %vm1856_vm11, %v1868_v8, %v1872_v6 }
 0x474   : > { %v9202_v58 = vpop.f32.mrf.mxu1  ;;  %10288 = vmatprep.subr.bf16.mxu1 %v14752_v7  ;;  %v2201_v1 = vshrl.u32 %v1873_v39, 16 }
 0x475   : > { %v9203_v31 = vadd.f32 %v9202_v58, %v9201_v20  ;;  %v13443_v18 = vadd.f32 %v14932_v47, %v4647_v32 }
 0x476   : > { %v9204_v37 = vpop.f32.mrf.mxu1  ;;  %5253 = vmatmul.mubr.bf16.gmra.mxu1 %v2046_v44  ;;  %v2153_v44 = vor.u32 %v2152_v30, %v2149_v53  ;;  %v2203_v63 = vrot.slane %v2201_v1, 1  ;;  %v10578_v30 = vld [vmem:[%s14472_s3 + $0x608] sm:$0xff]  }
 0x477   : > { %v4650_v38 = vadd.f32 %v9203_v31, %v13311_v22  ;;  %5260 = vmatprep.mubr.bf16.mxu1 %v14911_v48  ;;  %10296 = vmatpush3.bf16.msra.mxu1 %v10574_v5  ;;  %v2204_v31 = vshll.u32 %v1873_v39, 16  ;;  %v10577_v5 = vld [vmem:[%s14472_s3 + $0x610] sm:$0xff]  }
 0x478   : > { %v9205_v16 = vpop.f32.mrf.mxu1  ;;  %10289 = vmatprep.subr.bf16.mxu1 %v14752_v7  ;;  %v14940_v39 = vld [vmem:[#allocation56_spill] sm:$0xff] }
 0x479   : > { %v9206_v55 = vadd.f32 %v9205_v16, %v9204_v37  ;;  %v13453_v62 = vadd.f32 %v14933_v41, %v4650_v38  ;;  %v14937_v38 = vld [vmem:[#allocation25_spill] sm:$0xff]  ;;  %v2206_v12 = vrot.slane %v2204_v31, 2 }
 0x47a   : > { %v9207_v22 = vpop.f32.mrf.mxu1 }
 0x47b   : > { %v4655_v48 = vadd.f32 %v9206_v55, %v13322_v3  ;;  %10297 = vmatpush3.bf16.msra.mxu1 %v10575_v51  ;;  %v14935_v3 = vld [vmem:[#allocation10_spill] sm:$0xff]  ;;  %v14938_v55 = vld [vmem:[#allocation60_spill] sm:$0xff] }
 0x47c   : > { %v9208_v52 = vpop.f32.mrf.mxu1  ;;  %10290 = vmatprep.subr.bf16.mxu1 %v14752_v7  ;;  %v1874_v29 = vrot.slane %v14935_v3, 7  ;;  %v1877_v6 = vrot.slane %v14938_v55, 7 }
 0x47d   : > { %v9209_v54 = vadd.f32 %v9208_v52, %v9207_v22  ;;  %v13463_v20 = vadd.f32 %v14934_v59, %v4655_v48  ;;  %v2154_v22 = vsel %vm1403_vm4, %v2099_v21, %v2153_v44  ;;  %v14939_v48 = vld [vmem:[#allocation54_spill] sm:$0xff] }
 0x47e   : > { %v9210_v32 = vpop.f32.mrf.mxu1  ;;  %5261 = vmatmul.mubr.bf16.gmra.mxu1 %v2100_v13  ;;  %v2207_v13 = vor.u32 %v2206_v12, %v2203_v63  ;;  %v1878_v21 = vor.u32 %v1877_v6, %v14940_v39 }
 0x47f   : > { %v4658_v58 = vadd.f32 %v9209_v54, %v13333_v11  ;;  %5268 = vmatprep.mubr.bf16.mxu1 %v14912_v17  ;;  %10298 = vmatpush3.bf16.msra.mxu1 %v10576_v15  ;;  %v1875_v11 = vor.u32 %v1874_v29, %v14937_v38  ;;  %v10579_v15 = vld [vmem:[%s14472_s3 + $0x600] sm:$0xff]  }
 0x480   : > { %v9211_v40 = vpop.f32.mrf.mxu1  ;;  %10291 = vmatprep.subr.bf16.mxu1 %v14752_v7  ;;  %v2208_v1 = vsel %vm1403_vm4, %v2153_v44, %v2207_v13  ;;  %v1879_v31 = vsel %vm1856_vm11, %v1874_v29, %v1878_v21  ;;  %v14942_v38 = vld [vmem:[#allocation58_spill] sm:$0xff]  ;;  %v14944_v29 = vld [vmem:[#allocation13_spill] sm:$0xff] }
 0x481   : > { %v9212_v8 = vadd.f32 %v9211_v40, %v9210_v32  ;;  %v13473_v47 = vadd.f32 %v14936_v23, %v4658_v58  ;;  %v14941_v58 = vld [vmem:[#allocation11_spill] sm:$0xff]  ;;  %v2309_v12 = vshrl.u32 %v1879_v31, 16  ;;  %v2312_v55 = vshll.u32 %v1879_v31, 16 }
 0x482   : > { %v9213_v37 = vpop.f32.mrf.mxu1  ;;  %v14947_v31 = vld [vmem:[#allocation15_spill] sm:$0xff] }
 0x483   : > { %v4663_v17 = vadd.f32 %v9212_v8, %v13344_v14  ;;  %10299 = vmatpush3.bf16.msra.mxu1 %v10577_v5  ;;  %v1876_v14 = vsel %vm1856_vm11, %v1871_v33, %v1875_v11  ;;  %v14943_v5 = vld [vmem:[#allocation19_spill] sm:$0xff]  ;;  %v2314_v39 = vrot.slane %v2312_v55, 2 }
 0x484   : > { %v9214_v16 = vpop.f32.mrf.mxu1  ;;  %10292 = vmatprep.subr.bf16.mxu1 %v14752_v7  ;;  %v2255_v32 = vshrl.u32 %v1876_v14, 16  ;;  %v2258_v3 = vshll.u32 %v1876_v14, 16 }
 0x485   : > { %v9215_v41 = vadd.f32 %v9214_v16, %v9213_v37  ;;  %v13484_v51 = vadd.f32 %v14939_v48, %v4663_v17 }
 0x486   : > { %v9216_v52 = vpop.f32.mrf.mxu1  ;;  %5269 = vmatmul.mubr.bf16.gmra.mxu1 %v2154_v22  ;;  %v2257_v23 = vrot.slane %v2255_v32, 1  ;;  %v2260_v37 = vrot.slane %v2258_v3, 2  ;;  %v2380_v3 = vrot.slane %v14943_v5, 1 }
 0x487   : > { %v4666_v53 = vadd.f32 %v9215_v41, %v13355_v2  ;;  %5276 = vmatprep.mubr.bf16.mxu1 %v14913_v60  ;;  %10300 = vmatpush3.bf16.msra.mxu1 %v10578_v30 }
 0x488   : > { %v9217_v54 = vpop.f32.mrf.mxu1  ;;  %10293 = vmatprep.subr.bf16.mxu1 %v14752_v7  ;;  %v2261_v41 = vor.u32 %v2260_v37, %v2257_v23 }
 0x489   : > { %v9218_v59 = vadd.f32 %v9217_v54, %v9216_v52  ;;  %v13495_v33 = vadd.f32 %v14941_v58, %v4666_v53  ;;  %v14945_v52 = vld [vmem:[#allocation71_spill] sm:$0xff]  ;;  %v2311_v54 = vrot.slane %v2309_v12, 1 }
 0x48a   : > { %v9219_v2 = vpop.f32.mrf.mxu1  ;;  %v2381_v58 = vrot.slane %v14945_v52, 2 }
 0x48b   : > { %v4671_v60 = vadd.f32 %v9218_v59, %v13363_v61  ;;  %10301 = vmatpush3.bf16.msra.mxu1 %v10579_v15  ;;  %v1883_v61 = vrot.slane %v14943_v5, 7  ;;  %v2315_v15 = vor.u32 %v2314_v39, %v2311_v54 }
 0x48c   : > { %v9220_v40 = vpop.f32.mrf.mxu1  ;;  %v2382_v37 = vor.u32 %v2381_v58, %v2380_v3  ;;  %v14951_v58 = vld [vmem:[#allocation9_spill] sm:$0xff] }
 0x48d   : > { %v9221_v8 = vadd.f32 %v9220_v40, %v9219_v2  ;;  %v13504_v11 = vadd.f32 %v14942_v38, %v4671_v60  ;;  %v1886_v14 = vor.u32 %v14945_v52, %v1883_v61  ;;  %v2316_v5 = vsel %vm1403_vm4, %v2261_v41, %v2315_v15 }
 0x48e   : > { %v9222_v17 = vpop.f32.mrf.mxu1  ;;  %5277 = vmatmul.mubr.bf16.gmra.mxu1 %v2208_v1 }
 0x48f   : > { %v4674_v16 = vadd.f32 %v9221_v8, %v13369_v42  ;;  %5284 = vmatprep.mubr.bf16.mxu1 %v14914_v43  ;;  %v2262_v42 = vsel %vm1403_vm4, %v2207_v13, %v2261_v41  ;;  %v14946_v43 = vld [vmem:[#allocation63_spill] sm:$0xff]  ;;  %v1887_v2 = vsel %vm1856_vm11, %v1877_v6, %v1886_v14  ;;  %v14949_v14 = vld [vmem:[#allocation6_spill] sm:$0xff] }
 0x490   : > { %v9223_v63 = vpop.f32.mrf.mxu1  ;;  %v2372_v1 = vshrl.u32 %v1887_v2, 16  ;;  %v2375_v13 = vshll.u32 %v1887_v2, 16 }
 0x491   : > { %v9224_v44 = vadd.f32 %v9223_v63, %v9222_v17  ;;  %v13510_v22 = vadd.f32 %v14944_v29, %v4674_v16  ;;  %v2383_v63 = vsel %vm1403_vm4, %v14916_v25, %v2382_v37 }
 0x492   : > { %v9225_v48 = vpop.f32.mrf.mxu1  ;;  %v2374_v6 = vrot.slane %v2372_v1, 1  ;;  %v2377_v61 = vrot.slane %v2375_v13, 2 }
 0x493   : > { %v4679_v53 = vadd.f32 %v9224_v44, %v13374_v45 }
 0x494   : > { %v9226_v30 = vpop.f32.mrf.mxu1  ;;  %v2378_v44 = vor.u32 %v2377_v61, %v2374_v6 }
 0x495   : > { %v9227_v21 = vadd.f32 %v9226_v30, %v9225_v48  ;;  %v13516_v59 = vadd.f32 %v14946_v43, %v4679_v53 }
 0x496   : > { %v9228_v32 = vpop.f32.mrf.mxu1  ;;  %5285 = vmatmul.mubr.bf16.gmra.mxu1 %v2262_v42  ;;  %v2379_v41 = vsel %vm1403_vm4, %v2315_v15, %v2378_v44 }
 0x497   : > { %v4682_v60 = vadd.f32 %v9227_v21, %v13379_v36  ;;  %5292 = vmatprep.mubr.bf16.mxu1 %v14915_v9  ;;  %v14948_v36 = vld [vmem:[#allocation66_spill] sm:$0xff] }
 0x498   : > { %v9229_v45 = vpop.f32.mrf.mxu1  ;;  %v14950_v21 = vld [vmem:[#allocation18_spill] sm:$0xff] }
 0x499   : > { %v9230_v40 = vadd.f32 %v9229_v45, %v9228_v32  ;;  %v13524_v8 = vadd.f32 %v14947_v31, %v4682_v60 }
 0x49a   : > { %v9231_v23 = vpop.f32.mrf.mxu1 }
 0x49b   : > { %v4687_v38 = vadd.f32 %v9230_v40, %v13384_v28  ;;  %v14952_v40 = vld [vmem:[#allocation26_spill] sm:$0xff] }
 0x49c   : > { %v9232_v17 = vpop.f32.mrf.mxu1 }
 0x49d   : > { %v13529_v16 = vadd.f32 %v14948_v36, %v4687_v38  ;;  %v14955_v36 = vld [vmem:[#allocation50_spill] sm:$0xff] }
 0x49e   : > { %v9320_v9 = vpop.f32.mrf.mxu1  ;;  %5293 = vmatmul.mubr.bf16.gmra.mxu1 %v2316_v5  ;;  %v14954_v5 = vld [vmem:[#allocation77_spill] sm:$0xff] }
 0x49f   : > { %5300 = vmatprep.mubr.bf16.mxu1 %v2383_v63 }
 0x4a0   : > { %v9321_v12 = vpop.f32.mrf.mxu1 }
 0x4a1   : > { %v9322_v55 = vadd.f32 %v9321_v12, %v9320_v9 }
 0x4a2   : > { %v9323_v29 = vpop.f32.mrf.mxu1 }
 0x4a3   : > { %v4831_v28 = vadd.f32 %v9322_v55, %v13396_v24 }
 0x4a4   : > { %v9324_v48 = vpop.f32.mrf.mxu1 }
 0x4a5   : > { %v9325_v52 = vadd.f32 %v9324_v48, %v9323_v29  ;;  %v13536_v53 = vadd.f32 %v14949_v14, %v4831_v28  ;;  %v14957_v48 = vld [vmem:[#allocation34_spill] sm:$0xff] }
 0x4a6   : > { %v9326_v30 = vpop.f32.mrf.mxu1  ;;  %5301 = vmatmul.mubr.bf16.gmra.mxu1 %v2379_v41  ;;  %v14958_v41 = vld [vmem:[#allocation52_spill] sm:$0xff] }
 0x4a7   : > { %v4834_v54 = vadd.f32 %v9325_v52, %v13403_v34  ;;  %5308 = vmatprep.mubr.bf16.mxu1 %v2382_v37  ;;  %v14953_v37 = vld [vmem:[#allocation31_spill] sm:$0xff] }
 0x4a8   : > { %v9327_v25 = vpop.f32.mrf.mxu1 }
 0x4a9   : > { %v9328_v39 = vadd.f32 %v9327_v25, %v9326_v30  ;;  %v13540_v42 = vadd.f32 %v14950_v21, %v4834_v54 }
 0x4aa   : > { %v9329_v43 = vpop.f32.mrf.mxu1 }
 0x4ab   : > { %v4839_v24 = vadd.f32 %v9328_v39, %v13409_v46  ;;  %v14959_v39 = vld [vmem:[#allocation41_spill] sm:$0xff] }
 0x4ac   : > { %v9330_v32 = vpop.f32.mrf.mxu1 }
 0x4ad   : > { %v9331_v3 = vadd.f32 %v9330_v32, %v9329_v43  ;;  %v13544_v2 = vadd.f32 %v14951_v58, %v4839_v24  ;;  %v14960_v58 = vld [vmem:[#allocation55_spill] sm:$0xff] }
 0x4ae   : > { %v9332_v60 = vpop.f32.mrf.mxu1  ;;  %5309 = vmatmul.mubr.bf16.gmra.mxu1 %v2378_v44  ;;  %v14956_v44 = vld [vmem:[#allocation36_spill] sm:$0xff] }
 0x4af   : > { %v4842_v45 = vadd.f32 %v9331_v3, %v13415_v10  ;;  %10218 = vmatprep.mubr.msk.bf16.mxu1 %vm10809_vm0, %v14752_v7 }
 0x4b0   : > { %v9333_v34 = vpop.f32.mrf.mxu1 }
 0x4b1   : > { %v9334_v15 = vadd.f32 %v9333_v34, %v9332_v60  ;;  %v13550_v1 = vadd.f32 %v14952_v40, %v4842_v45  ;;  %v14961_v40 = vld [vmem:[#allocation46_spill] sm:$0xff] }
 0x4b2   : > { %v9335_v13 = vpop.f32.mrf.mxu1 }
 0x4b3   : > { %v4847_v46 = vadd.f32 %v9334_v15, %v13422_v56 }
 0x4b4   : > { %v9336_v31 = vpop.f32.mrf.mxu1 }
 0x4b5   : > { %v9337_v23 = vadd.f32 %v9336_v31, %v9335_v13  ;;  %v13554_v38 = vadd.f32 %v14953_v37, %v4847_v46  ;;  %v14962_v37 = vld [vmem:[#allocation59_spill] sm:$0xff] }
 0x4b6   : > { %v9338_v17 = vpop.f32.mrf.mxu1  ;;  %10219 = vmatmul.mubr.bf16.vlgmr.msra.gmra.mxu1 %v14954_v5 }
 0x4b7   : > { %v4850_v10 = vadd.f32 %v9337_v23, %v13432_v35  ;;  %10222 = vmatprep.mubr.msk.bf16.mxu1 %vm10809_vm0, %v14752_v7 }
 0x4b8   : > { %v9339_v6 = vpop.f32.mrf.mxu1 }
 0x4b9   : > { %v9340_v61 = vadd.f32 %v9339_v6, %v9338_v17  ;;  %v13561_v9 = vadd.f32 %v14955_v36, %v4850_v10 }
 0x4ba   : > { %v9341_v63 = vpop.f32.mrf.mxu1 }
 0x4bb   : > { %v4855_v56 = vadd.f32 %v9340_v61, %v13443_v18  ;;  %v14963_v61 = vld [vmem:[#allocation20_spill] sm:$0xff] }
 0x4bc   : > { %v9342_v12 = vpop.f32.mrf.mxu1 }
 0x4bd   : > { %v9343_v55 = vadd.f32 %v9342_v12, %v9341_v63  ;;  %v13565_v29 = vadd.f32 %v14956_v44, %v4855_v56 }
 0x4be   : > { %v9344_v28 = vpop.f32.mrf.mxu1  ;;  %10223 = vmatmul.mubr.bf16.gmra.mxu1 %v14957_v48 }
 0x4bf   : > { %v4858_v35 = vadd.f32 %v9343_v55, %v13453_v62  ;;  %v14964_v55 = vld [vmem:[#allocation62_spill] sm:$0xff] }
 0x4c0   : > { %v9345_v52 = vpop.f32.mrf.mxu1 }
 0x4c1   : > { %v9346_v7 = vadd.f32 %v9345_v52, %v9344_v28  ;;  %v13570_v14 = vadd.f32 %v14958_v41, %v4858_v35  ;;  %v14965_v52 = vld [vmem:[#allocation16_spill] sm:$0xff] }
 0x4c2   : > { %v9347_v30 = vpop.f32.mrf.mxu1 }
 0x4c3   : > { %v4863_v54 = vadd.f32 %v9346_v7, %v13463_v20 }
 0x4c4   : > { %v9348_v25 = vpop.f32.mrf.mxu1 }
 0x4c5   : > { %v9349_v18 = vadd.f32 %v9348_v25, %v9347_v30  ;;  %v13574_v21 = vadd.f32 %v14959_v39, %v4863_v54  ;;  %v14966_v25 = vld [vmem:[#allocation22_spill] sm:$0xff] }
 0x4c6   : > { %v9350_v43 = vpop.f32.mrf.mxu1 }
 0x4c7   : > { %v4866_v24 = vadd.f32 %v9349_v18, %v13473_v47 }
 0x4c8   : > { %v9351_v32 = vpop.f32.mrf.mxu1 }
 0x4c9   : > { %v9352_v3 = vadd.f32 %v9351_v32, %v9350_v43  ;;  %v13578_v62 = vadd.f32 %v14960_v58, %v4866_v24  ;;  %v14967_v24 = vld [vmem:[#allocation67_spill] sm:$0xff] }
 0x4ca   : > { %v9353_v60 = vpop.f32.mrf.mxu1 }
 0x4cb   : > { %v4871_v45 = vadd.f32 %v9352_v3, %v13484_v51 }
 0x4cc   : > { %v9354_v34 = vpop.f32.mrf.mxu1 }
 0x4cd   : > { %v9355_v15 = vadd.f32 %v9354_v34, %v9353_v60  ;;  %v13582_v20 = vadd.f32 %v14961_v40, %v4871_v45 }
 0x4ce   : > { %v9356_v13 = vpop.f32.mrf.mxu1 }
 0x4cf   : > { %v4874_v46 = vadd.f32 %v9355_v15, %v13495_v33  ;;  %v14968_v15 = vld [vmem:[#allocation8_spill] sm:$0xff] }
 0x4d0   : > { %v9357_v31 = vpop.f32.mrf.mxu1 }
 0x4d1   : > { %v9358_v23 = vadd.f32 %v9357_v31, %v9356_v13  ;;  %v13586_v47 = vadd.f32 %v14962_v37, %v4874_v46 }
 0x4d2   : > { %v9359_v17 = vpop.f32.mrf.mxu1 }
 0x4d3   : > { %v4879_v5 = vadd.f32 %v9358_v23, %v13504_v11  ;;  %v14969_v23 = vld [vmem:[#allocation64_spill] sm:$0xff] }
 0x4d4   : > { %v9360_v10 = vpop.f32.mrf.mxu1 }
 0x4d5   : > { %v9361_v6 = vadd.f32 %v9360_v10, %v9359_v17  ;;  %v13590_v51 = vadd.f32 %v14963_v61, %v4879_v5  ;;  %v14970_v61 = vld [vmem:[#allocation24_spill] sm:$0xff] }
 0x4d6   : > { %v9362_v36 = vpop.f32.mrf.mxu1 }
 0x4d7   : > { %v4882_v63 = vadd.f32 %v9361_v6, %v13510_v22 }
 0x4d8   : > { %v9363_v56 = vpop.f32.mrf.mxu1 }
 0x4d9   : > { %v9364_v12 = vadd.f32 %v9363_v56, %v9362_v36  ;;  %v13594_v33 = vadd.f32 %v14964_v55, %v4882_v63  ;;  %v14971_v55 = vld [vmem:[#allocation32_spill] sm:$0xff] }
 0x4da   : > { %v9365_v44 = vpop.f32.mrf.mxu1 }
 0x4db   : > { %v4887_v28 = vadd.f32 %v9364_v12, %v13516_v59 }
 0x4dc   : > { %v9366_v48 = vpop.f32.mrf.mxu1 }
 0x4dd   : > { %v9367_v35 = vadd.f32 %v9366_v48, %v9365_v44  ;;  %v13598_v11 = vadd.f32 %v14965_v52, %v4887_v28  ;;  %v14972_v52 = vld [vmem:[#allocation33_spill] sm:$0xff] }
 0x4de   : > { %v9368_v7 = vpop.f32.mrf.mxu1 }
 0x4df   : > { %v4890_v41 = vadd.f32 %v9367_v35, %v13524_v8 }
 0x4e0   : > { %v9369_v30 = vpop.f32.mrf.mxu1 }
 0x4e1   : > { %v9370_v54 = vadd.f32 %v9369_v30, %v9368_v7  ;;  %v13602_v22 = vadd.f32 %v14966_v25, %v4890_v41  ;;  %v14973_v25 = vld [vmem:[#allocation29_spill] sm:$0xff] }
 0x4e2   : > { %v9371_v18 = vpop.f32.mrf.mxu1 }
 0x4e3   : > { %v4895_v39 = vadd.f32 %v9370_v54, %v13529_v16 }
 0x4e4   : > { %v9372_v43 = vpop.f32.mrf.mxu1 }
 0x4e5   : > { %v13606_v32 = vadd.f32 %v14967_v24, %v4895_v39 }
 0x4e6   : > { %v9460_v59 = vpop.f32.mrf.mxu1 }
 0x4e8   : > { %v9461_v3 = vpop.f32.mrf.mxu1 }
 0x4e9   : > { %v9462_v58 = vadd.f32 %v9461_v3, %v9460_v59  ;;  %v14974_v59 = vld [vmem:[#allocation30_spill] sm:$0xff] }
 0x4ea   : > { %v9463_v60 = vpop.f32.mrf.mxu1 }
 0x4eb   : > { %v5039_v45 = vadd.f32 %v9462_v58, %v13536_v53 }
 0x4ec   : > { %v9464_v34 = vpop.f32.mrf.mxu1 }
 0x4ed   : > { %v9465_v8 = vadd.f32 %v9464_v34, %v9463_v60  ;;  %v13610_v40 = vadd.f32 %v14968_v15, %v5039_v45  ;;  %v14975_v34 = vld [vmem:[#allocation42_spill] sm:$0xff] }
 0x4ee   : > { %v9466_v13 = vpop.f32.mrf.mxu1 }
 0x4ef   : > { %v5042_v46 = vadd.f32 %v9465_v8, %v13540_v42 }
 0x4f0   : > { %v9467_v31 = vpop.f32.mrf.mxu1 }
 0x4f1   : > { %v9468_v16 = vadd.f32 %v9467_v31, %v9466_v13  ;;  %v13614_v37 = vadd.f32 %v14969_v23, %v5042_v46  ;;  %v14976_v31 = vld [vmem:[#allocation47_spill] sm:$0xff] }
 0x4f2   : > { %v9469_v17 = vpop.f32.mrf.mxu1 }
 0x4f3   : > { %v5047_v5 = vadd.f32 %v9468_v16, %v13544_v2 }
 0x4f4   : > { %v9470_v10 = vpop.f32.mrf.mxu1 }
 0x4f5   : > { %v9471_v6 = vadd.f32 %v9470_v10, %v9469_v17  ;;  %v13618_v53 = vadd.f32 %v14970_v61, %v5047_v5  ;;  %v14977_v10 = vld [vmem:[#allocation12_spill] sm:$0xff] }
 0x4f6   : > { %v9472_v36 = vpop.f32.mrf.mxu1 }
 0x4f7   : > { %v5050_v63 = vadd.f32 %v9471_v6, %v13550_v1 }
 0x4f8   : > { %v9473_v56 = vpop.f32.mrf.mxu1 }
 0x4f9   : > { %v9474_v12 = vadd.f32 %v9473_v56, %v9472_v36  ;;  %v13622_v42 = vadd.f32 %v14971_v55, %v5050_v63  ;;  %v14978_v56 = vld [vmem:[#allocation82_spill] sm:$0xff] }
 0x4fa   : > { %v9475_v44 = vpop.f32.mrf.mxu1 }
 0x4fb   : > { %v5055_v28 = vadd.f32 %v9474_v12, %v13554_v38 }
 0x4fc   : > { %v9476_v48 = vpop.f32.mrf.mxu1 }
 0x4fd   : > { %v9477_v35 = vadd.f32 %v9476_v48, %v9475_v44  ;;  %v13626_v2 = vadd.f32 %v14972_v52, %v5055_v28  ;;  %v14979_v48 = vld [vmem:[#allocation21_spill] sm:$0xff] }
 0x4fe   : > { %v9478_v7 = vpop.f32.mrf.mxu1 }
 0x4ff   : > { %v5058_v41 = vadd.f32 %v9477_v35, %v13561_v9 }
 0x500   : > { %v9479_v30 = vpop.f32.mrf.mxu1 }
 0x501   : > { %v9480_v54 = vadd.f32 %v9479_v30, %v9478_v7  ;;  %v13630_v1 = vadd.f32 %v14973_v25, %v5058_v41 }
 0x502   : > { %v9481_v18 = vpop.f32.mrf.mxu1 }
 0x503   : > { %v5063_v39 = vadd.f32 %v9480_v54, %v13565_v29 }
 0x504   : > { %v9482_v43 = vpop.f32.mrf.mxu1 }
 0x505   : > { %v9483_v24 = vadd.f32 %v9482_v43, %v9481_v18  ;;  %v13634_v38 = vadd.f32 %v14974_v59, %v5063_v39 }
 0x506   : > { %v9484_v3 = vpop.f32.mrf.mxu1 }
 0x507   : > { %v5066_v58 = vadd.f32 %v9483_v24, %v13570_v14 }
 0x508   : > { %v9485_v60 = vpop.f32.mrf.mxu1 }
 0x509   : > { %v9486_v45 = vadd.f32 %v9485_v60, %v9484_v3  ;;  %v13638_v9 = vadd.f32 %v14975_v34, %v5066_v58 }
 0x50a   : > { %v9487_v8 = vpop.f32.mrf.mxu1 }
 0x50b   : > { %v5071_v15 = vadd.f32 %v9486_v45, %v13574_v21 }
 0x50c   : > { %v9488_v13 = vpop.f32.mrf.mxu1 }
 0x50d   : > { %v9489_v46 = vadd.f32 %v9488_v13, %v9487_v8  ;;  %v13642_v29 = vadd.f32 %v14976_v31, %v5071_v15 }
 0x50e   : > { %v9490_v16 = vpop.f32.mrf.mxu1 }
 0x50f   : > { %v5074_v23 = vadd.f32 %v9489_v46, %v13578_v62 }
 0x510   : > { %v9491_v17 = vpop.f32.mrf.mxu1 }
 0x511   : > { %v9492_v5 = vadd.f32 %v9491_v17, %v9490_v16  ;;  %v13646_v14 = vadd.f32 %v14977_v10, %v5074_v23 }
 0x512   : > { %v9493_v6 = vpop.f32.mrf.mxu1 }
 0x513   : > { %v5079_v61 = vadd.f32 %v9492_v5, %v13582_v20 }
 0x514   : > { %v9494_v36 = vpop.f32.mrf.mxu1 }
 0x515   : > { %v9495_v63 = vadd.f32 %v9494_v36, %v9493_v6  ;;  %v13650_v21 = vadd.f32 %v14978_v56, %v5079_v61 }
 0x516   : > { %v9496_v12 = vpop.f32.mrf.mxu1 }
 0x517   : > { %v5082_v55 = vadd.f32 %v9495_v63, %v13586_v47 }
 0x518   : > { %v9497_v44 = vpop.f32.mrf.mxu1 }
 0x519   : > { %v9498_v28 = vadd.f32 %v9497_v44, %v9496_v12  ;;  %v13654_v62 = vadd.f32 %v14979_v48, %v5082_v55 }
 0x51a   : > { %v9499_v35 = vpop.f32.mrf.mxu1 }
 0x51b   : > { %v5087_v52 = vadd.f32 %v9498_v28, %v13590_v51 }
 0x51c   : > { %v9500_v7 = vpop.f32.mrf.mxu1 }
 0x51d   : > { %v9501_v41 = vadd.f32 %v9500_v7, %v9499_v35  ;;  %v13658_v20 = vadd.f32 %v13083_v50, %v5087_v52  ;;  %v14980_v35 = vld [vmem:[#allocation23_spill] sm:$0xff] }
 0x51e   : > { %v9502_v30 = vpop.f32.mrf.mxu1 }
 0x51f   : > { %v5090_v54 = vadd.f32 %v9501_v41, %v13594_v33 }
 0x520   : > { %v9503_v25 = vpop.f32.mrf.mxu1 }
 0x521   : > { %v9504_v18 = vadd.f32 %v9503_v25, %v9502_v30  ;;  %v13662_v47 = vadd.f32 %v13089_v4, %v5090_v54 }
 0x522   : > { %v9505_v39 = vpop.f32.mrf.mxu1 }
 0x523   : > { %v5095_v43 = vadd.f32 %v9504_v18, %v13598_v11 }
 0x524   : > { %v9506_v24 = vpop.f32.mrf.mxu1 }
 0x525   : > { %v9507_v59 = vadd.f32 %v9506_v24, %v9505_v39  ;;  %v13666_v51 = vadd.f32 %v13093_v26, %v5095_v43  ;;  %v14981_v39 = vld [vmem:[#allocation40_spill] sm:$0xff] }
 0x526   : > { %v9508_v3 = vpop.f32.mrf.mxu1 }
 0x527   : > { %v5098_v50 = vadd.f32 %v9507_v59, %v13602_v22 }
 0x528   : > { %v9509_v58 = vpop.f32.mrf.mxu1 }
 0x529   : > { %v9510_v60 = vadd.f32 %v9509_v58, %v9508_v3  ;;  %v13670_v33 = vadd.f32 %v13099_v57, %v5098_v50 }
 0x52a   : > { %v9511_v45 = vpop.f32.mrf.mxu1 }
 0x52b   : > { %v5103_v4 = vadd.f32 %v9510_v60, %v13606_v32 }
 0x52c   : > { %v9512_v34 = vpop.f32.mrf.mxu1 }
 0x52d   : > { %v13674_v8 = vadd.f32 %v13105_v0, %v5103_v4  ;;  %v14982_v4 = vld [vmem:[#allocation45_spill] sm:$0xff] }
 0x52e   : > { %v9600_v11 = vpop.f32.mrf.mxu1 }
 0x530   : > { %v9601_v15 = vpop.f32.mrf.mxu1 }
 0x531   : > { %v9602_v13 = vadd.f32 %v9601_v15, %v9600_v11 }
 0x532   : > { %v9603_v26 = vpop.f32.mrf.mxu1 }
 0x533   : > { %v5247_v46 = vadd.f32 %v9602_v13, %v13610_v40 }
 0x534   : > { %v9604_v31 = vpop.f32.mrf.mxu1 }
 0x535   : > { %v5351_v22 = vadd.f32 %v13111_v19, %v5247_v46  ;;  %v9605_v16 = vadd.f32 %v9604_v31, %v9603_v26 }
 0x536   : > { %v9606_v23 = vpop.f32.mrf.mxu1 }
 0x537   : > { %v5250_v57 = vadd.f32 %v9605_v16, %v13614_v37  ;;  %v5420_v5 = vmax.f32 %v5351_v22, 0.0 }
 0x538   : > { %v9607_v17 = vpop.f32.mrf.mxu1 }
 0x539   : > { %v5354_v32 = vadd.f32 %v13122_v49, %v5250_v57  ;;  %v9608_v10 = vadd.f32 %v9607_v17, %v9606_v23  ;;  %v5455_v63 = vrot.slane %v5420_v5, 1  ;;  %v14983_v17 = vld [vmem:[#allocation83_spill] sm:$0xff] }
 0x53a   : > { %v9609_v0 = vpop.f32.mrf.mxu1 }
 0x53b   : > { %v5421_v6 = vmax.f32 %v5354_v32, 0.0  ;;  %v5255_v61 = vadd.f32 %v9608_v10, %v13618_v53 }
 0x53c   : > { %v9610_v36 = vpop.f32.mrf.mxu1 }
 0x53d   : > { %v5456_v56 = vrot.slane %v5421_v6, 1  ;;  %v5359_v40 = vadd.f32 %v13133_v27, %v5255_v61  ;;  %v9611_v12 = vadd.f32 %v9610_v36, %v9609_v0  ;;  %v10810_v61 = vmov 1966171168  }
 0x53e   : > { %v9612_v19 = vpop.f32.mrf.mxu1  ;;  %v5621_v36 = vunpack.c.l.s4 %v10810_v61 }
 0x53f   : > { %v5457_v55 = vsel %vm1376_vm6, %v5455_v63, %v5456_v56  ;;  %v5422_v44 = vmax.f32 %v5359_v40, 0.0  ;;  %v5258_v37 = vadd.f32 %v9611_v12, %v13622_v42  ;;  %v5623_v63 = vlaneseq }
 0x540   : > { %v5505_v28 = vmax.f32 %v5420_v5, %v5457_v55  ;;  %v9613_v48 = vpop.f32.mrf.mxu1 }
 0x541   : > { %v5458_v49 = vrot.slane %v5422_v44, 1  ;;  %v5362_v52 = vadd.f32 %v14980_v35, %v5258_v37  ;;  %v9614_v7 = vadd.f32 %v9613_v48, %v9612_v19  ;;  %vm5805_vm13 = vcmp.lt.s32.totalorder %v5623_v63, 128 }
 0x542   : > { %v9615_v41 = vpop.f32.mrf.mxu1 }
 0x543   : > { %v5459_v53 = vsel %vm1376_vm6, %v5456_v56, %v5458_v49  ;;  %v5423_v30 = vmax.f32 %v5362_v52, 0.0  ;;  %v5263_v54 = vadd.f32 %v9614_v7, %v13626_v2  ;;  %v5622_v7 = vunpack.c.0.s8 %v5621_v36 }
 0x544   : > { %v13687_v27 = vmax.f32 %v5421_v6, %v5459_v53  ;;  %v9616_v25 = vpop.f32.mrf.mxu1 }
 0x545   : > { %v5460_v18 = vrot.slane %v5423_v30, 1  ;;  %v5367_v43 = vadd.f32 %v14981_v39, %v5263_v54  ;;  %v9617_v24 = vadd.f32 %v9616_v25, %v9615_v41  ;;  %v5624_v41 = vshrl.u32 %v5623_v63, 7  ;;  %v14985_v39 = vld [vmem:[#allocation84_spill] sm:$0xff] }
 0x546   : > { %v9618_v42 = vpop.f32.mrf.mxu1  ;;  %v5537_v11 = vrot.slane %v13687_v27, 6 }
 0x547   : > { %v5461_v59 = vsel %vm1376_vm6, %v5458_v49, %v5460_v18  ;;  %v5424_v3 = vmax.f32 %v5367_v43, 0.0  ;;  %v5266_v50 = vadd.f32 %v9617_v24, %v13630_v1 }
 0x548   : > { %v5507_v58 = vmax.f32 %v5422_v44, %v5461_v59  ;;  %v9619_v60 = vpop.f32.mrf.mxu1 }
 0x549   : > { %v5462_v45 = vrot.slane %v5424_v3, 1  ;;  %v5370_v34 = vadd.f32 %v14982_v4, %v5266_v50  ;;  %v9620_v2 = vadd.f32 %v9619_v60, %v9618_v42 }
 0x54a   : > { %v5538_v15 = vrot.slane %v5507_v58, 6  ;;  %v9621_v13 = vpop.f32.mrf.mxu1 }
 0x54b   : > { %v5463_v26 = vsel %vm1376_vm6, %v5460_v18, %v5462_v45  ;;  %v5425_v46 = vmax.f32 %v5370_v34, 0.0  ;;  %v5271_v31 = vadd.f32 %v9620_v2, %v13634_v38  ;;  %v13709_v34 = vsub.s32 %v5622_v7, %v5624_v41 }
 0x54c   : > { %v5539_v22 = vsel %vm5536_vm12, %v5537_v11, %v5538_v15  ;;  %v5508_v16 = vmax.f32 %v5423_v30, %v5463_v26  ;;  %v9622_v1 = vpop.f32.mrf.mxu1 }
 0x54d   : > { %v5570_v23 = vmax.f32 %v5505_v28, %v5539_v22  ;;  %v5464_v57 = vrot.slane %v5425_v46, 1  ;;  %v5375_v5 = vadd.f32 %v14983_v17, %v5271_v31  ;;  %v9623_v32 = vadd.f32 %v9622_v1, %v9621_v13  ;;  %v14984_v28 = vld [vmem:[#allocation3_spill] sm:$0xff]  ;;  %v14986_v13 = vld [vmem:[#allocation72_spill] sm:$0xff] }
 0x54e   : > { %v5540_v10 = vrot.slane %v5508_v16, 6  ;;  %v9624_v0 = vpop.f32.mrf.mxu1 }
 0x54f   : > { %v5465_v6 = vsel %vm1376_vm6, %v5462_v45, %v5464_v57  ;;  %v5426_v38 = vmax.f32 %v5375_v5, 0.0  ;;  %v5274_v12 = vadd.f32 %v9623_v32, %v13638_v9  ;;  %v5581_v35 = vrot.slane %v5570_v23, 2 }
 0x550   : > { %v5541_v56 = vsel %vm5536_vm12, %v5538_v15, %v5540_v10  ;;  %v5509_v40 = vmax.f32 %v5424_v3, %v5465_v6  ;;  %v9625_v19 = vpop.f32.mrf.mxu1  ;;  %v5582_v53 = vrot.slane %v5570_v23, 4  ;;  %v5583_v30 = vrot.slane %v5570_v23, 6 }
 0x551   : > { %v5571_v55 = vmax.f32 %v13687_v27, %v5541_v56  ;;  %v9626_v44 = vadd.f32 %v9625_v19, %v9624_v0  ;;  %v5466_v37 = vrot.slane %v5426_v38, 1  ;;  %v5378_v48 = vadd.f32 %v14984_v28, %v5274_v12  ;;  %v14987_v12 = vld [vmem:[#allocation85_spill] sm:$0xff] }
 0x552   : > { %v9627_v49 = vpop.f32.mrf.mxu1  ;;  %v5542_v59 = vrot.slane %v5509_v40, 6  ;;  %v5616_v58 = vcombine.low %v5570_v23, %v5581_v35  ;;  %v5617_v60 = vcombine.low %v5582_v53, %v5583_v30 }
 0x553   : > { %v5279_v52 = vadd.f32 %v9626_v44, %v13642_v29  ;;  %v5467_v54 = vsel %vm1376_vm6, %v5464_v57, %v5466_v37  ;;  %v5427_v25 = vmax.f32 %v5378_v48, 0.0 }
 0x554   : > { %v9628_v9 = vpop.f32.mrf.mxu1  ;;  %v5510_v18 = vmax.f32 %v5425_v46, %v5467_v54  ;;  %v5626_v10 = vrot.slane %v5616_v58, %v13709_v34  ;;  %v5633_v36 = vrot.slane %v5617_v60, %v13709_v34 }
 0x555   : > { %v5383_v27 = vadd.f32 %v14985_v39, %v5279_v52  ;;  %v9629_v43 = vadd.f32 %v9628_v9, %v9627_v49  ;;  %v5468_v24 = vrot.slane %v5427_v25, 1  ;;  %v14988_v52 = vld [vmem:[#allocation73_spill] sm:$0xff] }
 0x556   : > { %v9630_v42 = vpop.f32.mrf.mxu1  ;;  %v5543_v3 = vrot.slane %v5510_v18, 6  ;;  %v5648_v30 = vcombine.low %v5626_v10, %v5633_v36 }
 0x557   : > { %v5428_v50 = vmax.f32 %v5383_v27, 0.0  ;;  %v5282_v29 = vadd.f32 %v9629_v43, %v13646_v14  ;;  %v5469_v45 = vsel %vm1376_vm6, %v5466_v37, %v5468_v24  ;;  %v14989_v43 = vld [vmem:[#allocation86_spill] sm:$0xff] }
 0x558   : > { %v9631_v4 = vpop.f32.mrf.mxu1  ;;  %v5544_v2 = vsel %vm5536_vm12, %v5542_v59, %v5543_v3  ;;  %v5511_v11 = vmax.f32 %v5426_v38, %v5469_v45 }
 0x559   : > { %v5470_v15 = vrot.slane %v5428_v50, 1  ;;  %v5386_v26 = vadd.f32 %v14986_v13, %v5282_v29  ;;  %v5572_v46 = vmax.f32 %v5508_v16, %v5544_v2  ;;  %v9632_v31 = vadd.f32 %v9631_v4, %v9630_v42 }
 0x55a   : > { %v9633_v22 = vpop.f32.mrf.mxu1  ;;  %v5545_v1 = vrot.slane %v5511_v11, 6 }
 0x55b   : > { %v5471_v14 = vsel %vm1376_vm6, %v5468_v24, %v5470_v15  ;;  %v5429_v23 = vmax.f32 %v5386_v26, 0.0  ;;  %v5585_v57 = vrot.slane %v5572_v46, 4  ;;  %v5287_v5 = vadd.f32 %v9632_v31, %v13650_v21  ;;  %v14990_v31 = vld [vmem:[#allocation74_spill] sm:$0xff] }
 0x55c   : > { %v5512_v17 = vmax.f32 %v5427_v25, %v5471_v14  ;;  %v9634_v32 = vpop.f32.mrf.mxu1  ;;  %v5546_v0 = vsel %vm5536_vm12, %v5543_v3, %v5545_v1  ;;  %v5586_v16 = vrot.slane %v5572_v46, 6 }
 0x55d   : > { %v5472_v6 = vrot.slane %v5429_v23, 1  ;;  %v9635_v61 = vadd.f32 %v9634_v32, %v9633_v22  ;;  %v5618_v56 = vcombine.low %v5571_v55, %v5585_v57  ;;  %v5573_v38 = vmax.f32 %v5509_v40, %v5546_v0 }
 0x55e   : > { %v5391_v19 = vadd.f32 %v14987_v12, %v5287_v5  ;;  %v9636_v44 = vpop.f32.mrf.mxu1 }
 0x55f   : > { %v5473_v37 = vsel %vm1376_vm6, %v5470_v15, %v5472_v6  ;;  %v5290_v21 = vadd.f32 %v9635_v61, %v13654_v62  ;;  %v5619_v28 = vcombine.low %v5586_v16, %v5573_v38  ;;  %v5640_v40 = vrot.slane %v5618_v56, %v13709_v34 }
 0x560   : > { %v13722_v48 = vmax.f32 %v5428_v50, %v5473_v37  ;;  %v9637_v49 = vpop.f32.mrf.mxu1  ;;  %v5430_v35 = vmax.f32 %v5391_v19, 0.0  ;;  %v5656_v50 = vrot.slane %v5648_v30, %v13709_v34  ;;  %v5588_v13 = vrot.slane %v5573_v38, 2 }
 0x561   : > { %v5394_v7 = vadd.f32 %v14988_v52, %v5290_v21  ;;  %v9638_v41 = vadd.f32 %v9637_v49, %v9636_v44  ;;  %v5647_v55 = vrot.slane %v5619_v28, %v13709_v34  ;;  %v5589_v26 = vrot.slane %v5573_v38, 4 }
 0x562   : > { %v9639_v53 = vpop.f32.mrf.mxu1  ;;  %v5474_v54 = vrot.slane %v5430_v35, 1  ;;  %v5547_v45 = vrot.slane %v13722_v48, 6 }
 0x563   : > { %v5431_v25 = vmax.f32 %v5394_v7, 0.0  ;;  %v5295_v62 = vadd.f32 %v9638_v41, %v13658_v20  ;;  %v5649_v18 = vcombine.low %v5640_v40, %v5647_v55 }
 0x564   : > { %v9640_v9 = vpop.f32.mrf.mxu1  ;;  %v5475_v39 = vsel %vm1376_vm6, %v5472_v6, %v5474_v54  ;;  %v5665_v6 = vcombine.low %v5588_v13, %v5589_v26 }
 0x565   : > { %v5476_v27 = vrot.slane %v5431_v25, 1  ;;  %v5399_v24 = vadd.f32 %v14989_v43, %v5295_v62  ;;  %v9641_v42 = vadd.f32 %v9640_v9, %v9639_v53  ;;  %v5514_v59 = vmax.f32 %v5429_v23, %v5475_v39 }
 0x566   : > { %v9642_v3 = vpop.f32.mrf.mxu1  ;;  %v5663_v29 = vrot.slane %v5649_v18, %v13709_v34 }
 0x567   : > { %v5477_v58 = vsel %vm1376_vm6, %v5474_v54, %v5476_v27  ;;  %v5432_v60 = vmax.f32 %v5399_v24, 0.0  ;;  %v5298_v20 = vadd.f32 %v9641_v42, %v13662_v47  ;;  %v5548_v4 = vrot.slane %v5514_v59, 6 }
 0x568   : > { %v5515_v2 = vmax.f32 %v5430_v35, %v5477_v58  ;;  %v9643_v11 = vpop.f32.mrf.mxu1  ;;  %v5664_v15 = vcombine.low %v5656_v50, %v5663_v29 }
 0x569   : > { %v5478_v46 = vrot.slane %v5432_v60, 1  ;;  %v5402_v22 = vadd.f32 %v14990_v31, %v5298_v20  ;;  %v5549_v1 = vsel %vm5536_vm12, %v5547_v45, %v5548_v4  ;;  %v9644_v37 = vadd.f32 %v9643_v11, %v9642_v3 }
 0x56a   : > { %v5550_v14 = vrot.slane %v5515_v2, 6  ;;  %v9645_v23 = vpop.f32.mrf.mxu1  ;;  %5789 = vst [vmem:[%s13738_s13] ss:$8 sm:$0xf] %v5664_v15  ;;  %5790 = vst [vmem:[%s13738_s13] ss:$8 sm:$0xf0] %v5664_v15  ;;  %v5574_v47 = vmax.f32 %v5512_v17, %v5549_v1  ;;  %v5675_v17 = vrot.slane %v5665_v6, %v13709_v34 }
 0x56b   : > { %v5479_v57 = vsel %vm1376_vm6, %v5476_v27, %v5478_v46  ;;  %v5433_v5 = vmax.f32 %v5402_v22, 0.0  ;;  %v5303_v55 = vadd.f32 %v9644_v37, %v13666_v51 }
 0x56c   : > { %v5551_v32 = vsel %vm5536_vm12, %v5548_v4, %v5550_v14  ;;  %v5516_v10 = vmax.f32 %v5431_v25, %v5479_v57  ;;  %v9646_v0 = vpop.f32.mrf.mxu1  ;;  %v5591_v61 = vrot.slane %v5574_v47, 2  ;;  %v5592_v7 = vrot.slane %v5574_v47, 4 }
 0x56d   : > { %v5575_v36 = vmax.f32 %v13722_v48, %v5551_v32  ;;  %v5480_v16 = vrot.slane %v5433_v5, 1  ;;  %v5593_v41 = vrot.slane %v5574_v47, 6  ;;  %v9647_v40 = vadd.f32 %v9646_v0, %v9645_v23 }
 0x56e   : > { %v9648_v56 = vpop.f32.mrf.mxu1  ;;  %v5666_v38 = vcombine.low %v5574_v47, %v5591_v61  ;;  %v5552_v49 = vrot.slane %v5516_v10, 6 }
 0x56f   : > { %v5481_v12 = vsel %vm1376_vm6, %v5478_v46, %v5480_v16  ;;  %v5667_v62 = vcombine.low %v5592_v7, %v5593_v41  ;;  %v5306_v43 = vadd.f32 %v9647_v40, %v13670_v33 }
 0x570   : > { %v9649_v19 = vpop.f32.mrf.mxu1  ;;  %v5517_v44 = vmax.f32 %v5432_v60, %v5481_v12  ;;  %v5682_v21 = vrot.slane %v5666_v38, %v13709_v34 }
 0x571   : > { %v9650_v39 = vadd.f32 %v9649_v19, %v9648_v56  ;;  %v5689_v29 = vrot.slane %v5667_v62, %v13709_v34 }
 0x572   : > { %v9651_v28 = vpop.f32.mrf.mxu1  ;;  %v5553_v35 = vrot.slane %v5517_v44, 6  ;;  %v5697_v52 = vcombine.low %v5675_v17, %v5682_v21 }
 0x573   : > { %v5311_v20 = vadd.f32 %v9650_v39, %v13674_v8  ;;  %v10583_v39 = vld [vmem:[%s14474_s5 + $0xb8] sm:$0xff] (%p41_p0)  }
 0x574   : > { %v9652_v53 = vpop.f32.mrf.mxu1  ;;  %v5554_v48 = vsel %vm5536_vm12, %v5552_v49, %v5553_v35  ;;  %v5705_v13 = vrot.slane %v5697_v52, %v13709_v34 }
 0x575   : > { %v5576_v30 = vmax.f32 %v5515_v2, %v5554_v48 }
 0x576   : > { %v5406_v54 = vpop.f32.mrf.mxu1 }
 0x577   : > { %v5407_v25 = vadd.f32 %v5406_v54, %v5303_v55  ;;  %v5595_v9 = vrot.slane %v5576_v30, 4  ;;  %v5606_v47 = vrot.slane %v5576_v30, 6 }
 0x578   : > { %v10220_v18 = vpop.f32.mrf.mxu1 }
 0x579   : > { %v5434_v27 = vmax.f32 %v5407_v25, 0.0  ;;  %v5668_v24 = vcombine.low %v5575_v36, %v5595_v9  ;;  %v10580_v9 = vld [vmem:[%s14474_s5 + $0x78] sm:$0xff] (%p41_p0)  }
 0x57a   : > { %v5409_v42 = vpop.f32.mrf.mxu1  ;;  %v10581_v18 = vld [vmem:[%s14474_s5 + $0x38] sm:$0xff] (%p41_p0)   ;;  %9671 = vmatprep.subr.bf16.mxu0 (%p41_p0), %v10580_v9  ;;  %v10635_v9 = vld [vmem:[%s14474_s5 + $0x190] sm:$0xff] (%p41_p0)  }
 0x57b   : > { %v5482_v59 = vrot.slane %v5434_v27, 1  ;;  %v5410_v3 = vadd.f32 %v5409_v42, %v5306_v43  ;;  %v5696_v58 = vrot.slane %v5668_v24, %v13709_v34  ;;  %9672 = vmatpush3.bf16.msra.mxu0 (%p41_p0), %v10581_v18  ;;  %v10585_v43 = vld [vmem:[%s14474_s5 + $0x30] sm:$0xff] (%p41_p0)   ;;  %v10636_v18 = vld [vmem:[%s14474_s5 + $0x148] sm:$0xff] (%p41_p0)  }
 0x57c   : > { %v10221_v50 = vpop.f32.mrf.mxu1  ;;  %v10586_v24 = vld [vmem:[%s14474_s5 + $0xf0] sm:$0xff] (%p41_p0)  }
 0x57d   : > { %v5483_v51 = vsel %vm1376_vm6, %v5480_v16, %v5482_v59  ;;  %v5435_v60 = vmax.f32 %v5410_v3, 0.0  ;;  %v5698_v2 = vcombine.low %v5689_v29, %v5696_v58  ;;  %v10587_v42 = vld [vmem:[%s14474_s5 + $0xb0] sm:$0xff] (%p41_p0)   ;;  %v10589_v3 = vld [vmem:[%s14474_s5 + $0x28] sm:$0xff] (%p41_p0)   ;;  %v10592_v58 = vld [vmem:[%s14474_s5 + $0x60] sm:$0xff] (%p41_p0)  }
 0x57e   : > { %v5518_v45 = vmax.f32 %v5433_v5, %v5483_v51  ;;  %v5414_v4 = vpop.f32.mrf.mxu1  ;;  %v10590_v50 = vld [vmem:[%s14474_s5 + $0xe8] sm:$0xff] (%p41_p0)   ;;  %v10593_v51 = vld [vmem:[%s14474_s5 + $0x20] sm:$0xff] (%p41_p0)  }
 0x57f   : > { %v5484_v11 = vrot.slane %v5435_v60, 1  ;;  %v5415_v33 = vadd.f32 %v5414_v4, %v5311_v20  ;;  %v5712_v26 = vrot.slane %v5698_v2, %v13709_v34  ;;  %v10591_v29 = vld [vmem:[%s14474_s5 + $0xa8] sm:$0xff] (%p41_p0)   ;;  %v10595_v20 = vld [vmem:[%s14474_s5 + $0xa0] sm:$0xff] (%p41_p0)   ;;  %v10597_v4 = vld [vmem:[%s14474_s5 + $0x18] sm:$0xff] (%p41_p0)  }
 0x580   : > { %v5555_v15 = vrot.slane %v5518_v45, 6  ;;  %v10224_v46 = vpop.f32.mrf.mxu1  ;;  %v10596_v45 = vld [vmem:[%s14474_s5 + $0x58] sm:$0xff] (%p41_p0)  }
 0x581   : > { %v5485_v31 = vsel %vm1376_vm6, %v5482_v59, %v5484_v11  ;;  %v5436_v22 = vmax.f32 %v5415_v33, 0.0  ;;  %v5713_v8 = vcombine.low %v5705_v13, %v5712_v26  ;;  %v10588_v59 = vld [vmem:[%s14474_s5 + $0x68] sm:$0xff] (%p41_p0)   ;;  %v10598_v2 = vld [vmem:[%s14474_s5 + $0xd8] sm:$0xff] (%p41_p0)   ;;  %v10600_v33 = vld [vmem:[%s14474_s5 + $0x50] sm:$0xff] (%p41_p0)  }
 0x582   : > { %v5556_v1 = vsel %vm5536_vm12, %v5553_v35, %v5555_v15  ;;  %v5519_v14 = vmax.f32 %v5434_v27, %v5485_v31  ;;  %v5417_v23 = vpop.f32.mrf.mxu1  ;;  %v10584_v27 = vld [vmem:[%s14474_s5 + $0x70] sm:$0xff] (%p41_p0)   ;;  %v10604_v46 = vld [vmem:[%s14474_s5 + $0x48] sm:$0xff] (%p41_p0)  }
 0x583   : > { %v5577_v57 = vmax.f32 %v5516_v10, %v5556_v1  ;;  %v5486_v5 = vrot.slane %v5436_v22, 1  ;;  %8530 = vst [vmem:[%s13738_s13 + $0x40] ss:$8 sm:$0xf] %v5713_v8  ;;  %9673 = vmatprep.subr.bf16.mxu0 (%p41_p0), %v10584_v27  ;;  %v10601_v15 = vld [vmem:[%s14474_s5 + $0x10] sm:$0xff] (%p41_p0)   ;;  %v10605_v31 = vld [vmem:[%s14474_s5 + $0x8] sm:$0xff] (%p41_p0)  }
 0x584   : > { %8531 = vst [vmem:[%s13738_s13 + $0x40] ss:$8 sm:$0xf0] %v5713_v8  ;;  %v10225_v32 = vpop.f32.mrf.mxu1  ;;  %9674 = vmatpush3.bf16.msra.mxu0 (%p41_p0), %v10585_v43  ;;  %v10602_v13 = vld [vmem:[%s14474_s5 + $0xd0] sm:$0xff] (%p41_p0)   ;;  %v10607_v1 = vld [vmem:[%s14474_s5 + $0x88] sm:$0xff] (%p41_p0)   ;;  %v10609_v8 = vld [vmem:[%s14474_s5] sm:$0xff] (%p41_p0)  }
 0x585   : > { %v8523_v0 = vrot.slane %v5577_v57, 10  ;;  %v8524_v6 = vrot.slane %v5577_v57, 12  ;;  %v5714_v61 = vcombine.low %v5606_v47, %v5577_v57  ;;  %v5487_v36 = vsel %vm1376_vm6, %v5484_v11, %v5486_v5  ;;  %9675 = vmatprep.subr.bf16.mxu0 (%p41_p0), %v10588_v59  ;;  %v10599_v11 = vld [vmem:[%s14474_s5 + $0x98] sm:$0xff] (%p41_p0)   ;;  %v10603_v26 = vld [vmem:[%s14474_s5 + $0x90] sm:$0xff] (%p41_p0)   ;;  %v10610_v23 = vld [vmem:[%s14474_s5 + $0xc0] sm:$0xff] (%p41_p0)  }
 0x586   : > { %v5520_v16 = vmax.f32 %v5435_v60, %v5487_v36  ;;  %v5521_v56 = vmax.f32 %v5436_v22, %v5486_v5  ;;  %v10594_v60 = vld [vmem:[%s14474_s5 + $0xe0] sm:$0xff] (%p41_p0)   ;;  %v10606_v22 = vld [vmem:[%s14474_s5 + $0xc8] sm:$0xff] (%p41_p0)  }
 0x587   : > { %v5715_v38 = vcombine.low %v8523_v0, %v8524_v6  ;;  %v5724_v44 = vrot.slane %v5714_v61, %v13709_v34  ;;  %v10611_v5 = vld [vmem:[%s14474_s5 + $0x80] sm:$0xff] (%p41_p0)   ;;  %v10612_v6 = vld [vmem:[%s14474_s5 + $0x178] sm:$0xff] (%p41_p0)   ;;  %v10639_v27 = vld [vmem:[%s14474_s5 + $0x188] sm:$0xff] (%p41_p0)  }
 0x588   : > { %v5557_v12 = vrot.slane %v5520_v16, 6  ;;  %v5558_v19 = vrot.slane %v5521_v56, 6  ;;  %9676 = vmatpush3.bf16.msra.mxu0 (%p41_p0), %v10589_v3  ;;  %v10640_v43 = vld [vmem:[%s14474_s5 + $0x140] sm:$0xff] (%p41_p0)  }
 0x589   : > { %v5731_v37 = vrot.slane %v5715_v38, %v13709_v34  ;;  %9677 = vmatprep.subr.bf16.mxu0 (%p41_p0), %v10592_v58 }
 0x58a   : > { %v5559_v10 = vsel %vm5536_vm12, %v5557_v12, %v5558_v19  ;;  %v5579_v17 = vmax.f32 %v5520_v16, %v5558_v19  ;;  %v10613_v16 = vld [vmem:[%s14474_s5 + $0x138] sm:$0xff] (%p41_p0)  }
 0x58b   : > { %v5578_v21 = vmax.f32 %v5519_v14, %v5559_v10  ;;  %v5746_v28 = vcombine.low %v5724_v44, %v5731_v37  ;;  %v10608_v14 = vld [vmem:[%s14474_s5 + $0x40] sm:$0xff] (%p41_p0)   ;;  %v10614_v12 = vld [vmem:[%s14474_s5 + $0x1f8] sm:$0xff] (%p41_p0)   ;;  %v10616_v44 = vld [vmem:[%s14474_s5 + $0x170] sm:$0xff] (%p41_p0)  }
 0x58c   : > { %v5769_v49 = vrot.slane %v5579_v17, %v13709_v34  ;;  %9678 = vmatpush3.bf16.msra.mxu0 (%p41_p0), %v10593_v51  ;;  %v10615_v19 = vld [vmem:[%s14474_s5 + $0x1b8] sm:$0xff] (%p41_p0)   ;;  %v10617_v37 = vld [vmem:[%s14474_s5 + $0x130] sm:$0xff] (%p41_p0)  }
 0x58d   : > { %v5603_v35 = vrot.slane %v5578_v21, 6  ;;  %v8526_v52 = vrot.slane %v5578_v21, 10  ;;  %v5754_v54 = vrot.slane %v5746_v28, %v13709_v34  ;;  %9679 = vmatprep.subr.bf16.mxu0 (%p41_p0), %v10596_v45  ;;  %v10618_v10 = vld [vmem:[%s14474_s5 + $0x1f0] sm:$0xff] (%p41_p0)   ;;  %v10621_v28 = vld [vmem:[%s14474_s5 + $0x128] sm:$0xff] (%p41_p0)   ;;  %v10644_v51 = vld [vmem:[%s14474_s5 + $0x278] sm:$0xff] (%p41_p0)  }
 0x58e   : > { %v5776_v7 = vrot.slane %v5769_v49, %v13709_v34  ;;  %v10619_v17 = vld [vmem:[%s14474_s5 + $0x1b0] sm:$0xff] (%p41_p0)   ;;  %v10622_v49 = vld [vmem:[%s14474_s5 + $0x1e8] sm:$0xff] (%p41_p0)   ;;  %v10645_v45 = vld [vmem:[%s14474_s5 + $0x238] sm:$0xff] (%p41_p0)  }
 0x58f   : > { %v5612_v41 = vrot.slane %v5603_v35, 6  ;;  %v5716_v53 = vcombine.low %v5578_v21, %v8526_v52  ;;  %v10620_v21 = vld [vmem:[%s14474_s5 + $0x168] sm:$0xff] (%p41_p0)   ;;  %v10624_v52 = vld [vmem:[%s14474_s5 + $0x160] sm:$0xff] (%p41_p0)  }
 0x590   : > { %8536 = vst.msk [vmem:[%s13738_s13 + $0xc0] ss:$8 sm:$0x1] %vm5805_vm13, %v5776_v7  ;;  %9680 = vmatpush3.bf16.msra.mxu0 (%p41_p0), %v10597_v4  ;;  %v10625_v7 = vld [vmem:[%s14474_s5 + $0x120] sm:$0xff] (%p41_p0)  }
 0x591   : > { %v5717_v48 = vcombine.low %v5612_v41, %v5603_v35  ;;  %v5738_v40 = vrot.slane %v5716_v53, %v13709_v34  ;;  %9681 = vmatprep.subr.bf16.mxu0 (%p41_p0), %v10600_v33  ;;  %v10623_v35 = vld [vmem:[%s14474_s5 + $0x1a8] sm:$0xff] (%p41_p0)   ;;  %v10626_v41 = vld [vmem:[%s14474_s5 + $0x1e0] sm:$0xff] (%p41_p0)   ;;  %v10647_v33 = vld [vmem:[%s14474_s5 + $0x2b8] sm:$0xff] (%p41_p0)  }
 0x592   :  { %v10627_v53 = vld [vmem:[%s14474_s5 + $0x1a0] sm:$0xff] (%p41_p0)  }
 0x593   : > { %v5745_v55 = vrot.slane %v5717_v48, %v13709_v34  ;;  %v10628_v48 = vld [vmem:[%s14474_s5 + $0x158] sm:$0xff] (%p41_p0)  }
 0x594   :  { %9682 = vmatpush3.bf16.msra.mxu0 (%p41_p0), %v10601_v15  ;;  %v10648_v15 = vld [vmem:[%s14474_s5 + $0x270] sm:$0xff] (%p41_p0)  }
 0x595   : > { %v5747_v30 = vcombine.low %v5738_v40, %v5745_v55  ;;  %9683 = vmatprep.subr.bf16.mxu0 (%p41_p0), %v10604_v46  ;;  %v10629_v40 = vld [vmem:[%s14474_s5 + $0x118] sm:$0xff] (%p41_p0)   ;;  %v10651_v46 = vld [vmem:[%s14474_s5 + $0x2b0] sm:$0xff] (%p41_p0)  }
 0x596   :  { %v10630_v55 = vld [vmem:[%s14474_s5 + $0x1d8] sm:$0xff] (%p41_p0)  }
 0x597   : > { %v5761_v25 = vrot.slane %v5747_v30, %v13709_v34  ;;  %43 = sbr.rel (!%p41_p0) target bundleno = 1 (0x1), region = 76  ;;  %v10582_v34 = vld [vmem:[%s14474_s5 + $0xf8] sm:$0xff] (%p41_p0)  }
 0x598   :  { %9693 = vmatprep.subr.bf16.mxu1 (%p41_p0), %v10582_v34  ;;  %9684 = vmatpush3.bf16.msra.mxu0 (%p41_p0), %v10605_v31  ;;  %v10631_v30 = vld [vmem:[%s14474_s5 + $0x198] sm:$0xff] (%p41_p0)   ;;  %v10637_v34 = vld [vmem:[%s14474_s5 + $0x108] sm:$0xff] (%p41_p0)  }
 0x599   : > { %v5762_v62 = vcombine.low %v5754_v54, %v5761_v25  ;;  %9694 = vmatpush3.bf16.msra.mxu1 (%p41_p0), %v10583_v39  ;;  %9685 = vmatprep.subr.bf16.mxu0 (%p41_p0), %v10608_v14  ;;  %v10632_v54 = vld [vmem:[%s14474_s5 + $0x150] sm:$0xff] (%p41_p0)   ;;  %v10638_v39 = vld [vmem:[%s14474_s5 + $0x1c8] sm:$0xff] (%p41_p0)  }
 0x59a   :  { %9695 = vmatprep.subr.bf16.mxu1 (%p41_p0), %v10586_v24  ;;  %v10633_v25 = vld [vmem:[%s14474_s5 + $0x110] sm:$0xff] (%p41_p0)   ;;  %v10641_v24 = vld [vmem:[%s14474_s5 + $0x100] sm:$0xff] (%p41_p0)   ;;  %v10652_v31 = vld [vmem:[%s14474_s5 + $0x268] sm:$0xff] (%p41_p0)  }
 0x59b   : > { %8533 = vst [vmem:[%s13738_s13 + $0x80] ss:$8 sm:$0xf] %v5762_v62  ;;  %8534 = vst [vmem:[%s13738_s13 + $0x80] ss:$8 sm:$0xf0] %v5762_v62 }
 0x59c   :  { %9686 = vmatpush3.bf16.msra.mxu0 %v10609_v8  ;;  %v10634_v62 = vld [vmem:[%s14474_s5 + $0x1d0] sm:$0xff]   ;;  %v10655_v14 = vld [vmem:[%s14474_s5 + $0x2a8] sm:$0xff]   ;;  %v10656_v8 = vld [vmem:[%s14474_s5 + $0x260] sm:$0xff]  }
 0x59d   :  { %9696 = vmatpush3.bf16.msra.mxu1 %v10587_v42  ;;  %9715 = vmatprep.subr.bf16.mxu0 %v10612_v6  ;;  %v10642_v42 = vld [vmem:[%s14474_s5 + $0x1c0] sm:$0xff]   ;;  %v10663_v6 = vld [vmem:[%s14474_s5 + $0x298] sm:$0xff]  }
 0x59e   :  { %9697 = vmatprep.subr.bf16.mxu1 %v10590_v50  ;;  %v10643_v50 = vld [vmem:[%s14474_s5 + $0x180] sm:$0xff]  }
 0x5a1   :  { %9698 = vmatpush3.bf16.msra.mxu1 %v10591_v29 }
 0x5a2   :  { %9699 = vmatprep.subr.bf16.mxu1 %v10594_v60  ;;  %v5814_v47 = vld [vmem:[#allocation2 + $0x8] sm:$0xff]  ;;  %v5813_v32 = vld [vmem:[#allocation2] sm:$0xff]  ;;  %v5816_v61 = vld [vmem:[#allocation2 + $0x18] sm:$0xff] }
 0x5a3   :  { %v5839_v57 = vpack.c.bf16 %v5814_v47, %v5814_v47  ;;  %v5838_v0 = vpack.c.bf16 %v5813_v32, %v5813_v32  ;;  %v5841_v36 = vpack.c.bf16 %v5816_v61, %v5816_v61  ;;  %v5815_v56 = vld [vmem:[#allocation2 + $0x10] sm:$0xff]  ;;  %v5818_v59 = vld [vmem:[#allocation2 + $0x28] sm:$0xff]  ;;  %v5817_v29 = vld [vmem:[#allocation2 + $0x20] sm:$0xff] }
 0x5a4   :  { %v5840_v38 = vpack.c.bf16 %v5815_v56, %v5815_v56  ;;  %v5843_v3 = vpack.c.bf16 %v5818_v59, %v5818_v59  ;;  %v5842_v58 = vpack.c.bf16 %v5817_v29, %v5817_v29  ;;  %v5820_v60 = vld [vmem:[#allocation2 + $0x38] sm:$0xff]  ;;  %v5819_v4 = vld [vmem:[#allocation2 + $0x30] sm:$0xff]  ;;  %v10658_v47 = vld [vmem:[%s14474_s5 + $0x2e0] sm:$0xff]  }
 0x5a5   :  { %9700 = vmatpush3.bf16.msra.mxu1 %v10595_v20  ;;  %7502 = vmatprep.mubr.bf16.mxu0 %v5839_v57  ;;  %v5845_v20 = vpack.c.bf16 %v5820_v60, %v5820_v60  ;;  %v10659_v57 = vld [vmem:[%s14474_s5 + $0x2a0] sm:$0xff]   ;;  %v10661_v32 = vld [vmem:[%s14474_s5 + $0x218] sm:$0xff]   ;;  %v10664_v61 = vld [vmem:[%s14474_s5 + $0x250] sm:$0xff]  }
 0x5a6   :  { %9701 = vmatprep.subr.bf16.mxu1 %v10598_v2  ;;  %7503 = vmatmul.mubr.bf16.vlgmr.msra.gmra.mxu0 %v5838_v0  ;;  %v5844_v2 = vpack.c.bf16 %v5819_v4, %v5819_v4  ;;  %v10662_v0 = vld [vmem:[%s14474_s5 + $0x2d8] sm:$0xff]   ;;  %v10667_v56 = vld [vmem:[%s14474_s5 + $0x290] sm:$0xff]   ;;  %v10690_v59 = vld [vmem:[%s14474_s5 + $0x3e0] sm:$0xff]  }
 0x5a7   :  { %7542 = vmatprep.mubr.bf16.mxu1 %v5841_v36  ;;  %9716 = vmatpush3.bf16.msra.mxu0 %v10613_v16  ;;  %v10665_v36 = vld [vmem:[%s14474_s5 + $0x210] sm:$0xff]   ;;  %v10693_v29 = vld [vmem:[%s14474_s5 + $0x318] sm:$0xff]  }
 0x5a8   :  { %9717 = vmatprep.subr.bf16.mxu0 %v10616_v44  ;;  %7582 = vmatprep.mubr.bf16.mxu0 %v5843_v3  ;;  %v10666_v16 = vld [vmem:[%s14474_s5 + $0x2d0] sm:$0xff]   ;;  %v10671_v44 = vld [vmem:[%s14474_s5 + $0x288] sm:$0xff]   ;;  %v10691_v3 = vld [vmem:[%s14474_s5 + $0x3a0] sm:$0xff]  }
 0x5a9   :  { %9702 = vmatpush3.bf16.msra.mxu1 %v10599_v11  ;;  %v10646_v11 = vld [vmem:[%s14474_s5 + $0x2f8] sm:$0xff]   ;;  %v10696_v60 = vld [vmem:[%s14474_s5 + $0x350] sm:$0xff]  }
 0x5aa   :  { %9703 = vmatprep.subr.bf16.mxu1 %v10602_v13  ;;  %v10649_v13 = vld [vmem:[%s14474_s5 + $0x230] sm:$0xff]  }
 0x5ab   :  { %9718 = vmatpush3.bf16.msra.mxu0 %v10617_v37  ;;  %v10672_v37 = vld [vmem:[%s14474_s5 + $0x240] sm:$0xff]   ;;  %v10699_v4 = vld [vmem:[%s14474_s5 + $0x390] sm:$0xff]  }
 0x5ac   :  { %9719 = vmatprep.subr.bf16.mxu0 %v10620_v21  ;;  %v5822_v21 = vld [vmem:[#allocation2 + $0x48] sm:$0xff] }
 0x5ad   :  { %9704 = vmatpush3.bf16.msra.mxu1 %v10603_v26  ;;  %v10650_v26 = vld [vmem:[%s14474_s5 + $0x2f0] sm:$0xff]  }
 0x5ae   :  { %9705 = vmatprep.subr.bf16.mxu1 %v10606_v22  ;;  %v10653_v22 = vld [vmem:[%s14474_s5 + $0x228] sm:$0xff]  }
 0x5af   :  { %9720 = vmatpush3.bf16.msra.mxu0 %v10621_v28  ;;  %v5847_v28 = vpack.c.bf16 %v5822_v21, %v5822_v21  ;;  %v10722_v21 = vld [vmem:[%s14474_s5 + $0x4e0] sm:$0xff]  }
 0x5b0   :  { %9721 = vmatprep.subr.bf16.mxu0 %v10624_v52 }
 0x5b1   :  { %9706 = vmatpush3.bf16.msra.mxu1 %v10607_v1  ;;  %v10654_v1 = vld [vmem:[%s14474_s5 + $0x2e8] sm:$0xff]  }
 0x5b2   :  { %9707 = vmatprep.subr.bf16.mxu1 %v10610_v23  ;;  %v10657_v23 = vld [vmem:[%s14474_s5 + $0x220] sm:$0xff]  }
 0x5b3   :  { %9722 = vmatpush3.bf16.msra.mxu0 %v10625_v7  ;;  %v10676_v7 = vld [vmem:[%s14474_s5 + $0x378] sm:$0xff]  }
 0x5b4   :  { %9723 = vmatprep.subr.bf16.mxu0 %v10628_v48  ;;  %v10677_v48 = vld [vmem:[%s14474_s5 + $0x338] sm:$0xff]  }
 0x5b5   :  { %9708 = vmatpush3.bf16.msra.mxu1 %v10611_v5  ;;  %v10660_v5 = vld [vmem:[%s14474_s5 + $0x258] sm:$0xff]  }
 0x5b6   :  { %9737 = vmatprep.subr.bf16.mxu1 %v10614_v12  ;;  %v10669_v12 = vld [vmem:[%s14474_s5 + $0x208] sm:$0xff]  }
 0x5b7   :  { %9724 = vmatpush3.bf16.msra.mxu0 %v10629_v40  ;;  %v5823_v40 = vld [vmem:[#allocation2 + $0x50] sm:$0xff] }
 0x5b8   :  { %7543 = vmatmul.mubr.bf16.vlgmr.msra.gmra.mxu1 %v5840_v38  ;;  %9725 = vmatprep.subr.bf16.mxu0 %v10632_v54  ;;  %v10668_v38 = vld [vmem:[%s14474_s5 + $0x248] sm:$0xff]   ;;  %v10679_v54 = vld [vmem:[%s14474_s5 + $0x3b8] sm:$0xff]  }
 0x5b9   :  { %9738 = vmatpush3.bf16.msra.mxu1 %v10615_v19  ;;  %7622 = vmatprep.mubr.bf16.mxu1 %v5845_v20  ;;  %v10670_v19 = vld [vmem:[%s14474_s5 + $0x2c8] sm:$0xff]   ;;  %v10697_v20 = vld [vmem:[%s14474_s5 + $0x310] sm:$0xff]  }
 0x5ba   :  { %9739 = vmatprep.subr.bf16.mxu1 %v10618_v10  ;;  %v10673_v10 = vld [vmem:[%s14474_s5 + $0x200] sm:$0xff]  }
 0x5bb   :  { %9726 = vmatpush3.bf16.msra.mxu0 %v10633_v25  ;;  %v10680_v25 = vld [vmem:[%s14474_s5 + $0x370] sm:$0xff]  }
 0x5bc   :  { %9727 = vmatprep.subr.bf16.mxu0 %v10636_v18  ;;  %v10683_v18 = vld [vmem:[%s14474_s5 + $0x3b0] sm:$0xff]  }
 0x5bd   :  { %9740 = vmatpush3.bf16.msra.mxu1 %v10619_v17  ;;  %v10674_v17 = vld [vmem:[%s14474_s5 + $0x2c0] sm:$0xff]  }
 0x5be   :  { %9741 = vmatprep.subr.bf16.mxu1 %v10622_v49  ;;  %v10675_v49 = vld [vmem:[%s14474_s5 + $0x280] sm:$0xff]  }
 0x5bf   :  { %9728 = vmatpush3.bf16.msra.mxu0 %v10637_v34  ;;  %v10684_v34 = vld [vmem:[%s14474_s5 + $0x368] sm:$0xff]  }
 0x5c0   :  { %9729 = vmatprep.subr.bf16.mxu0 %v10640_v43  ;;  %v10687_v43 = vld [vmem:[%s14474_s5 + $0x3a8] sm:$0xff]  }
 0x5c1   :  { %9742 = vmatpush3.bf16.msra.mxu1 %v10623_v35  ;;  %v5821_v35 = vld [vmem:[#allocation2 + $0x40] sm:$0xff] }
 0x5c2   :  { %9743 = vmatprep.subr.bf16.mxu1 %v10626_v41  ;;  %v5846_v52 = vpack.c.bf16 %v5821_v35, %v5821_v35  ;;  %v5824_v41 = vld [vmem:[#allocation2 + $0x58] sm:$0xff] }
 0x5c3   :  { %9730 = vmatpush3.bf16.msra.mxu0 %v10641_v24  ;;  %v10688_v24 = vld [vmem:[%s14474_s5 + $0x360] sm:$0xff]   ;;  %v10725_v35 = vld [vmem:[%s14474_s5 + $0x418] sm:$0xff]  }
 0x5c4   :  { %9759 = vmatprep.subr.bf16.mxu0 %v10644_v51  ;;  %v10695_v51 = vld [vmem:[%s14474_s5 + $0x398] sm:$0xff]  }
 0x5c5   :  { %9744 = vmatpush3.bf16.msra.mxu1 %v10627_v53  ;;  %v5849_v53 = vpack.c.bf16 %v5824_v41, %v5824_v41  ;;  %v10728_v41 = vld [vmem:[%s14474_s5 + $0x450] sm:$0xff]  }
 0x5c6   :  { %9745 = vmatprep.subr.bf16.mxu1 %v10630_v55  ;;  %7583 = vmatmul.mubr.bf16.vlgmr.msra.gmra.mxu0 %v5842_v58  ;;  %v5848_v55 = vpack.c.bf16 %v5823_v40, %v5823_v40  ;;  %v10694_v58 = vld [vmem:[%s14474_s5 + $0x3d8] sm:$0xff]   ;;  %v10731_v40 = vld [vmem:[%s14474_s5 + $0x490] sm:$0xff]  }
 0x5c7   :  { %9760 = vmatpush3.bf16.msra.mxu0 %v10645_v45  ;;  %7662 = vmatprep.mubr.bf16.mxu0 %v5847_v28  ;;  %v10698_v45 = vld [vmem:[%s14474_s5 + $0x3d0] sm:$0xff]   ;;  %v10723_v28 = vld [vmem:[%s14474_s5 + $0x4a0] sm:$0xff]  }
 0x5c8   :  { %9761 = vmatprep.subr.bf16.mxu0 %v10648_v15  ;;  %v10703_v15 = vld [vmem:[%s14474_s5 + $0x388] sm:$0xff]  }
 0x5c9   :  { %9746 = vmatpush3.bf16.msra.mxu1 %v10631_v30  ;;  %v10678_v30 = vld [vmem:[%s14474_s5 + $0x3f8] sm:$0xff]  }
 0x5ca   :  { %9747 = vmatprep.subr.bf16.mxu1 %v10634_v62  ;;  %v10681_v62 = vld [vmem:[%s14474_s5 + $0x330] sm:$0xff]  }
 0x5cb   :  { %9762 = vmatpush3.bf16.msra.mxu0 %v10649_v13  ;;  %v10704_v13 = vld [vmem:[%s14474_s5 + $0x340] sm:$0xff]  }
 0x5cc   :  { %9763 = vmatprep.subr.bf16.mxu0 %v10652_v31  ;;  %v5826_v31 = vld [vmem:[#allocation2 + $0x68] sm:$0xff] }
 0x5cd   :  { %9748 = vmatpush3.bf16.msra.mxu1 %v10635_v9  ;;  %v10682_v9 = vld [vmem:[%s14474_s5 + $0x3f0] sm:$0xff]  }
 0x5ce   :  { %9749 = vmatprep.subr.bf16.mxu1 %v10638_v39  ;;  %v10685_v39 = vld [vmem:[%s14474_s5 + $0x328] sm:$0xff]  }
 0x5cf   :  { %9764 = vmatpush3.bf16.msra.mxu0 %v10653_v22  ;;  %v5851_v22 = vpack.c.bf16 %v5826_v31, %v5826_v31  ;;  %v10754_v31 = vld [vmem:[%s14474_s5 + $0x5e0] sm:$0xff]  }
 0x5d0   :  { %9765 = vmatprep.subr.bf16.mxu0 %v10656_v8 }
 0x5d1   :  { %9750 = vmatpush3.bf16.msra.mxu1 %v10639_v27  ;;  %v10686_v27 = vld [vmem:[%s14474_s5 + $0x3e8] sm:$0xff]  }
 0x5d2   :  { %9751 = vmatprep.subr.bf16.mxu1 %v10642_v42  ;;  %v10689_v42 = vld [vmem:[%s14474_s5 + $0x320] sm:$0xff]  }
 0x5d3   :  { %9766 = vmatpush3.bf16.msra.mxu0 %v10657_v23  ;;  %v10708_v23 = vld [vmem:[%s14474_s5 + $0x478] sm:$0xff]  }
 0x5d4   :  { %9767 = vmatprep.subr.bf16.mxu0 %v10660_v5  ;;  %v10709_v5 = vld [vmem:[%s14474_s5 + $0x438] sm:$0xff]  }
 0x5d5   :  { %9752 = vmatpush3.bf16.msra.mxu1 %v10643_v50  ;;  %v10692_v50 = vld [vmem:[%s14474_s5 + $0x358] sm:$0xff]  }
 0x5d6   :  { %9781 = vmatprep.subr.bf16.mxu1 %v10646_v11  ;;  %v10701_v11 = vld [vmem:[%s14474_s5 + $0x308] sm:$0xff]  }
 0x5d7   :  { %9768 = vmatpush3.bf16.msra.mxu0 %v10661_v32  ;;  %v5827_v32 = vld [vmem:[#allocation2 + $0x70] sm:$0xff] }
 0x5d8   :  { %7623 = vmatmul.mubr.bf16.vlgmr.msra.gmra.mxu1 %v5844_v2  ;;  %9769 = vmatprep.subr.bf16.mxu0 %v10664_v61  ;;  %v10700_v2 = vld [vmem:[%s14474_s5 + $0x348] sm:$0xff]   ;;  %v10711_v61 = vld [vmem:[%s14474_s5 + $0x4b8] sm:$0xff]  }
 0x5d9   :  { %9782 = vmatpush3.bf16.msra.mxu1 %v10647_v33  ;;  %7702 = vmatprep.mubr.bf16.mxu1 %v5849_v53  ;;  %v10702_v33 = vld [vmem:[%s14474_s5 + $0x3c8] sm:$0xff]   ;;  %v10729_v53 = vld [vmem:[%s14474_s5 + $0x410] sm:$0xff]  }
 0x5da   :  { %9783 = vmatprep.subr.bf16.mxu1 %v10650_v26  ;;  %v10705_v26 = vld [vmem:[%s14474_s5 + $0x300] sm:$0xff]  }
 0x5db   :  { %9770 = vmatpush3.bf16.msra.mxu0 %v10665_v36  ;;  %v10712_v36 = vld [vmem:[%s14474_s5 + $0x470] sm:$0xff]  }
 0x5dc   :  { %9771 = vmatprep.subr.bf16.mxu0 %v10668_v38  ;;  %v10715_v38 = vld [vmem:[%s14474_s5 + $0x4b0] sm:$0xff]  }
 0x5dd   :  { %9784 = vmatpush3.bf16.msra.mxu1 %v10651_v46  ;;  %v10706_v46 = vld [vmem:[%s14474_s5 + $0x3c0] sm:$0xff]  }
 0x5de   :  { %9785 = vmatprep.subr.bf16.mxu1 %v10654_v1  ;;  %v10707_v1 = vld [vmem:[%s14474_s5 + $0x380] sm:$0xff]  }
 0x5df   :  { %9772 = vmatpush3.bf16.msra.mxu0 %v10669_v12  ;;  %v10716_v12 = vld [vmem:[%s14474_s5 + $0x468] sm:$0xff]  }
 0x5e0   :  { %9773 = vmatprep.subr.bf16.mxu0 %v10672_v37  ;;  %v10719_v37 = vld [vmem:[%s14474_s5 + $0x4a8] sm:$0xff]  }
 0x5e1   :  { %9786 = vmatpush3.bf16.msra.mxu1 %v10655_v14  ;;  %v5825_v14 = vld [vmem:[#allocation2 + $0x60] sm:$0xff] }
 0x5e2   :  { %9787 = vmatprep.subr.bf16.mxu1 %v10658_v47  ;;  %v5850_v8 = vpack.c.bf16 %v5825_v14, %v5825_v14  ;;  %v5828_v47 = vld [vmem:[#allocation2 + $0x78] sm:$0xff] }
 0x5e3   :  { %9774 = vmatpush3.bf16.msra.mxu0 %v10673_v10  ;;  %v10720_v10 = vld [vmem:[%s14474_s5 + $0x460] sm:$0xff]   ;;  %v10757_v14 = vld [vmem:[%s14474_s5 + $0x518] sm:$0xff]  }
 0x5e4   :  { %9803 = vmatprep.subr.bf16.mxu0 %v10676_v7  ;;  %v10727_v7 = vld [vmem:[%s14474_s5 + $0x498] sm:$0xff]  }
 0x5e5   :  { %9788 = vmatpush3.bf16.msra.mxu1 %v10659_v57  ;;  %v5853_v57 = vpack.c.bf16 %v5828_v47, %v5828_v47  ;;  %v10760_v47 = vld [vmem:[%s14474_s5 + $0x550] sm:$0xff]  }
 0x5e6   :  { %9789 = vmatprep.subr.bf16.mxu1 %v10662_v0  ;;  %7663 = vmatmul.mubr.bf16.vlgmr.msra.gmra.mxu0 %v5846_v52  ;;  %v5852_v0 = vpack.c.bf16 %v5827_v32, %v5827_v32  ;;  %v10726_v52 = vld [vmem:[%s14474_s5 + $0x4d8] sm:$0xff]   ;;  %v10763_v32 = vld [vmem:[%s14474_s5 + $0x590] sm:$0xff]  }
 0x5e7   :  { %9804 = vmatpush3.bf16.msra.mxu0 %v10677_v48  ;;  %7742 = vmatprep.mubr.bf16.mxu0 %v5851_v22  ;;  %v10730_v48 = vld [vmem:[%s14474_s5 + $0x4d0] sm:$0xff]   ;;  %v10755_v22 = vld [vmem:[%s14474_s5 + $0x5a0] sm:$0xff]  }
 0x5e8   :  { %9805 = vmatprep.subr.bf16.mxu0 %v10680_v25  ;;  %v10735_v25 = vld [vmem:[%s14474_s5 + $0x488] sm:$0xff]  }
 0x5e9   :  { %9790 = vmatpush3.bf16.msra.mxu1 %v10663_v6  ;;  %v10710_v6 = vld [vmem:[%s14474_s5 + $0x4f8] sm:$0xff]  }
 0x5ea   :  { %9791 = vmatprep.subr.bf16.mxu1 %v10666_v16  ;;  %v10713_v16 = vld [vmem:[%s14474_s5 + $0x430] sm:$0xff]  }
 0x5eb   :  { %9806 = vmatpush3.bf16.msra.mxu0 %v10681_v62  ;;  %v10736_v62 = vld [vmem:[%s14474_s5 + $0x440] sm:$0xff]  }
 0x5ec   :  { %9807 = vmatprep.subr.bf16.mxu0 %v10684_v34  ;;  %v5830_v34 = vld [vmem:[#allocation2 + $0x88] sm:$0xff] }
 0x5ed   :  { %9792 = vmatpush3.bf16.msra.mxu1 %v10667_v56  ;;  %v10714_v56 = vld [vmem:[%s14474_s5 + $0x4f0] sm:$0xff]  }
 0x5ee   :  { %9793 = vmatprep.subr.bf16.mxu1 %v10670_v19  ;;  %v10717_v19 = vld [vmem:[%s14474_s5 + $0x428] sm:$0xff]  }
 0x5ef   :  { %9808 = vmatpush3.bf16.msra.mxu0 %v10685_v39  ;;  %v5855_v39 = vpack.c.bf16 %v5830_v34, %v5830_v34 }
 0x5f0   :  { %9809 = vmatprep.subr.bf16.mxu0 %v10688_v24 }
 0x5f1   :  { %9794 = vmatpush3.bf16.msra.mxu1 %v10671_v44  ;;  %v10718_v44 = vld [vmem:[%s14474_s5 + $0x4e8] sm:$0xff]  }
 0x5f2   :  { %9795 = vmatprep.subr.bf16.mxu1 %v10674_v17  ;;  %v10721_v17 = vld [vmem:[%s14474_s5 + $0x420] sm:$0xff]  }
 0x5f3   :  { %9810 = vmatpush3.bf16.msra.mxu0 %v10689_v42  ;;  %v10740_v42 = vld [vmem:[%s14474_s5 + $0x578] sm:$0xff]  }
 0x5f4   :  { %9811 = vmatprep.subr.bf16.mxu0 %v10692_v50  ;;  %v10741_v50 = vld [vmem:[%s14474_s5 + $0x538] sm:$0xff]  }
 0x5f5   :  { %9796 = vmatpush3.bf16.msra.mxu1 %v10675_v49  ;;  %v10724_v49 = vld [vmem:[%s14474_s5 + $0x458] sm:$0xff]  }
 0x5f6   :  { %9825 = vmatprep.subr.bf16.mxu1 %v10678_v30  ;;  %v10733_v30 = vld [vmem:[%s14474_s5 + $0x408] sm:$0xff]  }
 0x5f7   :  { %9812 = vmatpush3.bf16.msra.mxu0 %v10693_v29  ;;  %v5831_v29 = vld [vmem:[#allocation2 + $0x90] sm:$0xff] }
 0x5f8   :  { %7703 = vmatmul.mubr.bf16.vlgmr.msra.gmra.mxu1 %v5848_v55  ;;  %9813 = vmatprep.subr.bf16.mxu0 %v10696_v60  ;;  %v10732_v55 = vld [vmem:[%s14474_s5 + $0x448] sm:$0xff]   ;;  %v10743_v60 = vld [vmem:[%s14474_s5 + $0x5b8] sm:$0xff]  }
 0x5f9   :  { %9826 = vmatpush3.bf16.msra.mxu1 %v10679_v54  ;;  %7782 = vmatprep.mubr.bf16.mxu1 %v5853_v57  ;;  %v10734_v54 = vld [vmem:[%s14474_s5 + $0x4c8] sm:$0xff]   ;;  %v10761_v57 = vld [vmem:[%s14474_s5 + $0x510] sm:$0xff]  }
 0x5fa   :  { %9827 = vmatprep.subr.bf16.mxu1 %v10682_v9  ;;  %v10737_v9 = vld [vmem:[%s14474_s5 + $0x400] sm:$0xff]  }
 0x5fb   :  { %9814 = vmatpush3.bf16.msra.mxu0 %v10697_v20  ;;  %v10744_v20 = vld [vmem:[%s14474_s5 + $0x570] sm:$0xff]  }
 0x5fc   :  { %9815 = vmatprep.subr.bf16.mxu0 %v10700_v2  ;;  %v10747_v2 = vld [vmem:[%s14474_s5 + $0x5b0] sm:$0xff]  }
 0x5fd   :  { %9828 = vmatpush3.bf16.msra.mxu1 %v10683_v18  ;;  %v10738_v18 = vld [vmem:[%s14474_s5 + $0x4c0] sm:$0xff]  }
 0x5fe   :  { %9829 = vmatprep.subr.bf16.mxu1 %v10686_v27  ;;  %v10739_v27 = vld [vmem:[%s14474_s5 + $0x480] sm:$0xff]  }
 0x5ff   :  { %9816 = vmatpush3.bf16.msra.mxu0 %v10701_v11  ;;  %v10748_v11 = vld [vmem:[%s14474_s5 + $0x568] sm:$0xff]  }
 0x600   :  { %9817 = vmatprep.subr.bf16.mxu0 %v10704_v13  ;;  %v10751_v13 = vld [vmem:[%s14474_s5 + $0x5a8] sm:$0xff]  }
 0x601   :  { %9830 = vmatpush3.bf16.msra.mxu1 %v10687_v43  ;;  %v5829_v43 = vld [vmem:[#allocation2 + $0x80] sm:$0xff] }
 0x602   :  { %9831 = vmatprep.subr.bf16.mxu1 %v10690_v59  ;;  %v5854_v24 = vpack.c.bf16 %v5829_v43, %v5829_v43  ;;  %v5832_v59 = vld [vmem:[#allocation2 + $0x98] sm:$0xff] }
 0x603   :  { %9818 = vmatpush3.bf16.msra.mxu0 %v10705_v26  ;;  %v10752_v26 = vld [vmem:[%s14474_s5 + $0x560] sm:$0xff]  }
 0x604   :  { %9847 = vmatprep.subr.bf16.mxu0 %v10708_v23  ;;  %v10759_v23 = vld [vmem:[%s14474_s5 + $0x598] sm:$0xff]  }
 0x605   :  { %9832 = vmatpush3.bf16.msra.mxu1 %v10691_v3  ;;  %v5857_v3 = vpack.c.bf16 %v5832_v59, %v5832_v59 }
 0x606   :  { %9833 = vmatprep.subr.bf16.mxu1 %v10694_v58  ;;  %7743 = vmatmul.mubr.bf16.vlgmr.msra.gmra.mxu0 %v5850_v8  ;;  %v5856_v58 = vpack.c.bf16 %v5831_v29, %v5831_v29  ;;  %v10758_v8 = vld [vmem:[%s14474_s5 + $0x5d8] sm:$0xff]  }
 0x607   :  { %9848 = vmatpush3.bf16.msra.mxu0 %v10709_v5  ;;  %7822 = vmatprep.mubr.bf16.mxu0 %v5855_v39  ;;  %v10762_v5 = vld [vmem:[%s14474_s5 + $0x5d0] sm:$0xff]  }
 0x608   :  { %9849 = vmatprep.subr.bf16.mxu0 %v10712_v36  ;;  %v10767_v36 = vld [vmem:[%s14474_s5 + $0x588] sm:$0xff]  }
 0x609   :  { %9834 = vmatpush3.bf16.msra.mxu1 %v10695_v51  ;;  %v10742_v51 = vld [vmem:[%s14474_s5 + $0x5f8] sm:$0xff]  }
 0x60a   :  { %9835 = vmatprep.subr.bf16.mxu1 %v10698_v45  ;;  %v10745_v45 = vld [vmem:[%s14474_s5 + $0x530] sm:$0xff]  }
 0x60b   :  { %9850 = vmatpush3.bf16.msra.mxu0 %v10713_v16  ;;  %v10768_v16 = vld [vmem:[%s14474_s5 + $0x540] sm:$0xff]  }
 0x60c   :  { %9851 = vmatprep.subr.bf16.mxu0 %v10716_v12  ;;  %v5834_v12 = vld [vmem:[#allocation2 + $0xa8] sm:$0xff] }
 0x60d   :  { %9836 = vmatpush3.bf16.msra.mxu1 %v10699_v4  ;;  %v10746_v4 = vld [vmem:[%s14474_s5 + $0x5f0] sm:$0xff]  }
 0x60e   :  { %9837 = vmatprep.subr.bf16.mxu1 %v10702_v33  ;;  %v10749_v33 = vld [vmem:[%s14474_s5 + $0x528] sm:$0xff]  }
 0x60f   :  { %9852 = vmatpush3.bf16.msra.mxu0 %v10717_v19  ;;  %v5859_v19 = vpack.c.bf16 %v5834_v12, %v5834_v12 }
 0x610   :  { %9853 = vmatprep.subr.bf16.mxu0 %v10720_v10  ;;  %v10811_v10 = vmov 0.0  }
 0x611   :  { %9838 = vmatpush3.bf16.msra.mxu1 %v10703_v15  ;;  %v10750_v15 = vld [vmem:[%s14474_s5 + $0x5e8] sm:$0xff]  }
 0x612   :  { %9839 = vmatprep.subr.bf16.mxu1 %v10706_v46  ;;  %v10753_v46 = vld [vmem:[%s14474_s5 + $0x520] sm:$0xff]  }
 0x613   :  { %9854 = vmatpush3.bf16.msra.mxu0 %v10721_v17  ;;  %v5836_v17 = vld [vmem:[#allocation2 + $0xb8] sm:$0xff] }
 0x614   :  { %9855 = vmatprep.subr.bf16.mxu0 %v10724_v49  ;;  %v10772_v49 = vld [vmem:[%s14474_s5 + $0x638] sm:$0xff]  }
 0x615   :  { %9840 = vmatpush3.bf16.msra.mxu1 %v10707_v1  ;;  %v10756_v1 = vld [vmem:[%s14474_s5 + $0x558] sm:$0xff]  }
 0x616   :  { %9869 = vmatprep.subr.bf16.mxu1 %v10710_v6  ;;  %v10765_v6 = vld [vmem:[%s14474_s5 + $0x508] sm:$0xff]  }
 0x617   :  { %9856 = vmatpush3.bf16.msra.mxu0 %v10725_v35  ;;  %v5835_v35 = vld [vmem:[#allocation2 + $0xb0] sm:$0xff] }
 0x618   :  { %7783 = vmatmul.mubr.bf16.vlgmr.msra.gmra.mxu1 %v5852_v0  ;;  %9857 = vmatprep.subr.bf16.mxu0 %v10728_v41  ;;  %v10764_v0 = vld [vmem:[%s14474_s5 + $0x548] sm:$0xff]  }
 0x619   :  { %9870 = vmatpush3.bf16.msra.mxu1 %v10711_v61  ;;  %7862 = vmatprep.mubr.bf16.mxu1 %v5857_v3  ;;  %v10766_v61 = vld [vmem:[%s14474_s5 + $0x5c8] sm:$0xff]  }
 0x61a   :  { %9871 = vmatprep.subr.bf16.mxu1 %v10714_v56  ;;  %v10769_v56 = vld [vmem:[%s14474_s5 + $0x500] sm:$0xff]   ;;  %v10774_v41 = vld [vmem:[%s14474_s5 + $0x628] sm:$0xff]  }
 0x61b   :  { %9858 = vmatpush3.bf16.msra.mxu0 %v10729_v53  ;;  %v10775_v53 = vld [vmem:[%s14474_s5 + $0x620] sm:$0xff]  }
 0x61c   :  { %9859 = vmatprep.subr.bf16.mxu0 %v10732_v55  ;;  %v10778_v55 = vld [vmem:[%s14474_s5 + $0x608] sm:$0xff]  }
 0x61d   :  { %9872 = vmatpush3.bf16.msra.mxu1 %v10715_v38  ;;  %v10770_v38 = vld [vmem:[%s14474_s5 + $0x5c0] sm:$0xff]  }
 0x61e   :  { %9873 = vmatprep.subr.bf16.mxu1 %v10718_v44  ;;  %v10771_v44 = vld [vmem:[%s14474_s5 + $0x580] sm:$0xff]  }
 0x61f   :  { %9860 = vmatpush3.bf16.msra.mxu0 %v10733_v30  ;;  %v10779_v30 = vld [vmem:[%s14474_s5 + $0x600] sm:$0xff]  }
 0x620   :  { %9861 = vmatprep.subr.bf16.mxu0 %v10736_v62  ;;  %v8537_v62 = vld [vmem:[%s14475_s6] ss:$0 sm:$0xff] }
 0x621   :  { %9874 = vmatpush3.bf16.msra.mxu1 %v10719_v37  ;;  %v5833_v37 = vld [vmem:[#allocation2 + $0xa0] sm:$0xff] }
 0x622   :  { %9875 = vmatprep.subr.bf16.mxu1 %v10722_v21  ;;  %v5858_v21 = vpack.c.bf16 %v5833_v37, %v5833_v37  ;;  %v10789_v37 = vld [vmem:[%s14478_s9 + $0x30] sm:$0xff]  }
 0x623   :  { %9862 = vmatpush3.bf16.msra.mxu0 %v10737_v9 }
 0x624   :  { %9891 = vmatprep.subr.bf16.mxu0 %v10740_v42 }
 0x625   :  { %9876 = vmatpush3.bf16.msra.mxu1 %v10723_v28  ;;  %v5861_v28 = vpack.c.bf16 %v5836_v17, %v5836_v17  ;;  %v10790_v17 = vld [vmem:[%s14478_s9 + $0x28] sm:$0xff]  }
 0x626   :  { %9877 = vmatprep.subr.bf16.mxu1 %v10726_v52  ;;  %7823 = vmatmul.mubr.bf16.vlgmr.msra.gmra.mxu0 %v5854_v24  ;;  %v5860_v52 = vpack.c.bf16 %v5835_v35, %v5835_v35 }
 0x627   :  { %9892 = vmatpush3.bf16.msra.mxu0 %v10741_v50  ;;  %7902 = vmatprep.mubr.bf16.mxu0 %v5859_v19 }
 0x628   :  { %9893 = vmatprep.subr.bf16.mxu0 %v10744_v20 }
 0x629   :  { %9878 = vmatpush3.bf16.msra.mxu1 %v10727_v7  ;;  %v10773_v7 = vld [vmem:[%s14474_s5 + $0x630] sm:$0xff]  }
 0x62a   :  { %9879 = vmatprep.subr.bf16.mxu1 %v10730_v48  ;;  %v10776_v48 = vld [vmem:[%s14474_s5 + $0x618] sm:$0xff]  }
 0x62b   :  { %9894 = vmatpush3.bf16.msra.mxu0 %v10745_v45 }
 0x62c   :  { %9895 = vmatprep.subr.bf16.mxu0 %v10748_v11 }
 0x62d   :  { %9880 = vmatpush3.bf16.msra.mxu1 %v10731_v40  ;;  %v10777_v40 = vld [vmem:[%s14474_s5 + $0x610] sm:$0xff]  }
 0x62e   :  { %9881 = vmatprep.subr.bf16.mxu1 %v10734_v54 }
 0x62f   :  { %9896 = vmatpush3.bf16.msra.mxu0 %v10749_v33 }
 0x630   :  { %9897 = vmatprep.subr.bf16.mxu0 %v10752_v26 }
 0x631   :  { %9882 = vmatpush3.bf16.msra.mxu1 %v10735_v25  ;;  %v5837_v25 = vld [vmem:[#allocation2 + $0xc0] sm:$0xff] }
 0x632   :  { %9883 = vmatprep.subr.bf16.mxu1 %v10738_v18  ;;  %v5862_v18 = vpack.c.bf16 %v5837_v25, %v5837_v25 }
 0x633   :  { %9898 = vmatpush3.bf16.msra.mxu0 %v10753_v46  ;;  %v10780_v46 = vld [vmem:[%s14476_s7 + $0x38] sm:$0xff]  }
 0x634   :  { %9899 = vmatprep.subr.bf16.mxu0 %v10756_v1  ;;  %v10783_v1 = vld [vmem:[%s14476_s7 + $0x20] sm:$0xff]  }
 0x635   :  { %9884 = vmatpush3.bf16.msra.mxu1 %v10739_v27 }
 0x636   :  { %9913 = vmatprep.subr.bf16.mxu1 %v10742_v51 }
 0x637   :  { %9900 = vmatpush3.bf16.msra.mxu0 %v10757_v14  ;;  %v10784_v14 = vld [vmem:[%s14476_s7 + $0x18] sm:$0xff]  }
 0x638   :  { %7863 = vmatmul.mubr.bf16.vlgmr.msra.gmra.mxu1 %v5856_v58  ;;  %9901 = vmatprep.subr.bf16.mxu0 %v10760_v47 }
 0x639   :  { %9914 = vmatpush3.bf16.msra.mxu1 %v10743_v60  ;;  %7942 = vmatprep.mubr.bf16.mxu1 %v5861_v28  ;;  %v10792_v28 = vld [vmem:[%s14478_s9 + $0x18] sm:$0xff]  }
 0x63a   :  { %9915 = vmatprep.subr.bf16.mxu1 %v10746_v4 }
 0x63b   :  { %9902 = vmatpush3.bf16.msra.mxu0 %v10761_v57 }
 0x63c   :  { %9903 = vmatprep.subr.bf16.mxu0 %v10764_v0 }
 0x63d   :  { %9916 = vmatpush3.bf16.msra.mxu1 %v10747_v2 }
 0x63e   :  { %9917 = vmatprep.subr.bf16.mxu1 %v10750_v15 }
 0x63f   :  { %9904 = vmatpush3.bf16.msra.mxu0 %v10765_v6 }
 0x640   :  { %9905 = vmatprep.subr.bf16.mxu0 %v10768_v16 }
 0x641   :  { %9918 = vmatpush3.bf16.msra.mxu1 %v10751_v13 }
 0x642   :  { %9919 = vmatprep.subr.bf16.mxu1 %v10754_v31  ;;  %v10781_v31 = vld [vmem:[%s14476_s7 + $0x30] sm:$0xff]  }
 0x643   :  { %9906 = vmatpush3.bf16.msra.mxu0 %v10769_v56 }
 0x644   :  { %10226 = vmatprep.subr.bf16.mxu0 %v10811_v10 }
 0x645   :  { %9920 = vmatpush3.bf16.msra.mxu1 %v10755_v22  ;;  %v10782_v22 = vld [vmem:[%s14476_s7 + $0x28] sm:$0xff]  }
 0x646   :  { %9921 = vmatprep.subr.bf16.mxu1 %v10758_v8  ;;  %7903 = vmatmul.mubr.bf16.vlgmr.msra.gmra.mxu0 %v5858_v21  ;;  %v10785_v8 = vld [vmem:[%s14476_s7 + $0x10] sm:$0xff]   ;;  %v10791_v21 = vld [vmem:[%s14478_s9 + $0x20] sm:$0xff]  }
 0x647   :  { %10227 = vmatpush3.bf16.msra.mxu0 %v10772_v49  ;;  %10242 = vmatprep.mubr.msk.bf16.mxu0 %vm10812_vm14, %v10811_v10  ;;  %v10793_v49 = vld [vmem:[%s14478_s9 + $0x10] sm:$0xff]  }
 0x648   :  { %10228 = vmatprep.subr.bf16.mxu0 %v10811_v10 }
 0x649   :  { %9922 = vmatpush3.bf16.msra.mxu1 %v10759_v23 }
 0x64a   :  { %9923 = vmatprep.subr.bf16.mxu1 %v10762_v5  ;;  %v10786_v5 = vld [vmem:[%s14476_s7 + $0x8] sm:$0xff]  }
 0x64b   :  { %10229 = vmatpush3.bf16.msra.mxu0 %v10773_v7 }
 0x64c   :  { %10230 = vmatprep.subr.bf16.mxu0 %v10811_v10 }
 0x64d   :  { %9924 = vmatpush3.bf16.msra.mxu1 %v10763_v32 }
 0x64e   :  { %9925 = vmatprep.subr.bf16.mxu1 %v10766_v61 }
 0x64f   :  { %10231 = vmatpush3.bf16.msra.mxu0 %v10774_v41 }
 0x650   :  { %10232 = vmatprep.subr.bf16.mxu0 %v10811_v10 }
 0x651   :  { %9926 = vmatpush3.bf16.msra.mxu1 %v10767_v36 }
 0x652   :  { %9927 = vmatprep.subr.bf16.mxu1 %v10770_v38  ;;  %v10787_v38 = vld [vmem:[%s14476_s7] sm:$0xff]  }
 0x653   :  { %10233 = vmatpush3.bf16.msra.mxu0 %v10775_v53 }
 0x654   :  { %10234 = vmatprep.subr.bf16.mxu0 %v10811_v10 }
 0x655   :  { %9928 = vmatpush3.bf16.msra.mxu1 %v10771_v44  ;;  %v10788_v44 = vld [vmem:[%s14478_s9 + $0x38] sm:$0xff]  }
 0x656   :  { %10246 = vmatprep.subr.bf16.mxu1 %v10811_v10 }
 0x657   :  { %10235 = vmatpush3.bf16.msra.mxu0 %v10776_v48 }
 0x658   :  { %7943 = vmatmul.mubr.bf16.vlgmr.msra.gmra.mxu1 %v5860_v52  ;;  %10236 = vmatprep.subr.bf16.mxu0 %v10811_v10 }
 0x659   :  { %10262 = vmatprep.mubr.msk.bf16.mxu1 %vm10812_vm14, %v10811_v10  ;;  %10247 = vmatpush3.bf16.msra.mxu1 %v10780_v46 }
 0x65a   :  { %10248 = vmatprep.subr.bf16.mxu1 %v10811_v10 }
 0x65b   :  { %10237 = vmatpush3.bf16.msra.mxu0 %v10777_v40 }
 0x65c   :  { %10238 = vmatprep.subr.bf16.mxu0 %v10811_v10 }
 0x65d   :  { %10249 = vmatpush3.bf16.msra.mxu1 %v10781_v31 }
 0x65e   :  { %10250 = vmatprep.subr.bf16.mxu1 %v10811_v10 }
 0x65f   :  { %10239 = vmatpush3.bf16.msra.mxu0 %v10778_v55 }
 0x660   :  { %10240 = vmatprep.subr.bf16.mxu0 %v10811_v10 }
 0x661   :  { %10251 = vmatpush3.bf16.msra.mxu1 %v10782_v22 }
 0x662   :  { %10252 = vmatprep.subr.bf16.mxu1 %v10811_v10 }
 0x663   :  { %10241 = vmatpush3.bf16.msra.mxu0 %v10779_v30 }
 0x664   :  { %10266 = vmatprep.subr.bf16.mxu0 %v10811_v10 }
 0x665   :  { %10253 = vmatpush3.bf16.msra.mxu1 %v10783_v1 }
 0x666   :  { %v9687_v54 = vpop.f32.mrf.mxu0  ;;  %10243 = vmatmul.mubr.bf16.vlgmr.msra.gmra.mxu0 %v5862_v18  ;;  %10254 = vmatprep.subr.bf16.mxu1 %v10811_v10 }
 0x667   :  { %10282 = vmatprep.mubr.msk.bf16.mxu0 %vm10812_vm14, %v10811_v10  ;;  %10267 = vmatpush3.bf16.msra.mxu0 %v10788_v44 }
 0x668   :  { %v9688_v9 = vpop.f32.mrf.mxu0  ;;  %10268 = vmatprep.subr.bf16.mxu0 %v10811_v10 }
 0x669   :  { %v9689_v34 = vadd.f32 %v9688_v9, %v9687_v54  ;;  %10255 = vmatpush3.bf16.msra.mxu1 %v10784_v14 }
 0x66a   :  { %v9690_v27 = vpop.f32.mrf.mxu0  ;;  %10256 = vmatprep.subr.bf16.mxu1 %v10811_v10 }
 0x66b   :  { %v7505_v43 = vadd.f32 %v9689_v34, %v8537_v62  ;;  %10269 = vmatpush3.bf16.msra.mxu0 %v10789_v37 }
 0x66c   :  { %v9691_v59 = vpop.f32.mrf.mxu0  ;;  %10270 = vmatprep.subr.bf16.mxu0 %v10811_v10 }
 0x66d   :  { %10257 = vmatpush3.bf16.msra.mxu1 %v10785_v8 }
 0x66e   :  { %10258 = vmatprep.subr.bf16.mxu1 %v10811_v10 }
 0x66f   :  { %10271 = vmatpush3.bf16.msra.mxu0 %v10790_v17 }
 0x670   :  { %10272 = vmatprep.subr.bf16.mxu0 %v10811_v10 }
 0x671   :  { %10259 = vmatpush3.bf16.msra.mxu1 %v10786_v5  ;;  %v8738_v5 = vld [vmem:[%s14477_s8] ss:$0 sm:$0xff] }
 0x672   :  { %10260 = vmatprep.subr.bf16.mxu1 %v10811_v10 }
 0x673   :  { %10273 = vmatpush3.bf16.msra.mxu0 %v10791_v21 }
 0x674   :  { %10274 = vmatprep.subr.bf16.mxu0 %v10811_v10 }
 0x675   :  { %10261 = vmatpush3.bf16.msra.mxu1 %v10787_v38  ;;  %v8217_v38 = vand.u32 127, %v5623_v63 }
 0x677   :  { %10275 = vmatpush3.bf16.msra.mxu0 %v10792_v28  ;;  %vm8218_vm15 = vcmp.lt.s32.totalorder %v8217_v38, 10 }
 0x678   :  { %v9709_v39 = vpop.f32.mrf.mxu1  ;;  %10276 = vmatprep.subr.bf16.mxu0 %v10811_v10 }
 0x67a   :  { %v9710_v24 = vpop.f32.mrf.mxu1 }
 0x67b   :  { %v9711_v42 = vadd.f32 %v9710_v24, %v9709_v39  ;;  %10277 = vmatpush3.bf16.msra.mxu0 %v10793_v49 }
 0x67c   :  { %v9712_v3 = vpop.f32.mrf.mxu1  ;;  %10278 = vmatprep.subr.bf16.mxu0 %v10811_v10 }
 0x67d   :  { %v7545_v50 = vadd.f32 %v9711_v42, %v7505_v43 }
 0x67e   :  { %v9713_v29 = vpop.f32.mrf.mxu1 }
 0x686   :  { %v9731_v58 = vpop.f32.mrf.mxu0 }
 0x688   :  { %v9732_v51 = vpop.f32.mrf.mxu0 }
 0x689   :  { %v9733_v60 = vadd.f32 %v9732_v51, %v9731_v58 }
 0x68a   :  { %v9734_v45 = vpop.f32.mrf.mxu0 }
 0x68b   :  { %v7585_v4 = vadd.f32 %v9733_v60, %v7545_v50 }
 0x68c   :  { %v9735_v33 = vpop.f32.mrf.mxu0 }
 0x698   :  { %v9753_v20 = vpop.f32.mrf.mxu1 }
 0x69a   :  { %v9754_v2 = vpop.f32.mrf.mxu1 }
 0x69b   :  { %v9755_v11 = vadd.f32 %v9754_v2, %v9753_v20 }
 0x69c   :  { %v9756_v15 = vpop.f32.mrf.mxu1 }
 0x69d   :  { %v7625_v13 = vadd.f32 %v9755_v11, %v7585_v4 }
 0x69e   :  { %v9757_v26 = vpop.f32.mrf.mxu1 }
 0x6a6   :  { %v9775_v23 = vpop.f32.mrf.mxu0 }
 0x6a8   :  { %v9776_v47 = vpop.f32.mrf.mxu0 }
 0x6a9   :  { %v9777_v32 = vadd.f32 %v9776_v47, %v9775_v23  ;;  %v10794_v47 = vld [vmem:[%s14478_s9 + $0x8] sm:$0xff]  }
 0x6aa   :  { %v9778_v0 = vpop.f32.mrf.mxu0  ;;  %10279 = vmatpush3.bf16.msra.mxu0 %v10794_v47 }
 0x6ab   :  { %v7665_v61 = vadd.f32 %v9777_v32, %v7625_v13  ;;  %10280 = vmatprep.subr.bf16.mxu0 %v10811_v10  ;;  %v8747_v10 = vld [vmem:[%s14479_s10] ss:$0 sm:$0xff] }
 0x6ac   :  { %v9779_v16 = vpop.f32.mrf.mxu0 }
 0x6b8   :  { %v9797_v57 = vpop.f32.mrf.mxu1 }
 0x6ba   :  { %v9798_v6 = vpop.f32.mrf.mxu1 }
 0x6bb   :  { %v9799_v36 = vadd.f32 %v9798_v6, %v9797_v57  ;;  %v10795_v57 = vld [vmem:[%s14478_s9] sm:$0xff]  }
 0x6bc   :  { %v9800_v56 = vpop.f32.mrf.mxu1  ;;  %10281 = vmatpush3.bf16.msra.mxu0 %v10795_v57 }
 0x6bd   :  { %v7705_v12 = vadd.f32 %v9799_v36, %v7665_v61 }
 0x6be   :  { %v9801_v19 = vpop.f32.mrf.mxu1 }
 0x6c6   :  { %v9819_v35 = vpop.f32.mrf.mxu0 }
 0x6c8   :  { %v9820_v52 = vpop.f32.mrf.mxu0 }
 0x6c9   :  { %v9821_v7 = vadd.f32 %v9820_v52, %v9819_v35 }
 0x6ca   :  { %v9822_v53 = vpop.f32.mrf.mxu0 }
 0x6cb   :  { %v7745_v48 = vadd.f32 %v9821_v7, %v7705_v12 }
 0x6cc   :  { %v9823_v30 = vpop.f32.mrf.mxu0 }
 0x6d8   :  { %v9841_v41 = vpop.f32.mrf.mxu1 }
 0x6da   :  { %v9842_v40 = vpop.f32.mrf.mxu1 }
 0x6db   :  { %v9843_v55 = vadd.f32 %v9842_v40, %v9841_v41 }
 0x6dc   :  { %v9844_v54 = vpop.f32.mrf.mxu1 }
 0x6dd   :  { %v7785_v25 = vadd.f32 %v9843_v55, %v7745_v48 }
 0x6de   :  { %v9845_v62 = vpop.f32.mrf.mxu1 }
 0x6e6   :  { %v9863_v9 = vpop.f32.mrf.mxu0 }
 0x6e8   :  { %v9864_v18 = vpop.f32.mrf.mxu0 }
 0x6e9   :  { %v9865_v45 = vadd.f32 %v9864_v18, %v9863_v9 }
 0x6ea   :  { %v9866_v39 = vpop.f32.mrf.mxu0 }
 0x6eb   :  { %v7825_v4 = vadd.f32 %v9865_v45, %v7785_v25 }
 0x6ec   :  { %v9867_v43 = vpop.f32.mrf.mxu0 }
 0x6f8   :  { %v9885_v34 = vpop.f32.mrf.mxu1 }
 0x6fa   :  { %v9886_v27 = vpop.f32.mrf.mxu1 }
 0x6fb   :  { %v9887_v2 = vadd.f32 %v9886_v27, %v9885_v34 }
 0x6fc   :  { %v9888_v24 = vpop.f32.mrf.mxu1 }
 0x6fd   :  { %v7865_v33 = vadd.f32 %v9887_v2, %v7825_v4 }
 0x6fe   :  { %v9889_v42 = vpop.f32.mrf.mxu1 }
 0x706   :  { %v9907_v59 = vpop.f32.mrf.mxu0 }
 0x708   :  { %v9908_v50 = vpop.f32.mrf.mxu0 }
 0x709   :  { %v9909_v11 = vadd.f32 %v9908_v50, %v9907_v59 }
 0x70a   :  { %v9910_v58 = vpop.f32.mrf.mxu0 }
 0x70b   :  { %v7905_v15 = vadd.f32 %v9909_v11, %v7865_v33 }
 0x70c   :  { %v9911_v60 = vpop.f32.mrf.mxu0 }
 0x718   :  { %v9929_v3 = vpop.f32.mrf.mxu1 }
 0x71a   :  { %v9930_v29 = vpop.f32.mrf.mxu1 }
 0x71b   :  { %v9931_v13 = vadd.f32 %v9930_v29, %v9929_v3 }
 0x71c   :  { %v9932_v51 = vpop.f32.mrf.mxu1 }
 0x71d   :  { %v7945_v26 = vadd.f32 %v9931_v13, %v7905_v15 }
 0x71e   :  { %v9933_v20 = vpop.f32.mrf.mxu1 }
 0x726   :  { %v7984_v46 = vpop.f32.mrf.mxu0 }
 0x727   :  { %v7985_v31 = vadd.f32 %v7984_v46, %v7945_v26 }
 0x728   :  { %v10244_v22 = vpop.f32.mrf.mxu0 }
 0x729   :  { %v7990_v1 = vmax.f32 %v7985_v31, 0.0 }
 0x72a   :  { %v7987_v14 = vpop.f32.mrf.mxu0 }
 0x72b   :  { %v7991_v8 = vpack.c.bf16 %v7990_v1, %v7990_v1 }
 0x72c   :  { %v10245_v23 = vpop.f32.mrf.mxu0 }
 0x72d   :  { %10263 = vmatmul.mubr.bf16.vlgmr.msra.gmra.mxu1 %v7991_v8 }
 0x7ed   :  { %v8097_v32 = vpop.f32.mrf.mxu1 }
 0x7ee   :  { %v8098_v0 = vadd.f32 %v8738_v5, %v8097_v32 }
 0x7ef   :  { %v10264_v6 = vpop.f32.mrf.mxu1 }
 0x7f0   :  { %v8103_v61 = vmax.f32 %v8098_v0, 0.0 }
 0x7f1   :  { %v8100_v36 = vpop.f32.mrf.mxu1 }
 0x7f2   :  { %v8104_v16 = vpack.c.bf16 %v8103_v61, %v8103_v61 }
 0x7f3   :  { %v10265_v56 = vpop.f32.mrf.mxu1 }
 0x7f4   :  { %10283 = vmatmul.mubr.bf16.vlgmr.msra.gmra.mxu0 %v8104_v16 }
 0x8b4   :  { %v8210_v12 = vpop.f32.mrf.mxu0 }
 0x8b5   :  { %v8211_v19 = vadd.f32 %v8747_v10, %v8210_v12 }
 0x8b6   :  { %v10284_v44 = vpop.f32.mrf.mxu0 }
 0x8b7   :  { %v8219_v37 = vsel %vm8218_vm15, %v8211_v19, -1e+30 }
 0x8b8   :  { %8220 = vmax.xlane.f32.xlu0 %v8219_v37  ;;  %v8213_v17 = vpop.f32.mrf.mxu0 }
 0x8ba   :  { %v10285_v21 = vpop.f32.mrf.mxu0 }
 0x941   :  { %v8221_v28 = vpop.xlane.xlu0 %8220 }
 0x942   :  { %v8222_v49 = vsub.f32 %v8211_v19, %v8221_v28 }
 0x944   :  { %v8223_v35 = vmul.f32 1.442695, %v8222_v49 }
 0x946   :  { %10796 = vpow2.f32 %v8223_v35 }
 0x953   :  { %v10797_v52 = vpop.eup %10796 }
 0x954   :  { %v8225_v7 = vsel %vm8218_vm15, %v10797_v52, 0.0 }
 0x955   :  { %8226 = vadd.xlane.f32.xlu0 %v8225_v7 }
 0x9de   :  { %v8227_v63 = vpop.xlane.xlu0 %8226 }
 0x9df   :  { %10798 = vlog2.f32 %v8227_v63 }
 0x9ec   :  { %v10799_v41 = vpop.eup %10798 }
 0x9ed   :  { %v8229_v53 = vmul.f32 0.6931472, %v10799_v41 }
 0x9ef   :  { %v8230_v48 = vadd.f32 %v8229_v53, %v8221_v28 }
 0x9f1   :  { %v8231_v40 = vsub.f32 %v8211_v19, %v8230_v48 }
 0x9f3   :  { %8232 = vst [vmem:[%s14480_s11] sm:$0xff] %v8231_v40 }

</bundles_post_ra>
